<compile_context>
chip_gen: v5e
topology: v5e:2x2
jax: 0.10.0
libtpu: 0.0.40
codegen_flags: <defaults>
</compile_context>

<pallas_src>
import jax
import jax.numpy as jnp
from jax.experimental import pallas as pl
from jax.experimental.pallas import tpu as pltpu

LEAK = 0.1
BN_EPS = 1e-5
ACT_DTYPE = jnp.bfloat16            # MXU input / inter-layer activation dtype
VMEM_LIMIT = 32 * 1024 * 1024       # safe scoped-VMEM limit on v5e/v6e/v7x


def _leaky_relu_f32(x):
    return jnp.where(x >= 0, x, LEAK * x)


# ---------------------------------------------------------------------------
# Fused Conv3x3(pad=1) + bias + LeakyReLU + BatchNorm2d(eval) + MaxPool2d(2,2)
# ---------------------------------------------------------------------------
def conv_lrelu_bn_pool_kernel(x_ref, w_ref, b_ref, s_ref, t_ref, o_ref):
    """One image per grid step.

    x_ref : (1, (H+3)*(W+2), Cin)  zero-padded NHWC rows, flattened   (bf16)
    w_ref : (9, Cin, Cout)         tap-major conv weights             (bf16)
    b_ref, s_ref, t_ref : (1, Cout) conv bias / folded BN scale/shift (f32)
    o_ref : (1, Hp, Wp, Cout)      pooled output, Hp=H//2, Wp=W//2    (bf16)
    """
    _, Hp, Wp, Cout = o_ref.shape
    H, W = 2 * Hp, 2 * Wp
    Wpad = W + 2
    rows = H * Wpad                       # conv rows incl. 2 junk cols per row
    Cin = x_ref.shape[2]

    # 3x3 conv as 9 shifted matmuls over the flat padded image (patches are
    # contiguous slices of the VMEM-resident tile — nothing materialized in HBM).
    # Row m = r*Wpad + c of `acc` holds conv output (r, c); columns c >= W are
    # junk (row wrap-around) and are dropped by the pooling selection below.
    acc = jnp.zeros((rows, Cout), jnp.float32)
    for k in range(9):
        dy, dx = divmod(k, 3)
        off = dy * Wpad + dx
        patch = x_ref[0, off:off + rows, :]            # (rows, Cin) bf16
        acc = acc + jnp.dot(patch, w_ref[k],
                            preferred_element_type=jnp.float32)

    # epilogue in f32: conv bias -> LeakyReLU(0.1) -> BatchNorm (folded, eval)
    acc = acc + b_ref[...]
    acc = _leaky_relu_f32(acc)
    acc = acc * s_ref[...] + t_ref[...]

    # fused MaxPool2d(2, 2): pair-max along W, then along H, drop junk columns.
    h2 = acc.reshape(rows // 2, 2, Cout)               # pairs (c, c+1), c even
    hmax = jnp.maximum(h2[:, 0, :], h2[:, 1, :])       # (H*(Wp+1), Cout)
    v3 = hmax.reshape(Hp, 2 * (Wp + 1), Cout)          # rows 2q | 2q+1 per group
    pooled = jnp.maximum(v3[:, :Wp, :],                # even conv rows, valid cols
                         v3[:, Wp + 1:2 * Wp + 1, :])  # odd conv rows, valid cols
    o_ref[0] = pooled.astype(o_ref.dtype)


def conv_lrelu_bn_pool(x_nhwc, w9, bias, bn_scale, bn_shift):
    """x_nhwc: (N, H, W, Cin) bf16 -> (N, H//2, W//2, Cout) bf16."""
    N, H, W, Cin = x_nhwc.shape
    Cout = w9.shape[2]
    Hp, Wp = H // 2, W // 2
    Wpad = W + 2
    Lpad = (H + 3) * Wpad    # one spare zero row so the last tap slice stays in-bounds

    # Single cheap XLA zero-pad + free reshape — replaces the old 9x im2col write.
    xp = jnp.pad(x_nhwc, ((0, 0), (1, 2), (1, 1), (0, 0)))
    xf = xp.reshape(N, Lpad, Cin)

    return pl.pallas_call(
        conv_lrelu_bn_pool_kernel,
        out_shape=jax.ShapeDtypeStruct((N, Hp, Wp, Cout), ACT_DTYPE),
        grid_spec=pltpu.PrefetchScalarGridSpec(
            num_scalar_prefetch=0,
            grid=(N,),                                        # one image per step
            in_specs=[
                pl.BlockSpec((1, Lpad, Cin), lambda n: (n, 0, 0)),
                pl.BlockSpec((9, Cin, Cout), lambda n: (0, 0, 0)),  # VMEM-resident
                pl.BlockSpec((1, Cout), lambda n: (0, 0)),
                pl.BlockSpec((1, Cout), lambda n: (0, 0)),
                pl.BlockSpec((1, Cout), lambda n: (0, 0)),
            ],
            out_specs=pl.BlockSpec((1, Hp, Wp, Cout), lambda n: (n, 0, 0, 0)),
        ),
        compiler_params=pltpu.CompilerParams(
            dimension_semantics=("parallel",),                # both v7x cores
            vmem_limit_bytes=VMEM_LIMIT,
        ),
    )(xf, w9, bias, bn_scale, bn_shift)


# ---------------------------------------------------------------------------
# Fully-connected head: 3x [Linear + LeakyReLU + BatchNorm1d(eval)] + Linear
# ---------------------------------------------------------------------------
def fc_kernel(x_ref,
              w1_ref, b1_ref, s1_ref, t1_ref,
              w2_ref, b2_ref, s2_ref, t2_ref,
              w3_ref, b3_ref, s3_ref, t3_ref,
              w4_ref, b4_ref, o_ref):
    def lin(h, w_ref, b_ref):
        return jnp.dot(h, w_ref[...],
                       preferred_element_type=jnp.float32) + b_ref[...]

    h = lin(x_ref[...], w1_ref, b1_ref)
    h = _leaky_relu_f32(h) * s1_ref[...] + t1_ref[...]
    h = lin(h.astype(ACT_DTYPE), w2_ref, b2_ref)
    h = _leaky_relu_f32(h) * s2_ref[...] + t2_ref[...]
    h = lin(h.astype(ACT_DTYPE), w3_ref, b3_ref)
    h = _leaky_relu_f32(h) * s3_ref[...] + t3_ref[...]
    h = lin(h.astype(ACT_DTYPE), w4_ref, b4_ref)
    o_ref[...] = h.astype(o_ref.dtype)


def fc_forward(feat, fcp):
    """feat: (N, ch_f1) bf16 (NHWC-flattened features) -> (N, 1) f32."""
    N, F1 = feat.shape
    TB = 128 if N >= 256 else 8                      # sublane-aligned batch tiles
    nblocks = max(2, pl.cdiv(N, TB)) if N > 1 else 1  # >=2 blocks: use both v7x cores
    N_pad = TB * nblocks
    if N_pad != N:
        feat = jnp.pad(feat, ((0, N_pad - N), (0, 0)))

    args = [feat]
    in_specs = [pl.BlockSpec((TB, F1), lambda i: (i, 0))]
    for li in range(3):
        lay = fcp[li]
        for a in (lay["w"], lay["b"], lay["bn_scale"], lay["bn_shift"]):
            args.append(a)
            in_specs.append(pl.BlockSpec(a.shape, lambda i: (0, 0)))
    for a in (fcp[3]["w"], fcp[3]["b"]):
        args.append(a)
        in_specs.append(pl.BlockSpec(a.shape, lambda i: (0, 0)))

    out = pl.pallas_call(
        fc_kernel,
        out_shape=jax.ShapeDtypeStruct((N_pad, 1), jnp.float32),
        grid_spec=pltpu.PrefetchScalarGridSpec(
            num_scalar_prefetch=0,
            grid=(nblocks,),
            in_specs=in_specs,
            out_specs=pl.BlockSpec((TB, 1), lambda i: (i, 0)),
        ),
        compiler_params=pltpu.CompilerParams(
            dimension_semantics=("parallel",),
            vmem_limit_bytes=VMEM_LIMIT,
        ),
    )(*args)
    return out[:N]


# ---------------------------------------------------------------------------
# Parameters: PyTorch-layout init + one-time kernel-layout preparation
# ---------------------------------------------------------------------------
def fold_bn(gamma, beta, mean, var):
    scale = gamma / jnp.sqrt(var + BN_EPS)
    shift = beta - mean * scale
    return scale, shift


def init_torch_params(key, ch_in, w):
    """Deterministic parameters in the layouts the nn.Module would hold."""
    ch1 = ch_in * 2
    ch_f1 = ch1 * (w // 8) * (w // 8)
    ch_f2, ch_f3, ch_f4 = ch_f1 // 4, ch_f1 // 16, ch_f1 // 64
    keys = iter(jax.random.split(key, 64))
    nxt = lambda: next(keys)

    def bn(c):
        return {"gamma": 1.0 + 0.1 * jax.random.normal(nxt(), (c,), jnp.float32),
                "beta": 0.1 * jax.random.normal(nxt(), (c,), jnp.float32),
                "mean": 0.05 * jax.random.normal(nxt(), (c,), jnp.float32),
                "var": 0.5 + jax.random.uniform(nxt(), (c,), dtype=jnp.float32)}

    conv = []
    for cin, cout in [(ch_in, ch1), (ch1, ch1), (ch1, ch1)]:
        conv.append({"w": 0.05 * jax.random.normal(nxt(), (cout, cin, 3, 3), jnp.float32),
                     "b": 0.02 * jax.random.normal(nxt(), (cout,), jnp.float32),
                     "bn": bn(cout)})
    fc = []
    for li, (fin, fout) in enumerate([(ch_f1, ch_f2), (ch_f2, ch_f3),
                                      (ch_f3, ch_f4), (ch_f4, 1)]):
        layer = {"w": 0.05 * jax.random.normal(nxt(), (fout, fin), jnp.float32),
                 "b": 0.02 * jax.random.normal(nxt(), (fout,), jnp.float32)}
        if li < 3:
            layer["bn"] = bn(fout)
        fc.append(layer)
    return {"conv": conv, "fc": fc, "dims": (ch_in, ch1, w)}


def prepare_kernel_params(tp):
    """One-time (model-load-time) layout/dtype prep; zero per-forward cost."""
    _, ch1, w = tp["dims"]
    hf = wf = w // 8

    conv = []
    for lay in tp["conv"]:
        cout, cin = lay["w"].shape[0], lay["w"].shape[1]
        # (Cout, Cin, 3, 3) -> tap-major (9, Cin, Cout), bf16 for the MXU
        w9 = jnp.transpose(lay["w"], (2, 3, 1, 0)).reshape(9, cin, cout)
        s, t = fold_bn(lay["bn"]["gamma"], lay["bn"]["beta"],
                       lay["bn"]["mean"], lay["bn"]["var"])
        conv.append({"w9": w9.astype(ACT_DTYPE),
                     "b": lay["b"].reshape(1, -1),
                     "bn_scale": s.reshape(1, -1),
                     "bn_shift": t.reshape(1, -1)})

    fc = []
    for li, lay in enumerate(tp["fc"]):
        w_pt = lay["w"]                                   # (out, in) torch layout
        if li == 0:
            # Permute fc1 input features from NCHW-flatten order (torch.nn.Flatten)
            # to the NHWC-flatten order the conv stack produces (one-time cost).
            out_d = w_pt.shape[0]
            w_pt = (w_pt.reshape(out_d, ch1, hf, wf)
                        .transpose(0, 2, 3, 1)
                        .reshape(out_d, hf * wf * ch1))
        entry = {"w": jnp.transpose(w_pt).astype(ACT_DTYPE),   # (in, out)
                 "b": lay["b"].reshape(1, -1)}
        if li < 3:
            s, t = fold_bn(lay["bn"]["gamma"], lay["bn"]["beta"],
                           lay["bn"]["mean"], lay["bn"]["var"])
            entry["bn_scale"] = s.reshape(1, -1)
            entry["bn_shift"] = t.reshape(1, -1)
        fc.append(entry)
    return {"conv": conv, "fc": fc}


# ---------------------------------------------------------------------------
# Full forward (Pallas) and a pure-XLA reference for validation
# ---------------------------------------------------------------------------
def domain_classifier_forward(x_nchw, kp):
    x = jnp.transpose(x_nchw, (0, 2, 3, 1)).astype(ACT_DTYPE)   # NCHW -> NHWC once
    for lay in kp["conv"]:
        x = conv_lrelu_bn_pool(x, lay["w9"], lay["b"],
                               lay["bn_scale"], lay["bn_shift"])
    feat = x.reshape(x.shape[0], -1)        # NHWC flatten; fc1 weight pre-permuted
    return fc_forward(feat, kp["fc"])


def reference_forward(x_nchw, kp):
    """Pure-JAX/XLA reference using the same prepared (folded) parameters."""
    x = jnp.transpose(x_nchw, (0, 2, 3, 1)).astype(jnp.float32)
    for lay in kp["conv"]:
        w9 = lay["w9"].astype(jnp.float32)
        cin, cout = w9.shape[1], w9.shape[2]
        w4 = w9.reshape(3, 3, cin, cout)                        # HWIO
        y = jax.lax.conv_general_dilated(
            x, w4, window_strides=(1, 1), padding="SAME",
            dimension_numbers=("NHWC", "HWIO", "NHWC"))
        y = y + lay["b"]
        y = jnp.where(y >= 0, y, LEAK * y)
        y = y * lay["bn_scale"] + lay["bn_shift"]
        x = jax.lax.reduce_window(y, -jnp.inf, jax.lax.max,
                                  (1, 2, 2, 1), (1, 2, 2, 1), "VALID")
    h = x.reshape(x.shape[0], -1)
    for li, lay in enumerate(kp["fc"]):
        h = h @ lay["w"].astype(jnp.float32) + lay["b"]
        if li < 3:
            h = jnp.where(h >= 0, h, LEAK * h)
            h = h * lay["bn_scale"] + lay["bn_shift"]
    return h


if __name__ == "__main__":
    # Small config consistent with the module (default is ch_in=256, w=16).
    # ch_in=64 -> ch1=128 keeps conv/pool stores lane-dense (Cout = 128 lanes)
    # and ch_f4 = ch_f1 // 64 = 8 >= 1.
    BATCH, CH_IN, W_SPATIAL = 2, 64, 16
    key = jax.random.PRNGKey(0)
    pkey, xkey = jax.random.split(key)
    torch_params = init_torch_params(pkey, CH_IN, W_SPATIAL)
    kparams = prepare_kernel_params(torch_params)
    x = jax.random.normal(xkey, (BATCH, CH_IN, W_SPATIAL, W_SPATIAL), jnp.float32)

    fwd = jax.jit(domain_classifier_forward)
    out = jax.block_until_ready(fwd(x, kparams))
    assert out.shape == (BATCH, 1) and out.dtype == jnp.float32
    assert bool(jnp.all(jnp.isfinite(out)))

    ref = jax.block_until_ready(reference_forward(x, kparams))
    assert bool(jnp.allclose(out, ref, rtol=0.1, atol=0.1)), (out, ref)

    print("KERNEL_OK")
</pallas_src>

<mosaic_0001>
module attributes {stable_mosaic.version = 11 : i64} {
  func.func @conv_lrelu_bn_pool_kernel(%arg0: i32, %arg1: memref<1x342x64xbf16, #tpu.memory_space<vmem>>, %arg2: memref<9x64x128xbf16, #tpu.memory_space<vmem>>, %arg3: memref<1x128xf32, #tpu.memory_space<vmem>>, %arg4: memref<1x128xf32, #tpu.memory_space<vmem>>, %arg5: memref<1x128xf32, #tpu.memory_space<vmem>>, %arg6: memref<1x8x8x128xbf16, #tpu.memory_space<vmem>>) attributes {dimension_semantics = [#tpu.dimension_semantics<parallel>], iteration_bounds = array<i64: 2>, scalar_prefetch = 0 : i64, scratch_operands = 0 : i64, tpu.core_type = #tpu.core_type<tc>, window_params = [{transform_indices = @transform_0, window_bounds = array<i64: 1, 342, 64>}, {pipeline_mode = #tpu.pipeline_mode<synchronous>, transform_indices = @transform_1, window_bounds = array<i64: 9, 64, 128>}, {pipeline_mode = #tpu.pipeline_mode<synchronous>, transform_indices = @transform_2, window_bounds = array<i64: 1, 128>}, {pipeline_mode = #tpu.pipeline_mode<synchronous>, transform_indices = @transform_3, window_bounds = array<i64: 1, 128>}, {pipeline_mode = #tpu.pipeline_mode<synchronous>, transform_indices = @transform_4, window_bounds = array<i64: 1, 128>}, {transform_indices = @transform_5, window_bounds = array<i64: 1, 8, 8, 128>}]} {
    %cst = arith.constant 0.000000e+00 : f32
    %0 = vector.broadcast %cst : f32 to vector<288x128xf32>
    %c0 = arith.constant 0 : index
    %c0_0 = arith.constant 0 : index
    %c0_1 = arith.constant 0 : index
    %1 = vector.load %arg1[%c0, %c0_0, %c0_1] : memref<1x342x64xbf16, #tpu.memory_space<vmem>>, vector<1x288x64xbf16>
    %2 = vector.shape_cast %1 : vector<1x288x64xbf16> to vector<288x64xbf16>
    %c0_2 = arith.constant 0 : index
    %c0_3 = arith.constant 0 : index
    %c0_4 = arith.constant 0 : index
    %3 = vector.load %arg2[%c0_2, %c0_3, %c0_4] : memref<9x64x128xbf16, #tpu.memory_space<vmem>>, vector<1x64x128xbf16>
    %4 = vector.shape_cast %3 : vector<1x64x128xbf16> to vector<64x128xbf16>
    %cst_5 = arith.constant dense<0.000000e+00> : vector<288x128xf32>
    %5 = tpu.matmul %2, %4, %cst_5 {dimension_numbers = #tpu.dot_dimension_numbers<[1], [0], [0], [1], [0, 0, 1, 1], [], []>} : vector<288x64xbf16>, vector<64x128xbf16>, vector<288x128xf32> -> vector<288x128xf32>
    %6 = arith.addf %0, %5 : vector<288x128xf32>
    %c0_6 = arith.constant 0 : index
    %c1 = arith.constant 1 : index
    %c0_7 = arith.constant 0 : index
    %7 = vector.load %arg1[%c0_6, %c1, %c0_7] : memref<1x342x64xbf16, #tpu.memory_space<vmem>>, vector<1x288x64xbf16>
    %8 = vector.shape_cast %7 : vector<1x288x64xbf16> to vector<288x64xbf16>
    %c1_8 = arith.constant 1 : index
    %c0_9 = arith.constant 0 : index
    %c0_10 = arith.constant 0 : index
    %9 = vector.load %arg2[%c1_8, %c0_9, %c0_10] : memref<9x64x128xbf16, #tpu.memory_space<vmem>>, vector<1x64x128xbf16>
    %10 = vector.shape_cast %9 : vector<1x64x128xbf16> to vector<64x128xbf16>
    %cst_11 = arith.constant dense<0.000000e+00> : vector<288x128xf32>
    %11 = tpu.matmul %8, %10, %cst_11 {dimension_numbers = #tpu.dot_dimension_numbers<[1], [0], [0], [1], [0, 0, 1, 1], [], []>} : vector<288x64xbf16>, vector<64x128xbf16>, vector<288x128xf32> -> vector<288x128xf32>
    %12 = arith.addf %6, %11 : vector<288x128xf32>
    %c0_12 = arith.constant 0 : index
    %c2 = arith.constant 2 : index
    %c0_13 = arith.constant 0 : index
    %13 = vector.load %arg1[%c0_12, %c2, %c0_13] : memref<1x342x64xbf16, #tpu.memory_space<vmem>>, vector<1x288x64xbf16>
    %14 = vector.shape_cast %13 : vector<1x288x64xbf16> to vector<288x64xbf16>
    %c2_14 = arith.constant 2 : index
    %c0_15 = arith.constant 0 : index
    %c0_16 = arith.constant 0 : index
    %15 = vector.load %arg2[%c2_14, %c0_15, %c0_16] : memref<9x64x128xbf16, #tpu.memory_space<vmem>>, vector<1x64x128xbf16>
    %16 = vector.shape_cast %15 : vector<1x64x128xbf16> to vector<64x128xbf16>
    %cst_17 = arith.constant dense<0.000000e+00> : vector<288x128xf32>
    %17 = tpu.matmul %14, %16, %cst_17 {dimension_numbers = #tpu.dot_dimension_numbers<[1], [0], [0], [1], [0, 0, 1, 1], [], []>} : vector<288x64xbf16>, vector<64x128xbf16>, vector<288x128xf32> -> vector<288x128xf32>
    %18 = arith.addf %12, %17 : vector<288x128xf32>
    %c0_18 = arith.constant 0 : index
    %c18 = arith.constant 18 : index
    %c0_19 = arith.constant 0 : index
    %19 = vector.load %arg1[%c0_18, %c18, %c0_19] : memref<1x342x64xbf16, #tpu.memory_space<vmem>>, vector<1x288x64xbf16>
    %20 = vector.shape_cast %19 : vector<1x288x64xbf16> to vector<288x64xbf16>
    %c3 = arith.constant 3 : index
    %c0_20 = arith.constant 0 : index
    %c0_21 = arith.constant 0 : index
    %21 = vector.load %arg2[%c3, %c0_20, %c0_21] : memref<9x64x128xbf16, #tpu.memory_space<vmem>>, vector<1x64x128xbf16>
    %22 = vector.shape_cast %21 : vector<1x64x128xbf16> to vector<64x128xbf16>
    %cst_22 = arith.constant dense<0.000000e+00> : vector<288x128xf32>
    %23 = tpu.matmul %20, %22, %cst_22 {dimension_numbers = #tpu.dot_dimension_numbers<[1], [0], [0], [1], [0, 0, 1, 1], [], []>} : vector<288x64xbf16>, vector<64x128xbf16>, vector<288x128xf32> -> vector<288x128xf32>
    %24 = arith.addf %18, %23 : vector<288x128xf32>
    %c0_23 = arith.constant 0 : index
    %c19 = arith.constant 19 : index
    %c0_24 = arith.constant 0 : index
    %25 = vector.load %arg1[%c0_23, %c19, %c0_24] : memref<1x342x64xbf16, #tpu.memory_space<vmem>>, vector<1x288x64xbf16>
    %26 = vector.shape_cast %25 : vector<1x288x64xbf16> to vector<288x64xbf16>
    %c4 = arith.constant 4 : index
    %c0_25 = arith.constant 0 : index
    %c0_26 = arith.constant 0 : index
    %27 = vector.load %arg2[%c4, %c0_25, %c0_26] : memref<9x64x128xbf16, #tpu.memory_space<vmem>>, vector<1x64x128xbf16>
    %28 = vector.shape_cast %27 : vector<1x64x128xbf16> to vector<64x128xbf16>
    %cst_27 = arith.constant dense<0.000000e+00> : vector<288x128xf32>
    %29 = tpu.matmul %26, %28, %cst_27 {dimension_numbers = #tpu.dot_dimension_numbers<[1], [0], [0], [1], [0, 0, 1, 1], [], []>} : vector<288x64xbf16>, vector<64x128xbf16>, vector<288x128xf32> -> vector<288x128xf32>
    %30 = arith.addf %24, %29 : vector<288x128xf32>
    %c0_28 = arith.constant 0 : index
    %c20 = arith.constant 20 : index
    %c0_29 = arith.constant 0 : index
    %31 = vector.load %arg1[%c0_28, %c20, %c0_29] : memref<1x342x64xbf16, #tpu.memory_space<vmem>>, vector<1x288x64xbf16>
    %32 = vector.shape_cast %31 : vector<1x288x64xbf16> to vector<288x64xbf16>
    %c5 = arith.constant 5 : index
    %c0_30 = arith.constant 0 : index
    %c0_31 = arith.constant 0 : index
    %33 = vector.load %arg2[%c5, %c0_30, %c0_31] : memref<9x64x128xbf16, #tpu.memory_space<vmem>>, vector<1x64x128xbf16>
    %34 = vector.shape_cast %33 : vector<1x64x128xbf16> to vector<64x128xbf16>
    %cst_32 = arith.constant dense<0.000000e+00> : vector<288x128xf32>
    %35 = tpu.matmul %32, %34, %cst_32 {dimension_numbers = #tpu.dot_dimension_numbers<[1], [0], [0], [1], [0, 0, 1, 1], [], []>} : vector<288x64xbf16>, vector<64x128xbf16>, vector<288x128xf32> -> vector<288x128xf32>
    %36 = arith.addf %30, %35 : vector<288x128xf32>
    %c0_33 = arith.constant 0 : index
    %c36 = arith.constant 36 : index
    %c0_34 = arith.constant 0 : index
    %37 = vector.load %arg1[%c0_33, %c36, %c0_34] : memref<1x342x64xbf16, #tpu.memory_space<vmem>>, vector<1x288x64xbf16>
    %38 = vector.shape_cast %37 : vector<1x288x64xbf16> to vector<288x64xbf16>
    %c6 = arith.constant 6 : index
    %c0_35 = arith.constant 0 : index
    %c0_36 = arith.constant 0 : index
    %39 = vector.load %arg2[%c6, %c0_35, %c0_36] : memref<9x64x128xbf16, #tpu.memory_space<vmem>>, vector<1x64x128xbf16>
    %40 = vector.shape_cast %39 : vector<1x64x128xbf16> to vector<64x128xbf16>
    %cst_37 = arith.constant dense<0.000000e+00> : vector<288x128xf32>
    %41 = tpu.matmul %38, %40, %cst_37 {dimension_numbers = #tpu.dot_dimension_numbers<[1], [0], [0], [1], [0, 0, 1, 1], [], []>} : vector<288x64xbf16>, vector<64x128xbf16>, vector<288x128xf32> -> vector<288x128xf32>
    %42 = arith.addf %36, %41 : vector<288x128xf32>
    %c0_38 = arith.constant 0 : index
    %c37 = arith.constant 37 : index
    %c0_39 = arith.constant 0 : index
    %43 = vector.load %arg1[%c0_38, %c37, %c0_39] : memref<1x342x64xbf16, #tpu.memory_space<vmem>>, vector<1x288x64xbf16>
    %44 = vector.shape_cast %43 : vector<1x288x64xbf16> to vector<288x64xbf16>
    %c7 = arith.constant 7 : index
    %c0_40 = arith.constant 0 : index
    %c0_41 = arith.constant 0 : index
    %45 = vector.load %arg2[%c7, %c0_40, %c0_41] : memref<9x64x128xbf16, #tpu.memory_space<vmem>>, vector<1x64x128xbf16>
    %46 = vector.shape_cast %45 : vector<1x64x128xbf16> to vector<64x128xbf16>
    %cst_42 = arith.constant dense<0.000000e+00> : vector<288x128xf32>
    %47 = tpu.matmul %44, %46, %cst_42 {dimension_numbers = #tpu.dot_dimension_numbers<[1], [0], [0], [1], [0, 0, 1, 1], [], []>} : vector<288x64xbf16>, vector<64x128xbf16>, vector<288x128xf32> -> vector<288x128xf32>
    %48 = arith.addf %42, %47 : vector<288x128xf32>
    %c0_43 = arith.constant 0 : index
    %c38 = arith.constant 38 : index
    %c0_44 = arith.constant 0 : index
    %49 = vector.load %arg1[%c0_43, %c38, %c0_44] : memref<1x342x64xbf16, #tpu.memory_space<vmem>>, vector<1x288x64xbf16>
    %50 = vector.shape_cast %49 : vector<1x288x64xbf16> to vector<288x64xbf16>
    %c8 = arith.constant 8 : index
    %c0_45 = arith.constant 0 : index
    %c0_46 = arith.constant 0 : index
    %51 = vector.load %arg2[%c8, %c0_45, %c0_46] : memref<9x64x128xbf16, #tpu.memory_space<vmem>>, vector<1x64x128xbf16>
    %52 = vector.shape_cast %51 : vector<1x64x128xbf16> to vector<64x128xbf16>
    %cst_47 = arith.constant dense<0.000000e+00> : vector<288x128xf32>
    %53 = tpu.matmul %50, %52, %cst_47 {dimension_numbers = #tpu.dot_dimension_numbers<[1], [0], [0], [1], [0, 0, 1, 1], [], []>} : vector<288x64xbf16>, vector<64x128xbf16>, vector<288x128xf32> -> vector<288x128xf32>
    %54 = arith.addf %48, %53 : vector<288x128xf32>
    %c0_48 = arith.constant 0 : index
    %c0_49 = arith.constant 0 : index
    %55 = vector.load %arg3[%c0_48, %c0_49] : memref<1x128xf32, #tpu.memory_space<vmem>>, vector<1x128xf32>
    %56 = vector.broadcast %55 : vector<1x128xf32> to vector<288x128xf32>
    %57 = arith.addf %54, %56 : vector<288x128xf32>
    %cst_50 = arith.constant 0.000000e+00 : f32
    %58 = vector.broadcast %cst_50 : f32 to vector<288x128xf32>
    %59 = arith.cmpf oge, %57, %58 : vector<288x128xf32>
    %cst_51 = arith.constant 1.000000e-01 : f32
    %60 = vector.broadcast %cst_51 : f32 to vector<288x128xf32>
    %61 = arith.mulf %60, %57 : vector<288x128xf32>
    %62 = arith.select %59, %57, %61 : vector<288x128xi1>, vector<288x128xf32>
    %c0_52 = arith.constant 0 : index
    %c0_53 = arith.constant 0 : index
    %63 = vector.load %arg4[%c0_52, %c0_53] : memref<1x128xf32, #tpu.memory_space<vmem>>, vector<1x128xf32>
    %64 = vector.broadcast %63 : vector<1x128xf32> to vector<288x128xf32>
    %65 = arith.mulf %62, %64 : vector<288x128xf32>
    %c0_54 = arith.constant 0 : index
    %c0_55 = arith.constant 0 : index
    %66 = vector.load %arg5[%c0_54, %c0_55] : memref<1x128xf32, #tpu.memory_space<vmem>>, vector<1x128xf32>
    %67 = vector.broadcast %66 : vector<1x128xf32> to vector<288x128xf32>
    %68 = arith.addf %65, %67 : vector<288x128xf32>
    %69 = vector.shape_cast %68 : vector<288x128xf32> to vector<144x2x128xf32>
    %70 = vector.extract_strided_slice %69 {offsets = [0, 0, 0], sizes = [144, 1, 128], strides = [1, 1, 1]} : vector<144x2x128xf32> to vector<144x1x128xf32>
    %71 = vector.shape_cast %70 : vector<144x1x128xf32> to vector<144x128xf32>
    %72 = vector.extract_strided_slice %69 {offsets = [0, 1, 0], sizes = [144, 1, 128], strides = [1, 1, 1]} : vector<144x2x128xf32> to vector<144x1x128xf32>
    %73 = vector.shape_cast %72 : vector<144x1x128xf32> to vector<144x128xf32>
    %74 = arith.maximumf %71, %73 : vector<144x128xf32>
    %75 = vector.shape_cast %74 : vector<144x128xf32> to vector<8x18x128xf32>
    %76 = vector.extract_strided_slice %75 {offsets = [0, 0, 0], sizes = [8, 8, 128], strides = [1, 1, 1]} : vector<8x18x128xf32> to vector<8x8x128xf32>
    %77 = vector.extract_strided_slice %75 {offsets = [0, 9, 0], sizes = [8, 8, 128], strides = [1, 1, 1]} : vector<8x18x128xf32> to vector<8x8x128xf32>
    %78 = arith.maximumf %76, %77 : vector<8x8x128xf32>
    %79 = arith.truncf %78 : vector<8x8x128xf32> to vector<8x8x128xbf16>
    %c0_56 = arith.constant 0 : index
    %c0_57 = arith.constant 0 : index
    %c0_58 = arith.constant 0 : index
    %c0_59 = arith.constant 0 : index
    %80 = vector.load %arg6[%c0_56, %c0_57, %c0_58, %c0_59] : memref<1x8x8x128xbf16, #tpu.memory_space<vmem>>, vector<1x8x8x128xbf16>
    %81 = vector.shape_cast %80 : vector<1x8x8x128xbf16> to vector<8x8x128xbf16>
    %82 = vector.shape_cast %79 : vector<8x8x128xbf16> to vector<1x8x8x128xbf16>
    tpu.vector_store %arg6[%c0_56, %c0_57, %c0_58, %c0_59], %82 {strides = array<i32>} : memref<1x8x8x128xbf16, #tpu.memory_space<vmem>>, vector<1x8x8x128xbf16>,
    return
  }
  func.func @transform_0(%arg0: i32) -> (i32, i32, i32) {
    %c0_i32 = arith.constant 0 : i32
    %c0_i32_0 = arith.constant 0 : i32
    %c0_i32_1 = arith.constant 0 : i32
    return %arg0, %c0_i32, %c0_i32_0 : i32, i32, i32
  }
  func.func @transform_1(%arg0: i32) -> (i32, i32, i32) {
    %c0_i32 = arith.constant 0 : i32
    %c0_i32_0 = arith.constant 0 : i32
    %c0_i32_1 = arith.constant 0 : i32
    %c0_i32_2 = arith.constant 0 : i32
    return %c0_i32, %c0_i32_0, %c0_i32_1 : i32, i32, i32
  }
  func.func @transform_2(%arg0: i32) -> (i32, i32) {
    %c0_i32 = arith.constant 0 : i32
    %c0_i32_0 = arith.constant 0 : i32
    %c0_i32_1 = arith.constant 0 : i32
    return %c0_i32, %c0_i32_0 : i32, i32
  }
  func.func @transform_3(%arg0: i32) -> (i32, i32) {
    %c0_i32 = arith.constant 0 : i32
    %c0_i32_0 = arith.constant 0 : i32
    %c0_i32_1 = arith.constant 0 : i32
    return %c0_i32, %c0_i32_0 : i32, i32
  }
  func.func @transform_4(%arg0: i32) -> (i32, i32) {
    %c0_i32 = arith.constant 0 : i32
    %c0_i32_0 = arith.constant 0 : i32
    %c0_i32_1 = arith.constant 0 : i32
    return %c0_i32, %c0_i32_0 : i32, i32
  }
  func.func @transform_5(%arg0: i32) -> (i32, i32, i32, i32) {
    %c0_i32 = arith.constant 0 : i32
    %c0_i32_0 = arith.constant 0 : i32
    %c0_i32_1 = arith.constant 0 : i32
    %c0_i32_2 = arith.constant 0 : i32
    return %arg0, %c0_i32, %c0_i32_0, %c0_i32_1 : i32, i32, i32, i32
  }
}

module attributes {stable_mosaic.version = 11 : i64} {
  func.func @conv_lrelu_bn_pool_kernel(%arg0: i32, %arg1: memref<1x42x128xbf16, #tpu.memory_space<vmem>>, %arg2: memref<9x128x128xbf16, #tpu.memory_space<vmem>>, %arg3: memref<1x128xf32, #tpu.memory_space<vmem>>, %arg4: memref<1x128xf32, #tpu.memory_space<vmem>>, %arg5: memref<1x128xf32, #tpu.memory_space<vmem>>, %arg6: memref<1x2x2x128xbf16, #tpu.memory_space<vmem>>) attributes {dimension_semantics = [#tpu.dimension_semantics<parallel>], iteration_bounds = array<i64: 2>, scalar_prefetch = 0 : i64, scratch_operands = 0 : i64, tpu.core_type = #tpu.core_type<tc>, window_params = [{transform_indices = @transform_0, window_bounds = array<i64: 1, 42, 128>}, {pipeline_mode = #tpu.pipeline_mode<synchronous>, transform_indices = @transform_1, window_bounds = array<i64: 9, 128, 128>}, {pipeline_mode = #tpu.pipeline_mode<synchronous>, transform_indices = @transform_2, window_bounds = array<i64: 1, 128>}, {pipeline_mode = #tpu.pipeline_mode<synchronous>, transform_indices = @transform_3, window_bounds = array<i64: 1, 128>}, {pipeline_mode = #tpu.pipeline_mode<synchronous>, transform_indices = @transform_4, window_bounds = array<i64: 1, 128>}, {transform_indices = @transform_5, window_bounds = array<i64: 1, 2, 2, 128>}]} {
    %cst = arith.constant 0.000000e+00 : f32
    %0 = vector.broadcast %cst : f32 to vector<24x128xf32>
    %c0 = arith.constant 0 : index
    %c0_0 = arith.constant 0 : index
    %c0_1 = arith.constant 0 : index
    %1 = vector.load %arg1[%c0, %c0_0, %c0_1] : memref<1x42x128xbf16, #tpu.memory_space<vmem>>, vector<1x24x128xbf16>
    %2 = vector.shape_cast %1 : vector<1x24x128xbf16> to vector<24x128xbf16>
    %c0_2 = arith.constant 0 : index
    %c0_3 = arith.constant 0 : index
    %c0_4 = arith.constant 0 : index
    %3 = vector.load %arg2[%c0_2, %c0_3, %c0_4] : memref<9x128x128xbf16, #tpu.memory_space<vmem>>, vector<1x128x128xbf16>
    %4 = vector.shape_cast %3 : vector<1x128x128xbf16> to vector<128x128xbf16>
    %cst_5 = arith.constant dense<0.000000e+00> : vector<24x128xf32>
    %5 = tpu.matmul %2, %4, %cst_5 {dimension_numbers = #tpu.dot_dimension_numbers<[1], [0], [0], [1], [0, 0, 1, 1], [], []>} : vector<24x128xbf16>, vector<128x128xbf16>, vector<24x128xf32> -> vector<24x128xf32>
    %6 = arith.addf %0, %5 : vector<24x128xf32>
    %c0_6 = arith.constant 0 : index
    %c1 = arith.constant 1 : index
    %c0_7 = arith.constant 0 : index
    %7 = vector.load %arg1[%c0_6, %c1, %c0_7] : memref<1x42x128xbf16, #tpu.memory_space<vmem>>, vector<1x24x128xbf16>
    %8 = vector.shape_cast %7 : vector<1x24x128xbf16> to vector<24x128xbf16>
    %c1_8 = arith.constant 1 : index
    %c0_9 = arith.constant 0 : index
    %c0_10 = arith.constant 0 : index
    %9 = vector.load %arg2[%c1_8, %c0_9, %c0_10] : memref<9x128x128xbf16, #tpu.memory_space<vmem>>, vector<1x128x128xbf16>
    %10 = vector.shape_cast %9 : vector<1x128x128xbf16> to vector<128x128xbf16>
    %cst_11 = arith.constant dense<0.000000e+00> : vector<24x128xf32>
    %11 = tpu.matmul %8, %10, %cst_11 {dimension_numbers = #tpu.dot_dimension_numbers<[1], [0], [0], [1], [0, 0, 1, 1], [], []>} : vector<24x128xbf16>, vector<128x128xbf16>, vector<24x128xf32> -> vector<24x128xf32>
    %12 = arith.addf %6, %11 : vector<24x128xf32>
    %c0_12 = arith.constant 0 : index
    %c2 = arith.constant 2 : index
    %c0_13 = arith.constant 0 : index
    %13 = vector.load %arg1[%c0_12, %c2, %c0_13] : memref<1x42x128xbf16, #tpu.memory_space<vmem>>, vector<1x24x128xbf16>
    %14 = vector.shape_cast %13 : vector<1x24x128xbf16> to vector<24x128xbf16>
    %c2_14 = arith.constant 2 : index
    %c0_15 = arith.constant 0 : index
    %c0_16 = arith.constant 0 : index
    %15 = vector.load %arg2[%c2_14, %c0_15, %c0_16] : memref<9x128x128xbf16, #tpu.memory_space<vmem>>, vector<1x128x128xbf16>
    %16 = vector.shape_cast %15 : vector<1x128x128xbf16> to vector<128x128xbf16>
    %cst_17 = arith.constant dense<0.000000e+00> : vector<24x128xf32>
    %17 = tpu.matmul %14, %16, %cst_17 {dimension_numbers = #tpu.dot_dimension_numbers<[1], [0], [0], [1], [0, 0, 1, 1], [], []>} : vector<24x128xbf16>, vector<128x128xbf16>, vector<24x128xf32> -> vector<24x128xf32>
    %18 = arith.addf %12, %17 : vector<24x128xf32>
    %c0_18 = arith.constant 0 : index
    %c6 = arith.constant 6 : index
    %c0_19 = arith.constant 0 : index
    %19 = vector.load %arg1[%c0_18, %c6, %c0_19] : memref<1x42x128xbf16, #tpu.memory_space<vmem>>, vector<1x24x128xbf16>
    %20 = vector.shape_cast %19 : vector<1x24x128xbf16> to vector<24x128xbf16>
    %c3 = arith.constant 3 : index
    %c0_20 = arith.constant 0 : index
    %c0_21 = arith.constant 0 : index
    %21 = vector.load %arg2[%c3, %c0_20, %c0_21] : memref<9x128x128xbf16, #tpu.memory_space<vmem>>, vector<1x128x128xbf16>
    %22 = vector.shape_cast %21 : vector<1x128x128xbf16> to vector<128x128xbf16>
    %cst_22 = arith.constant dense<0.000000e+00> : vector<24x128xf32>
    %23 = tpu.matmul %20, %22, %cst_22 {dimension_numbers = #tpu.dot_dimension_numbers<[1], [0], [0], [1], [0, 0, 1, 1], [], []>} : vector<24x128xbf16>, vector<128x128xbf16>, vector<24x128xf32> -> vector<24x128xf32>
    %24 = arith.addf %18, %23 : vector<24x128xf32>
    %c0_23 = arith.constant 0 : index
    %c7 = arith.constant 7 : index
    %c0_24 = arith.constant 0 : index
    %25 = vector.load %arg1[%c0_23, %c7, %c0_24] : memref<1x42x128xbf16, #tpu.memory_space<vmem>>, vector<1x24x128xbf16>
    %26 = vector.shape_cast %25 : vector<1x24x128xbf16> to vector<24x128xbf16>
    %c4 = arith.constant 4 : index
    %c0_25 = arith.constant 0 : index
    %c0_26 = arith.constant 0 : index
    %27 = vector.load %arg2[%c4, %c0_25, %c0_26] : memref<9x128x128xbf16, #tpu.memory_space<vmem>>, vector<1x128x128xbf16>
    %28 = vector.shape_cast %27 : vector<1x128x128xbf16> to vector<128x128xbf16>
    %cst_27 = arith.constant dense<0.000000e+00> : vector<24x128xf32>
    %29 = tpu.matmul %26, %28, %cst_27 {dimension_numbers = #tpu.dot_dimension_numbers<[1], [0], [0], [1], [0, 0, 1, 1], [], []>} : vector<24x128xbf16>, vector<128x128xbf16>, vector<24x128xf32> -> vector<24x128xf32>
    %30 = arith.addf %24, %29 : vector<24x128xf32>
    %c0_28 = arith.constant 0 : index
    %c8 = arith.constant 8 : index
    %c0_29 = arith.constant 0 : index
    %31 = vector.load %arg1[%c0_28, %c8, %c0_29] : memref<1x42x128xbf16, #tpu.memory_space<vmem>>, vector<1x24x128xbf16>
    %32 = vector.shape_cast %31 : vector<1x24x128xbf16> to vector<24x128xbf16>
    %c5 = arith.constant 5 : index
    %c0_30 = arith.constant 0 : index
    %c0_31 = arith.constant 0 : index
    %33 = vector.load %arg2[%c5, %c0_30, %c0_31] : memref<9x128x128xbf16, #tpu.memory_space<vmem>>, vector<1x128x128xbf16>
    %34 = vector.shape_cast %33 : vector<1x128x128xbf16> to vector<128x128xbf16>
    %cst_32 = arith.constant dense<0.000000e+00> : vector<24x128xf32>
    %35 = tpu.matmul %32, %34, %cst_32 {dimension_numbers = #tpu.dot_dimension_numbers<[1], [0], [0], [1], [0, 0, 1, 1], [], []>} : vector<24x128xbf16>, vector<128x128xbf16>, vector<24x128xf32> -> vector<24x128xf32>
    %36 = arith.addf %30, %35 : vector<24x128xf32>
    %c0_33 = arith.constant 0 : index
    %c12 = arith.constant 12 : index
    %c0_34 = arith.constant 0 : index
    %37 = vector.load %arg1[%c0_33, %c12, %c0_34] : memref<1x42x128xbf16, #tpu.memory_space<vmem>>, vector<1x24x128xbf16>
    %38 = vector.shape_cast %37 : vector<1x24x128xbf16> to vector<24x128xbf16>
    %c6_35 = arith.constant 6 : index
    %c0_36 = arith.constant 0 : index
    %c0_37 = arith.constant 0 : index
    %39 = vector.load %arg2[%c6_35, %c0_36, %c0_37] : memref<9x128x128xbf16, #tpu.memory_space<vmem>>, vector<1x128x128xbf16>
    %40 = vector.shape_cast %39 : vector<1x128x128xbf16> to vector<128x128xbf16>
    %cst_38 = arith.constant dense<0.000000e+00> : vector<24x128xf32>
    %41 = tpu.matmul %38, %40, %cst_38 {dimension_numbers = #tpu.dot_dimension_numbers<[1], [0], [0], [1], [0, 0, 1, 1], [], []>} : vector<24x128xbf16>, vector<128x128xbf16>, vector<24x128xf32> -> vector<24x128xf32>
    %42 = arith.addf %36, %41 : vector<24x128xf32>
    %c0_39 = arith.constant 0 : index
    %c13 = arith.constant 13 : index
    %c0_40 = arith.constant 0 : index
    %43 = vector.load %arg1[%c0_39, %c13, %c0_40] : memref<1x42x128xbf16, #tpu.memory_space<vmem>>, vector<1x24x128xbf16>
    %44 = vector.shape_cast %43 : vector<1x24x128xbf16> to vector<24x128xbf16>
    %c7_41 = arith.constant 7 : index
    %c0_42 = arith.constant 0 : index
    %c0_43 = arith.constant 0 : index
    %45 = vector.load %arg2[%c7_41, %c0_42, %c0_43] : memref<9x128x128xbf16, #tpu.memory_space<vmem>>, vector<1x128x128xbf16>
    %46 = vector.shape_cast %45 : vector<1x128x128xbf16> to vector<128x128xbf16>
    %cst_44 = arith.constant dense<0.000000e+00> : vector<24x128xf32>
    %47 = tpu.matmul %44, %46, %cst_44 {dimension_numbers = #tpu.dot_dimension_numbers<[1], [0], [0], [1], [0, 0, 1, 1], [], []>} : vector<24x128xbf16>, vector<128x128xbf16>, vector<24x128xf32> -> vector<24x128xf32>
    %48 = arith.addf %42, %47 : vector<24x128xf32>
    %c0_45 = arith.constant 0 : index
    %c14 = arith.constant 14 : index
    %c0_46 = arith.constant 0 : index
    %49 = vector.load %arg1[%c0_45, %c14, %c0_46] : memref<1x42x128xbf16, #tpu.memory_space<vmem>>, vector<1x24x128xbf16>
    %50 = vector.shape_cast %49 : vector<1x24x128xbf16> to vector<24x128xbf16>
    %c8_47 = arith.constant 8 : index
    %c0_48 = arith.constant 0 : index
    %c0_49 = arith.constant 0 : index
    %51 = vector.load %arg2[%c8_47, %c0_48, %c0_49] : memref<9x128x128xbf16, #tpu.memory_space<vmem>>, vector<1x128x128xbf16>
    %52 = vector.shape_cast %51 : vector<1x128x128xbf16> to vector<128x128xbf16>
    %cst_50 = arith.constant dense<0.000000e+00> : vector<24x128xf32>
    %53 = tpu.matmul %50, %52, %cst_50 {dimension_numbers = #tpu.dot_dimension_numbers<[1], [0], [0], [1], [0, 0, 1, 1], [], []>} : vector<24x128xbf16>, vector<128x128xbf16>, vector<24x128xf32> -> vector<24x128xf32>
    %54 = arith.addf %48, %53 : vector<24x128xf32>
    %c0_51 = arith.constant 0 : index
    %c0_52 = arith.constant 0 : index
    %55 = vector.load %arg3[%c0_51, %c0_52] : memref<1x128xf32, #tpu.memory_space<vmem>>, vector<1x128xf32>
    %56 = vector.broadcast %55 : vector<1x128xf32> to vector<24x128xf32>
    %57 = arith.addf %54, %56 : vector<24x128xf32>
    %cst_53 = arith.constant 0.000000e+00 : f32
    %58 = vector.broadcast %cst_53 : f32 to vector<24x128xf32>
    %59 = arith.cmpf oge, %57, %58 : vector<24x128xf32>
    %cst_54 = arith.constant 1.000000e-01 : f32
    %60 = vector.broadcast %cst_54 : f32 to vector<24x128xf32>
    %61 = arith.mulf %60, %57 : vector<24x128xf32>
    %62 = arith.select %59, %57, %61 : vector<24x128xi1>, vector<24x128xf32>
    %c0_55 = arith.constant 0 : index
    %c0_56 = arith.constant 0 : index
    %63 = vector.load %arg4[%c0_55, %c0_56] : memref<1x128xf32, #tpu.memory_space<vmem>>, vector<1x128xf32>
    %64 = vector.broadcast %63 : vector<1x128xf32> to vector<24x128xf32>
    %65 = arith.mulf %62, %64 : vector<24x128xf32>
    %c0_57 = arith.constant 0 : index
    %c0_58 = arith.constant 0 : index
    %66 = vector.load %arg5[%c0_57, %c0_58] : memref<1x128xf32, #tpu.memory_space<vmem>>, vector<1x128xf32>
    %67 = vector.broadcast %66 : vector<1x128xf32> to vector<24x128xf32>
    %68 = arith.addf %65, %67 : vector<24x128xf32>
    %69 = vector.shape_cast %68 : vector<24x128xf32> to vector<12x2x128xf32>
    %70 = vector.extract_strided_slice %69 {offsets = [0, 0, 0], sizes = [12, 1, 128], strides = [1, 1, 1]} : vector<12x2x128xf32> to vector<12x1x128xf32>
    %71 = vector.shape_cast %70 : vector<12x1x128xf32> to vector<12x128xf32>
    %72 = vector.extract_strided_slice %69 {offsets = [0, 1, 0], sizes = [12, 1, 128], strides = [1, 1, 1]} : vector<12x2x128xf32> to vector<12x1x128xf32>
    %73 = vector.shape_cast %72 : vector<12x1x128xf32> to vector<12x128xf32>
    %74 = arith.maximumf %71, %73 : vector<12x128xf32>
    %75 = vector.shape_cast %74 : vector<12x128xf32> to vector<2x6x128xf32>
    %76 = vector.extract_strided_slice %75 {offsets = [0, 0, 0], sizes = [2, 2, 128], strides = [1, 1, 1]} : vector<2x6x128xf32> to vector<2x2x128xf32>
    %77 = vector.extract_strided_slice %75 {offsets = [0, 3, 0], sizes = [2, 2, 128], strides = [1, 1, 1]} : vector<2x6x128xf32> to vector<2x2x128xf32>
    %78 = arith.maximumf %76, %77 : vector<2x2x128xf32>
    %79 = arith.truncf %78 : vector<2x2x128xf32> to vector<2x2x128xbf16>
    %c0_59 = arith.constant 0 : index
    %c0_60 = arith.constant 0 : index
    %c0_61 = arith.constant 0 : index
    %c0_62 = arith.constant 0 : index
    %80 = vector.load %arg6[%c0_59, %c0_60, %c0_61, %c0_62] : memref<1x2x2x128xbf16, #tpu.memory_space<vmem>>, vector<1x2x2x128xbf16>
    %81 = vector.shape_cast %80 : vector<1x2x2x128xbf16> to vector<2x2x128xbf16>
    %82 = vector.shape_cast %79 : vector<2x2x128xbf16> to vector<1x2x2x128xbf16>
    tpu.vector_store %arg6[%c0_59, %c0_60, %c0_61, %c0_62], %82 {strides = array<i32>} : memref<1x2x2x128xbf16, #tpu.memory_space<vmem>>, vector<1x2x2x128xbf16>,
    return
  }
  func.func @transform_0(%arg0: i32) -> (i32, i32, i32) {
    %c0_i32 = arith.constant 0 : i32
    %c0_i32_0 = arith.constant 0 : i32
    %c0_i32_1 = arith.constant 0 : i32
    return %arg0, %c0_i32, %c0_i32_0 : i32, i32, i32
  }
  func.func @transform_1(%arg0: i32) -> (i32, i32, i32) {
    %c0_i32 = arith.constant 0 : i32
    %c0_i32_0 = arith.constant 0 : i32
    %c0_i32_1 = arith.constant 0 : i32
    %c0_i32_2 = arith.constant 0 : i32
    return %c0_i32, %c0_i32_0, %c0_i32_1 : i32, i32, i32
  }
  func.func @transform_2(%arg0: i32) -> (i32, i32) {
    %c0_i32 = arith.constant 0 : i32
    %c0_i32_0 = arith.constant 0 : i32
    %c0_i32_1 = arith.constant 0 : i32
    return %c0_i32, %c0_i32_0 : i32, i32
  }
  func.func @transform_3(%arg0: i32) -> (i32, i32) {
    %c0_i32 = arith.constant 0 : i32
    %c0_i32_0 = arith.constant 0 : i32
    %c0_i32_1 = arith.constant 0 : i32
    return %c0_i32, %c0_i32_0 : i32, i32
  }
  func.func @transform_4(%arg0: i32) -> (i32, i32) {
    %c0_i32 = arith.constant 0 : i32
    %c0_i32_0 = arith.constant 0 : i32
    %c0_i32_1 = arith.constant 0 : i32
    return %c0_i32, %c0_i32_0 : i32, i32
  }
  func.func @transform_5(%arg0: i32) -> (i32, i32, i32, i32) {
    %c0_i32 = arith.constant 0 : i32
    %c0_i32_0 = arith.constant 0 : i32
    %c0_i32_1 = arith.constant 0 : i32
    %c0_i32_2 = arith.constant 0 : i32
    return %arg0, %c0_i32, %c0_i32_0, %c0_i32_1 : i32, i32, i32, i32
  }
}

module attributes {stable_mosaic.version = 11 : i64} {
  func.func @conv_lrelu_bn_pool_kernel(%arg0: i32, %arg1: memref<1x110x128xbf16, #tpu.memory_space<vmem>>, %arg2: memref<9x128x128xbf16, #tpu.memory_space<vmem>>, %arg3: memref<1x128xf32, #tpu.memory_space<vmem>>, %arg4: memref<1x128xf32, #tpu.memory_space<vmem>>, %arg5: memref<1x128xf32, #tpu.memory_space<vmem>>, %arg6: memref<1x4x4x128xbf16, #tpu.memory_space<vmem>>) attributes {dimension_semantics = [#tpu.dimension_semantics<parallel>], iteration_bounds = array<i64: 2>, scalar_prefetch = 0 : i64, scratch_operands = 0 : i64, tpu.core_type = #tpu.core_type<tc>, window_params = [{transform_indices = @transform_0, window_bounds = array<i64: 1, 110, 128>}, {pipeline_mode = #tpu.pipeline_mode<synchronous>, transform_indices = @transform_1, window_bounds = array<i64: 9, 128, 128>}, {pipeline_mode = #tpu.pipeline_mode<synchronous>, transform_indices = @transform_2, window_bounds = array<i64: 1, 128>}, {pipeline_mode = #tpu.pipeline_mode<synchronous>, transform_indices = @transform_3, window_bounds = array<i64: 1, 128>}, {pipeline_mode = #tpu.pipeline_mode<synchronous>, transform_indices = @transform_4, window_bounds = array<i64: 1, 128>}, {transform_indices = @transform_5, window_bounds = array<i64: 1, 4, 4, 128>}]} {
    %cst = arith.constant 0.000000e+00 : f32
    %0 = vector.broadcast %cst : f32 to vector<80x128xf32>
    %c0 = arith.constant 0 : index
    %c0_0 = arith.constant 0 : index
    %c0_1 = arith.constant 0 : index
    %1 = vector.load %arg1[%c0, %c0_0, %c0_1] : memref<1x110x128xbf16, #tpu.memory_space<vmem>>, vector<1x80x128xbf16>
    %2 = vector.shape_cast %1 : vector<1x80x128xbf16> to vector<80x128xbf16>
    %c0_2 = arith.constant 0 : index
    %c0_3 = arith.constant 0 : index
    %c0_4 = arith.constant 0 : index
    %3 = vector.load %arg2[%c0_2, %c0_3, %c0_4] : memref<9x128x128xbf16, #tpu.memory_space<vmem>>, vector<1x128x128xbf16>
    %4 = vector.shape_cast %3 : vector<1x128x128xbf16> to vector<128x128xbf16>
    %cst_5 = arith.constant dense<0.000000e+00> : vector<80x128xf32>
    %5 = tpu.matmul %2, %4, %cst_5 {dimension_numbers = #tpu.dot_dimension_numbers<[1], [0], [0], [1], [0, 0, 1, 1], [], []>} : vector<80x128xbf16>, vector<128x128xbf16>, vector<80x128xf32> -> vector<80x128xf32>
    %6 = arith.addf %0, %5 : vector<80x128xf32>
    %c0_6 = arith.constant 0 : index
    %c1 = arith.constant 1 : index
    %c0_7 = arith.constant 0 : index
    %7 = vector.load %arg1[%c0_6, %c1, %c0_7] : memref<1x110x128xbf16, #tpu.memory_space<vmem>>, vector<1x80x128xbf16>
    %8 = vector.shape_cast %7 : vector<1x80x128xbf16> to vector<80x128xbf16>
    %c1_8 = arith.constant 1 : index
    %c0_9 = arith.constant 0 : index
    %c0_10 = arith.constant 0 : index
    %9 = vector.load %arg2[%c1_8, %c0_9, %c0_10] : memref<9x128x128xbf16, #tpu.memory_space<vmem>>, vector<1x128x128xbf16>
    %10 = vector.shape_cast %9 : vector<1x128x128xbf16> to vector<128x128xbf16>
    %cst_11 = arith.constant dense<0.000000e+00> : vector<80x128xf32>
    %11 = tpu.matmul %8, %10, %cst_11 {dimension_numbers = #tpu.dot_dimension_numbers<[1], [0], [0], [1], [0, 0, 1, 1], [], []>} : vector<80x128xbf16>, vector<128x128xbf16>, vector<80x128xf32> -> vector<80x128xf32>
    %12 = arith.addf %6, %11 : vector<80x128xf32>
    %c0_12 = arith.constant 0 : index
    %c2 = arith.constant 2 : index
    %c0_13 = arith.constant 0 : index
    %13 = vector.load %arg1[%c0_12, %c2, %c0_13] : memref<1x110x128xbf16, #tpu.memory_space<vmem>>, vector<1x80x128xbf16>
    %14 = vector.shape_cast %13 : vector<1x80x128xbf16> to vector<80x128xbf16>
    %c2_14 = arith.constant 2 : index
    %c0_15 = arith.constant 0 : index
    %c0_16 = arith.constant 0 : index
    %15 = vector.load %arg2[%c2_14, %c0_15, %c0_16] : memref<9x128x128xbf16, #tpu.memory_space<vmem>>, vector<1x128x128xbf16>
    %16 = vector.shape_cast %15 : vector<1x128x128xbf16> to vector<128x128xbf16>
    %cst_17 = arith.constant dense<0.000000e+00> : vector<80x128xf32>
    %17 = tpu.matmul %14, %16, %cst_17 {dimension_numbers = #tpu.dot_dimension_numbers<[1], [0], [0], [1], [0, 0, 1, 1], [], []>} : vector<80x128xbf16>, vector<128x128xbf16>, vector<80x128xf32> -> vector<80x128xf32>
    %18 = arith.addf %12, %17 : vector<80x128xf32>
    %c0_18 = arith.constant 0 : index
    %c10 = arith.constant 10 : index
    %c0_19 = arith.constant 0 : index
    %19 = vector.load %arg1[%c0_18, %c10, %c0_19] : memref<1x110x128xbf16, #tpu.memory_space<vmem>>, vector<1x80x128xbf16>
    %20 = vector.shape_cast %19 : vector<1x80x128xbf16> to vector<80x128xbf16>
    %c3 = arith.constant 3 : index
    %c0_20 = arith.constant 0 : index
    %c0_21 = arith.constant 0 : index
    %21 = vector.load %arg2[%c3, %c0_20, %c0_21] : memref<9x128x128xbf16, #tpu.memory_space<vmem>>, vector<1x128x128xbf16>
    %22 = vector.shape_cast %21 : vector<1x128x128xbf16> to vector<128x128xbf16>
    %cst_22 = arith.constant dense<0.000000e+00> : vector<80x128xf32>
    %23 = tpu.matmul %20, %22, %cst_22 {dimension_numbers = #tpu.dot_dimension_numbers<[1], [0], [0], [1], [0, 0, 1, 1], [], []>} : vector<80x128xbf16>, vector<128x128xbf16>, vector<80x128xf32> -> vector<80x128xf32>
    %24 = arith.addf %18, %23 : vector<80x128xf32>
    %c0_23 = arith.constant 0 : index
    %c11 = arith.constant 11 : index
    %c0_24 = arith.constant 0 : index
    %25 = vector.load %arg1[%c0_23, %c11, %c0_24] : memref<1x110x128xbf16, #tpu.memory_space<vmem>>, vector<1x80x128xbf16>
    %26 = vector.shape_cast %25 : vector<1x80x128xbf16> to vector<80x128xbf16>
    %c4 = arith.constant 4 : index
    %c0_25 = arith.constant 0 : index
    %c0_26 = arith.constant 0 : index
    %27 = vector.load %arg2[%c4, %c0_25, %c0_26] : memref<9x128x128xbf16, #tpu.memory_space<vmem>>, vector<1x128x128xbf16>
    %28 = vector.shape_cast %27 : vector<1x128x128xbf16> to vector<128x128xbf16>
    %cst_27 = arith.constant dense<0.000000e+00> : vector<80x128xf32>
    %29 = tpu.matmul %26, %28, %cst_27 {dimension_numbers = #tpu.dot_dimension_numbers<[1], [0], [0], [1], [0, 0, 1, 1], [], []>} : vector<80x128xbf16>, vector<128x128xbf16>, vector<80x128xf32> -> vector<80x128xf32>
    %30 = arith.addf %24, %29 : vector<80x128xf32>
    %c0_28 = arith.constant 0 : index
    %c12 = arith.constant 12 : index
    %c0_29 = arith.constant 0 : index
    %31 = vector.load %arg1[%c0_28, %c12, %c0_29] : memref<1x110x128xbf16, #tpu.memory_space<vmem>>, vector<1x80x128xbf16>
    %32 = vector.shape_cast %31 : vector<1x80x128xbf16> to vector<80x128xbf16>
    %c5 = arith.constant 5 : index
    %c0_30 = arith.constant 0 : index
    %c0_31 = arith.constant 0 : index
    %33 = vector.load %arg2[%c5, %c0_30, %c0_31] : memref<9x128x128xbf16, #tpu.memory_space<vmem>>, vector<1x128x128xbf16>
    %34 = vector.shape_cast %33 : vector<1x128x128xbf16> to vector<128x128xbf16>
    %cst_32 = arith.constant dense<0.000000e+00> : vector<80x128xf32>
    %35 = tpu.matmul %32, %34, %cst_32 {dimension_numbers = #tpu.dot_dimension_numbers<[1], [0], [0], [1], [0, 0, 1, 1], [], []>} : vector<80x128xbf16>, vector<128x128xbf16>, vector<80x128xf32> -> vector<80x128xf32>
    %36 = arith.addf %30, %35 : vector<80x128xf32>
    %c0_33 = arith.constant 0 : index
    %c20 = arith.constant 20 : index
    %c0_34 = arith.constant 0 : index
    %37 = vector.load %arg1[%c0_33, %c20, %c0_34] : memref<1x110x128xbf16, #tpu.memory_space<vmem>>, vector<1x80x128xbf16>
    %38 = vector.shape_cast %37 : vector<1x80x128xbf16> to vector<80x128xbf16>
    %c6 = arith.constant 6 : index
    %c0_35 = arith.constant 0 : index
    %c0_36 = arith.constant 0 : index
    %39 = vector.load %arg2[%c6, %c0_35, %c0_36] : memref<9x128x128xbf16, #tpu.memory_space<vmem>>, vector<1x128x128xbf16>
    %40 = vector.shape_cast %39 : vector<1x128x128xbf16> to vector<128x128xbf16>
    %cst_37 = arith.constant dense<0.000000e+00> : vector<80x128xf32>
    %41 = tpu.matmul %38, %40, %cst_37 {dimension_numbers = #tpu.dot_dimension_numbers<[1], [0], [0], [1], [0, 0, 1, 1], [], []>} : vector<80x128xbf16>, vector<128x128xbf16>, vector<80x128xf32> -> vector<80x128xf32>
    %42 = arith.addf %36, %41 : vector<80x128xf32>
    %c0_38 = arith.constant 0 : index
    %c21 = arith.constant 21 : index
    %c0_39 = arith.constant 0 : index
    %43 = vector.load %arg1[%c0_38, %c21, %c0_39] : memref<1x110x128xbf16, #tpu.memory_space<vmem>>, vector<1x80x128xbf16>
    %44 = vector.shape_cast %43 : vector<1x80x128xbf16> to vector<80x128xbf16>
    %c7 = arith.constant 7 : index
    %c0_40 = arith.constant 0 : index
    %c0_41 = arith.constant 0 : index
    %45 = vector.load %arg2[%c7, %c0_40, %c0_41] : memref<9x128x128xbf16, #tpu.memory_space<vmem>>, vector<1x128x128xbf16>
    %46 = vector.shape_cast %45 : vector<1x128x128xbf16> to vector<128x128xbf16>
    %cst_42 = arith.constant dense<0.000000e+00> : vector<80x128xf32>
    %47 = tpu.matmul %44, %46, %cst_42 {dimension_numbers = #tpu.dot_dimension_numbers<[1], [0], [0], [1], [0, 0, 1, 1], [], []>} : vector<80x128xbf16>, vector<128x128xbf16>, vector<80x128xf32> -> vector<80x128xf32>
    %48 = arith.addf %42, %47 : vector<80x128xf32>
    %c0_43 = arith.constant 0 : index
    %c22 = arith.constant 22 : index
    %c0_44 = arith.constant 0 : index
    %49 = vector.load %arg1[%c0_43, %c22, %c0_44] : memref<1x110x128xbf16, #tpu.memory_space<vmem>>, vector<1x80x128xbf16>
    %50 = vector.shape_cast %49 : vector<1x80x128xbf16> to vector<80x128xbf16>
    %c8 = arith.constant 8 : index
    %c0_45 = arith.constant 0 : index
    %c0_46 = arith.constant 0 : index
    %51 = vector.load %arg2[%c8, %c0_45, %c0_46] : memref<9x128x128xbf16, #tpu.memory_space<vmem>>, vector<1x128x128xbf16>
    %52 = vector.shape_cast %51 : vector<1x128x128xbf16> to vector<128x128xbf16>
    %cst_47 = arith.constant dense<0.000000e+00> : vector<80x128xf32>
    %53 = tpu.matmul %50, %52, %cst_47 {dimension_numbers = #tpu.dot_dimension_numbers<[1], [0], [0], [1], [0, 0, 1, 1], [], []>} : vector<80x128xbf16>, vector<128x128xbf16>, vector<80x128xf32> -> vector<80x128xf32>
    %54 = arith.addf %48, %53 : vector<80x128xf32>
    %c0_48 = arith.constant 0 : index
    %c0_49 = arith.constant 0 : index
    %55 = vector.load %arg3[%c0_48, %c0_49] : memref<1x128xf32, #tpu.memory_space<vmem>>, vector<1x128xf32>
    %56 = vector.broadcast %55 : vector<1x128xf32> to vector<80x128xf32>
    %57 = arith.addf %54, %56 : vector<80x128xf32>
    %cst_50 = arith.constant 0.000000e+00 : f32
    %58 = vector.broadcast %cst_50 : f32 to vector<80x128xf32>
    %59 = arith.cmpf oge, %57, %58 : vector<80x128xf32>
    %cst_51 = arith.constant 1.000000e-01 : f32
    %60 = vector.broadcast %cst_51 : f32 to vector<80x128xf32>
    %61 = arith.mulf %60, %57 : vector<80x128xf32>
    %62 = arith.select %59, %57, %61 : vector<80x128xi1>, vector<80x128xf32>
    %c0_52 = arith.constant 0 : index
    %c0_53 = arith.constant 0 : index
    %63 = vector.load %arg4[%c0_52, %c0_53] : memref<1x128xf32, #tpu.memory_space<vmem>>, vector<1x128xf32>
    %64 = vector.broadcast %63 : vector<1x128xf32> to vector<80x128xf32>
    %65 = arith.mulf %62, %64 : vector<80x128xf32>
    %c0_54 = arith.constant 0 : index
    %c0_55 = arith.constant 0 : index
    %66 = vector.load %arg5[%c0_54, %c0_55] : memref<1x128xf32, #tpu.memory_space<vmem>>, vector<1x128xf32>
    %67 = vector.broadcast %66 : vector<1x128xf32> to vector<80x128xf32>
    %68 = arith.addf %65, %67 : vector<80x128xf32>
    %69 = vector.shape_cast %68 : vector<80x128xf32> to vector<40x2x128xf32>
    %70 = vector.extract_strided_slice %69 {offsets = [0, 0, 0], sizes = [40, 1, 128], strides = [1, 1, 1]} : vector<40x2x128xf32> to vector<40x1x128xf32>
    %71 = vector.shape_cast %70 : vector<40x1x128xf32> to vector<40x128xf32>
    %72 = vector.extract_strided_slice %69 {offsets = [0, 1, 0], sizes = [40, 1, 128], strides = [1, 1, 1]} : vector<40x2x128xf32> to vector<40x1x128xf32>
    %73 = vector.shape_cast %72 : vector<40x1x128xf32> to vector<40x128xf32>
    %74 = arith.maximumf %71, %73 : vector<40x128xf32>
    %75 = vector.shape_cast %74 : vector<40x128xf32> to vector<4x10x128xf32>
    %76 = vector.extract_strided_slice %75 {offsets = [0, 0, 0], sizes = [4, 4, 128], strides = [1, 1, 1]} : vector<4x10x128xf32> to vector<4x4x128xf32>
    %77 = vector.extract_strided_slice %75 {offsets = [0, 5, 0], sizes = [4, 4, 128], strides = [1, 1, 1]} : vector<4x10x128xf32> to vector<4x4x128xf32>
    %78 = arith.maximumf %76, %77 : vector<4x4x128xf32>
    %79 = arith.truncf %78 : vector<4x4x128xf32> to vector<4x4x128xbf16>
    %c0_56 = arith.constant 0 : index
    %c0_57 = arith.constant 0 : index
    %c0_58 = arith.constant 0 : index
    %c0_59 = arith.constant 0 : index
    %80 = vector.load %arg6[%c0_56, %c0_57, %c0_58, %c0_59] : memref<1x4x4x128xbf16, #tpu.memory_space<vmem>>, vector<1x4x4x128xbf16>
    %81 = vector.shape_cast %80 : vector<1x4x4x128xbf16> to vector<4x4x128xbf16>
    %82 = vector.shape_cast %79 : vector<4x4x128xbf16> to vector<1x4x4x128xbf16>
    tpu.vector_store %arg6[%c0_56, %c0_57, %c0_58, %c0_59], %82 {strides = array<i32>} : memref<1x4x4x128xbf16, #tpu.memory_space<vmem>>, vector<1x4x4x128xbf16>,
    return
  }
  func.func @transform_0(%arg0: i32) -> (i32, i32, i32) {
    %c0_i32 = arith.constant 0 : i32
    %c0_i32_0 = arith.constant 0 : i32
    %c0_i32_1 = arith.constant 0 : i32
    return %arg0, %c0_i32, %c0_i32_0 : i32, i32, i32
  }
  func.func @transform_1(%arg0: i32) -> (i32, i32, i32) {
    %c0_i32 = arith.constant 0 : i32
    %c0_i32_0 = arith.constant 0 : i32
    %c0_i32_1 = arith.constant 0 : i32
    %c0_i32_2 = arith.constant 0 : i32
    return %c0_i32, %c0_i32_0, %c0_i32_1 : i32, i32, i32
  }
  func.func @transform_2(%arg0: i32) -> (i32, i32) {
    %c0_i32 = arith.constant 0 : i32
    %c0_i32_0 = arith.constant 0 : i32
    %c0_i32_1 = arith.constant 0 : i32
    return %c0_i32, %c0_i32_0 : i32, i32
  }
  func.func @transform_3(%arg0: i32) -> (i32, i32) {
    %c0_i32 = arith.constant 0 : i32
    %c0_i32_0 = arith.constant 0 : i32
    %c0_i32_1 = arith.constant 0 : i32
    return %c0_i32, %c0_i32_0 : i32, i32
  }
  func.func @transform_4(%arg0: i32) -> (i32, i32) {
    %c0_i32 = arith.constant 0 : i32
    %c0_i32_0 = arith.constant 0 : i32
    %c0_i32_1 = arith.constant 0 : i32
    return %c0_i32, %c0_i32_0 : i32, i32
  }
  func.func @transform_5(%arg0: i32) -> (i32, i32, i32, i32) {
    %c0_i32 = arith.constant 0 : i32
    %c0_i32_0 = arith.constant 0 : i32
    %c0_i32_1 = arith.constant 0 : i32
    %c0_i32_2 = arith.constant 0 : i32
    return %arg0, %c0_i32, %c0_i32_0, %c0_i32_1 : i32, i32, i32, i32
  }
}

module attributes {stable_mosaic.version = 11 : i64} {
  func.func @fc_kernel(%arg0: i32, %arg1: memref<8x512xbf16, #tpu.memory_space<vmem>>, %arg2: memref<512x128xbf16, #tpu.memory_space<vmem>>, %arg3: memref<1x128xf32, #tpu.memory_space<vmem>>, %arg4: memref<1x128xf32, #tpu.memory_space<vmem>>, %arg5: memref<1x128xf32, #tpu.memory_space<vmem>>, %arg6: memref<128x32xbf16, #tpu.memory_space<vmem>>, %arg7: memref<1x32xf32, #tpu.memory_space<vmem>>, %arg8: memref<1x32xf32, #tpu.memory_space<vmem>>, %arg9: memref<1x32xf32, #tpu.memory_space<vmem>>, %arg10: memref<32x8xbf16, #tpu.memory_space<vmem>>, %arg11: memref<1x8xf32, #tpu.memory_space<vmem>>, %arg12: memref<1x8xf32, #tpu.memory_space<vmem>>, %arg13: memref<1x8xf32, #tpu.memory_space<vmem>>, %arg14: memref<8x1xbf16, #tpu.memory_space<vmem>>, %arg15: memref<1x1xf32, #tpu.memory_space<vmem>>, %arg16: memref<8x1xf32, #tpu.memory_space<vmem>>) attributes {dimension_semantics = [#tpu.dimension_semantics<parallel>], iteration_bounds = array<i64: 2>, scalar_prefetch = 0 : i64, scratch_operands = 0 : i64, tpu.core_type = #tpu.core_type<tc>, window_params = [{transform_indices = @transform_0, window_bounds = array<i64: 8, 512>}, {pipeline_mode = #tpu.pipeline_mode<synchronous>, transform_indices = @transform_1, window_bounds = array<i64: 512, 128>}, {pipeline_mode = #tpu.pipeline_mode<synchronous>, transform_indices = @transform_2, window_bounds = array<i64: 1, 128>}, {pipeline_mode = #tpu.pipeline_mode<synchronous>, transform_indices = @transform_3, window_bounds = array<i64: 1, 128>}, {pipeline_mode = #tpu.pipeline_mode<synchronous>, transform_indices = @transform_4, window_bounds = array<i64: 1, 128>}, {pipeline_mode = #tpu.pipeline_mode<synchronous>, transform_indices = @transform_5, window_bounds = array<i64: 128, 32>}, {pipeline_mode = #tpu.pipeline_mode<synchronous>, transform_indices = @transform_6, window_bounds = array<i64: 1, 32>}, {pipeline_mode = #tpu.pipeline_mode<synchronous>, transform_indices = @transform_7, window_bounds = array<i64: 1, 32>}, {pipeline_mode = #tpu.pipeline_mode<synchronous>, transform_indices = @transform_8, window_bounds = array<i64: 1, 32>}, {pipeline_mode = #tpu.pipeline_mode<synchronous>, transform_indices = @transform_9, window_bounds = array<i64: 32, 8>}, {pipeline_mode = #tpu.pipeline_mode<synchronous>, transform_indices = @transform_10, window_bounds = array<i64: 1, 8>}, {pipeline_mode = #tpu.pipeline_mode<synchronous>, transform_indices = @transform_11, window_bounds = array<i64: 1, 8>}, {pipeline_mode = #tpu.pipeline_mode<synchronous>, transform_indices = @transform_12, window_bounds = array<i64: 1, 8>}, {pipeline_mode = #tpu.pipeline_mode<synchronous>, transform_indices = @transform_13, window_bounds = array<i64: 8, 1>}, {pipeline_mode = #tpu.pipeline_mode<synchronous>, transform_indices = @transform_14, window_bounds = array<i64: 1, 1>}, {transform_indices = @transform_15, window_bounds = array<i64: 8, 1>}]} {
    %c0 = arith.constant 0 : index
    %c0_0 = arith.constant 0 : index
    %0 = vector.load %arg1[%c0, %c0_0] : memref<8x512xbf16, #tpu.memory_space<vmem>>, vector<8x512xbf16>
    %c0_1 = arith.constant 0 : index
    %c0_2 = arith.constant 0 : index
    %1 = vector.load %arg2[%c0_1, %c0_2] : memref<512x128xbf16, #tpu.memory_space<vmem>>, vector<512x128xbf16>
    %cst = arith.constant dense<0.000000e+00> : vector<8x128xf32>
    %2 = tpu.matmul %0, %1, %cst {dimension_numbers = #tpu.dot_dimension_numbers<[1], [0], [0], [1], [0, 0, 1, 1], [], []>} : vector<8x512xbf16>, vector<512x128xbf16>, vector<8x128xf32> -> vector<8x128xf32>
    %c0_3 = arith.constant 0 : index
    %c0_4 = arith.constant 0 : index
    %3 = vector.load %arg3[%c0_3, %c0_4] : memref<1x128xf32, #tpu.memory_space<vmem>>, vector<1x128xf32>
    %4 = vector.broadcast %3 : vector<1x128xf32> to vector<8x128xf32>
    %5 = arith.addf %2, %4 : vector<8x128xf32>
    %cst_5 = arith.constant 0.000000e+00 : f32
    %6 = vector.broadcast %cst_5 : f32 to vector<8x128xf32>
    %7 = arith.cmpf oge, %5, %6 : vector<8x128xf32>
    %cst_6 = arith.constant 1.000000e-01 : f32
    %8 = vector.broadcast %cst_6 : f32 to vector<8x128xf32>
    %9 = arith.mulf %8, %5 : vector<8x128xf32>
    %10 = arith.select %7, %5, %9 : vector<8x128xi1>, vector<8x128xf32>
    %c0_7 = arith.constant 0 : index
    %c0_8 = arith.constant 0 : index
    %11 = vector.load %arg4[%c0_7, %c0_8] : memref<1x128xf32, #tpu.memory_space<vmem>>, vector<1x128xf32>
    %12 = vector.broadcast %11 : vector<1x128xf32> to vector<8x128xf32>
    %13 = arith.mulf %10, %12 : vector<8x128xf32>
    %c0_9 = arith.constant 0 : index
    %c0_10 = arith.constant 0 : index
    %14 = vector.load %arg5[%c0_9, %c0_10] : memref<1x128xf32, #tpu.memory_space<vmem>>, vector<1x128xf32>
    %15 = vector.broadcast %14 : vector<1x128xf32> to vector<8x128xf32>
    %16 = arith.addf %13, %15 : vector<8x128xf32>
    %17 = arith.truncf %16 : vector<8x128xf32> to vector<8x128xbf16>
    %c0_11 = arith.constant 0 : index
    %c0_12 = arith.constant 0 : index
    %18 = vector.load %arg6[%c0_11, %c0_12] : memref<128x32xbf16, #tpu.memory_space<vmem>>, vector<128x32xbf16>
    %cst_13 = arith.constant dense<0.000000e+00> : vector<8x32xf32>
    %19 = tpu.matmul %17, %18, %cst_13 {dimension_numbers = #tpu.dot_dimension_numbers<[1], [0], [0], [1], [0, 0, 1, 1], [], []>} : vector<8x128xbf16>, vector<128x32xbf16>, vector<8x32xf32> -> vector<8x32xf32>
    %c0_14 = arith.constant 0 : index
    %c0_15 = arith.constant 0 : index
    %20 = vector.load %arg7[%c0_14, %c0_15] : memref<1x32xf32, #tpu.memory_space<vmem>>, vector<1x32xf32>
    %21 = vector.broadcast %20 : vector<1x32xf32> to vector<8x32xf32>
    %22 = arith.addf %19, %21 : vector<8x32xf32>
    %cst_16 = arith.constant 0.000000e+00 : f32
    %23 = vector.broadcast %cst_16 : f32 to vector<8x32xf32>
    %24 = arith.cmpf oge, %22, %23 : vector<8x32xf32>
    %cst_17 = arith.constant 1.000000e-01 : f32
    %25 = vector.broadcast %cst_17 : f32 to vector<8x32xf32>
    %26 = arith.mulf %25, %22 : vector<8x32xf32>
    %27 = arith.select %24, %22, %26 : vector<8x32xi1>, vector<8x32xf32>
    %c0_18 = arith.constant 0 : index
    %c0_19 = arith.constant 0 : index
    %28 = vector.load %arg8[%c0_18, %c0_19] : memref<1x32xf32, #tpu.memory_space<vmem>>, vector<1x32xf32>
    %29 = vector.broadcast %28 : vector<1x32xf32> to vector<8x32xf32>
    %30 = arith.mulf %27, %29 : vector<8x32xf32>
    %c0_20 = arith.constant 0 : index
    %c0_21 = arith.constant 0 : index
    %31 = vector.load %arg9[%c0_20, %c0_21] : memref<1x32xf32, #tpu.memory_space<vmem>>, vector<1x32xf32>
    %32 = vector.broadcast %31 : vector<1x32xf32> to vector<8x32xf32>
    %33 = arith.addf %30, %32 : vector<8x32xf32>
    %34 = arith.truncf %33 : vector<8x32xf32> to vector<8x32xbf16>
    %c0_22 = arith.constant 0 : index
    %c0_23 = arith.constant 0 : index
    %35 = vector.load %arg10[%c0_22, %c0_23] : memref<32x8xbf16, #tpu.memory_space<vmem>>, vector<32x8xbf16>
    %cst_24 = arith.constant dense<0.000000e+00> : vector<8x8xf32>
    %36 = tpu.matmul %34, %35, %cst_24 {dimension_numbers = #tpu.dot_dimension_numbers<[1], [0], [0], [1], [0, 0, 1, 1], [], []>} : vector<8x32xbf16>, vector<32x8xbf16>, vector<8x8xf32> -> vector<8x8xf32>
    %c0_25 = arith.constant 0 : index
    %c0_26 = arith.constant 0 : index
    %37 = vector.load %arg11[%c0_25, %c0_26] : memref<1x8xf32, #tpu.memory_space<vmem>>, vector<1x8xf32>
    %38 = vector.broadcast %37 : vector<1x8xf32> to vector<8x8xf32>
    %39 = arith.addf %36, %38 : vector<8x8xf32>
    %cst_27 = arith.constant 0.000000e+00 : f32
    %40 = vector.broadcast %cst_27 : f32 to vector<8x8xf32>
    %41 = arith.cmpf oge, %39, %40 : vector<8x8xf32>
    %cst_28 = arith.constant 1.000000e-01 : f32
    %42 = vector.broadcast %cst_28 : f32 to vector<8x8xf32>
    %43 = arith.mulf %42, %39 : vector<8x8xf32>
    %44 = arith.select %41, %39, %43 : vector<8x8xi1>, vector<8x8xf32>
    %c0_29 = arith.constant 0 : index
    %c0_30 = arith.constant 0 : index
    %45 = vector.load %arg12[%c0_29, %c0_30] : memref<1x8xf32, #tpu.memory_space<vmem>>, vector<1x8xf32>
    %46 = vector.broadcast %45 : vector<1x8xf32> to vector<8x8xf32>
    %47 = arith.mulf %44, %46 : vector<8x8xf32>
    %c0_31 = arith.constant 0 : index
    %c0_32 = arith.constant 0 : index
    %48 = vector.load %arg13[%c0_31, %c0_32] : memref<1x8xf32, #tpu.memory_space<vmem>>, vector<1x8xf32>
    %49 = vector.broadcast %48 : vector<1x8xf32> to vector<8x8xf32>
    %50 = arith.addf %47, %49 : vector<8x8xf32>
    %51 = arith.truncf %50 : vector<8x8xf32> to vector<8x8xbf16>
    %c0_33 = arith.constant 0 : index
    %c0_34 = arith.constant 0 : index
    %52 = vector.load %arg14[%c0_33, %c0_34] : memref<8x1xbf16, #tpu.memory_space<vmem>>, vector<8x1xbf16>
    %cst_35 = arith.constant dense<0.000000e+00> : vector<8x1xf32>
    %53 = tpu.matmul %51, %52, %cst_35 {dimension_numbers = #tpu.dot_dimension_numbers<[1], [0], [0], [1], [0, 0, 1, 1], [], []>} : vector<8x8xbf16>, vector<8x1xbf16>, vector<8x1xf32> -> vector<8x1xf32>
    %c0_36 = arith.constant 0 : index
    %c0_37 = arith.constant 0 : index
    %54 = vector.load %arg15[%c0_36, %c0_37] : memref<1x1xf32, #tpu.memory_space<vmem>>, vector<1x1xf32>
    %55 = vector.broadcast %54 : vector<1x1xf32> to vector<8x1xf32>
    %56 = arith.addf %53, %55 : vector<8x1xf32>
    %c0_38 = arith.constant 0 : index
    %c0_39 = arith.constant 0 : index
    %57 = vector.load %arg16[%c0_38, %c0_39] : memref<8x1xf32, #tpu.memory_space<vmem>>, vector<8x1xf32>
    tpu.vector_store %arg16[%c0_38, %c0_39], %56 {strides = array<i32>} : memref<8x1xf32, #tpu.memory_space<vmem>>, vector<8x1xf32>,
    return
  }
  func.func @transform_0(%arg0: i32) -> (i32, i32) {
    %c0_i32 = arith.constant 0 : i32
    %c0_i32_0 = arith.constant 0 : i32
    return %arg0, %c0_i32 : i32, i32
  }
  func.func @transform_1(%arg0: i32) -> (i32, i32) {
    %c0_i32 = arith.constant 0 : i32
    %c0_i32_0 = arith.constant 0 : i32
    %c0_i32_1 = arith.constant 0 : i32
    return %c0_i32, %c0_i32_0 : i32, i32
  }
  func.func @transform_2(%arg0: i32) -> (i32, i32) {
    %c0_i32 = arith.constant 0 : i32
    %c0_i32_0 = arith.constant 0 : i32
    %c0_i32_1 = arith.constant 0 : i32
    return %c0_i32, %c0_i32_0 : i32, i32
  }
  func.func @transform_3(%arg0: i32) -> (i32, i32) {
    %c0_i32 = arith.constant 0 : i32
    %c0_i32_0 = arith.constant 0 : i32
    %c0_i32_1 = arith.constant 0 : i32
    return %c0_i32, %c0_i32_0 : i32, i32
  }
  func.func @transform_4(%arg0: i32) -> (i32, i32) {
    %c0_i32 = arith.constant 0 : i32
    %c0_i32_0 = arith.constant 0 : i32
    %c0_i32_1 = arith.constant 0 : i32
    return %c0_i32, %c0_i32_0 : i32, i32
  }
  func.func @transform_5(%arg0: i32) -> (i32, i32) {
    %c0_i32 = arith.constant 0 : i32
    %c0_i32_0 = arith.constant 0 : i32
    %c0_i32_1 = arith.constant 0 : i32
    return %c0_i32, %c0_i32_0 : i32, i32
  }
  func.func @transform_6(%arg0: i32) -> (i32, i32) {
    %c0_i32 = arith.constant 0 : i32
    %c0_i32_0 = arith.constant 0 : i32
    %c0_i32_1 = arith.constant 0 : i32
    return %c0_i32, %c0_i32_0 : i32, i32
  }
  func.func @transform_7(%arg0: i32) -> (i32, i32) {
    %c0_i32 = arith.constant 0 : i32
    %c0_i32_0 = arith.constant 0 : i32
    %c0_i32_1 = arith.constant 0 : i32
    return %c0_i32, %c0_i32_0 : i32, i32
  }
  func.func @transform_8(%arg0: i32) -> (i32, i32) {
    %c0_i32 = arith.constant 0 : i32
    %c0_i32_0 = arith.constant 0 : i32
    %c0_i32_1 = arith.constant 0 : i32
    return %c0_i32, %c0_i32_0 : i32, i32
  }
  func.func @transform_9(%arg0: i32) -> (i32, i32) {
    %c0_i32 = arith.constant 0 : i32
    %c0_i32_0 = arith.constant 0 : i32
    %c0_i32_1 = arith.constant 0 : i32
    return %c0_i32, %c0_i32_0 : i32, i32
  }
  func.func @transform_10(%arg0: i32) -> (i32, i32) {
    %c0_i32 = arith.constant 0 : i32
    %c0_i32_0 = arith.constant 0 : i32
    %c0_i32_1 = arith.constant 0 : i32
    return %c0_i32, %c0_i32_0 : i32, i32
  }
  func.func @transform_11(%arg0: i32) -> (i32, i32) {
    %c0_i32 = arith.constant 0 : i32
    %c0_i32_0 = arith.constant 0 : i32
    %c0_i32_1 = arith.constant 0 : i32
    return %c0_i32, %c0_i32_0 : i32, i32
  }
  func.func @transform_12(%arg0: i32) -> (i32, i32) {
    %c0_i32 = arith.constant 0 : i32
    %c0_i32_0 = arith.constant 0 : i32
    %c0_i32_1 = arith.constant 0 : i32
    return %c0_i32, %c0_i32_0 : i32, i32
  }
  func.func @transform_13(%arg0: i32) -> (i32, i32) {
    %c0_i32 = arith.constant 0 : i32
    %c0_i32_0 = arith.constant 0 : i32
    %c0_i32_1 = arith.constant 0 : i32
    return %c0_i32, %c0_i32_0 : i32, i32
  }
  func.func @transform_14(%arg0: i32) -> (i32, i32) {
    %c0_i32 = arith.constant 0 : i32
    %c0_i32_0 = arith.constant 0 : i32
    %c0_i32_1 = arith.constant 0 : i32
    return %c0_i32, %c0_i32_0 : i32, i32
  }
  func.func @transform_15(%arg0: i32) -> (i32, i32) {
    %c0_i32 = arith.constant 0 : i32
    %c0_i32_0 = arith.constant 0 : i32
    return %arg0, %c0_i32 : i32, i32
  }
}

</mosaic_0001>

<bundles_post_ra>
// kernel: domain_classifier_forward.6
= control target key start
LH: loop header
LB: loop body
LE: loop exit
PB: predicated region body
PF: predicated region fallthrough
CT: control target
= control target key end

     0   :  { %s1897_s18 = smov 0   ;;  %s2236_s0 = inlined_call_operand.vmem [shape: bf16[2,42,128], index: 0, kind: input, shape index: {}]   ;;  %s2237_s1 = inlined_call_operand.vmem [shape: bf16[9,128,128], index: 1, kind: input, shape index: {}]   ;;  %s2238_s2 = inlined_call_operand.vmem [shape: f32[1,128], index: 2, kind: input, shape index: {}]   ;;  %s2239_s3 = inlined_call_operand.vmem [shape: f32[1,128], index: 3, kind: input, shape index: {}]   ;;  %s2240_s4 = inlined_call_operand.vmem [shape: f32[1,128], index: 4, kind: input, shape index: {}]   ;;  %s2241_s5 = inlined_call_operand.vmem [shape: bf16[2,2,2,128], index: 5, kind: output, shape index: {}]  }
   0x1 LB: > { %s1325_s19 = sadd.s32 4294967295, %s1865_s18   ;;  %p1329_p0 = scmp.ge.s32.totalorder %s1865_s18, 1  ;;  %s1865_s18 = sphi %s1897_s18, %s15_s18  }
   0x2   : > { %p187_p1 = scmp.lt.s32.totalorder %s1865_s18, 3 }
   0x4   : > { %p188_p2 = pnand %p1329_p0, %p187_p1 }
   0x5   : > { %p214_p3 = scmp.lt.s32.totalorder (!%p188_p2), %s1325_s19, 1 }
   0x6   : > { %191 = sbr.rel (%p188_p2) target bundleno = 290 (0x122), region = 40 }
   0xb   : > { %v1773_v0 = vld [vmem:[%s2237_s1 + $0x78] sm:$0xff]  ;;  %v1772_v4 = vld [vmem:[%s2237_s1 + $0x70] sm:$0xff]  ;;  %s2243_s19 = smov (!%p214_p3, %s1325_s19), 1  ;;  %v1771_v8 = vld [vmem:[%s2237_s1 + $0x68] sm:$0xff]  ;;  %vm270_vm0 = vsmask.f32 7424 }
   0xc   : > { %v1765_v1 = vld [vmem:[%s2237_s1 + $0x38] sm:$0xff]  ;;  %336 = vmatpush.bf16.msra.mxu0 %v1773_v0  ;;  %v1764_v5 = vld [vmem:[%s2237_s1 + $0x30] sm:$0xff]  ;;  %s1847_s11 = smul.u32 24, %s2243_s19  ;;  %v1763_v9 = vld [vmem:[%s2237_s1 + $0x28] sm:$0xff]  ;;  %vm444_vm1 = vcmask 1046528   ;;  %vm544_vm2 = vcmask 1044480  }
   0xd   : > { %v1781_v2 = vld [vmem:[%s2237_s1 + $0xb8] sm:$0xff]  ;;  %405 = vmatpush.bf16.msra.mxu1 %v1765_v1  ;;  %v1780_v6 = vld [vmem:[%s2237_s1 + $0xb0] sm:$0xff]  ;;  %v1779_v10 = vld [vmem:[%s2237_s1 + $0xa8] sm:$0xff]  ;;  %vm640_vm3 = vsmask.f32 4352  ;;  %vm850_vm4 = vcmask 1045504  }
   0xe   : > { %v1789_v3 = vld [vmem:[%s2237_s1 + $0xf8] sm:$0xff]  ;;  %498 = vmatpush.bf16.msra.mxu2 %v1781_v2  ;;  %v1788_v7 = vld [vmem:[%s2237_s1 + $0xf0] sm:$0xff]  ;;  %v1787_v11 = vld [vmem:[%s2237_s1 + $0xe8] sm:$0xff]  ;;  %s1947_s24 = scalar_lea.vmem %s2236_s0, %s1847_s11  ;;  %vm946_vm5 = vsmask.f32 5376  ;;  %vm1223_vm9 = vcmask 1040384  }
   0xf   : > { %598 = vmatpush.bf16.msra.mxu3 %v1789_v3  ;;  %v1770_v12 = vld [vmem:[%s2237_s1 + $0x60] sm:$0xff]  ;;  %v1962_v16 = vld [vmem:[%s1947_s24 + $0x8] sm:$0xff]   ;;  %v1769_v18 = vld [vmem:[%s2237_s1 + $0x58] sm:$0xff]  ;;  %vm1254_vm10 = vcmask 1041409   ;;  %s1331_s15 = sshll.u32 %s2243_s19, 1 }
  0x10   : > { %337 = vmatpush.bf16.msra.mxu0 %v1772_v4  ;;  %v1762_v13 = vld [vmem:[%s2237_s1 + $0x20] sm:$0xff]  ;;  %v242_v17 = vld [vmem:[%s1947_s24 + $0xc] sm:$0x1]  ;;  %v1761_v19 = vld [vmem:[%s2237_s1 + $0x18] sm:$0xff]  ;;  %v1972_v20 = vunpack.c.l.b16 %v1962_v16  ;;  %s222_s20 = scalar_lea.vmem %s2241_s5, %s1331_s15 }
  0x11   : > { %406 = vmatpush.bf16.msra.mxu1 %v1764_v5  ;;  %v1778_v14 = vld [vmem:[%s2237_s1 + $0xa0] sm:$0xff]  ;;  %v267_v21 = vunpack.c.l.b16 %v242_v17  ;;  %v1777_v22 = vld [vmem:[%s2237_s1 + $0x98] sm:$0xff]  ;;  %v520_v27 = vld [vmem:[%s1947_s24 + $0xc] sm:$0x7] }
  0x12   : > { %499 = vmatpush.bf16.msra.mxu2 %v1780_v6  ;;  %v1786_v15 = vld [vmem:[%s2237_s1 + $0xe0] sm:$0xff]  ;;  %v1785_v23 = vld [vmem:[%s2237_s1 + $0xd8] sm:$0xff]  ;;  %v1768_v28 = vld [vmem:[%s2237_s1 + $0x50] sm:$0xff]  ;;  %v541_v37 = vunpack.c.l.b16 %v520_v27  ;;  %v354_v27 = vpack.c.b16 %v1972_v20, %v1972_v20 }
  0x13   : > { %599 = vmatpush.bf16.msra.mxu3 %v1788_v7  ;;  %v1981_v24 = vld [vmem:[%s1947_s24] sm:$0xff]   ;;  %v1760_v29 = vld [vmem:[%s2237_s1 + $0x10] sm:$0xff]  ;;  %v1993_v30 = vpack.c.b16 %v267_v21, %v1972_v20  ;;  %v1767_v38 = vld [vmem:[%s2237_s1 + $0x48] sm:$0xff] }
  0x14   : > { %338 = vmatpush.bf16.msra.mxu0 %v1771_v8  ;;  %v423_v25 = vld [vmem:[%s1947_s24] sm:$0xe]  ;;  %v274_v31 = vshll.u32 %v1981_v24, 16  ;;  %v1776_v32 = vld [vmem:[%s2237_s1 + $0x90] sm:$0xff]  ;;  %v2003_v34 = vunpack.c.h.b16 %v1981_v24  ;;  %v1759_v39 = vld [vmem:[%s2237_s1 + $0x8] sm:$0xff]  ;;  %v272_v40 = vshrl.u32 %v1981_v24, 16  ;;  %v2024_v47 = vpack.c.b16 %v541_v37, %v1972_v20 }
  0x15   : > { %407 = vmatpush.bf16.msra.mxu1 %v1763_v9  ;;  %v519_v26 = vld [vmem:[%s1947_s24] sm:$0x8]  ;;  %v1784_v33 = vld [vmem:[%s2237_s1 + $0xd0] sm:$0xff]  ;;  %v442_v35 = vunpack.c.l.b16 %v423_v25  ;;  %v279_v42 = vshll.u32 %v1993_v30, 16  ;;  %v1775_v43 = vld [vmem:[%s2237_s1 + $0x88] sm:$0xff]  ;;  %v446_v55 = vrot.slane %v1993_v30, 1 }
  0x16   : > { %500 = vmatpush.bf16.msra.mxu2 %v1779_v10  ;;  %v540_v36 = vunpack.c.l.b16 %v519_v26  ;;  %v276_v41 = vrot.slane %v274_v31, 1  ;;  %v1783_v44 = vld [vmem:[%s2237_s1 + $0xc8] sm:$0xff]  ;;  %v1766_v48 = vld [vmem:[%s2237_s1 + $0x40] sm:$0xff]  ;;  %v546_v57 = vrot.slane %v2024_v47, 3  ;;  %v1797_v58 = vld [vmem:[%s2237_s1 + $0x138] sm:$0xff] }
  0x17   : > { %600 = vmatpush.bf16.msra.mxu3 %v1787_v11  ;;  %v443_v45 = vpack.c.b16 %v2003_v34, %v442_v35  ;;  %v1758_v49 = vld [vmem:[%s2237_s1] sm:$0xff]  ;;  %v2032_v51 = vrot.slane %v279_v42, 1  ;;  %v1805_v59 = vld [vmem:[%s2237_s1 + $0x178] sm:$0xff]  ;;  %v1796_v1 = vld [vmem:[%s2237_s1 + $0x130] sm:$0xff] }
  0x18   : > { %339 = vmatpush.bf16.msra.mxu0 %v1770_v12  ;;  %v2021_v46 = vpack.c.b16 %v2003_v34, %v540_v36  ;;  %v277_v50 = vor.u32 %v276_v41, %v272_v40  ;;  %v1774_v52 = vld [vmem:[%s2237_s1 + $0x80] sm:$0xff]  ;;  %v1813_v62 = vld [vmem:[%s2237_s1 + $0x1b8] sm:$0xff]  ;;  %v1804_v2 = vld [vmem:[%s2237_s1 + $0x170] sm:$0xff]  ;;  %v653_v40 = vshll.u32 %v1962_v16, 16 }
  0x19   : > { %408 = vmatpush.bf16.msra.mxu1 %v1762_v13  ;;  %v1782_v53 = vld [vmem:[%s2237_s1 + $0xc0] sm:$0xff]  ;;  %v445_v54 = vrot.slane %v443_v45, 1  ;;  %v1821_v0 = vld [vmem:[%s2237_s1 + $0x1f8] sm:$0xff]  ;;  %v1812_v3 = vld [vmem:[%s2237_s1 + $0x1b0] sm:$0xff] }
  0x1a   : > { %501 = vmatpush.bf16.msra.mxu2 %v1778_v14  ;;  %v545_v56 = vrot.slane %v2021_v46, 3  ;;  %v282_v60 = vsel %vm270_vm0, %v277_v50, %v2032_v51  ;;  %v1820_v4 = vld [vmem:[%s2237_s1 + $0x1f0] sm:$0xff]  ;;  %v1795_v5 = vld [vmem:[%s2237_s1 + $0x128] sm:$0xff]  ;;  %v1794_v9 = vld [vmem:[%s2237_s1 + $0x120] sm:$0xff]  ;;  %v283_v14 = vshrl.u32 %v1993_v30, 16  ;;  %v642_v37 = vshrl.u32 %v2021_v46, 16 }
  0x1b   : > { %601 = vmatpush.bf16.msra.mxu3 %v1786_v15  ;;  %v447_v61 = vsel %vm444_vm1, %v445_v54, %v446_v55  ;;  %v1803_v6 = vld [vmem:[%s2237_s1 + $0x168] sm:$0xff]  ;;  %v1802_v10 = vld [vmem:[%s2237_s1 + $0x160] sm:$0xff]  ;;  %v925_v13 = vld [vmem:[%s1947_s24 + $0x10] sm:$0x7]  ;;  %v638_v15 = vunpack.c.h.b16 %v1962_v16 }
  0x1c   : > { %340 = vmatpush.bf16.msra.mxu0 %v1769_v18  ;;  %v547_v63 = vsel %vm544_vm2, %v545_v56, %v546_v57  ;;  %v1811_v7 = vld [vmem:[%s2237_s1 + $0x1a8] sm:$0xff]  ;;  %v819_v11 = vld [vmem:[%s1947_s24 + $0x4] sm:$0xc]  ;;  %v1801_v25 = vld [vmem:[%s2237_s1 + $0x158] sm:$0xff]  ;;  %v285_v26 = vor.u32 %v283_v14, %v2032_v51 }
  0x1d   : > { %409 = vmatpush.bf16.msra.mxu1 %v1761_v19  ;;  %v1819_v8 = vld [vmem:[%s2237_s1 + $0x1e8] sm:$0xff]  ;;  %v1810_v17 = vld [vmem:[%s2237_s1 + $0x1a0] sm:$0xff]  ;;  %v822_v31 = vld [vmem:[%s1947_s24 + $0x10] sm:$0x3]  ;;  %v747_v14 = vpack.c.b16 %v638_v15, %v638_v15 }
  0x1e   : > { %502 = vmatpush.bf16.msra.mxu2 %v1777_v22  ;;  %v2095_v12 = vld [vmem:[%s1947_s24 + $0x8] sm:$0xff]   ;;  %v1818_v18 = vld [vmem:[%s2237_s1 + $0x1e0] sm:$0xff]  ;;  %v844_v22 = vunpack.c.l.b16 %v819_v11  ;;  %v1792_v35 = vld [vmem:[%s2237_s1 + $0x110] sm:$0xff]  ;;  %v847_v41 = vunpack.c.l.b16 %v822_v31 }
  0x1f   : > { %602 = vmatpush.bf16.msra.mxu3 %v1785_v23  ;;  %v1836_v19 = vunpack.c.l.b16 %v2095_v12  ;;  %v1837_v21 = vunpack.c.h.b16 %v2095_v12  ;;  %v944_v23 = vunpack.c.l.b16 %v925_v13  ;;  %v1800_v36 = vld [vmem:[%s2237_s1 + $0x150] sm:$0xff]  ;;  %v1791_v47 = vld [vmem:[%s2237_s1 + $0x108] sm:$0xff]  ;;  %v1825_v13 = vld [vmem:[%s2237_s1 + $0x218] sm:$0xff] }
  0x20   : > { %341 = vmatpush.bf16.msra.mxu0 %v1768_v28  ;;  %v1809_v28 = vld [vmem:[%s2237_s1 + $0x198] sm:$0xff]  ;;  %v1808_v42 = vld [vmem:[%s2237_s1 + $0x190] sm:$0xff]  ;;  %v1807_v54 = vld [vmem:[%s2237_s1 + $0x188] sm:$0xff] }
  0x21   : > { %410 = vmatpush.bf16.msra.mxu1 %v1760_v29  ;;  %v1817_v29 = vld [vmem:[%s2237_s1 + $0x1d8] sm:$0xff]  ;;  %v1816_v30 = vld [vmem:[%s2237_s1 + $0x1d0] sm:$0xff] }
  0x22   : > { %503 = vmatpush.bf16.msra.mxu2 %v1776_v32  ;;  %v2126_v32 = vpack.c.b16 %v1836_v19, %v844_v22  ;;  %v1828_v11 = vld [vmem:[%s2237_s1 + $0x230] sm:$0xff]  ;;  %v1822_v22 = vld [vmem:[%s2237_s1 + $0x200] sm:$0xff] }
  0x23   : > { %603 = vmatpush.bf16.msra.mxu3 %v1784_v33  ;;  %v2128_v33 = vpack.c.b16 %v944_v23, %v1837_v21 }
  0x24   : > { %342 = vmatpush.bf16.msra.mxu0 %v1767_v38  ;;  %v645_v38 = vshll.u32 %v2021_v46, 16 }
  0x25   : > { %411 = vmatpush.bf16.msra.mxu1 %v1759_v39  ;;  %v650_v39 = vshrl.u32 %v1962_v16, 16  ;;  %v956_v45 = vshrl.u32 %v2128_v33, 16  ;;  %v959_v46 = vshll.u32 %v2128_v33, 16  ;;  %v1823_v16 = vld [vmem:[%s2237_s1 + $0x208] sm:$0xff] }
  0x26   : > { %504 = vmatpush.bf16.msra.mxu2 %v1775_v43  ;;  %v948_v43 = vshrl.u32 %v2126_v32, 16  ;;  %v647_v50 = vrot.slane %v645_v38, 4 }
  0x27   : > { %604 = vmatpush.bf16.msra.mxu3 %v1783_v44  ;;  %v951_v44 = vshll.u32 %v2126_v32, 16  ;;  %v652_v51 = vrot.slane %v650_v39, 3 }
  0x28   : > { %343 = vmatpush.bf16.msra.mxu0 %v1766_v48  ;;  %v1799_v48 = vld [vmem:[%s2237_s1 + $0x148] sm:$0xff]  ;;  %v950_v56 = vrot.slane %v948_v43, 2 }
  0x29   : > { %412 = vmatpush.bf16.msra.mxu1 %v1758_v49  ;;  %v644_v49 = vrot.slane %v642_v37, 3 }
  0x2a   : > { %505 = vmatpush.bf16.msra.mxu2 %v1774_v52  ;;  %v655_v52 = vrot.slane %v653_v40, 4 }
  0x2b   : > { %605 = vmatpush.bf16.msra.mxu3 %v1782_v53  ;;  %344 = vmatmul.bf16.vlgmr.msra.gmra.mxu0 %v282_v60  ;;  %v849_v53 = vpack.c.b16 %v847_v41, %v1837_v21  ;;  %v1790_v60 = vld [vmem:[%s2237_s1 + $0x100] sm:$0xff] }
  0x2c   : > { %708 = vmatpush.bf16.msrb.mxu0 %v1797_v58  ;;  %413 = vmatmul.bf16.vlgmr.msra.gmra.mxu1 %v1981_v24  ;;  %v1793_v24 = vld [vmem:[%s2237_s1 + $0x118] sm:$0xff]  ;;  %v958_v58 = vrot.slane %v956_v45, 2 }
  0x2d   : > { %798 = vmatpush.bf16.msrb.mxu1 %v1805_v59  ;;  %506 = vmatmul.bf16.vlgmr.msra.gmra.mxu2 %v447_v61  ;;  %v961_v59 = vrot.slane %v959_v46, 3  ;;  %v1798_v61 = vld [vmem:[%s2237_s1 + $0x140] sm:$0xff] }
  0x2e   : > { %606 = vmatmul.bf16.vlgmr.msra.gmra.mxu3 %v547_v63  ;;  %904 = vmatpush.bf16.msrb.mxu2 %v1813_v62  ;;  %v1829_v62 = vld [vmem:[%s2237_s1 + $0x238] sm:$0xff]  ;;  %v648_v63 = vor.u32 %v647_v50, %v644_v49 }
  0x2f   : > { %1014 = vmatpush.bf16.msrb.mxu3 %v1821_v0  ;;  %v656_v0 = vor.u32 %v655_v52, %v652_v51 }
  0x30   : > { %709 = vmatpush.bf16.msrb.mxu0 %v1796_v1  ;;  %v1806_v1 = vld [vmem:[%s2237_s1 + $0x180] sm:$0xff] }
  0x31   : > { %799 = vmatpush.bf16.msrb.mxu1 %v1804_v2  ;;  %v1814_v2 = vld [vmem:[%s2237_s1 + $0x1c0] sm:$0xff] }
  0x32   : > { %905 = vmatpush.bf16.msrb.mxu2 %v1812_v3  ;;  %v851_v3 = vrot.slane %v2126_v32, 2 }
  0x33   : > { %1015 = vmatpush.bf16.msrb.mxu3 %v1820_v4  ;;  %v852_v4 = vrot.slane %v849_v53, 2 }
  0x34   : > { %710 = vmatpush.bf16.msrb.mxu0 %v1795_v5 }
  0x35   : > { %800 = vmatpush.bf16.msrb.mxu1 %v1803_v6  ;;  %v962_v6 = vor.u32 %v961_v59, %v958_v58 }
  0x36   : > { %906 = vmatpush.bf16.msrb.mxu2 %v1811_v7  ;;  %v746_v7 = vpack.c.b16 %v1972_v20, %v2003_v34  ;;  %v1827_v20 = vld [vmem:[%s2237_s1 + $0x228] sm:$0xff]  ;;  %v1826_v34 = vld [vmem:[%s2237_s1 + $0x220] sm:$0xff] }
  0x37   : > { %1016 = vmatpush.bf16.msrb.mxu3 %v1819_v8  ;;  %v657_v8 = vsel %vm640_vm3, %v648_v63, %v656_v0 }
  0x38   : > { %711 = vmatpush.bf16.msrb.mxu0 %v1794_v9  ;;  %v853_v9 = vsel %vm850_vm4, %v851_v3, %v852_v4 }
  0x39   : > { %801 = vmatpush.bf16.msrb.mxu1 %v1802_v10 }
  0x3a   : > { %907 = vmatpush.bf16.msrb.mxu2 %v1810_v17  ;;  %v1824_v17 = vld [vmem:[%s2237_s1 + $0x210] sm:$0xff] }
  0x3b   : > { %1017 = vmatpush.bf16.msrb.mxu3 %v1818_v18  ;;  %349 = vmatmul.bf16.gmra.mxu0 %v285_v26  ;;  %v1035_v18 = vld [vmem:[%s1947_s24 + $0x4] sm:$0x8] }
  0x3c   : > { %712 = vmatpush.bf16.msrb.mxu0 %v1793_v24  ;;  %418 = vmatmul.bf16.gmra.mxu1 %v354_v27  ;;  %v1054_v21 = vunpack.c.l.b16 %v1035_v18  ;;  %v1057_v24 = vrot.slane %v2128_v33, 3 }
  0x3d   : > { %802 = vmatpush.bf16.msrb.mxu1 %v1801_v25  ;;  %511 = vmatmul.bf16.gmra.mxu2 %v446_v55  ;;  %v1815_v55 = vld [vmem:[%s2237_s1 + $0x1c8] sm:$0xff] }
  0x3e   : > { %611 = vmatmul.bf16.gmra.mxu3 %v546_v57  ;;  %908 = vmatpush.bf16.msrb.mxu2 %v1809_v28  ;;  %v953_v57 = vrot.slane %v951_v44, 3  ;;  %v1055_v15 = vpack.c.b16 %v1836_v19, %v1054_v21 }
  0x3f   : > { %1018 = vmatpush.bf16.msrb.mxu3 %v1817_v29 }
  0x40   : > { %713 = vmatpush.bf16.msrb.mxu0 %v1792_v35  ;;  %v954_v5 = vor.u32 %v953_v57, %v950_v56  ;;  %v1056_v23 = vrot.slane %v1055_v15, 3  ;;  %v1857_v15 = vld [vmem:[%s2239_s3] ss:$0 sm:$0xff] }
  0x41   : > { %803 = vmatpush.bf16.msrb.mxu1 %v1800_v36 }
  0x42   : > { %909 = vmatpush.bf16.msrb.mxu2 %v1808_v42  ;;  %v963_v10 = vsel %vm946_vm5, %v954_v5, %v962_v6  ;;  %v1058_v25 = vsel %vm544_vm2, %v1056_v23, %v1057_v24 }
  0x43   : > { %1019 = vmatpush.bf16.msrb.mxu3 %v1816_v30 }
  0x44   : > { %714 = vmatpush.bf16.msrb.mxu0 %v1791_v47 }
  0x45   : > { %804 = vmatpush.bf16.msrb.mxu1 %v1799_v48 }
  0x46   : > { %910 = vmatpush.bf16.msrb.mxu2 %v1807_v54 }
  0x47   : > { %1020 = vmatpush.bf16.msrb.mxu3 %v1815_v55 }
  0x48   : > { %715 = vmatpush.bf16.msrb.mxu0 %v1790_v60 }
  0x49   : > { %805 = vmatpush.bf16.msrb.mxu1 %v1798_v61 }
  0x4a   : > { %911 = vmatpush.bf16.msrb.mxu2 %v1806_v1 }
  0x4b   : > { %1021 = vmatpush.bf16.msrb.mxu3 %v1814_v2  ;;  %716 = vmatmul.bf16.vlgmr.msrb.gmra.mxu0 %v657_v8 }
  0x4c   : > { %1109 = vmatpush.bf16.msra.mxu0 %v1829_v62  ;;  %806 = vmatmul.bf16.vlgmr.msrb.gmra.mxu1 %v746_v7 }
  0x4d   : > { %1839 = vmatpush.bf16.msra.mxu1 %v1829_v62  ;;  %912 = vmatmul.bf16.vlgmr.msrb.gmra.mxu2 %v853_v9  ;;  %v1856_v9 = vld [vmem:[%s2238_s2] ss:$0 sm:$0xff] }
  0x4e   : > { %1022 = vmatmul.bf16.vlgmr.msrb.gmra.mxu3 %v963_v10 }
  0x50   : > { %1110 = vmatpush.bf16.msra.mxu0 %v1828_v11 }
  0x51   : > { %1840 = vmatpush.bf16.msra.mxu1 %v1828_v11 }
  0x54   : > { %1111 = vmatpush.bf16.msra.mxu0 %v1827_v20 }
  0x55   : > { %1841 = vmatpush.bf16.msra.mxu1 %v1827_v20 }
  0x58   : > { %1112 = vmatpush.bf16.msra.mxu0 %v1826_v34 }
  0x59   : > { %1842 = vmatpush.bf16.msra.mxu1 %v1826_v34 }
  0x5b   : > { %721 = vmatmul.bf16.gmra.mxu0 %v656_v0 }
  0x5c   : > { %1113 = vmatpush.bf16.msra.mxu0 %v1825_v13  ;;  %811 = vmatmul.bf16.gmra.mxu1 %v747_v14 }
  0x5d   : > { %1843 = vmatpush.bf16.msra.mxu1 %v1825_v13  ;;  %917 = vmatmul.bf16.gmra.mxu2 %v852_v4 }
  0x5e   : > { %1027 = vmatmul.bf16.gmra.mxu3 %v962_v6 }
  0x60   : > { %1114 = vmatpush.bf16.msra.mxu0 %v1824_v17 }
  0x61   : > { %1844 = vmatpush.bf16.msra.mxu1 %v1824_v17 }
  0x64   : > { %1115 = vmatpush.bf16.msra.mxu0 %v1823_v16 }
  0x65   : > { %1845 = vmatpush.bf16.msra.mxu1 %v1823_v16 }
  0x68   : > { %1116 = vmatpush.bf16.msra.mxu0 %v1822_v22 }
  0x69   : > { %1846 = vmatpush.bf16.msra.mxu1 %v1822_v22 }
  0x6b   : > { %1117 = vmatmul.bf16.vlgmr.msra.gmra.mxu0 %v1058_v25 }
  0x6c   : > { %1122 = vmatmul.bf16.vlgmr.msra.gmra.mxu1 %v1057_v24  ;;  %v1858_v24 = vld [vmem:[%s2240_s4] ss:$0 sm:$0xff] }
  0xa8   : > { %v345_v26 = vpop.f32.mrf.mxu0 }
  0xa9   : > { %v414_v27 = vpop.f32.mrf.mxu1 }
  0xaa   : > { %v415_v47 = vadd.f32 %v414_v27, %v345_v26 }
  0xb0   : > { %v507_v28 = vpop.f32.mrf.mxu2  ;;  %v347_v19 = vpop.f32.mrf.mxu0 }
  0xb1   : > { %v607_v12 = vpop.f32.mrf.mxu3  ;;  %v416_v29 = vpop.f32.mrf.mxu1  ;;  %v516_v49 = vadd.f32 %v507_v28, %v415_v47 }
  0xb2   : > { %v417_v57 = vadd.f32 %v416_v29, %v347_v19 }
  0xb3   : > { %v616_v55 = vadd.f32 %v607_v12, %v516_v49 }
  0xb8   : > { %v509_v31 = vpop.f32.mrf.mxu2  ;;  %v350_v35 = vpop.f32.mrf.mxu0 }
  0xb9   : > { %v609_v32 = vpop.f32.mrf.mxu3  ;;  %v419_v36 = vpop.f32.mrf.mxu1  ;;  %v517_v60 = vadd.f32 %v509_v31, %v417_v57 }
  0xba   : > { %v420_v48 = vadd.f32 %v419_v36, %v350_v35 }
  0xbb   : > { %v617_v3 = vadd.f32 %v609_v32, %v517_v60 }
  0xc0   : > { %v512_v37 = vpop.f32.mrf.mxu2  ;;  %v352_v39 = vpop.f32.mrf.mxu0 }
  0xc1   : > { %v612_v38 = vpop.f32.mrf.mxu3  ;;  %v421_v33 = vpop.f32.mrf.mxu1  ;;  %v518_v50 = vadd.f32 %v512_v37, %v420_v48 }
  0xc3   : > { %v618_v56 = vadd.f32 %v612_v38, %v518_v50 }
  0xc8   : > { %v514_v40 = vpop.f32.mrf.mxu2  ;;  %v717_v42 = vpop.f32.mrf.mxu0 }
  0xc9   : > { %v614_v41 = vpop.f32.mrf.mxu3  ;;  %v807_v30 = vpop.f32.mrf.mxu1  ;;  %v726_v58 = vadd.f32 %v717_v42, %v616_v55 }
  0xcb   : > { %v816_v1 = vadd.f32 %v807_v30, %v726_v58 }
  0xd0   : > { %v913_v43 = vpop.f32.mrf.mxu2  ;;  %v719_v45 = vpop.f32.mrf.mxu0 }
  0xd1   : > { %v1023_v44 = vpop.f32.mrf.mxu3  ;;  %v809_v46 = vpop.f32.mrf.mxu1  ;;  %v922_v4 = vadd.f32 %v913_v43, %v816_v1  ;;  %v727_v6 = vadd.f32 %v719_v45, %v617_v3 }
  0xd3   : > { %v1032_v7 = vadd.f32 %v1023_v44, %v922_v4  ;;  %v817_v13 = vadd.f32 %v809_v46, %v727_v6 }
  0xd8   : > { %v915_v51 = vpop.f32.mrf.mxu2  ;;  %v722_v53 = vpop.f32.mrf.mxu0 }
  0xd9   : > { %v1025_v52 = vpop.f32.mrf.mxu3  ;;  %v812_v54 = vpop.f32.mrf.mxu1  ;;  %v728_v59 = vadd.f32 %v722_v53, %v618_v56  ;;  %v923_v18 = vadd.f32 %v915_v51, %v817_v13 }
  0xdb   : > { %v818_v2 = vadd.f32 %v812_v54, %v728_v59  ;;  %v1033_v25 = vadd.f32 %v1025_v52, %v923_v18 }
  0xe0   : > { %v918_v61 = vpop.f32.mrf.mxu2  ;;  %v724_v63 = vpop.f32.mrf.mxu0 }
  0xe1   : > { %v1028_v62 = vpop.f32.mrf.mxu3  ;;  %v814_v0 = vpop.f32.mrf.mxu1  ;;  %v924_v5 = vadd.f32 %v918_v61, %v818_v2 }
  0xe3   : > { %v1034_v8 = vadd.f32 %v1028_v62, %v924_v5 }
  0xe8   : > { %v920_v10 = vpop.f32.mrf.mxu2  ;;  %v1118_v20 = vpop.f32.mrf.mxu0 }
  0xe9   : > { %v1030_v11 = vpop.f32.mrf.mxu3  ;;  %v1123_v34 = vpop.f32.mrf.mxu1  ;;  %v1127_v14 = vadd.f32 %v1118_v20, %v1032_v7 }
  0xea   : > { %v1129_v17 = vadd.f32 %v1123_v34, %v1034_v8 }
  0xeb   : > { %v1134_v21 = vadd.f32 %v1856_v9, %v1127_v14 }
  0xec   : > { %v1136_v16 = vadd.f32 %v1856_v9, %v1129_v17 }
  0xed   : > { %vm1137_vm6 = vcmp.ge.f32.partialorder %v1134_v21, 0.0  ;;  %v1140_v22 = vmul.f32 0.1, %v1134_v21 }
  0xee   : > { %vm1139_vm7 = vcmp.ge.f32.partialorder %v1136_v16, 0.0  ;;  %v1142_v23 = vmul.f32 0.1, %v1136_v16 }
  0xef   : > { %v1143_v26 = vsel %vm1137_vm6, %v1134_v21, %v1140_v22 }
  0xf0   : > { %v1145_v27 = vsel %vm1139_vm7, %v1136_v16, %v1142_v23  ;;  %v1150_v28 = vmul.f32 %v1857_v15, %v1143_v26  ;;  %v1120_v19 = vpop.f32.mrf.mxu0 }
  0xf1   : > { %v1152_v12 = vmul.f32 %v1857_v15, %v1145_v27  ;;  %v1125_v29 = vpop.f32.mrf.mxu1  ;;  %v1128_v31 = vadd.f32 %v1120_v19, %v1033_v25 }
  0xf2   : > { %v1157_v32 = vadd.f32 %v1858_v24, %v1150_v28 }
  0xf3   : > { %v1159_v35 = vadd.f32 %v1858_v24, %v1152_v12  ;;  %v1135_v36 = vadd.f32 %v1856_v9, %v1128_v31 }
  0xf4   : > { %v1164_v37 = vrot.slane %v1157_v32, 6  ;;  %v1748_v38 = vrot.slane %v1157_v32, 9  ;;  %v1163_v39 = vrot.slane %v1157_v32, 2 }
  0xf5   : > { %vm1138_vm8 = vcmp.ge.f32.partialorder %v1135_v36, 0.0  ;;  %v1141_v33 = vmul.f32 0.1, %v1135_v36  ;;  %v1167_v41 = vrot.slane %v1159_v35, 2  ;;  %v1168_v42 = vrot.slane %v1159_v35, 4 }
  0xf6   : > { %v1750_v40 = vrot.slane %v1164_v37, 9  ;;  %v1199_v43 = vmax.f32 %v1157_v32, %v1748_v38  ;;  %v1749_v46 = vrot.slane %v1163_v39, 9 }
  0xf7   : > { %v1144_v30 = vsel %vm1138_vm8, %v1135_v36, %v1141_v33  ;;  %v1754_v49 = vrot.slane %v1167_v41, 9  ;;  %v1755_v50 = vrot.slane %v1168_v42, 9 }
  0xf8   : > { %v1201_v44 = vmax.f32 %v1164_v37, %v1750_v40  ;;  %v1151_v45 = vmul.f32 %v1857_v15, %v1144_v30  ;;  %v1200_v55 = vmax.f32 %v1163_v39, %v1749_v46 }
  0xf9   : > { %v1205_v60 = vmax.f32 %v1167_v41, %v1754_v49  ;;  %v1206_v61 = vmax.f32 %v1168_v42, %v1755_v50 }
  0xfa   : > { %v1207_v47 = vmax.f32 %v1199_v43, %v1201_v44  ;;  %v1158_v48 = vadd.f32 %v1858_v24, %v1151_v45 }
  0xfc   : > { %v1211_v51 = vpack.c.bf16 %v1207_v47, %v1207_v47  ;;  %v1165_v52 = vrot.slane %v1158_v48, 4  ;;  %v1166_v53 = vrot.slane %v1158_v48, 6  ;;  %v1751_v54 = vrot.slane %v1158_v48, 9 }
  0xfe   : > { %v1219_v56 = vrot.slane %v1211_v51, 3  ;;  %v1752_v57 = vrot.slane %v1165_v52, 9  ;;  %v1753_v58 = vrot.slane %v1166_v53, 9  ;;  %v1202_v59 = vmax.f32 %v1158_v48, %v1751_v54 }
 0x100   : > { %v1226_v62 = vsel %vm1223_vm9, %v1211_v51, %v1219_v56  ;;  %v1203_v63 = vmax.f32 %v1165_v52, %v1752_v57  ;;  %v1204_v0 = vmax.f32 %v1166_v53, %v1753_v58  ;;  %v1208_v1 = vmax.f32 %v1200_v55, %v1202_v59 }
 0x101   : > { %1236 = vst [vmem:[#allocation1] ss:$4 sm:$0xff] %v1226_v62 }
 0x102   : > { %v1209_v2 = vmax.f32 %v1203_v63, %v1205_v60  ;;  %v1210_v3 = vmax.f32 %v1204_v0, %v1206_v61  ;;  %v1212_v4 = vpack.c.bf16 %v1208_v1, %v1208_v1 }
 0x104   : > { %v1213_v5 = vpack.c.bf16 %v1209_v2, %v1209_v2  ;;  %v1220_v6 = vrot.slane %v1212_v4, 3  ;;  %v1214_v7 = vpack.c.bf16 %v1210_v3, %v1210_v3 }
 0x106   : > { %v1221_v8 = vrot.slane %v1213_v5, 3  ;;  %v1229_v9 = vsel %vm1223_vm9, %v1212_v4, %v1220_v6  ;;  %v1222_v20 = vrot.slane %v1214_v7, 3 }
 0x107   : > { %1240 = vst [vmem:[#allocation1 + $0x20] ss:$4 sm:$0xff] %v1229_v9 }
 0x108   : > { %v1232_v10 = vsel %vm1223_vm9, %v1213_v5, %v1221_v8  ;;  %v1237_v11 = vld [vmem:[#allocation1] sm:$0xf]  ;;  %v1235_v34 = vsel %vm1223_vm9, %v1214_v7, %v1222_v20 }
 0x109   : > { %1243 = vst [vmem:[#allocation1] ss:$4 sm:$0xff] %v1232_v10  ;;  %v1249_v17 = vunpack.c.l.b16 %v1237_v11 }
 0x10e   : > { %v1241_v13 = vld [vmem:[#allocation1 + $0x20] sm:$0xf] }
 0x10f   : > { %1246 = vst [vmem:[#allocation1 + $0x20] ss:$4 sm:$0xff] %v1235_v34  ;;  %v1250_v14 = vunpack.c.l.b16 %v1241_v13 }
 0x110   : > { %v1244_v15 = vld [vmem:[#allocation1] sm:$0xf] }
 0x111   : > { %v1253_v18 = vrot.slane %v1250_v14, 7  ;;  %v1251_v26 = vunpack.c.l.b16 %v1244_v15 }
 0x113   : > { %v1255_v21 = vsel %vm1254_vm10, %v1253_v18, %v1249_v17 }
 0x114   : > { %v1258_v16 = vpack.c.b16 %v1255_v21, %v1255_v21 }
 0x116   : > { %v1247_v22 = vld [vmem:[#allocation1 + $0x20] sm:$0xf]  ;;  %v1260_v23 = vrot.slane %v1258_v16, 3 }
 0x117   : > { %v1252_v24 = vunpack.c.l.b16 %v1247_v22 }
 0x118   : > { %v1264_v25 = vsel %vm1223_vm9, %v1258_v16, %v1260_v23 }
 0x119   : > { %v1256_v27 = vrot.slane %v1252_v24, 7  ;;  %1270 = vst [vmem:[%s222_s20] sm:$0x1] %v1264_v25 }
 0x11b   : > { %v1257_v28 = vsel %vm1254_vm10, %v1256_v27, %v1251_v26 }
 0x11c   : > { %v1259_v12 = vpack.c.b16 %v1257_v28, %v1257_v28 }
 0x11e   : > { %v1261_v19 = vrot.slane %v1259_v12, 3 }
 0x120   : > { %v1267_v29 = vsel %vm1223_vm9, %v1259_v12, %v1261_v19 }
 0x121   : > { %1271 = vst [vmem:[%s222_s20 + $0x1] sm:$0x1] %v1267_v29 }
 0x122 PF: > { %s15_s18 = sadd.s32 1, %s1865_s18  }
 0x123   : > { %p12_p4 = scmp.ge.s32.totalorder %s15_s18, 4  }
 0x125   :  { %14 = sbr.rel (!%p12_p4) target bundleno = 1 (0x1), region = 79 }

// kernel: domain_classifier_forward.7
= control target key start
LH: loop header
LB: loop body
LE: loop exit
PB: predicated region body
PF: predicated region fallthrough
CT: control target
= control target key end

     0   :  { %s1397_s20 = smov 0   ;;  %s1578_s0 = inlined_call_operand.vmem [shape: bf16[16,512], index: 0, kind: input, shape index: {}]   ;;  %s1579_s1 = inlined_call_operand.vmem [shape: bf16[512,128], index: 1, kind: input, shape index: {}]   ;;  %s1580_s2 = inlined_call_operand.vmem [shape: f32[1,128], index: 2, kind: input, shape index: {}]   ;;  %s1581_s3 = inlined_call_operand.vmem [shape: f32[1,128], index: 3, kind: input, shape index: {}]   ;;  %s1582_s4 = inlined_call_operand.vmem [shape: f32[1,128], index: 4, kind: input, shape index: {}]   ;;  %s1583_s5 = inlined_call_operand.vmem [shape: bf16[128,32], index: 5, kind: input, shape index: {}]   ;;  %s1584_s6 = inlined_call_operand.vmem [shape: f32[1,32], index: 6, kind: input, shape index: {}]   ;;  %s1585_s7 = inlined_call_operand.vmem [shape: f32[1,32], index: 7, kind: input, shape index: {}]   ;;  %s1586_s8 = inlined_call_operand.vmem [shape: f32[1,32], index: 8, kind: input, shape index: {}]   ;;  %s1587_s9 = inlined_call_operand.vmem [shape: bf16[32,8], index: 9, kind: input, shape index: {}]   ;;  %s1588_s10 = inlined_call_operand.vmem [shape: f32[1,8], index: 10, kind: input, shape index: {}]   ;;  %s1589_s11 = inlined_call_operand.vmem [shape: f32[1,8], index: 11, kind: input, shape index: {}]   ;;  %s1590_s12 = inlined_call_operand.vmem [shape: f32[1,8], index: 12, kind: input, shape index: {}]   ;;  %s1591_s13 = inlined_call_operand.vmem [shape: bf16[8,1], index: 13, kind: input, shape index: {}]   ;;  %s1592_s14 = inlined_call_operand.<no memory space> [shape: f32[1,1], index: 14, kind: input, shape index: {}]   ;;  %s1593_s15 = inlined_call_operand.vmem [shape: f32[16,1], index: 15, kind: output, shape index: {}]  }
   0x1   :  { %v20_v0 = vstv %s1592_s14 }
   0x2   :  { %21 = vst [vmem:[#allocation2] sm:$0x1] %v20_v0 }
   0x3 LB: > { %s1065_s21 = sadd.s32 4294967295, %s1312_s20   ;;  %p1069_p0 = scmp.ge.s32.totalorder %s1312_s20, 1  ;;  %s1312_s20 = sphi %s1397_s20, %s27_s20  }
   0x4   : > { %p439_p1 = scmp.lt.s32.totalorder %s1312_s20, 3 }
   0x6   : > { %p440_p2 = pnand %p1069_p0, %p439_p1 }
   0x7   : > { %p486_p3 = scmp.lt.s32.totalorder (!%p440_p2), %s1065_s21, 1 }
   0x8   : > { %443 = sbr.rel (%p440_p2) target bundleno = 606 (0x25e), region = 80 }
   0xd   : > { %v1253_v1 = vld [vmem:[%s1579_s1 + $0x38] sm:$0xff]  ;;  %v1252_v5 = vld [vmem:[%s1579_s1 + $0x30] sm:$0xff]  ;;  %v1251_v9 = vld [vmem:[%s1579_s1 + $0x28] sm:$0xff]  ;;  %s1595_s21 = smov (!%p486_p3, %s1065_s21), 1  ;;  %vm993_vm1 = vcmask 1043456   ;;  %vm953_vm3 = vcmask 261120  }
   0xe   : > { %v1261_v2 = vld [vmem:[%s1579_s1 + $0x78] sm:$0xff]  ;;  %772 = vmatpush.bf16.msra.mxu0 %v1253_v1  ;;  %v1260_v6 = vld [vmem:[%s1579_s1 + $0x70] sm:$0xff]  ;;  %v1259_v10 = vld [vmem:[%s1579_s1 + $0x68] sm:$0xff]  ;;  %s1245_s18 = sshll.u32 %s1595_s21, 4  ;;  %vm989_vm5 = vcmask 64512   ;;  %vm1010_vm6 = vcmask 7168  }
   0xf   : > { %v1269_v3 = vld [vmem:[%s1579_s1 + $0xb8] sm:$0xff]  ;;  %785 = vmatpush.bf16.msra.mxu1 %v1261_v2  ;;  %v1268_v7 = vld [vmem:[%s1579_s1 + $0xb0] sm:$0xff]  ;;  %v1267_v11 = vld [vmem:[%s1579_s1 + $0xa8] sm:$0xff]  ;;  %s490_s30 = scalar_lea.vmem %s1578_s0, %s1245_s18 }
  0x10   : > { %v1277_v4 = vld [vmem:[%s1579_s1 + $0xf8] sm:$0xff]  ;;  %798 = vmatpush.bf16.msra.mxu2 %v1269_v3  ;;  %v1276_v8 = vld [vmem:[%s1579_s1 + $0xf0] sm:$0xff]  ;;  %v1275_v12 = vld [vmem:[%s1579_s1 + $0xe8] sm:$0xff] }
  0x11   : > { %811 = vmatpush.bf16.msra.mxu3 %v1277_v4  ;;  %v1250_v13 = vld [vmem:[%s1579_s1 + $0x20] sm:$0xff]  ;;  %v1249_v17 = vld [vmem:[%s1579_s1 + $0x18] sm:$0xff]  ;;  %v1248_v21 = vld [vmem:[%s1579_s1 + $0x10] sm:$0xff] }
  0x12   : > { %773 = vmatpush.bf16.msra.mxu0 %v1252_v5  ;;  %v1258_v14 = vld [vmem:[%s1579_s1 + $0x60] sm:$0xff]  ;;  %v1257_v18 = vld [vmem:[%s1579_s1 + $0x58] sm:$0xff]  ;;  %v1256_v22 = vld [vmem:[%s1579_s1 + $0x50] sm:$0xff] }
  0x13   : > { %786 = vmatpush.bf16.msra.mxu1 %v1260_v6  ;;  %v1266_v15 = vld [vmem:[%s1579_s1 + $0xa0] sm:$0xff]  ;;  %v1265_v19 = vld [vmem:[%s1579_s1 + $0x98] sm:$0xff]  ;;  %v1264_v23 = vld [vmem:[%s1579_s1 + $0x90] sm:$0xff] }
  0x14   : > { %799 = vmatpush.bf16.msra.mxu2 %v1268_v7  ;;  %v1274_v16 = vld [vmem:[%s1579_s1 + $0xe0] sm:$0xff]  ;;  %v1273_v20 = vld [vmem:[%s1579_s1 + $0xd8] sm:$0xff]  ;;  %v1272_v24 = vld [vmem:[%s1579_s1 + $0xd0] sm:$0xff] }
  0x15   : > { %812 = vmatpush.bf16.msra.mxu3 %v1276_v8  ;;  %v1247_v25 = vld [vmem:[%s1579_s1 + $0x8] sm:$0xff]  ;;  %v496_v27 = vld [vmem:[%s490_s30] sm:$0xff]  ;;  %v1285_v39 = vld [vmem:[%s1583_s5 + $0x38] sm:$0xff] }
  0x16   : > { %774 = vmatpush.bf16.msra.mxu0 %v1251_v9  ;;  %v1255_v26 = vld [vmem:[%s1579_s1 + $0x48] sm:$0xff]  ;;  %v568_v31 = vunpack.c.l.b16 %v496_v27  ;;  %v569_v32 = vunpack.c.h.b16 %v496_v27  ;;  %v1246_v33 = vld [vmem:[%s1579_s1] sm:$0xff]  ;;  %v1284_v44 = vld [vmem:[%s1583_s5 + $0x30] sm:$0xff] }
  0x17   : > { %787 = vmatpush.bf16.msra.mxu1 %v1259_v10  ;;  %v1263_v28 = vld [vmem:[%s1579_s1 + $0x88] sm:$0xff]  ;;  %v1254_v34 = vld [vmem:[%s1579_s1 + $0x40] sm:$0xff]  ;;  %v1281_v47 = vld [vmem:[%s1583_s5 + $0x18] sm:$0xff] }
  0x18   : > { %800 = vmatpush.bf16.msra.mxu2 %v1267_v11  ;;  %v1271_v29 = vld [vmem:[%s1579_s1 + $0xc8] sm:$0xff]  ;;  %v1262_v37 = vld [vmem:[%s1579_s1 + $0x80] sm:$0xff]  ;;  %v572_v40 = vpack.c.b16 %v568_v31, %v568_v31  ;;  %v573_v41 = vpack.c.b16 %v569_v32, %v569_v32  ;;  %v1280_v48 = vld [vmem:[%s1583_s5 + $0x10] sm:$0xff] }
  0x19   : > { %813 = vmatpush.bf16.msra.mxu3 %v1275_v12  ;;  %v497_v30 = vld [vmem:[%s490_s30 + $0x8] sm:$0xff]  ;;  %v1270_v38 = vld [vmem:[%s1579_s1 + $0xc0] sm:$0xff]  ;;  %s1072_s30 = sshll.u32 %s1595_s21, 3 }
  0x1a   : > { %775 = vmatpush.bf16.msra.mxu0 %v1250_v13  ;;  %v570_v35 = vunpack.c.l.b16 %v497_v30  ;;  %v571_v36 = vunpack.c.h.b16 %v497_v30  ;;  %v1283_v45 = vld [vmem:[%s1583_s5 + $0x28] sm:$0xff]  ;;  %v1282_v46 = vld [vmem:[%s1583_s5 + $0x20] sm:$0xff]  ;;  %s494_s22 = scalar_lea.vmem %s1593_s15, %s1072_s30 }
  0x1b   : > { %788 = vmatpush.bf16.msra.mxu1 %v1258_v14  ;;  %v1279_v49 = vld [vmem:[%s1583_s5 + $0x8] sm:$0xff]  ;;  %v1278_v50 = vld [vmem:[%s1583_s5] sm:$0xff] }
  0x1c   : > { %801 = vmatpush.bf16.msra.mxu2 %v1266_v15  ;;  %v574_v42 = vpack.c.b16 %v570_v35, %v570_v35  ;;  %v575_v43 = vpack.c.b16 %v571_v36, %v571_v36  ;;  %v1287_v51 = vld [vmem:[%s1587_s9 + $0x8] sm:$0xff]  ;;  %v1296_v52 = vld [vmem:[%s1580_s2] ss:$0 sm:$0xff] }
  0x1d   : > { %814 = vmatpush.bf16.msra.mxu3 %v1274_v16  ;;  %v1297_v63 = vld [vmem:[%s1581_s3] ss:$0 sm:$0xff] }
  0x1e   : > { %776 = vmatpush.bf16.msra.mxu0 %v1249_v17  ;;  %v1298_v1 = vld [vmem:[%s1582_s4] ss:$0 sm:$0xff] }
  0x1f   : > { %789 = vmatpush.bf16.msra.mxu1 %v1257_v18  ;;  %v1286_v8 = vld [vmem:[%s1587_s9] sm:$0xff] }
  0x20   : > { %802 = vmatpush.bf16.msra.mxu2 %v1265_v19  ;;  %v984_v9 = vld [vmem:[%s1591_s13] sm:$0xf] }
  0x21   : > { %815 = vmatpush.bf16.msra.mxu3 %v1273_v20  ;;  %v995_v10 = vsel %vm993_vm1, %v984_v9, 0  ;;  %v1299_v11 = vld [vmem:[%s1584_s6] ss:$0 sm:$0xff] }
  0x22   : > { %777 = vmatpush.bf16.msra.mxu0 %v1248_v21  ;;  %v1300_v14 = vld [vmem:[%s1585_s7] ss:$0 sm:$0xff] }
  0x23   : > { %790 = vmatpush.bf16.msra.mxu1 %v1256_v22  ;;  %v1301_v16 = vld [vmem:[%s1586_s8] ss:$0 sm:$0xff] }
  0x24   : > { %803 = vmatpush.bf16.msra.mxu2 %v1264_v23  ;;  %v1302_v22 = vld [vmem:[%s1588_s10] ss:$0 sm:$0xff] }
  0x25   : > { %816 = vmatpush.bf16.msra.mxu3 %v1272_v24  ;;  %v1304_v27 = vld [vmem:[%s1590_s12] ss:$0 sm:$0xff] }
  0x26   : > { %778 = vmatpush.bf16.msra.mxu0 %v1247_v25  ;;  %v1303_v25 = vld [vmem:[%s1589_s11] ss:$0 sm:$0xff] }
  0x27   : > { %791 = vmatpush.bf16.msra.mxu1 %v1255_v26 }
  0x28   : > { %804 = vmatpush.bf16.msra.mxu2 %v1263_v28 }
  0x29   : > { %817 = vmatpush.bf16.msra.mxu3 %v1271_v29 }
  0x2a   : > { %779 = vmatpush.bf16.msra.mxu0 %v1246_v33  ;;  %v1305_v33 = vld [vmem:[#allocation2] ss:$0 sm:$0xff] }
  0x2b   : > { %792 = vmatpush.bf16.msra.mxu1 %v1254_v34 }
  0x2c   : > { %805 = vmatpush.bf16.msra.mxu2 %v1262_v37 }
  0x2d   : > { %818 = vmatpush.bf16.msra.mxu3 %v1270_v38  ;;  %780 = vmatmul.bf16.vlgmr.msra.gmra.mxu0 %v572_v40 }
  0x2e   : > { %906 = vmatpush.bf16.msrb.mxu0 %v1285_v39  ;;  %793 = vmatmul.bf16.vlgmr.msra.gmra.mxu1 %v573_v41 }
  0x2f   : > { %806 = vmatmul.bf16.vlgmr.msra.gmra.mxu2 %v574_v42  ;;  %963 = vmatpush.bf16.msrb.mxu1 %v1287_v51 }
  0x30   : > { %819 = vmatmul.bf16.vlgmr.msra.gmra.mxu3 %v575_v43  ;;  %1004 = vmatpush.bf16.msrb.mxu2 %v995_v10 }
  0x32   : > { %907 = vmatpush.bf16.msrb.mxu0 %v1284_v44 }
  0x33   : > { %964 = vmatpush.bf16.msrb.mxu1 %v1286_v8 }
  0x36   : > { %908 = vmatpush.bf16.msrb.mxu0 %v1283_v45 }
  0x3a   : > { %909 = vmatpush.bf16.msrb.mxu0 %v1282_v46 }
  0x3e   : > { %910 = vmatpush.bf16.msrb.mxu0 %v1281_v47 }
  0x42   : > { %911 = vmatpush.bf16.msrb.mxu0 %v1280_v48 }
  0x46   : > { %912 = vmatpush.bf16.msrb.mxu0 %v1279_v49 }
  0x4a   : > { %913 = vmatpush.bf16.msrb.mxu0 %v1278_v50 }
  0xaa   : > { %v781_v53 = vpop.f32.mrf.mxu0 }
  0xab   : > { %v794_v54 = vpop.f32.mrf.mxu1  ;;  %v782_v55 = vadd.f32 %v1296_v52, %v781_v53 }
  0xad   : > { %v795_v56 = vadd.f32 %v794_v54, %v782_v55 }
  0xb2   : > { %v807_v57 = vpop.f32.mrf.mxu2  ;;  %v783_v60 = vpop.f32.mrf.mxu0 }
  0xb3   : > { %v820_v58 = vpop.f32.mrf.mxu3  ;;  %v808_v59 = vadd.f32 %v807_v57, %v795_v56  ;;  %v796_v61 = vpop.f32.mrf.mxu1 }
  0xb5   : > { %v821_v62 = vadd.f32 %v820_v58, %v808_v59 }
  0xb7   : > { %vm824_vm0 = vcmp.ge.f32.partialorder %v821_v62, 0.0  ;;  %v825_v0 = vmul.f32 0.1, %v821_v62 }
  0xb9   : > { %v826_v2 = vsel %vm824_vm0, %v821_v62, %v825_v0 }
  0xba   : > { %v831_v3 = vmul.f32 %v1297_v63, %v826_v2  ;;  %v809_v4 = vpop.f32.mrf.mxu2 }
  0xbb   : > { %v822_v5 = vpop.f32.mrf.mxu3 }
  0xbc   : > { %v836_v6 = vadd.f32 %v1298_v1, %v831_v3 }
  0xbe   : > { %v837_v7 = vpack.c.bf16 %v836_v6, %v836_v6 }
  0xc0   : > { %914 = vmatmul.bf16.vlgmr.msrb.gmra.mxu0 %v837_v7 }
 0x13d   : > { %v915_v12 = vpop.f32.mrf.mxu0 }
 0x13e   : > { %v916_v13 = vadd.f32 %v1299_v11, %v915_v12 }
 0x140   : > { %vm919_vm2 = vcmp.ge.f32.partialorder %v916_v13, 0.0  ;;  %v920_v15 = vmul.f32 0.1, %v916_v13 }
 0x142   : > { %v921_v17 = vsel %vm919_vm2, %v916_v13, %v920_v15 }
 0x143   : > { %v926_v18 = vmul.f32 %v1300_v14, %v921_v17 }
 0x145   : > { %v917_v19 = vpop.f32.mrf.mxu0  ;;  %v931_v20 = vadd.f32 %v1301_v16, %v926_v18 }
 0x147   : > { %v932_v21 = vpack.c.bf16 %v931_v20, %v931_v20 }
 0x149   : > { %1241 = vmatmul.msk.bf16.vlgmr.msrb.gmra.mxu1 %vm953_vm3, %v932_v21 }
 0x1c6   : > { %v966_v23 = vpop.f32.mrf.mxu1 }
 0x1c7   : > { %v967_v24 = vadd.f32 %v1302_v22, %v966_v23 }
 0x1c9   : > { %vm970_vm4 = vcmp.ge.f32.partialorder %v967_v24, 0.0  ;;  %v971_v26 = vmul.f32 0.1, %v967_v24 }
 0x1cb   : > { %v972_v28 = vsel %vm970_vm4, %v967_v24, %v971_v26 }
 0x1cc   : > { %v977_v29 = vmul.f32 %v1303_v25, %v972_v28 }
 0x1ce   : > { %v968_v30 = vpop.f32.mrf.mxu1  ;;  %v982_v31 = vadd.f32 %v1304_v27, %v977_v29 }
 0x1d0   : > { %v983_v32 = vpack.c.bf16 %v982_v31, %v982_v31 }
 0x1d2   : > { %1242 = vmatmul.msk.bf16.vlgmr.msrb.gmra.mxu2 %vm989_vm5, %v983_v32 }
 0x255   : > { %v1006_v34 = vpop.f32.mrf.mxu2 }
 0x256   : > { %v1007_v35 = vadd.f32 %v1305_v33, %v1006_v34 }
 0x258   : > { %1011 = vst.msk [vmem:[%s494_s22] sm:$0xff] %vm1010_vm6, %v1007_v35 }
 0x25d   : > { %v1008_v36 = vpop.f32.mrf.mxu2 }
 0x25e PF: > { %s27_s20 = sadd.s32 1, %s1312_s20  }
 0x25f   : > { %p24_p4 = scmp.ge.s32.totalorder %s27_s20, 4  }
 0x261   :  { %26 = sbr.rel (!%p24_p4) target bundleno = 3 (0x3), region = 110 }

// kernel: domain_classifier_forward.5
= control target key start
LH: loop header
LB: loop body
LE: loop exit
PB: predicated region body
PF: predicated region fallthrough
CT: control target
= control target key end

     0   :  { %s2790_s18 = smov 0   ;;  %s3374_s0 = inlined_call_operand.vmem [shape: bf16[2,110,128], index: 0, kind: input, shape index: {}]   ;;  %s3375_s1 = inlined_call_operand.vmem [shape: bf16[9,128,128], index: 1, kind: input, shape index: {}]   ;;  %s3376_s2 = inlined_call_operand.vmem [shape: f32[1,128], index: 2, kind: input, shape index: {}]   ;;  %s3377_s3 = inlined_call_operand.vmem [shape: f32[1,128], index: 3, kind: input, shape index: {}]   ;;  %s3378_s4 = inlined_call_operand.vmem [shape: f32[1,128], index: 4, kind: input, shape index: {}]   ;;  %s3379_s5 = inlined_call_operand.vmem [shape: bf16[2,4,4,128], index: 5, kind: output, shape index: {}]  }
   0x1 LB: > { %s2126_s19 = sadd.s32 4294967295, %s2758_s18   ;;  %p2130_p0 = scmp.ge.s32.totalorder %s2758_s18, 1  ;;  %s2758_s18 = sphi %s2790_s18, %s15_s18  }
   0x2   : > { %p187_p1 = scmp.lt.s32.totalorder %s2758_s18, 3 }
   0x4   : > { %p188_p2 = pnand %p2130_p0, %p187_p1 }
   0x5   : > { %p215_p3 = scmp.lt.s32.totalorder (!%p188_p2), %s2126_s19, 1 }
   0x6   : > { %191 = sbr.rel (%p188_p2) target bundleno = 413 (0x19d), region = 40 }
   0xb   : > { %v2652_v0 = vld [vmem:[%s3375_s1 + $0x78] sm:$0xff]  ;;  %v2651_v1 = vld [vmem:[%s3375_s1 + $0x70] sm:$0xff]  ;;  %s3381_s19 = smov (!%p215_p3, %s2126_s19), 1  ;;  %v2650_v4 = vld [vmem:[%s3375_s1 + $0x68] sm:$0xff]  ;;  %vm297_vm0 = vsmask.f32 7424 }
   0xc   : > { %395 = vmatpush.bf16.msra.mxu0 %v2652_v0  ;;  %2724 = vmatpush.bf16.msra.mxu1 %v2652_v0  ;;  %v2672_v2 = vld [vmem:[%s3375_s1 + $0xf8] sm:$0xff]  ;;  %v2671_v3 = vld [vmem:[%s3375_s1 + $0xf0] sm:$0xff]  ;;  %s2740_s30 = smul.u32 56, %s3381_s19  ;;  %v2670_v5 = vld [vmem:[%s3375_s1 + $0xe8] sm:$0xff]  ;;  %vm537_vm1 = vcmask 1046528   ;;  %vm1003_vm4 = vcmask 1045504  }
   0xd   : > { %2725 = vmatpush.bf16.msra.mxu2 %v2652_v0  ;;  %766 = vmatpush.bf16.msra.mxu3 %v2672_v2  ;;  %v2649_v6 = vld [vmem:[%s3375_s1 + $0x60] sm:$0xff]  ;;  %v2648_v9 = vld [vmem:[%s3375_s1 + $0x58] sm:$0xff]  ;;  %v2647_v17 = vld [vmem:[%s3375_s1 + $0x50] sm:$0xff]  ;;  %vm831_vm2 = vsmask.f32 6400  ;;  %vm1469_vm5 = vcmask 1044480  }
   0xe   : > { %s2825_s12 = scalar_lea.vmem %s3374_s0, %s2740_s30  ;;  %v2669_v7 = vld [vmem:[%s3375_s1 + $0xe0] sm:$0xff]  ;;  %v2668_v14 = vld [vmem:[%s3375_s1 + $0xd8] sm:$0xff]  ;;  %v2667_v24 = vld [vmem:[%s3375_s1 + $0xd0] sm:$0xff]  ;;  %vm1297_vm3 = vsmask.f32 5376  ;;  %vm1900_vm9 = vcmask 1041408  }
   0xf   : > { %v251_v8 = vld [vmem:[%s2825_s12 + $0x28] sm:$0x1]  ;;  %v2835_v10 = vld [vmem:[%s2825_s12] sm:$0xff]   ;;  %v2838_v11 = vld [vmem:[%s2825_s12 + $0x10] sm:$0xff]  ;;  %vm2017_vm11 = vcmask 1041409   ;;  %vm2020_vm13 = vcmask 1042434  }
  0x10   : > { %396 = vmatpush.bf16.msra.mxu0 %v2651_v1  ;;  %2726 = vmatpush.bf16.msra.mxu1 %v2651_v1  ;;  %v2841_v12 = vld [vmem:[%s2825_s12 + $0x20] sm:$0xff]  ;;  %v290_v13 = vunpack.c.l.b16 %v251_v8  ;;  %v2847_v15 = vld [vmem:[%s2825_s12 + $0x8] sm:$0xff]  ;;  %v301_v16 = vshll.u32 %v2835_v10, 16  ;;  %v2854_v18 = vld [vmem:[%s2825_s12 + $0x18] sm:$0xff]  ;;  %v314_v19 = vshll.u32 %v2838_v11, 16  ;;  %v299_v25 = vshrl.u32 %v2835_v10, 16 }
  0x11   : > { %2727 = vmatpush.bf16.msra.mxu2 %v2651_v1  ;;  %767 = vmatpush.bf16.msra.mxu3 %v2671_v3  ;;  %v330_v21 = vshll.u32 %v2841_v12, 16  ;;  %v646_v22 = vld [vmem:[%s2825_s12 + $0x4] sm:$0xe]  ;;  %v2862_v23 = vld [vmem:[%s2825_s12 + $0x8] sm:$0xff]   ;;  %v306_v27 = vshll.u32 %v2847_v15, 16  ;;  %v318_v28 = vshrl.u32 %v2838_v11, 16 }
  0x12   : > { %v2857_v20 = vpack.c.b16 %v290_v13, %v290_v13  ;;  %v303_v26 = vrot.slane %v301_v16, 1  ;;  %v2646_v29 = vld [vmem:[%s3375_s1 + $0x48] sm:$0xff]  ;;  %v2873_v30 = vrot.slane %v314_v19, 1  ;;  %v322_v31 = vshll.u32 %v2854_v18, 16  ;;  %v2645_v39 = vld [vmem:[%s3375_s1 + $0x40] sm:$0xff]  ;;  %v2644_v45 = vld [vmem:[%s3375_s1 + $0x38] sm:$0xff] }
  0x13   : > { %v685_v32 = vunpack.c.l.b16 %v646_v22  ;;  %v686_v33 = vunpack.c.l.b16 %v2862_v23  ;;  %v2877_v34 = vrot.slane %v330_v21, 1  ;;  %v334_v35 = vshrl.u32 %v2841_v12, 16  ;;  %v2666_v37 = vld [vmem:[%s3375_s1 + $0xc8] sm:$0xff]  ;;  %v2660_v48 = vld [vmem:[%s3375_s1 + $0xb8] sm:$0xff]  ;;  %v2665_v52 = vld [vmem:[%s3375_s1 + $0xc0] sm:$0xff]  ;;  %s2632_s16 = sshll.u32 %s3381_s19, 3 }
  0x14   : > { %397 = vmatpush.bf16.msra.mxu0 %v2650_v4  ;;  %2728 = vmatpush.bf16.msra.mxu1 %v2650_v4  ;;  %v338_v36 = vshll.u32 %v2857_v20, 16  ;;  %v308_v38 = vrot.slane %v306_v27, 1  ;;  %v304_v40 = vor.u32 %v303_v26, %v299_v25  ;;  %v320_v41 = vor.u32 %v318_v28, %v2873_v30  ;;  %v2889_v43 = vld [vmem:[%s2825_s12 + $0xc] sm:$0xff]  ;;  %v2680_v49 = vld [vmem:[%s3375_s1 + $0x138] sm:$0xff]  ;;  %v2641_v3 = vld [vmem:[%s3375_s1 + $0x20] sm:$0xff]  ;;  %s3319_s21 = scalar_lea.vmem %s3379_s5, %s2632_s16 }
  0x15   : > { %2729 = vmatpush.bf16.msra.mxu2 %v2650_v4  ;;  %768 = vmatpush.bf16.msra.mxu3 %v2670_v5  ;;  %v324_v42 = vrot.slane %v322_v31, 1  ;;  %v2893_v44 = vpack.c.b16 %v686_v33, %v685_v32  ;;  %v336_v46 = vor.u32 %v334_v35, %v2877_v34  ;;  %v703_v54 = vrot.slane %v2889_v43, 1  ;;  %v2643_v56 = vld [vmem:[%s3375_s1 + $0x30] sm:$0xff]  ;;  %v2708_v57 = vld [vmem:[%s3375_s1 + $0x1f8] sm:$0xff]  ;;  %v2642_v61 = vld [vmem:[%s3375_s1 + $0x28] sm:$0xff] }
  0x16   : > { %v340_v47 = vrot.slane %v338_v36, 1  ;;  %v309_v50 = vsel %vm297_vm0, %v304_v40, %v308_v38  ;;  %v2659_v58 = vld [vmem:[%s3375_s1 + $0xb0] sm:$0xff]  ;;  %v2658_v63 = vld [vmem:[%s3375_s1 + $0xa8] sm:$0xff]  ;;  %v310_v1 = vshrl.u32 %v2847_v15, 16  ;;  %v326_v2 = vshrl.u32 %v2854_v18, 16  ;;  %v2657_v4 = vld [vmem:[%s3375_s1 + $0xa0] sm:$0xff] }
  0x17   : > { %v325_v51 = vsel %vm297_vm0, %v320_v41, %v324_v42  ;;  %v702_v53 = vrot.slane %v2893_v44, 1  ;;  %v2679_v59 = vld [vmem:[%s3375_s1 + $0x130] sm:$0xff]  ;;  %v2678_v0 = vld [vmem:[%s3375_s1 + $0x128] sm:$0xff]  ;;  %v2677_v5 = vld [vmem:[%s3375_s1 + $0x120] sm:$0xff]  ;;  %v833_v27 = vshrl.u32 %v2893_v44, 16  ;;  %v844_v31 = vshll.u32 %v2889_v43, 16 }
  0x18   : > { %398 = vmatpush.bf16.msra.mxu0 %v2649_v6  ;;  %2730 = vmatpush.bf16.msra.mxu1 %v2649_v6  ;;  %v341_v55 = vsel %vm297_vm0, %v336_v46, %v340_v47  ;;  %v2707_v62 = vld [vmem:[%s3375_s1 + $0x1f0] sm:$0xff]  ;;  %v2656_v13 = vld [vmem:[%s3375_s1 + $0x98] sm:$0xff]  ;;  %v2721_v25 = vld [vmem:[%s2825_s12] sm:$0xf0]  ;;  %v539_v46 = vrot.slane %v2847_v15, 1  ;;  %vm2023_vm14 = vcmask 1043459  }
  0x19   : > { %2731 = vmatpush.bf16.msra.mxu2 %v2649_v6  ;;  %769 = vmatpush.bf16.msra.mxu3 %v2669_v7  ;;  %v704_v60 = vsel %vm537_vm1, %v702_v53, %v703_v54  ;;  %v312_v6 = vor.u32 %v310_v1, %v308_v38  ;;  %v328_v7 = vor.u32 %v326_v2, %v324_v42  ;;  %v2950_v8 = vld [vmem:[%s2825_s12 + $0x14] sm:$0xff]  ;;  %v2722_v26 = vld [vmem:[%s2825_s12] sm:$0xe]  ;;  %v2706_v28 = vld [vmem:[%s3375_s1 + $0x1e8] sm:$0xff]  ;;  %v835_v38 = vrot.slane %v833_v27, 1 }
  0x1a   : > { %v705_v19 = vrot.slane %v2950_v8, 1  ;;  %v2639_v21 = vld [vmem:[%s3375_s1 + $0x10] sm:$0xff]  ;;  %v2654_v35 = vld [vmem:[%s3375_s1 + $0x88] sm:$0xff]  ;;  %v846_v41 = vrot.slane %v844_v31, 2  ;;  %v2637_v42 = vld [vmem:[%s3375_s1] sm:$0xff] }
  0x1b   : > { %v317_v16 = vsel %vm297_vm0, %v312_v6, %v2873_v30  ;;  %v2655_v22 = vld [vmem:[%s3375_s1 + $0x90] sm:$0xff]  ;;  %v841_v30 = vshrl.u32 %v2889_v43, 16  ;;  %v2674_v36 = vld [vmem:[%s3375_s1 + $0x108] sm:$0xff]  ;;  %v2673_v47 = vld [vmem:[%s3375_s1 + $0x100] sm:$0xff] }
  0x1c   : > { %399 = vmatpush.bf16.msra.mxu0 %v2648_v9  ;;  %2732 = vmatpush.bf16.msra.mxu1 %v2648_v9  ;;  %v706_v32 = vsel %vm537_vm1, %v703_v54, %v705_v19  ;;  %v3016_v53 = vld [vmem:[%s2825_s12 + $0x1c] sm:$0xff]  ;;  %v2683_v27 = vld [vmem:[%s3375_s1 + $0x150] sm:$0xff] }
  0x1d   : > { %2733 = vmatpush.bf16.msra.mxu2 %v2648_v9  ;;  %770 = vmatpush.bf16.msra.mxu3 %v2668_v14  ;;  %v2640_v9 = vld [vmem:[%s3375_s1 + $0x18] sm:$0xff]  ;;  %v843_v40 = vrot.slane %v841_v30, 1  ;;  %v2685_v6 = vld [vmem:[%s3375_s1 + $0x160] sm:$0xff]  ;;  %v2711_v31 = vld [vmem:[%s3375_s1 + $0x210] sm:$0xff] }
  0x1e   : > { %v2676_v14 = vld [vmem:[%s3375_s1 + $0x118] sm:$0xff] }
  0x1f   : > { %v2704_v2 = vld [vmem:[%s3375_s1 + $0x1d8] sm:$0xff] }
  0x20   : > { %400 = vmatpush.bf16.msra.mxu0 %v2647_v17  ;;  %2734 = vmatpush.bf16.msra.mxu1 %v2647_v17 }
  0x21   : > { %2735 = vmatpush.bf16.msra.mxu2 %v2647_v17  ;;  %771 = vmatpush.bf16.msra.mxu3 %v2667_v24  ;;  %v333_v17 = vsel %vm297_vm0, %v328_v7, %v2877_v34  ;;  %v2675_v24 = vld [vmem:[%s3375_s1 + $0x110] sm:$0xff]  ;;  %v2638_v34 = vld [vmem:[%s3375_s1 + $0x8] sm:$0xff]  ;;  %v2713_v7 = vld [vmem:[%s3375_s1 + $0x220] sm:$0xff] }
  0x24   : > { %401 = vmatpush.bf16.msra.mxu0 %v2646_v29  ;;  %2736 = vmatpush.bf16.msra.mxu1 %v2646_v29 }
  0x25   : > { %2737 = vmatpush.bf16.msra.mxu2 %v2646_v29  ;;  %772 = vmatpush.bf16.msra.mxu3 %v2666_v37  ;;  %v836_v29 = vshll.u32 %v2893_v44, 16  ;;  %v2723_v37 = vor.u32 %v2722_v26, %v2721_v25  ;;  %v2653_v44 = vld [vmem:[%s3375_s1 + $0x80] sm:$0xff]  ;;  %v2712_v25 = vld [vmem:[%s3375_s1 + $0x218] sm:$0xff]  ;;  %v2703_v26 = vld [vmem:[%s3375_s1 + $0x1d0] sm:$0xff] }
  0x28   : > { %402 = vmatpush.bf16.msra.mxu0 %v2645_v39  ;;  %2738 = vmatpush.bf16.msra.mxu1 %v2645_v39 }
  0x29   : > { %2739 = vmatpush.bf16.msra.mxu2 %v2645_v39  ;;  %773 = vmatpush.bf16.msra.mxu3 %v2665_v52  ;;  %v838_v39 = vrot.slane %v836_v29, 2  ;;  %v2716_v52 = vld [vmem:[%s3375_s1 + $0x238] sm:$0xff]  ;;  %v862_v29 = vshll.u32 %v3016_v53, 16 }
  0x2b   : > { %403 = vmatmul.bf16.vlgmr.msra.gmra.mxu0 %v309_v50  ;;  %413 = vmatmul.bf16.vlgmr.msra.gmra.mxu1 %v325_v51  ;;  %v839_v50 = vor.u32 %v838_v39, %v835_v38  ;;  %v847_v51 = vor.u32 %v846_v41, %v843_v40  ;;  %v543_v38 = vrot.slane %v2854_v18, 1 }
  0x2c   : > { %482 = vmatpush.bf16.msrb.mxu1 %v2644_v45  ;;  %938 = vmatpush.bf16.msrb.mxu0 %v2680_v49  ;;  %v538_v45 = vrot.slane %v2723_v37, 1  ;;  %v2688_v49 = vld [vmem:[%s3375_s1 + $0x178] sm:$0xff] }
  0x2d   : > { %602 = vmatpush.bf16.msrb.mxu2 %v2660_v48  ;;  %1404 = vmatpush.bf16.msrb.mxu3 %v2708_v57  ;;  %v2700_v48 = vld [vmem:[%s3375_s1 + $0x1b8] sm:$0xff]  ;;  %v2687_v57 = vld [vmem:[%s3375_s1 + $0x170] sm:$0xff] }
  0x2e   : > { %423 = vmatmul.bf16.vlgmr.msra.gmra.mxu2 %v341_v55  ;;  %774 = vmatmul.bf16.vlgmr.msra.gmra.mxu3 %v704_v60  ;;  %v540_v54 = vsel %vm537_vm1, %v538_v45, %v539_v46  ;;  %v848_v55 = vsel %vm831_vm2, %v839_v50, %v847_v51  ;;  %v2705_v60 = vld [vmem:[%s3375_s1 + $0x1e0] sm:$0xff] }
  0x30   : > { %483 = vmatpush.bf16.msrb.mxu1 %v2643_v56  ;;  %939 = vmatpush.bf16.msrb.mxu0 %v2679_v59  ;;  %v2699_v56 = vld [vmem:[%s3375_s1 + $0x1b0] sm:$0xff] }
  0x31   : > { %603 = vmatpush.bf16.msrb.mxu2 %v2659_v58  ;;  %1405 = vmatpush.bf16.msrb.mxu3 %v2707_v62  ;;  %v707_v58 = vrot.slane %v3016_v53, 1  ;;  %v2715_v59 = vld [vmem:[%s3375_s1 + $0x230] sm:$0xff]  ;;  %v853_v62 = vshll.u32 %v2950_v8, 16 }
  0x33   : > { %v708_v1 = vsel %vm537_vm1, %v705_v19, %v707_v58 }
  0x34   : > { %484 = vmatpush.bf16.msrb.mxu1 %v2642_v61  ;;  %940 = vmatpush.bf16.msrb.mxu0 %v2678_v0  ;;  %v850_v61 = vshrl.u32 %v2950_v8, 16  ;;  %v2686_v0 = vld [vmem:[%s3375_s1 + $0x168] sm:$0xff] }
  0x35   : > { %604 = vmatpush.bf16.msrb.mxu2 %v2658_v63  ;;  %1406 = vmatpush.bf16.msrb.mxu3 %v2706_v28  ;;  %v2698_v63 = vld [vmem:[%s3375_s1 + $0x1a8] sm:$0xff]  ;;  %v859_v28 = vshrl.u32 %v3016_v53, 16 }
  0x38   : > { %485 = vmatpush.bf16.msrb.mxu1 %v2641_v3  ;;  %941 = vmatpush.bf16.msrb.mxu0 %v2677_v5  ;;  %v852_v3 = vrot.slane %v850_v61, 1  ;;  %v2697_v5 = vld [vmem:[%s3375_s1 + $0x1a0] sm:$0xff] }
  0x39   : > { %605 = vmatpush.bf16.msrb.mxu2 %v2657_v4  ;;  %1407 = vmatpush.bf16.msrb.mxu3 %v2705_v60  ;;  %v855_v4 = vrot.slane %v853_v62, 2  ;;  %v810_v60 = vld [vmem:[%s2825_s12 + $0x2c] sm:$0x3] }
  0x3b   : > { %408 = vmatmul.bf16.gmra.mxu0 %v317_v16  ;;  %418 = vmatmul.bf16.gmra.mxu1 %v333_v17  ;;  %v3065_v16 = vld [vmem:[%s2825_s12 + $0x24] sm:$0xff]  ;;  %v2684_v17 = vld [vmem:[%s3375_s1 + $0x158] sm:$0xff] }
  0x3c   : > { %486 = vmatpush.bf16.msrb.mxu1 %v2640_v9  ;;  %942 = vmatpush.bf16.msrb.mxu0 %v2676_v14  ;;  %v541_v9 = vrot.slane %v2838_v11, 1  ;;  %v2696_v14 = vld [vmem:[%s3375_s1 + $0x198] sm:$0xff]  ;;  %v871_v50 = vshll.u32 %v3065_v16, 16 }
  0x3d   : > { %606 = vmatpush.bf16.msrb.mxu2 %v2656_v13  ;;  %1408 = vmatpush.bf16.msrb.mxu3 %v2704_v2  ;;  %v856_v13 = vor.u32 %v855_v4, %v852_v3  ;;  %v829_v2 = vunpack.c.l.b16 %v810_v60 }
  0x3e   : > { %779 = vmatmul.bf16.gmra.mxu3 %v706_v32  ;;  %v542_v19 = vsel %vm537_vm1, %v539_v46, %v541_v9  ;;  %v656_v32 = vld [vmem:[%s2825_s12 + $0x2c] sm:$0x1]  ;;  %v544_v41 = vsel %vm537_vm1, %v541_v9, %v543_v38  ;;  %v2709_v9 = vld [vmem:[%s3375_s1 + $0x200] sm:$0xff] }
  0x3f   : > { %v695_v37 = vunpack.c.l.b16 %v656_v32 }
  0x40   : > { %487 = vmatpush.bf16.msrb.mxu1 %v2639_v21  ;;  %943 = vmatpush.bf16.msrb.mxu0 %v2675_v24  ;;  %v857_v21 = vsel %vm831_vm2, %v847_v51, %v856_v13  ;;  %v2695_v24 = vld [vmem:[%s3375_s1 + $0x190] sm:$0xff]  ;;  %v2693_v51 = vld [vmem:[%s3375_s1 + $0x180] sm:$0xff] }
  0x41   : > { %607 = vmatpush.bf16.msrb.mxu2 %v2655_v22  ;;  %v709_v22 = vrot.slane %v3065_v16, 1  ;;  %1409 = vmatpush.bf16.msrb.mxu3 %v2703_v26  ;;  %v701_v40 = vpack.c.b16 %v695_v37, %v695_v37  ;;  %v1448_v37 = vld [vmem:[%s2825_s12 + $0x8] sm:$0x8] }
  0x43   : > { %v710_v30 = vsel %vm537_vm1, %v707_v58, %v709_v22  ;;  %v711_v45 = vrot.slane %v701_v40, 1 }
  0x44   : > { %488 = vmatpush.bf16.msrb.mxu1 %v2638_v34  ;;  %944 = vmatpush.bf16.msrb.mxu0 %v2674_v36  ;;  %v2702_v34 = vld [vmem:[%s3375_s1 + $0x1c8] sm:$0xff]  ;;  %v864_v36 = vrot.slane %v862_v29, 2 }
  0x45   : > { %608 = vmatpush.bf16.msrb.mxu2 %v2654_v35  ;;  %v861_v35 = vrot.slane %v859_v28, 1  ;;  %1410 = vmatpush.bf16.msrb.mxu3 %v2702_v34 }
  0x47   : > { %v865_v39 = vor.u32 %v864_v36, %v861_v35  ;;  %v982_v35 = vld [vmem:[%s2825_s12 + $0x4] sm:$0xc] }
  0x48   : > { %489 = vmatpush.bf16.msrb.mxu1 %v2637_v42  ;;  %945 = vmatpush.bf16.msrb.mxu0 %v2673_v47  ;;  %v1112_v42 = vld [vmem:[%s2825_s12 + $0x8] sm:$0xc]  ;;  %v1152_v47 = vunpack.c.h.b16 %v2862_v23 }
  0x49   : > { %609 = vmatpush.bf16.msrb.mxu2 %v2653_v44  ;;  %v866_v44 = vsel %vm831_vm2, %v856_v13, %v865_v39  ;;  %v1151_v46 = vunpack.c.l.b16 %v1112_v42 }
  0x4b   : > { %490 = vmatmul.bf16.vlgmr.msrb.gmra.mxu1 %v2835_v10  ;;  %946 = vmatmul.bf16.vlgmr.msrb.gmra.mxu0 %v848_v55  ;;  %v2714_v10 = vld [vmem:[%s3375_s1 + $0x228] sm:$0xff]  ;;  %v2681_v55 = vld [vmem:[%s3375_s1 + $0x140] sm:$0xff] }
  0x4c   : > { %1068 = vmatpush.bf16.msra.mxu1 %v2688_v49  ;;  %1534 = vmatpush.bf16.msra.mxu0 %v2716_v52  ;;  %v868_v49 = vshrl.u32 %v3065_v16, 16  ;;  %v2710_v52 = vld [vmem:[%s3375_s1 + $0x208] sm:$0xff] }
  0x4d   : > { %1232 = vmatpush.bf16.msra.mxu2 %v2700_v48  ;;  %v2682_v48 = vld [vmem:[%s3375_s1 + $0x148] sm:$0xff] }
  0x4e   : > { %610 = vmatmul.bf16.vlgmr.msrb.gmra.mxu2 %v540_v54  ;;  %784 = vmatmul.bf16.gmra.mxu3 %v708_v1  ;;  %v2701_v54 = vld [vmem:[%s3375_s1 + $0x1c0] sm:$0xff]  ;;  %v870_v58 = vrot.slane %v868_v49, 1  ;;  %v545_v1 = vrot.slane %v2841_v12, 1  ;;  %v1005_v49 = vrot.slane %v2889_v43, 2  ;;  %v3177_v43 = vld [vmem:[%s2825_s12 + $0x28] sm:$0xff] }
  0x4f   : > { %1411 = vmatpush.bf16.msrb.mxu3 %v2701_v54 }
  0x50   : > { %1069 = vmatpush.bf16.msra.mxu1 %v2687_v57  ;;  %1535 = vmatpush.bf16.msra.mxu0 %v2715_v59  ;;  %v3128_v57 = vpack.c.b16 %v1152_v47, %v1151_v46  ;;  %v873_v59 = vrot.slane %v871_v50, 2 }
  0x51   : > { %1233 = vmatpush.bf16.msra.mxu2 %v2699_v56  ;;  %v3124_v56 = vld [vmem:[%s2825_s12 + $0x10] sm:$0xff] }
  0x52   : > { %v1299_v61 = vshrl.u32 %v3128_v57, 16  ;;  %v1302_v62 = vshll.u32 %v3128_v57, 16  ;;  %v1169_v46 = vrot.slane %v3124_v56, 2 }
  0x54   : > { %1070 = vmatpush.bf16.msra.mxu1 %v2686_v0  ;;  %1536 = vmatpush.bf16.msra.mxu0 %v2714_v10  ;;  %v1310_v0 = vshll.u32 %v3124_v56, 16  ;;  %v874_v10 = vor.u32 %v873_v59, %v870_v58  ;;  %v1301_v3 = vrot.slane %v1299_v61, 2  ;;  %v1304_v4 = vrot.slane %v1302_v62, 3 }
  0x55   : > { %1234 = vmatpush.bf16.msra.mxu2 %v2698_v63  ;;  %v1307_v63 = vshrl.u32 %v3124_v56, 16  ;;  %v1007_v59 = vrot.slane %v2950_v8, 2 }
  0x56   : > { %v875_v13 = vsel %vm831_vm2, %v865_v39, %v874_v10  ;;  %v1467_v39 = vunpack.c.l.b16 %v1448_v37 }
  0x58   : > { %1071 = vmatpush.bf16.msra.mxu1 %v2685_v6  ;;  %1537 = vmatpush.bf16.msra.mxu0 %v2713_v7  ;;  %v1312_v6 = vrot.slane %v1310_v0, 3  ;;  %v546_v7 = vsel %vm537_vm1, %v543_v38, %v545_v1  ;;  %v1001_v38 = vunpack.c.l.b16 %v982_v35  ;;  %v1468_v42 = vpack.c.b16 %v1152_v47, %v1467_v39  ;;  %v1276_v0 = vld [vmem:[%s2825_s12 + $0x30] sm:$0x7] }
  0x59   : > { %1235 = vmatpush.bf16.msra.mxu2 %v2697_v5  ;;  %v1309_v5 = vrot.slane %v1307_v63, 2  ;;  %v1011_v39 = vrot.slane %v3065_v16, 2 }
  0x5a   : > { %v1470_v50 = vrot.slane %v1468_v42, 3 }
  0x5b   : > { %495 = vmatmul.bf16.gmra.mxu1 %v2847_v15  ;;  %951 = vmatmul.bf16.gmra.mxu0 %v857_v21  ;;  %v2694_v15 = vld [vmem:[%s3375_s1 + $0x188] sm:$0xff] }
  0x5c   : > { %1072 = vmatpush.bf16.msra.mxu1 %v2684_v17  ;;  %1538 = vmatpush.bf16.msra.mxu0 %v2712_v25  ;;  %v1305_v17 = vor.u32 %v1304_v4, %v1301_v3  ;;  %v3148_v25 = vld [vmem:[%s2825_s12 + $0x18] sm:$0xff] }
  0x5d   : > { %1236 = vmatpush.bf16.msra.mxu2 %v2696_v14  ;;  %v3141_v14 = vpack.c.b16 %v829_v2, %v829_v2  ;;  %v1316_v28 = vshrl.u32 %v3148_v25, 16  ;;  %v1319_v29 = vshll.u32 %v3148_v25, 16  ;;  %v1171_v58 = vrot.slane %v3148_v25, 2 }
  0x5e   : > { %615 = vmatmul.bf16.gmra.mxu2 %v542_v19  ;;  %789 = vmatmul.bf16.gmra.mxu3 %v710_v30  ;;  %v1313_v19 = vor.u32 %v1312_v6, %v1309_v5  ;;  %v1473_v60 = vrot.slane %v3148_v25, 3  ;;  %v1008_v2 = vsel %vm1003_vm4, %v1005_v49, %v1007_v59  ;;  %v1295_v5 = vunpack.c.l.b16 %v1276_v0 }
  0x5f   : > { %v877_v21 = vshrl.u32 %v3141_v14, 16  ;;  %v1172_v63 = vsel %vm1003_vm4, %v1169_v46, %v1171_v58 }
  0x60   : > { %1073 = vmatpush.bf16.msra.mxu1 %v2683_v27  ;;  %1539 = vmatpush.bf16.msra.mxu0 %v2711_v31  ;;  %v1321_v31 = vrot.slane %v1319_v29, 3  ;;  %v3191_v6 = vpack.c.b16 %v1295_v5, %v1295_v5 }
  0x61   : > { %1237 = vmatpush.bf16.msra.mxu2 %v2695_v24  ;;  %v1314_v24 = vsel %vm1297_vm3, %v1305_v17, %v1313_v19  ;;  %v879_v26 = vrot.slane %v877_v21, 1 }
  0x62   : > { %v1346_v17 = vshll.u32 %v3191_v6, 16 }
  0x64   : > { %1074 = vmatpush.bf16.msra.mxu1 %v2682_v48  ;;  %1540 = vmatpush.bf16.msra.mxu0 %v2710_v52 }
  0x65   : > { %1238 = vmatpush.bf16.msra.mxu2 %v2694_v15  ;;  %v1318_v15 = vrot.slane %v1316_v28, 2 }
  0x67   : > { %v1322_v36 = vor.u32 %v1321_v31, %v1318_v15 }
  0x68   : > { %1075 = vmatpush.bf16.msra.mxu1 %v2681_v55  ;;  %1541 = vmatpush.bf16.msra.mxu0 %v2709_v9 }
  0x69   : > { %1239 = vmatpush.bf16.msra.mxu2 %v2693_v51  ;;  %v1323_v40 = vsel %vm1297_vm3, %v1313_v19, %v1322_v36 }
  0x6b   : > { %500 = vmatmul.bf16.gmra.mxu1 %v2838_v11  ;;  %956 = vmatmul.bf16.gmra.mxu0 %v866_v44  ;;  %v712_v11 = vsel %vm537_vm1, %v709_v22, %v711_v45  ;;  %v880_v22 = vshll.u32 %v3141_v14, 16 }
  0x6d   : > { %v882_v27 = vrot.slane %v880_v22, 2  ;;  %v1009_v22 = vrot.slane %v3016_v53, 2 }
  0x6e   : > { %620 = vmatmul.bf16.gmra.mxu2 %v544_v41  ;;  %794 = vmatmul.bf16.gmra.mxu3 %v712_v11  ;;  %v3160_v41 = vld [vmem:[%s2825_s12 + $0x20] sm:$0xff] }
  0x6f   : > { %v883_v30 = vor.u32 %v882_v27, %v879_v26  ;;  %v1325_v44 = vshrl.u32 %v3160_v41, 16  ;;  %v1328_v45 = vshll.u32 %v3160_v41, 16  ;;  %v1173_v19 = vrot.slane %v3160_v41, 2 }
  0x70   : > { %v1348_v26 = vrot.slane %v1346_v17, 3 }
  0x71   : > { %v884_v34 = vsel %vm831_vm2, %v874_v10, %v883_v30  ;;  %v1327_v51 = vrot.slane %v1325_v44, 2  ;;  %v1330_v52 = vrot.slane %v1328_v45, 3  ;;  %v1174_v27 = vsel %vm1003_vm4, %v1171_v58, %v1173_v19 }
  0x72   : > { %v1012_v45 = vsel %vm1003_vm4, %v1009_v22, %v1011_v39 }
  0x73   : > { %v1331_v11 = vor.u32 %v1330_v52, %v1327_v51 }
  0x75   : > { %v1332_v55 = vsel %vm1297_vm3, %v1322_v36, %v1331_v11  ;;  %v1175_v36 = vrot.slane %v3177_v43, 2 }
  0x7b   : > { %505 = vmatmul.bf16.gmra.mxu1 %v2854_v18  ;;  %961 = vmatmul.bf16.gmra.mxu0 %v875_v13  ;;  %v547_v18 = vrot.slane %v2857_v20, 1  ;;  %v1002_v20 = vpack.c.b16 %v686_v33, %v1001_v38  ;;  %v1471_v33 = vrot.slane %v3124_v56, 3  ;;  %v1334_v56 = vshrl.u32 %v3177_v43, 16 }
  0x7c   : > { %v1343_v13 = vshrl.u32 %v3191_v6, 16 }
  0x7d   : > { %v548_v32 = vsel %vm537_vm1, %v545_v1, %v547_v18  ;;  %v1004_v48 = vrot.slane %v1002_v20, 2  ;;  %v1472_v54 = vsel %vm1469_vm5, %v1470_v50, %v1471_v33  ;;  %v1336_v61 = vrot.slane %v1334_v56, 2  ;;  %v1122_v20 = vld [vmem:[%s2825_s12 + $0x30] sm:$0x3] }
  0x7e   : > { %625 = vmatmul.bf16.gmra.mxu2 %v546_v7  ;;  %1412 = vmatmul.bf16.vlgmr.msrb.gmra.mxu3 %v1314_v24  ;;  %v1474_v3 = vsel %vm1469_vm5, %v1471_v33, %v1473_v60  ;;  %v1475_v24 = vrot.slane %v3160_v41, 3  ;;  %v1345_v25 = vrot.slane %v1343_v13, 2  ;;  %v1010_v18 = vsel %vm1003_vm4, %v1007_v59, %v1009_v22 }
  0x7f   : > { %v1006_v47 = vsel %vm1003_vm4, %v1004_v48, %v1005_v49  ;;  %v1176_v41 = vsel %vm1003_vm4, %v1173_v19, %v1175_v36  ;;  %v1161_v48 = vunpack.c.l.b16 %v1122_v20  ;;  %v1479_v56 = vrot.slane %v3191_v6, 3 }
  0x80   : > { %v1476_v30 = vsel %vm1469_vm5, %v1473_v60, %v1475_v24  ;;  %v1349_v15 = vor.u32 %v1348_v26, %v1345_v25 }
  0x81   : > { %v1167_v16 = vpack.c.b16 %v1161_v48, %v1161_v48 }
  0x8b   : > { %510 = vmatmul.bf16.gmra.mxu1 %v2841_v12  ;;  %966 = vmatmul.bf16.gmra.mxu0 %v884_v34  ;;  %v1168_v12 = vrot.slane %v3128_v57, 2  ;;  %v1337_v57 = vshll.u32 %v3177_v43, 16 }
  0x8d   : > { %v1170_v23 = vsel %vm1003_vm4, %v1168_v12, %v1169_v46  ;;  %v1339_v62 = vrot.slane %v1337_v57, 3 }
  0x8e   : > { %630 = vmatmul.bf16.gmra.mxu2 %v548_v32  ;;  %1417 = vmatmul.bf16.gmra.mxu3 %v1323_v40  ;;  %v1477_v40 = vrot.slane %v3177_v43, 3  ;;  %v1013_v43 = vrot.slane %v3141_v14, 2 }
  0x8f   : > { %v1340_v4 = vor.u32 %v1339_v62, %v1336_v61 }
  0x90   : > { %v1478_v12 = vsel %vm1469_vm5, %v1475_v24, %v1477_v40  ;;  %v1480_v0 = vsel %vm1469_vm5, %v1477_v40, %v1479_v56 }
  0x91   : > { %v1341_v8 = vsel %vm1297_vm3, %v1331_v11, %v1340_v4  ;;  %v1350_v53 = vsel %vm1297_vm3, %v1340_v4, %v1349_v15  ;;  %v1177_v11 = vrot.slane %v1167_v16, 2 }
  0x93   : > { %v1178_v59 = vsel %vm1003_vm4, %v1175_v36, %v1177_v11 }
  0x9b   : > { %1076 = vmatmul.bf16.vlgmr.msra.gmra.mxu1 %v1006_v47  ;;  %1542 = vmatmul.bf16.vlgmr.msra.gmra.mxu0 %v1472_v54 }
  0x9e   : > { %1240 = vmatmul.bf16.vlgmr.msra.gmra.mxu2 %v1170_v23  ;;  %1422 = vmatmul.bf16.gmra.mxu3 %v1332_v55 }
  0xa8   : > { %v404_v1 = vpop.f32.mrf.mxu0  ;;  %v3186_v10 = vpop.f32.mrf.mxu1 }
  0xab   : > { %1081 = vmatmul.bf16.gmra.mxu1 %v1008_v2  ;;  %1547 = vmatmul.bf16.gmra.mxu0 %v1474_v3 }
  0xae   : > { %1245 = vmatmul.bf16.gmra.mxu2 %v1172_v63  ;;  %1427 = vmatmul.bf16.gmra.mxu3 %v1341_v8  ;;  %v1014_v63 = vsel %vm1003_vm4, %v1011_v39, %v1013_v43 }
  0xb0   : > { %v406_v7 = vpop.f32.mrf.mxu0  ;;  %v3193_v9 = vpop.f32.mrf.mxu1 }
  0xb1   : > { %v775_v21 = vpop.f32.mrf.mxu3  ;;  %v3205_v31 = vpop.f32.mrf.mxu2 }
  0xb8   : > { %v409_v28 = vpop.f32.mrf.mxu0  ;;  %v3201_v29 = vpop.f32.mrf.mxu1 }
  0xb9   : > { %v777_v32 = vpop.f32.mrf.mxu3  ;;  %v3211_v38 = vpop.f32.mrf.mxu2 }
  0xbb   : > { %1086 = vmatmul.bf16.gmra.mxu1 %v1010_v18  ;;  %1552 = vmatmul.bf16.gmra.mxu0 %v1476_v30 }
  0xbe   : > { %1250 = vmatmul.bf16.gmra.mxu2 %v1174_v27  ;;  %1432 = vmatmul.bf16.gmra.mxu3 %v1350_v53 }
  0xc0   : > { %v411_v34 = vpop.f32.mrf.mxu0  ;;  %v3208_v35 = vpop.f32.mrf.mxu1 }
  0xc1   : > { %v780_v37 = vpop.f32.mrf.mxu3 }
  0xc8   : > { %v491_v42 = vpop.f32.mrf.mxu1  ;;  %v947_v44 = vpop.f32.mrf.mxu0 }
  0xc9   : > { %v492_v46 = vadd.f32 %v491_v42, %v404_v1  ;;  %v782_v49 = vpop.f32.mrf.mxu3 }
  0xcb   : > { %1091 = vmatmul.bf16.gmra.mxu1 %v1012_v45  ;;  %1557 = vmatmul.bf16.gmra.mxu0 %v1478_v12 }
  0xce   : > { %1255 = vmatmul.bf16.gmra.mxu2 %v1176_v41 }
  0xd0   : > { %v493_v52 = vpop.f32.mrf.mxu1  ;;  %v949_v23 = vpop.f32.mrf.mxu0 }
  0xd1   : > { %v611_v50 = vpop.f32.mrf.mxu2  ;;  %v494_v47 = vadd.f32 %v493_v52, %v406_v7  ;;  %v785_v58 = vpop.f32.mrf.mxu3 }
  0xd2   : > { %v636_v33 = vadd.f32 %v611_v50, %v492_v46 }
  0xd4   : > { %v800_v51 = vadd.f32 %v775_v21, %v636_v33 }
  0xd6   : > { %v3219_v54 = vadd.f32 %v947_v44, %v800_v51 }
  0xd8   : > { %v496_v61 = vpop.f32.mrf.mxu1  ;;  %v952_v62 = vpop.f32.mrf.mxu0 }
  0xd9   : > { %v613_v55 = vpop.f32.mrf.mxu2  ;;  %v497_v1 = vadd.f32 %v496_v61, %v409_v28  ;;  %v787_v5 = vpop.f32.mrf.mxu3 }
  0xda   : > { %v637_v57 = vadd.f32 %v613_v55, %v494_v47 }
  0xdb   : > { %1096 = vmatmul.bf16.gmra.mxu1 %v1014_v63  ;;  %1562 = vmatmul.bf16.gmra.mxu0 %v1480_v0 }
  0xdc   : > { %v801_v60 = vadd.f32 %v777_v32, %v637_v57 }
  0xde   : > { %1260 = vmatmul.bf16.gmra.mxu2 %v1178_v59  ;;  %v3226_v2 = vadd.f32 %v949_v23, %v801_v60 }
  0xe0   : > { %v498_v8 = vpop.f32.mrf.mxu1  ;;  %v954_v6 = vpop.f32.mrf.mxu0 }
  0xe1   : > { %v616_v14 = vpop.f32.mrf.mxu2  ;;  %v499_v7 = vadd.f32 %v498_v8, %v411_v34  ;;  %v790_v26 = vpop.f32.mrf.mxu3 }
  0xe2   : > { %v638_v3 = vadd.f32 %v616_v14, %v497_v1 }
  0xe4   : > { %v802_v4 = vadd.f32 %v780_v37, %v638_v3 }
  0xe6   : > { %v3228_v13 = vadd.f32 %v952_v62, %v802_v4 }
  0xe8   : > { %v501_v22 = vpop.f32.mrf.mxu1  ;;  %v957_v24 = vpop.f32.mrf.mxu0 }
  0xe9   : > { %v618_v17 = vpop.f32.mrf.mxu2  ;;  %v502_v25 = vadd.f32 %v501_v22, %v3186_v10  ;;  %v792_v36 = vpop.f32.mrf.mxu3 }
  0xea   : > { %v639_v19 = vadd.f32 %v618_v17, %v499_v7 }
  0xec   : > { %v803_v21 = vadd.f32 %v782_v49, %v639_v19 }
  0xee   : > { %v3231_v27 = vadd.f32 %v954_v6, %v803_v21 }
  0xf0   : > { %v503_v15 = vpop.f32.mrf.mxu1  ;;  %v959_v32 = vpop.f32.mrf.mxu0 }
  0xf1   : > { %v621_v28 = vpop.f32.mrf.mxu2  ;;  %v504_v53 = vadd.f32 %v503_v15, %v3193_v9  ;;  %v795_v12 = vpop.f32.mrf.mxu3 }
  0xf2   : > { %v640_v18 = vadd.f32 %v621_v28, %v502_v25 }
  0xf4   : > { %v804_v30 = vadd.f32 %v785_v58, %v640_v18  ;;  %v3266_v18 = vld [vmem:[%s3378_s4] ss:$0 sm:$0xff] }
  0xf6   : > { %v3234_v34 = vadd.f32 %v957_v24, %v804_v30 }
  0xf8   : > { %v506_v41 = vpop.f32.mrf.mxu1  ;;  %v962_v20 = vpop.f32.mrf.mxu0 }
  0xf9   : > { %v623_v37 = vpop.f32.mrf.mxu2  ;;  %v507_v10 = vadd.f32 %v506_v41, %v3201_v29  ;;  %v797_v52 = vpop.f32.mrf.mxu3 }
  0xfa   : > { %v641_v39 = vadd.f32 %v623_v37, %v504_v53 }
  0xfc   : > { %v805_v40 = vadd.f32 %v787_v5, %v641_v39 }
  0xfe   : > { %v3237_v42 = vadd.f32 %v959_v32, %v805_v40 }
 0x100   : > { %v508_v48 = vpop.f32.mrf.mxu1  ;;  %v964_v49 = vpop.f32.mrf.mxu0 }
 0x101   : > { %v626_v44 = vpop.f32.mrf.mxu2  ;;  %v509_v9 = vadd.f32 %v508_v48, %v3208_v35  ;;  %v1413_v35 = vpop.f32.mrf.mxu3 }
 0x102   : > { %v642_v45 = vadd.f32 %v626_v44, %v507_v10 }
 0x104   : > { %v806_v46 = vadd.f32 %v790_v26, %v642_v45 }
 0x106   : > { %v3240_v50 = vadd.f32 %v962_v20, %v806_v46 }
 0x108   : > { %v511_v23 = vpop.f32.mrf.mxu1  ;;  %v967_v47 = vpop.f32.mrf.mxu0 }
 0x109   : > { %v628_v33 = vpop.f32.mrf.mxu2  ;;  %v512_v29 = vadd.f32 %v511_v23, %v3205_v31  ;;  %v1415_v3 = vpop.f32.mrf.mxu3 }
 0x10a   : > { %v643_v16 = vadd.f32 %v628_v33, %v509_v9 }
 0x10c   : > { %v807_v51 = vadd.f32 %v792_v36, %v643_v16 }
 0x10e   : > { %v3243_v11 = vadd.f32 %v964_v49, %v807_v51 }
 0x110   : > { %v513_v57 = vpop.f32.mrf.mxu1  ;;  %v969_v58 = vpop.f32.mrf.mxu0 }
 0x111   : > { %v631_v55 = vpop.f32.mrf.mxu2  ;;  %v514_v59 = vadd.f32 %v513_v57, %v3211_v38  ;;  %v3254_v38 = vld [vmem:[%s3376_s2] ss:$0 sm:$0xff]  ;;  %v1418_v26 = vpop.f32.mrf.mxu3 }
 0x112   : > { %v644_v43 = vadd.f32 %v631_v55, %v512_v29 }
 0x114   : > { %v808_v56 = vadd.f32 %v795_v12, %v644_v43 }
 0x116   : > { %v3246_v60 = vadd.f32 %v967_v47, %v808_v56 }
 0x118   : > { %v1077_v0 = vpop.f32.mrf.mxu1  ;;  %v1543_v1 = vpop.f32.mrf.mxu0 }
 0x119   : > { %v633_v61 = vpop.f32.mrf.mxu2  ;;  %v1102_v14 = vadd.f32 %v1077_v0, %v3219_v54  ;;  %v3261_v54 = vld [vmem:[%s3377_s3] ss:$0 sm:$0xff]  ;;  %v1420_v46 = vpop.f32.mrf.mxu3 }
 0x11a   : > { %v645_v62 = vadd.f32 %v633_v61, %v514_v59 }
 0x11c   : > { %v809_v63 = vadd.f32 %v797_v52, %v645_v62 }
 0x11e   : > { %v3249_v31 = vadd.f32 %v969_v58, %v809_v63 }
 0x120   : > { %v1079_v6 = vpop.f32.mrf.mxu1  ;;  %v1545_v7 = vpop.f32.mrf.mxu0 }
 0x121   : > { %v1241_v4 = vpop.f32.mrf.mxu2  ;;  %v1103_v19 = vadd.f32 %v1079_v6, %v3226_v2 }
 0x122   : > { %v1266_v5 = vadd.f32 %v1241_v4, %v1102_v14 }
 0x124   : > { %v1438_v8 = vadd.f32 %v1413_v35, %v1266_v5 }
 0x126   : > { %v1568_v17 = vadd.f32 %v1543_v1, %v1438_v8 }
 0x128   : > { %v1582_v21 = vadd.f32 %v3254_v38, %v1568_v17  ;;  %v1082_v15 = vpop.f32.mrf.mxu1  ;;  %v1548_v32 = vpop.f32.mrf.mxu0 }
 0x129   : > { %v1243_v22 = vpop.f32.mrf.mxu2  ;;  %v1104_v36 = vadd.f32 %v1082_v15, %v3228_v13  ;;  %v1423_v17 = vpop.f32.mrf.mxu3 }
 0x12a   : > { %vm1592_vm6 = vcmp.ge.f32.partialorder %v1582_v21, 0.0  ;;  %v1602_v24 = vmul.f32 0.1, %v1582_v21  ;;  %v1267_v25 = vadd.f32 %v1243_v22, %v1103_v19 }
 0x12c   : > { %v1612_v28 = vsel %vm1592_vm6, %v1582_v21, %v1602_v24  ;;  %v1439_v30 = vadd.f32 %v1415_v3, %v1267_v25 }
 0x12d   : > { %v1626_v2 = vmul.f32 %v3261_v54, %v1612_v28 }
 0x12e   : > { %v1569_v53 = vadd.f32 %v1545_v7, %v1439_v30 }
 0x12f   : > { %v3271_v37 = vadd.f32 %v3266_v18, %v1626_v2 }
 0x130   : > { %v1583_v39 = vadd.f32 %v3254_v38, %v1569_v53  ;;  %v1084_v49 = vpop.f32.mrf.mxu1  ;;  %v1550_v33 = vpop.f32.mrf.mxu0 }
 0x131   : > { %v1246_v40 = vpop.f32.mrf.mxu2  ;;  %v1660_v44 = vrot.slane %v3271_v37, 2  ;;  %v1661_v45 = vrot.slane %v3271_v37, 4  ;;  %v1105_v9 = vadd.f32 %v1084_v49, %v3231_v27  ;;  %v2598_v51 = vrot.slane %v3271_v37, 9 }
 0x132   : > { %vm1593_vm7 = vcmp.ge.f32.partialorder %v1583_v39, 0.0  ;;  %v1603_v41 = vmul.f32 0.1, %v1583_v39  ;;  %v1268_v20 = vadd.f32 %v1246_v40, %v1104_v36  ;;  %v1662_v57 = vrot.slane %v3271_v37, 6 }
 0x133   : > { %v2599_v52 = vrot.slane %v1660_v44, 9  ;;  %v2600_v23 = vrot.slane %v1661_v45, 9  ;;  %v1804_v62 = vmax.f32 %v3271_v37, %v2598_v51 }
 0x134   : > { %v1613_v10 = vsel %vm1593_vm7, %v1583_v39, %v1603_v41  ;;  %v1440_v12 = vadd.f32 %v1418_v26, %v1268_v20  ;;  %v2601_v25 = vrot.slane %v1662_v57, 9 }
 0x135   : > { %v1627_v48 = vmul.f32 %v3261_v54, %v1613_v10  ;;  %v1805_v63 = vmax.f32 %v1660_v44, %v2599_v52  ;;  %v1806_v0 = vmax.f32 %v1661_v45, %v2600_v23 }
 0x136   : > { %v1570_v13 = vadd.f32 %v1548_v32, %v1440_v12  ;;  %v1807_v20 = vmax.f32 %v1662_v57, %v2601_v25 }
 0x137   : > { %v1641_v16 = vadd.f32 %v3266_v18, %v1627_v48 }
 0x138   : > { %v1584_v47 = vadd.f32 %v3254_v38, %v1570_v13  ;;  %v1087_v6 = vpop.f32.mrf.mxu1  ;;  %v1553_v30 = vpop.f32.mrf.mxu0 }
 0x139   : > { %v1663_v29 = vrot.slane %v1641_v16, 2  ;;  %v1664_v55 = vrot.slane %v1641_v16, 4  ;;  %v1665_v43 = vrot.slane %v1641_v16, 6  ;;  %v1248_v56 = vpop.f32.mrf.mxu2  ;;  %v1106_v28 = vadd.f32 %v1087_v6, %v3234_v34 }
 0x13a   : > { %vm1594_vm8 = vcmp.ge.f32.partialorder %v1584_v47, 0.0  ;;  %v1604_v58 = vmul.f32 0.1, %v1584_v47  ;;  %v1269_v59 = vadd.f32 %v1248_v56, %v1105_v9 }
 0x13b   : > { %v2602_v35 = vrot.slane %v1663_v29, 9  ;;  %v2603_v27 = vrot.slane %v1664_v55, 9  ;;  %v2604_v61 = vrot.slane %v1665_v43, 9 }
 0x13c   : > { %v1614_v1 = vsel %vm1594_vm8, %v1584_v47, %v1604_v58  ;;  %v1441_v14 = vadd.f32 %v1420_v46, %v1269_v59  ;;  %v1425_v47 = vpop.f32.mrf.mxu3 }
 0x13d   : > { %v1808_v3 = vmax.f32 %v1663_v29, %v2602_v35  ;;  %v1809_v4 = vmax.f32 %v1664_v55, %v2603_v27  ;;  %v1810_v5 = vmax.f32 %v1665_v43, %v2604_v61  ;;  %v1628_v8 = vmul.f32 %v3261_v54, %v1614_v1 }
 0x13e   : > { %v1571_v7 = vadd.f32 %v1550_v33, %v1441_v14 }
 0x13f   : > { %v1836_v19 = vmax.f32 %v1804_v62, %v1808_v3  ;;  %v1837_v21 = vmax.f32 %v1805_v63, %v1809_v4  ;;  %v1838_v22 = vmax.f32 %v1806_v0, %v1810_v5  ;;  %v3285_v24 = vadd.f32 %v3266_v18, %v1628_v8 }
 0x140   : > { %v1585_v26 = vadd.f32 %v3254_v38, %v1571_v7  ;;  %v1089_v48 = vpop.f32.mrf.mxu1  ;;  %v1555_v58 = vpop.f32.mrf.mxu0 }
 0x141   : > { %v1852_v2 = vpack.c.bf16 %v1836_v19, %v1836_v19  ;;  %v1853_v15 = vpack.c.bf16 %v1837_v21, %v1837_v21  ;;  %v1854_v32 = vpack.c.bf16 %v1838_v22, %v1838_v22  ;;  %v1251_v53 = vpop.f32.mrf.mxu2  ;;  %v2605_v36 = vrot.slane %v3285_v24, 9 }
 0x142   : > { %vm1595_vm10 = vcmp.ge.f32.partialorder %v1585_v26, 0.0  ;;  %v1605_v37 = vmul.f32 0.1, %v1585_v26  ;;  %v1270_v45 = vadd.f32 %v1251_v53, %v1106_v28  ;;  %v1666_v49 = vrot.slane %v3285_v24, 4 }
 0x143   : > { %v1884_v39 = vrot.slane %v1852_v2, 2  ;;  %v1885_v40 = vrot.slane %v1853_v15, 2  ;;  %v1886_v41 = vrot.slane %v1854_v32, 2  ;;  %v1811_v10 = vmax.f32 %v3285_v24, %v2605_v36 }
 0x144   : > { %v1615_v44 = vsel %vm1595_vm10, %v1585_v26, %v1605_v37  ;;  %v1442_v33 = vadd.f32 %v1423_v17, %v1270_v45  ;;  %v1107_v16 = vadd.f32 %v1089_v48, %v3237_v42  ;;  %v1667_v29 = vrot.slane %v3285_v24, 6  ;;  %v1428_v36 = vpop.f32.mrf.mxu3 }
 0x145   : > { %v1903_v34 = vsel %vm1900_vm9, %v1852_v2, %v1884_v39  ;;  %v1906_v12 = vsel %vm1900_vm9, %v1853_v15, %v1885_v40  ;;  %v1909_v46 = vsel %vm1900_vm9, %v1854_v32, %v1886_v41  ;;  %v1839_v13 = vmax.f32 %v1807_v20, %v1811_v10 }
 0x146   : > { %1949 = vst [vmem:[#allocation1] ss:$2 sm:$0xff] %v1903_v34  ;;  %v1629_v9 = vmul.f32 %v3261_v54, %v1615_v44  ;;  %v1572_v23 = vadd.f32 %v1553_v30, %v1442_v33  ;;  %v2606_v43 = vrot.slane %v1666_v49, 9  ;;  %v2607_v42 = vrot.slane %v1667_v29, 9 }
 0x147   : > { %1953 = vst [vmem:[#allocation1 + $0x10] ss:$2 sm:$0xff] %v1906_v12  ;;  %v1855_v51 = vpack.c.bf16 %v1839_v13, %v1839_v13 }
 0x148   : > { %1957 = vst [vmem:[#allocation1 + $0x20] ss:$2 sm:$0xff] %v1909_v46  ;;  %v1643_v52 = vadd.f32 %v3266_v18, %v1629_v9  ;;  %v1586_v59 = vadd.f32 %v3254_v38, %v1572_v23  ;;  %v1092_v0 = vpop.f32.mrf.mxu1  ;;  %v1812_v1 = vmax.f32 %v1666_v49, %v2606_v43  ;;  %v1813_v25 = vmax.f32 %v1667_v29, %v2607_v42  ;;  %v1558_v45 = vpop.f32.mrf.mxu0 }
 0x149   : > { %v1253_v55 = vpop.f32.mrf.mxu2  ;;  %v1887_v56 = vrot.slane %v1855_v51, 2  ;;  %v1108_v19 = vadd.f32 %v1092_v0, %v3240_v50 }
 0x14a   : > { %v1669_v57 = vrot.slane %v1643_v52, 6  ;;  %v1271_v35 = vadd.f32 %v1253_v55, %v1107_v16  ;;  %v1668_v62 = vrot.slane %v1643_v52, 2  ;;  %vm1596_vm12 = vcmp.ge.f32.partialorder %v1586_v59, 0.0 }
 0x14b   : > { %v1912_v27 = vsel %vm1900_vm9, %v1855_v51, %v1887_v56  ;;  %v2608_v14 = vrot.slane %v1643_v52, 9  ;;  %v1606_v4 = vmul.f32 0.1, %v1586_v59 }
 0x14c   : > { %v2610_v61 = vrot.slane %v1669_v57, 9  ;;  %1961 = vst [vmem:[#allocation1 + $0x30] ss:$2 sm:$0xff] %v1912_v27  ;;  %v1443_v63 = vadd.f32 %v1425_v47, %v1271_v35  ;;  %v2609_v15 = vrot.slane %v1668_v62, 9 }
 0x14d   : > { %v1950_v8 = vld.sshfl [vmem:[#allocation1] sm:$0xff pattern:$0x75643120]  ;;  %v1616_v22 = vsel %vm1596_vm12, %v1586_v59, %v1606_v4  ;;  %v1814_v39 = vmax.f32 %v1643_v52, %v2608_v14 }
 0x14e   : > { %v1816_v3 = vmax.f32 %v1669_v57, %v2610_v61  ;;  %v1954_v5 = vld.sshfl [vmem:[#allocation1 + $0x10] sm:$0xff pattern:$0x75643120]  ;;  %v1573_v17 = vadd.f32 %v1555_v58, %v1443_v63  ;;  %v1630_v26 = vmul.f32 %v3261_v54, %v1616_v22  ;;  %v2000_v53 = vunpack.c.l.b16 %v1950_v8 }
 0x14f   : > { %v1958_v6 = vld.sshfl [vmem:[#allocation1 + $0x20] sm:$0xff pattern:$0x75643120]  ;;  %v2001_v7 = vunpack.c.l.b16 %v1954_v5  ;;  %v1815_v9 = vmax.f32 %v1668_v62, %v2609_v15  ;;  %v1430_v5 = vpop.f32.mrf.mxu3 }
 0x150   : > { %v1840_v21 = vmax.f32 %v1812_v1, %v1816_v3  ;;  %v2002_v24 = vunpack.c.l.b16 %v1958_v6  ;;  %v1587_v30 = vadd.f32 %v3254_v38, %v1573_v17  ;;  %v1644_v40 = vadd.f32 %v3266_v18, %v1630_v26  ;;  %v1094_v13 = vpop.f32.mrf.mxu1 }
 0x151   : > { %v2016_v28 = vrot.slane %v2001_v7, 7  ;;  %v1256_v2 = vpop.f32.mrf.mxu2  ;;  %v1109_v57 = vadd.f32 %v1094_v13, %v3243_v11 }
 0x152   : > { %v1856_v32 = vpack.c.bf16 %v1840_v21, %v1840_v21  ;;  %v1272_v37 = vadd.f32 %v1256_v2, %v1108_v19  ;;  %vm1597_vm15 = vcmp.ge.f32.partialorder %v1587_v30, 0.0  ;;  %v1607_v50 = vmul.f32 0.1, %v1587_v30 }
 0x153   : > { %v1962_v20 = vld.sshfl [vmem:[#allocation1 + $0x30] sm:$0xff pattern:$0x75643120]  ;;  %v2018_v10 = vsel %vm2017_vm11, %v2016_v28, %v2000_v53  ;;  %v2019_v44 = vrot.slane %v2002_v24, 6  ;;  %v1670_v12 = vrot.slane %v1644_v40, 2  ;;  %v1671_v46 = vrot.slane %v1644_v40, 4  ;;  %v1560_v24 = vpop.f32.mrf.mxu0 }
 0x154   : > { %v1888_v41 = vrot.slane %v1856_v32, 2  ;;  %v1444_v34 = vadd.f32 %v1428_v36, %v1272_v37  ;;  %v2611_v48 = vrot.slane %v1644_v40, 9  ;;  %v2003_v49 = vunpack.c.l.b16 %v1962_v20 }
 0x155   : > { %v1617_v16 = vsel %vm1597_vm15, %v1587_v30, %v1607_v50  ;;  %v2612_v52 = vrot.slane %v1670_v12, 9  ;;  %v2613_v23 = vrot.slane %v1671_v46, 9  ;;  %v2021_v55 = vsel %vm2020_vm13, %v2019_v44, %v2018_v10 }
 0x156   : > { %v1915_v33 = vsel %vm1900_vm9, %v1856_v32, %v1888_v41  ;;  %v1574_v51 = vadd.f32 %v1558_v45, %v1444_v34  ;;  %v1817_v47 = vmax.f32 %v1644_v40, %v2611_v48  ;;  %v2022_v29 = vrot.slane %v2003_v49, 5 }
 0x157   : > { %1964 = vst [vmem:[#allocation1] ss:$2 sm:$0xff] %v1915_v33  ;;  %v1631_v43 = vmul.f32 %v3261_v54, %v1617_v16  ;;  %v1818_v58 = vmax.f32 %v1670_v12, %v2612_v52  ;;  %v1819_v59 = vmax.f32 %v1671_v46, %v2613_v23 }
 0x158   : > { %v1588_v56 = vadd.f32 %v3254_v38, %v1574_v51  ;;  %v1841_v35 = vmax.f32 %v1813_v25, %v1817_v47  ;;  %v2024_v27 = vsel %vm2023_vm14, %v2022_v29, %v2021_v55  ;;  %v1097_v19 = vpop.f32.mrf.mxu1  ;;  %v1433_v29 = vpop.f32.mrf.mxu3 }
 0x159   : > { %v1258_v61 = vpop.f32.mrf.mxu2  ;;  %v2043_v42 = vpack.c.b16 %v2024_v27, %v2024_v27  ;;  %v3314_v62 = vadd.f32 %v3266_v18, %v1631_v43  ;;  %v1842_v0 = vmax.f32 %v1814_v39, %v1818_v58  ;;  %v1843_v1 = vmax.f32 %v1815_v9, %v1819_v59 }
 0x15a   : > { %vm1598_vm0 = vcmp.ge.f32.partialorder %v1588_v56, 0.0  ;;  %v1608_v63 = vmul.f32 0.1, %v1588_v56  ;;  %v1857_v14 = vpack.c.bf16 %v1841_v35, %v1841_v35  ;;  %v1273_v25 = vadd.f32 %v1258_v61, %v1109_v57 }
 0x15b   : > { %v2047_v11 = vrot.slane %v2043_v42, 2  ;;  %v1672_v4 = vrot.slane %v3314_v62, 2  ;;  %v1858_v8 = vpack.c.bf16 %v1842_v0, %v1842_v0  ;;  %v1859_v6 = vpack.c.bf16 %v1843_v1, %v1843_v1  ;;  %v1563_v61 = vpop.f32.mrf.mxu0 }
 0x15c   : > { %v1618_v3 = vsel %vm1598_vm0, %v1588_v56, %v1608_v63  ;;  %v1889_v7 = vrot.slane %v1857_v14, 2  ;;  %v1673_v22 = vrot.slane %v3314_v62, 4  ;;  %v2614_v15 = vrot.slane %v3314_v62, 9 }
 0x15d   : > { %v1632_v17 = vmul.f32 %v3261_v54, %v1618_v3  ;;  %v2053_v21 = vsel %vm1900_vm9, %v2043_v42, %v2047_v11  ;;  %v1890_v26 = vrot.slane %v1858_v8, 2  ;;  %v1891_v28 = vrot.slane %v1859_v6, 2 }
 0x15e   : > { %v1918_v30 = vsel %vm1900_vm9, %v1857_v14, %v1889_v7  ;;  %2067 = vst [vmem:[%s3319_s21] sm:$0x3] %v2053_v21  ;;  %v2615_v32 = vrot.slane %v1672_v4, 9  ;;  %v1965_v40 = vld.sshfl [vmem:[#allocation1] sm:$0xff pattern:$0x75643120]  ;;  %v2616_v41 = vrot.slane %v1673_v22, 9  ;;  %v1445_v20 = vadd.f32 %v1430_v5, %v1273_v25 }
 0x15f   : > { %v1646_v2 = vadd.f32 %v3266_v18, %v1632_v17  ;;  %1967 = vst [vmem:[#allocation1 + $0x10] ss:$2 sm:$0xff] %v1918_v30  ;;  %v1921_v53 = vsel %vm1900_vm9, %v1858_v8, %v1890_v26  ;;  %v1924_v36 = vsel %vm1900_vm9, %v1859_v6, %v1891_v28  ;;  %v1674_v44 = vrot.slane %v3314_v62, 6 }
 0x160   : > { %1970 = vst [vmem:[#allocation1 + $0x20] ss:$2 sm:$0xff] %v1921_v53  ;;  %v1110_v12 = vadd.f32 %v1097_v19, %v3246_v60  ;;  %v1820_v48 = vmax.f32 %v3314_v62, %v2614_v15  ;;  %v1575_v49 = vadd.f32 %v1560_v24, %v1445_v20  ;;  %v1821_v13 = vmax.f32 %v1672_v4, %v2615_v32  ;;  %v1099_v55 = vpop.f32.mrf.mxu1 }
 0x161   : > { %v1675_v37 = vrot.slane %v1646_v2, 2  ;;  %v1676_v39 = vrot.slane %v1646_v2, 4  ;;  %v1677_v50 = vrot.slane %v1646_v2, 6  ;;  %v1261_v10 = vpop.f32.mrf.mxu2  ;;  %1973 = vst [vmem:[#allocation1 + $0x30] ss:$2 sm:$0xff] %v1924_v36  ;;  %v1822_v51 = vmax.f32 %v1673_v22, %v2616_v41 }
 0x162   : > { %v1274_v16 = vadd.f32 %v1261_v10, %v1110_v12  ;;  %v2004_v23 = vunpack.c.l.b16 %v1965_v40  ;;  %v1589_v47 = vadd.f32 %v3254_v38, %v1575_v49  ;;  %v2617_v60 = vrot.slane %v1674_v44, 9 }
 0x163   : > { %v2618_v45 = vrot.slane %v1675_v37, 9  ;;  %v2619_v34 = vrot.slane %v1676_v39, 9  ;;  %v2620_v46 = vrot.slane %v1677_v50, 9  ;;  %v1111_v14 = vadd.f32 %v1099_v55, %v3249_v31 }
 0x164   : > { %v1446_v58 = vadd.f32 %v1433_v29, %v1274_v16  ;;  %vm1599_vm1 = vcmp.ge.f32.partialorder %v1589_v47, 0.0  ;;  %v1609_v27 = vmul.f32 0.1, %v1589_v47  ;;  %v1823_v20 = vmax.f32 %v1674_v44, %v2617_v60 }
 0x165   : > { %v1824_v9 = vmax.f32 %v1675_v37, %v2618_v45  ;;  %v1825_v33 = vmax.f32 %v1676_v39, %v2619_v34  ;;  %v1826_v52 = vmax.f32 %v1677_v50, %v2620_v46  ;;  %v1435_v34 = vpop.f32.mrf.mxu3 }
 0x166   : > { %v1968_v57 = vld.sshfl [vmem:[#allocation1 + $0x10] sm:$0xff pattern:$0x75643120]  ;;  %v1576_v1 = vadd.f32 %v1563_v61, %v1446_v58  ;;  %v1619_v5 = vsel %vm1599_vm1, %v1589_v47, %v1609_v27 }
 0x167   : > { %v1844_v43 = vmax.f32 %v1820_v48, %v1824_v9  ;;  %v1845_v56 = vmax.f32 %v1821_v13, %v1825_v33  ;;  %v1846_v59 = vmax.f32 %v1822_v51, %v1826_v52  ;;  %v2005_v35 = vunpack.c.l.b16 %v1968_v57  ;;  %v1971_v0 = vld.sshfl [vmem:[#allocation1 + $0x20] sm:$0xff pattern:$0x75643120]  ;;  %v1565_v13 = vpop.f32.mrf.mxu0 }
 0x168   : > { %v2006_v3 = vunpack.c.l.b16 %v1971_v0  ;;  %v1974_v8 = vld.sshfl [vmem:[#allocation1 + $0x30] sm:$0xff pattern:$0x75643120]  ;;  %v1633_v17 = vmul.f32 %v3261_v54, %v1619_v5  ;;  %v1590_v25 = vadd.f32 %v3254_v38, %v1576_v1 }
 0x169   : > { %v1860_v42 = vpack.c.bf16 %v1844_v43, %v1844_v43  ;;  %v1861_v63 = vpack.c.bf16 %v1845_v56, %v1845_v56  ;;  %v1862_v11 = vpack.c.bf16 %v1846_v59, %v1846_v59  ;;  %v2025_v4 = vrot.slane %v2005_v35, 7  ;;  %v1263_v2 = vpop.f32.mrf.mxu2 }
 0x16a   : > { %v2007_v19 = vunpack.c.l.b16 %v1974_v8  ;;  %v2027_v24 = vrot.slane %v2006_v3, 6  ;;  %v1647_v28 = vadd.f32 %v3266_v18, %v1633_v17  ;;  %vm1600_vm2 = vcmp.ge.f32.partialorder %v1590_v25, 0.0 }
 0x16b   : > { %v1892_v6 = vrot.slane %v1860_v42, 2  ;;  %v1893_v7 = vrot.slane %v1861_v63, 2  ;;  %v1894_v21 = vrot.slane %v1862_v11, 2  ;;  %v2026_v22 = vsel %vm2017_vm11, %v2025_v4, %v2004_v23 }
 0x16c   : > { %v2029_v30 = vrot.slane %v2007_v19, 5  ;;  %v2028_v32 = vsel %vm2020_vm13, %v2027_v24, %v2026_v22  ;;  %v1610_v53 = vmul.f32 0.1, %v1590_v25  ;;  %v2621_v36 = vrot.slane %v1647_v28, 9 }
 0x16d   : > { %v1927_v26 = vsel %vm1900_vm9, %v1860_v42, %v1892_v6  ;;  %v1930_v31 = vsel %vm1900_vm9, %v1861_v63, %v1893_v7  ;;  %v1933_v15 = vsel %vm1900_vm9, %v1862_v11, %v1894_v21  ;;  %v1275_v50 = vadd.f32 %v1263_v2, %v1111_v14 }
 0x16e   : > { %1976 = vst [vmem:[#allocation1] ss:$2 sm:$0xff] %v1927_v26  ;;  %v2030_v37 = vsel %vm2023_vm14, %v2029_v30, %v2028_v32  ;;  %v1620_v40 = vsel %vm1600_vm2, %v1590_v25, %v1610_v53  ;;  %v1678_v41 = vrot.slane %v1647_v28, 4  ;;  %v1827_v10 = vmax.f32 %v1647_v28, %v2621_v36 }
 0x16f   : > { %1979 = vst [vmem:[#allocation1 + $0x10] ss:$2 sm:$0xff] %v1930_v31  ;;  %v2044_v39 = vpack.c.b16 %v2030_v37, %v2030_v37  ;;  %v1634_v45 = vmul.f32 %v3261_v54, %v1620_v40  ;;  %v1447_v46 = vadd.f32 %v1435_v34, %v1275_v50  ;;  %v1679_v29 = vrot.slane %v1647_v28, 6 }
 0x170   : > { %1982 = vst [vmem:[#allocation1 + $0x20] ss:$2 sm:$0xff] %v1933_v15  ;;  %v1847_v48 = vmax.f32 %v1823_v20, %v1827_v10  ;;  %v2622_v16 = vrot.slane %v1678_v41, 9 }
 0x171   : > { %v2048_v12 = vrot.slane %v2044_v39, 2  ;;  %v1648_v49 = vadd.f32 %v3266_v18, %v1634_v45  ;;  %v1577_v33 = vadd.f32 %v1565_v13, %v1447_v46  ;;  %v2623_v42 = vrot.slane %v1679_v29, 9 }
 0x172   : > { %v1863_v51 = vpack.c.bf16 %v1847_v48, %v1847_v48  ;;  %v1828_v43 = vmax.f32 %v1678_v41, %v2622_v16 }
 0x173   : > { %v2056_v9 = vsel %vm1900_vm9, %v2044_v39, %v2048_v12  ;;  %v1681_v52 = vrot.slane %v1648_v49, 6  ;;  %v1591_v62 = vadd.f32 %v3254_v38, %v1577_v33  ;;  %v1680_v58 = vrot.slane %v1648_v49, 2 }
 0x174   : > { %2068 = vst [vmem:[%s3319_s21 + $0x2] sm:$0x3] %v2056_v9  ;;  %v1895_v44 = vrot.slane %v1863_v51, 2  ;;  %v2624_v14 = vrot.slane %v1648_v49, 9  ;;  %v1829_v7 = vmax.f32 %v1679_v29, %v2623_v42 }
 0x175   : > { %v2626_v23 = vrot.slane %v1681_v52, 9  ;;  %vm1601_vm3 = vcmp.ge.f32.partialorder %v1591_v62, 0.0  ;;  %v1611_v55 = vmul.f32 0.1, %v1591_v62  ;;  %v2625_v11 = vrot.slane %v1680_v58, 9 }
 0x176   : > { %v1980_v47 = vld.sshfl [vmem:[#allocation1 + $0x10] sm:$0xff pattern:$0x75643120]  ;;  %v1936_v56 = vsel %vm1900_vm9, %v1863_v51, %v1895_v44  ;;  %v1977_v0 = vld.sshfl [vmem:[#allocation1] sm:$0xff pattern:$0x75643120]  ;;  %v1830_v26 = vmax.f32 %v1648_v49, %v2624_v14 }
 0x177   : > { %v1832_v57 = vmax.f32 %v1681_v52, %v2626_v23  ;;  %v1983_v60 = vld.sshfl [vmem:[#allocation1 + $0x20] sm:$0xff pattern:$0x75643120]  ;;  %1985 = vst [vmem:[#allocation1 + $0x30] ss:$2 sm:$0xff] %v1936_v56  ;;  %v1621_v59 = vsel %vm1601_vm3, %v1591_v62, %v1611_v55  ;;  %v2009_v35 = vunpack.c.l.b16 %v1980_v47  ;;  %v2008_v17 = vunpack.c.l.b16 %v1977_v0 }
 0x178   : > { %v1635_v61 = vmul.f32 %v3261_v54, %v1621_v59  ;;  %v2010_v38 = vunpack.c.l.b16 %v1983_v60  ;;  %v1831_v28 = vmax.f32 %v1680_v58, %v2625_v11 }
 0x179   : > { %v1848_v27 = vmax.f32 %v1828_v43, %v1832_v57  ;;  %v2031_v3 = vrot.slane %v2009_v35, 7 }
 0x17a   : > { %v1649_v1 = vadd.f32 %v3266_v18, %v1635_v61  ;;  %v2033_v19 = vrot.slane %v2010_v38, 6 }
 0x17b   : > { %v1864_v63 = vpack.c.bf16 %v1848_v27, %v1848_v27  ;;  %v2032_v18 = vsel %vm2017_vm11, %v2031_v3, %v2008_v17 }
 0x17c   : > { %v1682_v5 = vrot.slane %v1649_v1, 2  ;;  %v1683_v8 = vrot.slane %v1649_v1, 4  ;;  %v2627_v6 = vrot.slane %v1649_v1, 9  ;;  %v2034_v39 = vsel %vm2020_vm13, %v2033_v19, %v2032_v18 }
 0x17d   : > { %v1896_v4 = vrot.slane %v1864_v63, 2 }
 0x17e   : > { %v2628_v22 = vrot.slane %v1682_v5, 9  ;;  %v2629_v54 = vrot.slane %v1683_v8, 9  ;;  %v1833_v24 = vmax.f32 %v1649_v1, %v2627_v6  ;;  %v1986_v25 = vld.sshfl [vmem:[#allocation1 + $0x30] sm:$0xff pattern:$0x75643120] }
 0x17f   : > { %v1939_v21 = vsel %vm1900_vm9, %v1864_v63, %v1896_v4  ;;  %v2011_v31 = vunpack.c.l.b16 %v1986_v25 }
 0x180   : > { %1988 = vst [vmem:[#allocation1] ss:$2 sm:$0xff] %v1939_v21  ;;  %v1834_v30 = vmax.f32 %v1682_v5, %v2628_v22  ;;  %v1835_v2 = vmax.f32 %v1683_v8, %v2629_v54  ;;  %v1849_v15 = vmax.f32 %v1829_v7, %v1833_v24 }
 0x181   : > { %v2035_v32 = vrot.slane %v2011_v31, 5 }
 0x182   : > { %v1850_v53 = vmax.f32 %v1830_v26, %v1834_v30  ;;  %v1851_v36 = vmax.f32 %v1831_v28, %v1835_v2  ;;  %v1865_v37 = vpack.c.bf16 %v1849_v15, %v1849_v15 }
 0x183   : > { %v2036_v40 = vsel %vm2023_vm14, %v2035_v32, %v2034_v39 }
 0x184   : > { %v1866_v50 = vpack.c.bf16 %v1850_v53, %v1850_v53  ;;  %v1867_v41 = vpack.c.bf16 %v1851_v36, %v1851_v36  ;;  %v1897_v20 = vrot.slane %v1865_v37, 2  ;;  %v2045_v10 = vpack.c.b16 %v2036_v40, %v2036_v40 }
 0x186   : > { %v1898_v45 = vrot.slane %v1866_v50, 2  ;;  %v1899_v34 = vrot.slane %v1867_v41, 2  ;;  %v1942_v12 = vsel %vm1900_vm9, %v1865_v37, %v1897_v20  ;;  %v2049_v46 = vrot.slane %v2045_v10, 2 }
 0x187   : > { %1991 = vst [vmem:[#allocation1 + $0x10] ss:$2 sm:$0xff] %v1942_v12  ;;  %v1989_v9 = vld.sshfl [vmem:[#allocation1] sm:$0xff pattern:$0x75643120] }
 0x188   : > { %v1945_v48 = vsel %vm1900_vm9, %v1866_v50, %v1898_v45  ;;  %v1948_v49 = vsel %vm1900_vm9, %v1867_v41, %v1899_v34  ;;  %v2059_v13 = vsel %vm1900_vm9, %v2045_v10, %v2049_v46  ;;  %v2012_v52 = vunpack.c.l.b16 %v1989_v9 }
 0x189   : > { %1994 = vst [vmem:[#allocation1 + $0x20] ss:$2 sm:$0xff] %v1945_v48 }
 0x18a   : > { %1997 = vst [vmem:[#allocation1 + $0x30] ss:$2 sm:$0xff] %v1948_v49 }
 0x18b   : > { %2069 = vst [vmem:[%s3319_s21 + $0x4] sm:$0x3] %v2059_v13 }
 0x18e   : > { %v1992_v33 = vld.sshfl [vmem:[#allocation1 + $0x10] sm:$0xff pattern:$0x75643120] }
 0x18f   : > { %v2013_v16 = vunpack.c.l.b16 %v1992_v33 }
 0x190   : > { %v1995_v51 = vld.sshfl [vmem:[#allocation1 + $0x20] sm:$0xff pattern:$0x75643120] }
 0x191   : > { %v1998_v62 = vld.sshfl [vmem:[#allocation1 + $0x30] sm:$0xff pattern:$0x75643120]  ;;  %v2014_v44 = vunpack.c.l.b16 %v1995_v51  ;;  %v2037_v23 = vrot.slane %v2013_v16, 7 }
 0x192   : > { %v2015_v47 = vunpack.c.l.b16 %v1998_v62 }
 0x193   : > { %v2038_v29 = vsel %vm2017_vm11, %v2037_v23, %v2012_v52  ;;  %v2039_v55 = vrot.slane %v2014_v44, 6 }
 0x194   : > { %v2041_v43 = vrot.slane %v2015_v47, 5 }
 0x195   : > { %v2040_v56 = vsel %vm2020_vm13, %v2039_v55, %v2038_v29 }
 0x196   : > { %v2042_v57 = vsel %vm2023_vm14, %v2041_v43, %v2040_v56 }
 0x197   : > { %v2046_v60 = vpack.c.b16 %v2042_v57, %v2042_v57 }
 0x199   : > { %v2050_v58 = vrot.slane %v2046_v60, 2 }
 0x19b   : > { %v2062_v59 = vsel %vm1900_vm9, %v2046_v60, %v2050_v58 }
 0x19c   : > { %2070 = vst [vmem:[%s3319_s21 + $0x6] sm:$0x3] %v2062_v59 }
 0x19d PF: > { %s15_s18 = sadd.s32 1, %s2758_s18  }
 0x19e   : > { %p12_p4 = scmp.ge.s32.totalorder %s15_s18, 4  }
 0x1a0   :  { %14 = sbr.rel (!%p12_p4) target bundleno = 1 (0x1), region = 81 }

// kernel: domain_classifier_forward.4
= control target key start
LH: loop header
LB: loop body
LE: loop exit
PB: predicated region body
PF: predicated region fallthrough
CT: control target
= control target key end

     0   :  { %s5540_s18 = smov 0   ;;  %s7142_s0 = inlined_call_operand.vmem [shape: bf16[2,342,64], index: 0, kind: input, shape index: {}]   ;;  %s7143_s1 = inlined_call_operand.vmem [shape: bf16[9,64,128], index: 1, kind: input, shape index: {}]   ;;  %s7144_s2 = inlined_call_operand.vmem [shape: f32[1,128], index: 2, kind: input, shape index: {}]   ;;  %s7145_s3 = inlined_call_operand.vmem [shape: f32[1,128], index: 3, kind: input, shape index: {}]   ;;  %s7146_s4 = inlined_call_operand.vmem [shape: f32[1,128], index: 4, kind: input, shape index: {}]   ;;  %s7147_s5 = inlined_call_operand.vmem [shape: bf16[2,8,8,128], index: 5, kind: output, shape index: {}]  }
   0x1 LB: > { %s4645_s19 = sadd.s32 4294967295, %s5508_s18   ;;  %p4649_p0 = scmp.ge.s32.totalorder %s5508_s18, 1  ;;  %s5508_s18 = sphi %s5540_s18, %s15_s18  }
   0x2   : > { %p187_p1 = scmp.lt.s32.totalorder %s5508_s18, 3 }
   0x4   : > { %p188_p2 = pnand %p4649_p0, %p187_p1 }
   0x6   : > { %191 = sbr.rel (%p188_p2) target bundleno = 852 (0x354), region = 40 }
   0xb   : > { %v5382_v0 = vld [vmem:[%s7143_s1 + $0x38] sm:$0xff]  ;;  %p215_p3 = scmp.lt.s32.totalorder %s4645_s19, 1  ;;  %v5381_v1 = vld [vmem:[%s7143_s1 + $0x30] sm:$0xff]  ;;  %v5380_v2 = vld [vmem:[%s7143_s1 + $0x28] sm:$0xff]  ;;  %vm373_vm0 = vsmask.f32 7424 }
   0xc   : > { %5452 = vmatpush.bf16.msra.mxu1 %v5382_v0  ;;  %5453 = vmatpush.bf16.msra.mxu2 %v5382_v0  ;;  %v5379_v13 = vld [vmem:[%s7143_s1 + $0x20] sm:$0xff]  ;;  %v5386_v21 = vld [vmem:[%s7143_s1 + $0x58] sm:$0xff]  ;;  %vm546_vm1 = vcmask 523264   ;;  %v5385_v35 = vld [vmem:[%s7143_s1 + $0x50] sm:$0xff]  ;;  %vm872_vm2 = vcmask 1046528   ;;  %vm1922_vm5 = vcmask 1045504  }
   0xd   : > { %s7213_s19 = smov (!%p215_p3, %s4645_s19), 1  ;;  %605 = vmatpush.bf16.msra.mxu0 %v5382_v0  ;;  %5454 = vmatpush.bf16.msra.mxu3 %v5382_v0  ;;  %v5378_v25 = vld [vmem:[%s7143_s1 + $0x18] sm:$0xff]  ;;  %v5377_v37 = vld [vmem:[%s7143_s1 + $0x10] sm:$0xff]  ;;  %v5384_v48 = vld [vmem:[%s7143_s1 + $0x48] sm:$0xff]  ;;  %vm1525_vm3 = vsmask.f32 6400 }
   0xe   : > { %s5464_s24 = smul.u32 172, %s7213_s19  ;;  %v5411_v26 = vld [vmem:[%s7143_s1 + $0x98] sm:$0xff]  ;;  %v5410_v38 = vld [vmem:[%s7143_s1 + $0x90] sm:$0xff]  ;;  %v5376_v49 = vld [vmem:[%s7143_s1 + $0x8] sm:$0xff]  ;;  %vm2575_vm4 = vsmask.f32 5376 }
   0xf   : > { %v5407_v44 = vld [vmem:[%s7143_s1 + $0x78] sm:$0xff]  ;;  %v5406_v51 = vld [vmem:[%s7143_s1 + $0x70] sm:$0xff]  ;;  %vm2972_vm6 = vcmask 1044480   ;;  %vm4448_vm11 = vcmask 1041409   ;;  %vm4451_vm12 = vcmask 1042434   ;;  %vm4454_vm14 = vcmask 1043459  }
  0x10   : > { %5455 = vmatpush.bf16.msra.mxu1 %v5381_v1  ;;  %5456 = vmatpush.bf16.msra.mxu2 %v5381_v1  ;;  %s5563_s29 = scalar_lea.vmem %s7142_s0, %s5464_s24  ;;  %vm4457_vm15 = vcmask 1044484   ;;  %s5357_s11 = sshll.u32 %s7213_s19, 5 }
  0x11   : > { %606 = vmatpush.bf16.msra.mxu0 %v5381_v1  ;;  %v5566_v3 = vld [vmem:[%s5563_s29 + $0x28] sm:$0xff]  ;;  %v5569_v4 = vld [vmem:[%s5563_s29 + $0x30] sm:$0xff]  ;;  %5457 = vmatpush.bf16.msra.mxu3 %v5381_v1  ;;  %v5575_v6 = vld [vmem:[%s5563_s29 + $0x58] sm:$0xff]  ;;  %s6614_s13 = scalar_lea.vmem %s7147_s5, %s5357_s11 }
  0x12   : > { %v5572_v5 = vld [vmem:[%s5563_s29 + $0x50] sm:$0xff]  ;;  %v5578_v7 = vld [vmem:[%s5563_s29] sm:$0xff]   ;;  %v5581_v8 = vld [vmem:[%s5563_s29 + $0x8] sm:$0xff]  ;;  %v414_v9 = vshll.u32 %v5566_v3, 16  ;;  %v418_v10 = vshrl.u32 %v5566_v3, 16  ;;  %v422_v11 = vshll.u32 %v5569_v4, 16 }
  0x13   : > { %v454_v12 = vshll.u32 %v5572_v5, 16  ;;  %v458_v14 = vshrl.u32 %v5572_v5, 16  ;;  %v462_v15 = vshll.u32 %v5575_v6, 16  ;;  %v375_v16 = vshrl.u32 %v5578_v7, 16  ;;  %v5372_v30 = vld [vmem:[%s5563_s29 + $0x78] sm:$0xff]  ;;  %v5612_v31 = vld [vmem:[%s5563_s29 + $0x80] sm:$0xff] }
  0x14   : > { %5458 = vmatpush.bf16.msra.mxu1 %v5380_v2  ;;  %5459 = vmatpush.bf16.msra.mxu2 %v5380_v2  ;;  %v377_v17 = vshll.u32 %v5578_v7, 16  ;;  %v5594_v18 = vrot.slane %v414_v9, 1  ;;  %v424_v19 = vrot.slane %v422_v11, 1  ;;  %v382_v22 = vshll.u32 %v5581_v8, 16  ;;  %v5631_v42 = vld [vmem:[%s5563_s29 + $0x38] sm:$0xff]  ;;  %v5634_v43 = vld [vmem:[%s5563_s29 + $0x60] sm:$0xff] }
  0x15   : > { %607 = vmatpush.bf16.msra.mxu0 %v5380_v2  ;;  %v5596_v20 = vrot.slane %v454_v12, 1  ;;  %5460 = vmatpush.bf16.msra.mxu3 %v5380_v2  ;;  %v464_v23 = vrot.slane %v462_v15, 1  ;;  %v494_v39 = vshll.u32 %v5372_v30, 16  ;;  %v498_v40 = vshrl.u32 %v5372_v30, 16  ;;  %v5640_v45 = vld [vmem:[%s5563_s29 + $0x10] sm:$0xff]  ;;  %v5663_v59 = vld [vmem:[%s5563_s29 + $0x88] sm:$0xff] }
  0x16   : > { %v379_v24 = vrot.slane %v377_v17, 1  ;;  %v420_v27 = vor.u32 %v418_v10, %v5594_v18  ;;  %v384_v29 = vrot.slane %v382_v22, 1  ;;  %v502_v41 = vshll.u32 %v5612_v31, 16  ;;  %v5666_v0 = vld [vmem:[%s5563_s29 + $0x48] sm:$0xff]  ;;  %v5677_v15 = vld [vmem:[%s5563_s29 + $0x40] sm:$0xff] }
  0x17   : > { %v460_v28 = vor.u32 %v458_v14, %v5596_v20  ;;  %v5642_v46 = vrot.slane %v494_v39, 1  ;;  %v426_v52 = vshrl.u32 %v5569_v4, 16  ;;  %v430_v53 = vshll.u32 %v5631_v42, 16 }
  0x18   : > { %5461 = vmatpush.bf16.msra.mxu1 %v5379_v13  ;;  %5462 = vmatpush.bf16.msra.mxu2 %v5379_v13  ;;  %v380_v32 = vor.u32 %v379_v24, %v375_v16  ;;  %v425_v33 = vsel %vm373_vm0, %v420_v27, %v424_v19  ;;  %v504_v47 = vrot.slane %v502_v41, 1  ;;  %v466_v54 = vshrl.u32 %v5575_v6, 16  ;;  %v5680_v16 = vld [vmem:[%s5563_s29 + $0x68] sm:$0xff]  ;;  %v5697_v27 = vld [vmem:[%s5563_s29 + $0x18] sm:$0xff] }
  0x19   : > { %608 = vmatpush.bf16.msra.mxu0 %v5379_v13  ;;  %v465_v34 = vsel %vm373_vm0, %v460_v28, %v464_v23  ;;  %5463 = vmatpush.bf16.msra.mxu3 %v5379_v13  ;;  %v500_v50 = vor.u32 %v498_v40, %v5642_v46  ;;  %v470_v55 = vshll.u32 %v5634_v43, 16  ;;  %v386_v56 = vshrl.u32 %v5581_v8, 16  ;;  %v5405_v24 = vld [vmem:[%s7143_s1 + $0x68] sm:$0xff] }
  0x1a   : > { %v385_v36 = vsel %vm373_vm0, %v380_v32, %v384_v29  ;;  %v390_v57 = vshll.u32 %v5640_v45, 16  ;;  %v428_v60 = vor.u32 %v426_v52, %v424_v19  ;;  %v432_v61 = vrot.slane %v430_v53, 1 }
  0x1b   : > { %4750 = vmatmul.msk.bf16.vlgmr.msra.gmra.mxu1 %vm546_vm1, %v425_v33  ;;  %4755 = vmatmul.msk.bf16.vlgmr.msra.gmra.mxu2 %vm546_vm1, %v465_v34  ;;  %v505_v58 = vsel %vm373_vm0, %v500_v50, %v504_v47  ;;  %v468_v62 = vor.u32 %v466_v54, %v464_v23  ;;  %v472_v63 = vrot.slane %v470_v55, 1  ;;  %v388_v1 = vor.u32 %v386_v56, %v384_v29  ;;  %v5409_v23 = vld [vmem:[%s7143_s1 + $0x88] sm:$0xff] }
  0x1c   : > { %992 = vmatpush.bf16.msrb.mxu2 %v5386_v21  ;;  %764 = vmatpush.bf16.msrb.mxu1 %v5378_v25  ;;  %v392_v2 = vrot.slane %v390_v57, 1  ;;  %v506_v9 = vshrl.u32 %v5612_v31, 16  ;;  %v510_v10 = vshll.u32 %v5663_v59, 16  ;;  %v433_v11 = vsel %vm373_vm0, %v428_v60, %v432_v61  ;;  %v270_v21 = vld [vmem:[%s5563_s29 + $0x90] sm:$0x1]  ;;  %v5383_v25 = vld [vmem:[%s7143_s1 + $0x40] sm:$0xff] }
  0x1d   : > { %1778 = vmatpush.bf16.msrb.mxu0 %v5411_v26  ;;  %1381 = vmatpush.bf16.msrb.mxu3 %v5407_v44  ;;  %v473_v12 = vsel %vm373_vm0, %v468_v62, %v472_v63  ;;  %v446_v13 = vshll.u32 %v5666_v0, 16  ;;  %v450_v26 = vshrl.u32 %v5666_v0, 16  ;;  %v434_v29 = vshrl.u32 %v5631_v42, 16  ;;  %v5375_v60 = vld [vmem:[%s7143_s1] sm:$0xff] }
  0x1e   : > { %4745 = vmatmul.msk.bf16.vlgmr.msra.gmra.mxu0 %vm546_vm1, %v385_v36  ;;  %4760 = vmatmul.msk.bf16.vlgmr.msra.gmra.mxu3 %vm546_vm1, %v505_v58  ;;  %v393_v14 = vsel %vm373_vm0, %v388_v1, %v392_v2  ;;  %v508_v17 = vor.u32 %v506_v9, %v504_v47  ;;  %v512_v19 = vrot.slane %v510_v10, 1  ;;  %v353_v31 = vunpack.c.l.b16 %v270_v21  ;;  %v5408_v1 = vld [vmem:[%s7143_s1 + $0x80] sm:$0xff] }
  0x1f   : > { %v5684_v22 = vrot.slane %v446_v13, 1  ;;  %v438_v32 = vshll.u32 %v5677_v15, 16  ;;  %v474_v33 = vshrl.u32 %v5634_v43, 16  ;;  %v478_v34 = vshll.u32 %v5680_v16, 16 }
  0x20   : > { %993 = vmatpush.bf16.msrb.mxu2 %v5385_v35  ;;  %765 = vmatpush.bf16.msrb.mxu1 %v5377_v37  ;;  %v513_v30 = vsel %vm373_vm0, %v508_v17, %v512_v19  ;;  %v5706_v35 = vld [vmem:[%s5563_s29 + $0x20] sm:$0xff]  ;;  %v394_v37 = vshrl.u32 %v5640_v45, 16  ;;  %v436_v39 = vor.u32 %v434_v29, %v432_v61  ;;  %v5715_v40 = vpack.c.b16 %v353_v31, %v353_v31  ;;  %v5731_v61 = vld [vmem:[%s5563_s29 + $0x70] sm:$0xff] }
  0x21   : > { %1779 = vmatpush.bf16.msrb.mxu0 %v5410_v38  ;;  %1382 = vmatpush.bf16.msrb.mxu3 %v5406_v51  ;;  %v452_v28 = vor.u32 %v450_v26, %v5684_v22  ;;  %v398_v38 = vshll.u32 %v5697_v27, 16  ;;  %v440_v41 = vrot.slane %v438_v32, 1  ;;  %v476_v44 = vor.u32 %v474_v33, %v472_v63  ;;  %v5404_v63 = vld [vmem:[%s7143_s1 + $0x60] sm:$0xff]  ;;  %v5436_v33 = vld [vmem:[%s7143_s1 + $0xd8] sm:$0xff] }
  0x22   : > { %v480_v47 = vrot.slane %v478_v34, 1  ;;  %v518_v51 = vshll.u32 %v5715_v40, 16  ;;  %v410_v55 = vshrl.u32 %v5706_v35, 16  ;;  %v482_v10 = vshrl.u32 %v5680_v16, 16  ;;  %v5415_v34 = vld [vmem:[%s7143_s1 + $0xb8] sm:$0xff] }
  0x23   : > { %v5710_v36 = vsel %vm373_vm0, %v452_v28, %v5596_v20  ;;  %v400_v50 = vrot.slane %v398_v38, 1  ;;  %v514_v20 = vshrl.u32 %v5663_v59, 16  ;;  %v441_v52 = vsel %vm373_vm0, %v436_v39, %v440_v41 }
  0x24   : > { %994 = vmatpush.bf16.msrb.mxu2 %v5384_v48  ;;  %766 = vmatpush.bf16.msrb.mxu1 %v5376_v49  ;;  %v406_v48 = vshll.u32 %v5706_v35, 16  ;;  %v396_v49 = vor.u32 %v394_v37, %v392_v2  ;;  %v481_v53 = vsel %vm373_vm0, %v476_v44, %v480_v47  ;;  %v520_v59 = vrot.slane %v518_v51, 1  ;;  %v5444_v37 = vld [vmem:[%s7143_s1 + $0x118] sm:$0xff] }
  0x25   : > { %1780 = vmatpush.bf16.msrb.mxu0 %v5409_v23  ;;  %1383 = vmatpush.bf16.msrb.mxu3 %v5405_v24  ;;  %v516_v58 = vor.u32 %v514_v20, %v512_v19  ;;  %v442_v2 = vshrl.u32 %v5677_v15, 16  ;;  %v402_v13 = vshrl.u32 %v5697_v27, 16  ;;  %v484_v21 = vor.u32 %v482_v10, %v480_v47  ;;  %v5388_v44 = vld [vmem:[%s5563_s29 + $0x18] sm:$0xff] }
  0x26   : > { %v408_v54 = vrot.slane %v406_v48, 1  ;;  %v401_v56 = vsel %vm373_vm0, %v396_v49, %v400_v50  ;;  %v490_v39 = vshrl.u32 %v5731_v61, 16  ;;  %v1265_v48 = vrot.slane %v5388_v44, 1  ;;  %v5449_v49 = vld [vmem:[%s5563_s29] sm:$0xf0] }
  0x27   : > { %v521_v9 = vsel %vm373_vm0, %v516_v58, %v520_v59  ;;  %v444_v19 = vor.u32 %v442_v2, %v440_v41  ;;  %v404_v24 = vor.u32 %v402_v13, %v400_v50  ;;  %v5450_v50 = vld [vmem:[%s5563_s29] sm:$0xe]  ;;  %v874_v59 = vrot.slane %v5581_v8, 1 }
  0x28   : > { %995 = vmatpush.bf16.msrb.mxu2 %v5383_v25  ;;  %v412_v57 = vor.u32 %v410_v55, %v408_v54  ;;  %767 = vmatpush.bf16.msrb.mxu1 %v5375_v60  ;;  %v5387_v25 = vld [vmem:[%s5563_s29 + $0x10] sm:$0xff]  ;;  %v5451_v55 = vor.u32 %v5450_v50, %v5449_v49  ;;  %v1544_v10 = vshrl.u32 %v5388_v44, 16  ;;  %v880_v49 = vrot.slane %v5706_v35, 1 }
  0x29   : > { %1384 = vmatpush.bf16.msrb.mxu3 %v5404_v63  ;;  %1781 = vmatpush.bf16.msrb.mxu0 %v5408_v1  ;;  %v449_v28 = vsel %vm373_vm0, %v444_v19, %v5684_v22  ;;  %v1263_v32 = vrot.slane %v5387_v25, 1  ;;  %v5440_v22 = vld [vmem:[%s7143_s1 + $0xf8] sm:$0xff]  ;;  %v5389_v63 = vld [vmem:[%s5563_s29 + $0x20] sm:$0xff]  ;;  %v876_v19 = vrot.slane %v5640_v45, 1 }
  0x2a   : > { %v417_v62 = vsel %vm373_vm0, %v412_v57, %v5594_v18  ;;  %v486_v18 = vshll.u32 %v5731_v61, 16  ;;  %v1546_v13 = vrot.slane %v1544_v10, 1 }
  0x2b   : > { %4751 = vmatmul.msk.bf16.gmra.mxu1 %vm546_vm1, %v433_v11  ;;  %4756 = vmatmul.msk.bf16.gmra.mxu2 %vm546_vm1, %v473_v12  ;;  %v1123_v11 = vld [vmem:[%s5563_s29 + $0x8] sm:$0xe]  ;;  %v5747_v12 = vld [vmem:[%s5563_s29 + $0xc] sm:$0xf] }
  0x2c   : > { %v7148_v17 = vunpack.c.l.b16 %v5747_v12  ;;  %v488_v23 = vrot.slane %v486_v18, 1  ;;  %2431 = vmatpush.bf16.msra.mxu2 %v5436_v33  ;;  %2042 = vmatpush.bf16.msra.mxu1 %v5415_v34  ;;  %v1547_v18 = vshll.u32 %v5388_v44, 16 }
  0x2d   : > { %2828 = vmatpush.bf16.msra.mxu3 %v5440_v22  ;;  %3092 = vmatpush.bf16.msra.mxu0 %v5444_v37  ;;  %v5391_v22 = vld [vmem:[%s5563_s29 + $0x30] sm:$0xff] }
  0x2e   : > { %4746 = vmatmul.msk.bf16.gmra.mxu0 %vm546_vm1, %v393_v14  ;;  %4761 = vmatmul.msk.bf16.gmra.mxu3 %vm546_vm1, %v513_v30  ;;  %v1206_v14 = vunpack.c.l.b16 %v1123_v11  ;;  %v489_v29 = vsel %vm373_vm0, %v484_v21, %v488_v23  ;;  %v409_v30 = vsel %vm373_vm0, %v404_v24, %v408_v54  ;;  %v492_v41 = vor.u32 %v490_v39, %v488_v23  ;;  %v5390_v23 = vld [vmem:[%s5563_s29 + $0x28] sm:$0xff] }
  0x2f   : > { %v1266_v54 = vsel %vm872_vm2, %v1263_v32, %v1265_v48  ;;  %v1271_v37 = vrot.slane %v5391_v22, 1  ;;  %v1565_v39 = vshll.u32 %v5390_v23, 16 }
  0x30   : > { %v1243_v26 = vpack.c.b16 %v7148_v17, %v1206_v14  ;;  %v497_v47 = vsel %vm373_vm0, %v492_v41, %v5642_v46  ;;  %v1549_v14 = vrot.slane %v1547_v18, 2  ;;  %v5393_v18 = vld [vmem:[%s5563_s29 + $0x40] sm:$0xff]  ;;  %vm4460_vm0 = vcmask 1045509  }
  0x32   : > { %v1262_v31 = vrot.slane %v1243_v26, 1  ;;  %v1527_v20 = vshrl.u32 %v1243_v26, 16  ;;  %v1530_v51 = vshll.u32 %v1243_v26, 16  ;;  %v1550_v21 = vor.u32 %v1549_v14, %v1546_v13 }
  0x33   : > { %v1553_v26 = vshrl.u32 %v5389_v63, 16 }
  0x34   : > { %v1264_v38 = vsel %vm872_vm2, %v1262_v31, %v1263_v32  ;;  %v1532_v46 = vrot.slane %v1530_v51, 2  ;;  %v878_v32 = vrot.slane %v5697_v27, 1  ;;  %v5392_v51 = vld [vmem:[%s5563_s29 + $0x38] sm:$0xff] }
  0x36   : > { %v879_v34 = vsel %vm872_vm2, %v876_v19, %v878_v32 }
  0x3b   : > { %4752 = vmatmul.msk.bf16.gmra.mxu1 %vm546_vm1, %v441_v52  ;;  %4757 = vmatmul.msk.bf16.gmra.mxu2 %vm546_vm1, %v481_v53  ;;  %v1535_v52 = vshrl.u32 %v5387_v25, 16  ;;  %v1538_v53 = vshll.u32 %v5387_v25, 16  ;;  %v1269_v25 = vrot.slane %v5390_v23, 1 }
  0x3d   : > { %v1537_v57 = vrot.slane %v1535_v52, 1  ;;  %v1540_v58 = vrot.slane %v1538_v53, 2  ;;  %v1272_v41 = vsel %vm872_vm2, %v1269_v25, %v1271_v37  ;;  %v881_v53 = vsel %vm872_vm2, %v878_v32, %v880_v49 }
  0x3e   : > { %4747 = vmatmul.msk.bf16.gmra.mxu0 %vm546_vm1, %v401_v56  ;;  %4762 = vmatmul.msk.bf16.gmra.mxu3 %vm546_vm1, %v521_v9  ;;  %v1529_v56 = vrot.slane %v1527_v20, 1  ;;  %v1267_v9 = vrot.slane %v5389_v63, 1  ;;  %v5414_v20 = vld [vmem:[%s7143_s1 + $0xb0] sm:$0xff] }
  0x3f   : > { %2043 = vmatpush.bf16.msra.mxu1 %v5414_v20 }
  0x40   : > { %v1533_v60 = vor.u32 %v1532_v46, %v1529_v56  ;;  %v1268_v11 = vsel %vm872_vm2, %v1265_v48, %v1267_v9  ;;  %v5435_v48 = vld [vmem:[%s7143_s1 + $0xd0] sm:$0xff]  ;;  %v1273_v56 = vrot.slane %v5392_v51, 1 }
  0x41   : > { %2432 = vmatpush.bf16.msra.mxu2 %v5435_v48  ;;  %v5443_v46 = vld [vmem:[%s7143_s1 + $0x110] sm:$0xff] }
  0x42   : > { %3093 = vmatpush.bf16.msra.mxu0 %v5443_v46 }
  0x4b   : > { %4753 = vmatmul.msk.bf16.gmra.mxu1 %vm546_vm1, %v449_v28  ;;  %4758 = vmatmul.msk.bf16.gmra.mxu2 %vm546_vm1, %v489_v29  ;;  %v1556_v28 = vshll.u32 %v5389_v63, 16  ;;  %v1270_v29 = vsel %vm872_vm2, %v1267_v9, %v1269_v25 }
  0x4d   : > { %v1558_v31 = vrot.slane %v1556_v28, 2 }
  0x4e   : > { %4748 = vmatmul.msk.bf16.gmra.mxu0 %vm546_vm1, %v409_v30  ;;  %4931 = vmatmul.msk.bf16.vlgmr.msrb.gmra.mxu3 %vm546_vm1, %v1264_v38  ;;  %v1555_v30 = vrot.slane %v1553_v26, 1  ;;  %v1562_v38 = vshrl.u32 %v5390_v23, 16  ;;  %v1580_v23 = vshrl.u32 %v5392_v51, 16 }
  0x50   : > { %v1559_v33 = vor.u32 %v1558_v31, %v1555_v30  ;;  %v1564_v44 = vrot.slane %v1562_v38, 1  ;;  %v1582_v30 = vrot.slane %v1580_v23, 1  ;;  %v884_v31 = vrot.slane %v5569_v4, 1 }
  0x5b   : > { %4754 = vmatmul.msk.bf16.gmra.mxu1 %vm546_vm1, %v5710_v36  ;;  %4759 = vmatmul.msk.bf16.gmra.mxu2 %vm546_vm1, %v497_v47  ;;  %v873_v36 = vrot.slane %v5451_v55, 1  ;;  %v1567_v47 = vrot.slane %v1565_v39, 2 }
  0x5d   : > { %v875_v1 = vsel %vm872_vm2, %v873_v36, %v874_v59  ;;  %v1568_v50 = vor.u32 %v1567_v47, %v1564_v44  ;;  %v1589_v44 = vshrl.u32 %v5393_v18, 16  ;;  %v1592_v47 = vshll.u32 %v5393_v18, 16 }
  0x5e   : > { %4749 = vmatmul.msk.bf16.gmra.mxu0 %vm546_vm1, %v417_v62  ;;  %4932 = vmatmul.msk.bf16.gmra.mxu3 %vm546_vm1, %v1266_v54  ;;  %v1541_v62 = vor.u32 %v1540_v58, %v1537_v57  ;;  %v1571_v57 = vshrl.u32 %v5391_v22, 16  ;;  %v1574_v58 = vshll.u32 %v5391_v22, 16 }
  0x5f   : > { %v1569_v55 = vsel %vm1525_vm3, %v1559_v33, %v1568_v50 }
  0x60   : > { %v1542_v2 = vsel %vm1525_vm3, %v1533_v60, %v1541_v62  ;;  %v1551_v24 = vsel %vm1525_vm3, %v1541_v62, %v1550_v21  ;;  %v1573_v62 = vrot.slane %v1571_v57, 1  ;;  %v1576_v63 = vrot.slane %v1574_v58, 2  ;;  %v5395_v57 = vld [vmem:[%s5563_s29 + $0x50] sm:$0xff] }
  0x6b   : > { %4779 = vmatmul.msk.bf16.vlgmr.msrb.gmra.mxu1 %vm546_vm1, %v5578_v7  ;;  %4821 = vmatmul.msk.bf16.vlgmr.msrb.gmra.mxu2 %vm546_vm1, %v875_v1  ;;  %v877_v7 = vsel %vm872_vm2, %v874_v59, %v876_v19  ;;  %v1274_v59 = vsel %vm872_vm2, %v1271_v37, %v1273_v56  ;;  %v882_v1 = vrot.slane %v5566_v3, 1 }
  0x6d   : > { %v883_v13 = vsel %vm872_vm2, %v880_v49, %v882_v1  ;;  %v885_v37 = vsel %vm872_vm2, %v882_v1, %v884_v31  ;;  %v1279_v1 = vrot.slane %v5395_v57, 1 }
  0x6e   : > { %4973 = vmatmul.msk.bf16.vlgmr.msrb.gmra.mxu0 %vm546_vm1, %v1542_v2  ;;  %4933 = vmatmul.msk.bf16.gmra.mxu3 %vm546_vm1, %v1268_v11  ;;  %v1577_v2 = vor.u32 %v1576_v63, %v1573_v62 }
  0x70   : > { %v1578_v19 = vsel %vm1525_vm3, %v1568_v50, %v1577_v2 }
  0x7b   : > { %4780 = vmatmul.msk.bf16.gmra.mxu1 %vm546_vm1, %v5581_v8  ;;  %4822 = vmatmul.msk.bf16.gmra.mxu2 %vm546_vm1, %v877_v7  ;;  %v1560_v8 = vsel %vm1525_vm3, %v1550_v21, %v1559_v33  ;;  %v1275_v21 = vrot.slane %v5393_v18, 1  ;;  %v1583_v7 = vshll.u32 %v5392_v51, 16  ;;  %v1591_v51 = vrot.slane %v1589_v44, 1 }
  0x7d   : > { %v1276_v26 = vsel %vm872_vm2, %v1273_v56, %v1275_v21 }
  0x7e   : > { %4974 = vmatmul.msk.bf16.gmra.mxu0 %vm546_vm1, %v1551_v24  ;;  %4934 = vmatmul.msk.bf16.gmra.mxu3 %vm546_vm1, %v1270_v29 }
  0x8b   : > { %4781 = vmatmul.msk.bf16.gmra.mxu1 %vm546_vm1, %v5640_v45  ;;  %4823 = vmatmul.msk.bf16.gmra.mxu2 %vm546_vm1, %v879_v34  ;;  %v5439_v45 = vld [vmem:[%s7143_s1 + $0xf0] sm:$0xff]  ;;  %v5394_v34 = vld [vmem:[%s5563_s29 + $0x48] sm:$0xff] }
  0x8c   : > { %2829 = vmatpush.bf16.msra.mxu3 %v5439_v45  ;;  %v1601_v18 = vshll.u32 %v5394_v34, 16 }
  0x8e   : > { %4975 = vmatmul.msk.bf16.gmra.mxu0 %vm546_vm1, %v1560_v8  ;;  %4935 = vmatmul.msk.bf16.gmra.mxu3 %vm546_vm1, %v1272_v41  ;;  %v1277_v41 = vrot.slane %v5394_v34, 1 }
  0x90   : > { %v1278_v49 = vsel %vm872_vm2, %v1275_v21, %v1277_v41  ;;  %v1280_v21 = vsel %vm872_vm2, %v1277_v41, %v1279_v1 }
  0x98   : > { %v5829_v52 = vpop.f32.mrf.mxu1 }
  0x9b   : > { %v5832_v54 = vpop.f32.mrf.mxu0  ;;  %4782 = vmatmul.msk.bf16.gmra.mxu1 %vm546_vm1, %v5697_v27  ;;  %4824 = vmatmul.msk.bf16.gmra.mxu2 %vm546_vm1, %v881_v53  ;;  %v886_v53 = vrot.slane %v5631_v42, 1 }
  0x9e   : > { %4976 = vmatmul.msk.bf16.gmra.mxu0 %vm546_vm1, %v1569_v55  ;;  %v5842_v36 = vpop.f32.mrf.mxu2  ;;  %4936 = vmatmul.msk.bf16.gmra.mxu3 %vm546_vm1, %v1274_v59  ;;  %v887_v59 = vsel %vm872_vm2, %v884_v31, %v886_v53 }
  0xa0   : > { %v5845_v60 = vpop.f32.mrf.mxu1 }
  0xa1   : > { %v5851_v9 = vpop.f32.mrf.mxu3 }
  0xa2   : > { %7153 = vst [vmem:[#allocation2_spill] sm:$0xff] %v5851_v9 }
  0xa3   : > { %v5847_v27 = vpop.f32.mrf.mxu0 }
  0xa6   : > { %v5853_v10 = vpop.f32.mrf.mxu2 }
  0xa8   : > { %v5856_v11 = vpop.f32.mrf.mxu1 }
  0xa9   : > { %v5866_v24 = vpop.f32.mrf.mxu3 }
  0xaa   : > { %7154 = vst [vmem:[#allocation3_spill] sm:$0xff] %v5866_v24 }
  0xab   : > { %v5859_v14 = vpop.f32.mrf.mxu0  ;;  %4783 = vmatmul.msk.bf16.gmra.mxu1 %vm546_vm1, %v5706_v35  ;;  %4825 = vmatmul.msk.bf16.gmra.mxu2 %vm546_vm1, %v883_v13  ;;  %v1585_v35 = vrot.slane %v1583_v7, 2 }
  0xad   : > { %v1586_v32 = vor.u32 %v1585_v35, %v1582_v30  ;;  %v888_v30 = vrot.slane %v5677_v15, 1 }
  0xae   : > { %4977 = vmatmul.msk.bf16.gmra.mxu0 %vm546_vm1, %v1578_v19  ;;  %v5868_v25 = vpop.f32.mrf.mxu2  ;;  %4937 = vmatmul.msk.bf16.gmra.mxu3 %vm546_vm1, %v1276_v26 }
  0xaf   : > { %v1587_v39 = vsel %vm1525_vm3, %v1577_v2, %v1586_v32  ;;  %v1598_v2 = vshrl.u32 %v5394_v34, 16  ;;  %v5396_v34 = vld [vmem:[%s5563_s29 + $0x58] sm:$0xff] }
  0xb0   : > { %v5871_v28 = vpop.f32.mrf.mxu1 }
  0xb1   : > { %v5877_v33 = vpop.f32.mrf.mxu3  ;;  %v1600_v26 = vrot.slane %v1598_v2, 1 }
  0xb2   : > { %7155 = vst [vmem:[#allocation4_spill] sm:$0xff] %v5877_v33 }
  0xb3   : > { %v5873_v29 = vpop.f32.mrf.mxu0 }
  0xb6   : > { %v5879_v22 = vpop.f32.mrf.mxu2 }
  0xb8   : > { %v5882_v8 = vpop.f32.mrf.mxu1 }
  0xb9   : > { %v5892_v48 = vpop.f32.mrf.mxu3 }
  0xba   : > { %7156 = vst [vmem:[#allocation5_spill] sm:$0xff] %v5892_v48 }
  0xbb   : > { %v5885_v38 = vpop.f32.mrf.mxu0  ;;  %4784 = vmatmul.msk.bf16.gmra.mxu1 %vm546_vm1, %v5566_v3  ;;  %4826 = vmatmul.msk.bf16.gmra.mxu2 %vm546_vm1, %v885_v37  ;;  %v1594_v3 = vrot.slane %v1592_v47, 2  ;;  %v1281_v47 = vrot.slane %v5396_v34, 1 }
  0xbd   : > { %v1595_v55 = vor.u32 %v1594_v3, %v1591_v51  ;;  %v5438_v51 = vld [vmem:[%s7143_s1 + $0xe8] sm:$0xff]  ;;  %v1607_v3 = vshrl.u32 %v5395_v57, 16 }
  0xbe   : > { %4978 = vmatmul.msk.bf16.gmra.mxu0 %vm546_vm1, %v1587_v39  ;;  %v5894_v45 = vpop.f32.mrf.mxu2  ;;  %4938 = vmatmul.msk.bf16.gmra.mxu3 %vm546_vm1, %v1278_v49  ;;  %v889_v39 = vsel %vm872_vm2, %v886_v53, %v888_v30  ;;  %v5434_v49 = vld [vmem:[%s7143_s1 + $0xc8] sm:$0xff]  ;;  %v1610_v53 = vshll.u32 %v5395_v57, 16 }
  0xbf   : > { %v1596_v63 = vsel %vm1525_vm3, %v1586_v32, %v1595_v55  ;;  %2433 = vmatpush.bf16.msra.mxu2 %v5434_v49  ;;  %2830 = vmatpush.bf16.msra.mxu3 %v5438_v51  ;;  %v5442_v57 = vld [vmem:[%s7143_s1 + $0x108] sm:$0xff]  ;;  %v5397_v49 = vld [vmem:[%s5563_s29 + $0x60] sm:$0xff] }
  0xc0   : > { %v5897_v50 = vpop.f32.mrf.mxu1  ;;  %3094 = vmatpush.bf16.msra.mxu0 %v5442_v57 }
  0xc1   : > { %v5903_v56 = vpop.f32.mrf.mxu3 }
  0xc2   : > { %7157 = vst [vmem:[#allocation6_spill] sm:$0xff] %v5903_v56 }
  0xc3   : > { %v5899_v20 = vpop.f32.mrf.mxu0 }
  0xc6   : > { %v5905_v46 = vpop.f32.mrf.mxu2 }
  0xc8   : > { %v5908_v58 = vpop.f32.mrf.mxu1 }
  0xc9   : > { %v5918_v13 = vpop.f32.mrf.mxu3 }
  0xca   : > { %7158 = vst [vmem:[#allocation7_spill] sm:$0xff] %v5918_v13 }
  0xcb   : > { %v5911_v62 = vpop.f32.mrf.mxu0  ;;  %4785 = vmatmul.msk.bf16.gmra.mxu1 %vm546_vm1, %v5569_v4  ;;  %4827 = vmatmul.msk.bf16.gmra.mxu2 %vm546_vm1, %v887_v59  ;;  %v1603_v4 = vrot.slane %v1601_v18, 2  ;;  %v1609_v18 = vrot.slane %v1607_v3, 1 }
  0xcd   : > { %v1604_v35 = vor.u32 %v1603_v4, %v1600_v26  ;;  %v5413_v26 = vld [vmem:[%s7143_s1 + $0xa8] sm:$0xff] }
  0xce   : > { %4979 = vmatmul.msk.bf16.gmra.mxu0 %vm546_vm1, %v1596_v63  ;;  %v5920_v19 = vpop.f32.mrf.mxu2  ;;  %4939 = vmatmul.msk.bf16.gmra.mxu3 %vm546_vm1, %v1280_v21  ;;  %v1612_v21 = vrot.slane %v1610_v53, 2 }
  0xcf   : > { %v1605_v44 = vsel %vm1525_vm3, %v1595_v55, %v1604_v35  ;;  %2044 = vmatpush.bf16.msra.mxu1 %v5413_v26  ;;  %v1619_v26 = vshll.u32 %v5396_v34, 16 }
  0xd0   : > { %v5923_v23 = vpop.f32.mrf.mxu1  ;;  %v1613_v4 = vor.u32 %v1612_v21, %v1609_v18  ;;  %v1616_v21 = vshrl.u32 %v5396_v34, 16 }
  0xd1   : > { %v1386_v31 = vpop.f32.mrf.mxu3 }
  0xd2   : > { %v1614_v17 = vsel %vm1525_vm3, %v1604_v35, %v1613_v4  ;;  %v1618_v24 = vrot.slane %v1616_v21, 1 }
  0xd3   : > { %v5925_v7 = vpop.f32.mrf.mxu0 }
  0xd6   : > { %v5929_v32 = vpop.f32.mrf.mxu2 }
  0xd8   : > { %v5932_v37 = vpop.f32.mrf.mxu1 }
  0xd9   : > { %v1388_v59 = vpop.f32.mrf.mxu3 }
  0xdb   : > { %v5935_v41 = vpop.f32.mrf.mxu0  ;;  %4786 = vmatmul.msk.bf16.gmra.mxu1 %vm546_vm1, %v5631_v42  ;;  %4828 = vmatmul.msk.bf16.gmra.mxu2 %vm546_vm1, %v889_v39  ;;  %v1282_v42 = vsel %vm872_vm2, %v1279_v1, %v1281_v47  ;;  %v890_v1 = vrot.slane %v5666_v0, 1 }
  0xdd   : > { %v891_v3 = vsel %vm872_vm2, %v888_v30, %v890_v1 }
  0xde   : > { %4980 = vmatmul.msk.bf16.gmra.mxu0 %vm546_vm1, %v1605_v44  ;;  %v5948_v55 = vpop.f32.mrf.mxu2  ;;  %4940 = vmatmul.msk.bf16.gmra.mxu3 %vm546_vm1, %v1282_v42  ;;  %v1283_v42 = vrot.slane %v5397_v49, 1 }
  0xe0   : > { %v5951_v63 = vpop.f32.mrf.mxu1  ;;  %v1284_v30 = vsel %vm872_vm2, %v1281_v47, %v1283_v42 }
  0xe1   : > { %v1391_v39 = vpop.f32.mrf.mxu3 }
  0xe3   : > { %v5953_v2 = vpop.f32.mrf.mxu0 }
  0xe6   : > { %v5963_v44 = vpop.f32.mrf.mxu2 }
  0xe7   : > { %7159 = vst [vmem:[#allocation8_spill] sm:$0xff] %v5963_v44 }
  0xe8   : > { %v769_v51 = vpop.f32.mrf.mxu1 }
  0xe9   : > { %v770_v18 = vadd.f32 %v769_v51, %v5832_v54  ;;  %v1393_v57 = vpop.f32.mrf.mxu3 }
  0xeb   : > { %v1783_v53 = vpop.f32.mrf.mxu0  ;;  %4787 = vmatmul.msk.bf16.gmra.mxu1 %vm546_vm1, %v5677_v15  ;;  %4829 = vmatmul.msk.bf16.gmra.mxu2 %vm546_vm1, %v891_v3  ;;  %v1621_v15 = vrot.slane %v1619_v26, 2 }
  0xed   : > { %v1622_v34 = vor.u32 %v1621_v15, %v1618_v24  ;;  %v1628_v24 = vshll.u32 %v5397_v49, 16 }
  0xee   : > { %4981 = vmatmul.msk.bf16.gmra.mxu0 %vm546_vm1, %v1614_v17  ;;  %v997_v13 = vpop.f32.mrf.mxu2  ;;  %4941 = vmatmul.msk.bf16.gmra.mxu3 %vm546_vm1, %v1284_v30  ;;  %v892_v17 = vrot.slane %v5572_v5, 1 }
  0xef   : > { %v1087_v56 = vadd.f32 %v997_v13, %v770_v18  ;;  %v5398_v13 = vld [vmem:[%s5563_s29 + $0x68] sm:$0xff]  ;;  %v1623_v21 = vsel %vm1525_vm3, %v1613_v4, %v1622_v34  ;;  %v1630_v15 = vrot.slane %v1628_v24, 2 }
  0xf0   : > { %v771_v48 = vpop.f32.mrf.mxu1  ;;  %v893_v47 = vsel %vm872_vm2, %v890_v1, %v892_v17 }
  0xf1   : > { %v1476_v35 = vadd.f32 %v1386_v31, %v1087_v56  ;;  %v772_v54 = vadd.f32 %v771_v48, %v5847_v27  ;;  %v1396_v51 = vpop.f32.mrf.mxu3 }
  0xf3   : > { %v1785_v33 = vpop.f32.mrf.mxu0  ;;  %v5975_v3 = vadd.f32 %v1783_v53, %v1476_v35  ;;  %v1285_v53 = vrot.slane %v5398_v13, 1 }
  0xf5   : > { %v1286_v4 = vsel %vm872_vm2, %v1283_v42, %v1285_v53 }
  0xf6   : > { %v999_v9 = vpop.f32.mrf.mxu2 }
  0xf7   : > { %v1088_v44 = vadd.f32 %v999_v9, %v772_v54  ;;  %v1625_v9 = vshrl.u32 %v5397_v49, 16  ;;  %v894_v54 = vrot.slane %v5575_v6, 1 }
  0xf8   : > { %v774_v18 = vpop.f32.mrf.mxu1 }
  0xf9   : > { %v1477_v56 = vadd.f32 %v1388_v59, %v1088_v44  ;;  %v775_v27 = vadd.f32 %v774_v18, %v5859_v14  ;;  %v1398_v48 = vpop.f32.mrf.mxu3  ;;  %v1627_v35 = vrot.slane %v1625_v9, 1  ;;  %v895_v42 = vsel %vm872_vm2, %v892_v17, %v894_v54 }
  0xfb   : > { %v1788_v31 = vpop.f32.mrf.mxu0  ;;  %4788 = vmatmul.msk.bf16.gmra.mxu1 %vm546_vm1, %v5666_v0  ;;  %4830 = vmatmul.msk.bf16.gmra.mxu2 %vm546_vm1, %v893_v47  ;;  %v5985_v26 = vadd.f32 %v1785_v33, %v1477_v56  ;;  %v1631_v49 = vor.u32 %v1630_v15, %v1627_v35 }
  0xfd   : > { %v1632_v9 = vsel %vm1525_vm3, %v1622_v34, %v1631_v49 }
  0xfe   : > { %4982 = vmatmul.msk.bf16.gmra.mxu0 %vm546_vm1, %v1623_v21  ;;  %v1002_v1 = vpop.f32.mrf.mxu2  ;;  %4942 = vmatmul.msk.bf16.gmra.mxu3 %vm546_vm1, %v1286_v4  ;;  %v5399_v21 = vld [vmem:[%s5563_s29 + $0x70] sm:$0xff]  ;;  %v1637_v4 = vshll.u32 %v5398_v13, 16 }
  0xff   : > { %v1089_v59 = vadd.f32 %v1002_v1, %v775_v27 }
 0x100   : > { %v776_v44 = vpop.f32.mrf.mxu1 }
 0x101   : > { %v1478_v30 = vadd.f32 %v1391_v39, %v1089_v59  ;;  %v777_v14 = vadd.f32 %v776_v44, %v5873_v29  ;;  %v1401_v18 = vpop.f32.mrf.mxu3  ;;  %v1634_v59 = vshrl.u32 %v5398_v13, 16 }
 0x103   : > { %v1790_v0 = vpop.f32.mrf.mxu0  ;;  %v5991_v33 = vadd.f32 %v1788_v31, %v1478_v30  ;;  %v1287_v31 = vrot.slane %v5399_v21, 1  ;;  %v1636_v15 = vrot.slane %v1634_v59, 1 }
 0x105   : > { %v1288_v34 = vsel %vm872_vm2, %v1285_v53, %v1287_v31 }
 0x106   : > { %v1004_v47 = vpop.f32.mrf.mxu2 }
 0x107   : > { %v1090_v56 = vadd.f32 %v1004_v47, %v777_v14  ;;  %v1639_v14 = vrot.slane %v1637_v4, 2  ;;  %v896_v47 = vrot.slane %v5634_v43, 1 }
 0x108   : > { %v779_v27 = vpop.f32.mrf.mxu1 }
 0x109   : > { %v1479_v39 = vadd.f32 %v1393_v57, %v1090_v56  ;;  %v780_v29 = vadd.f32 %v779_v27, %v5885_v38  ;;  %v1403_v44 = vpop.f32.mrf.mxu3  ;;  %v1640_v13 = vor.u32 %v1639_v14, %v1636_v15  ;;  %v897_v53 = vsel %vm872_vm2, %v894_v54, %v896_v47 }
 0x10b   : > { %v1793_v1 = vpop.f32.mrf.mxu0  ;;  %4789 = vmatmul.msk.bf16.gmra.mxu1 %vm546_vm1, %v5572_v5  ;;  %4831 = vmatmul.msk.bf16.gmra.mxu2 %vm546_vm1, %v895_v42  ;;  %v6001_v24 = vadd.f32 %v1790_v0, %v1479_v39  ;;  %v5400_v39 = vld [vmem:[%s5563_s29 + $0x78] sm:$0xff]  ;;  %v1641_v59 = vsel %vm1525_vm3, %v1631_v49, %v1640_v13 }
 0x10e   : > { %4983 = vmatmul.msk.bf16.gmra.mxu0 %vm546_vm1, %v1632_v9  ;;  %v1007_v17 = vpop.f32.mrf.mxu2  ;;  %4943 = vmatmul.msk.bf16.gmra.mxu3 %vm546_vm1, %v1288_v34 }
 0x10f   : > { %v1091_v57 = vadd.f32 %v1007_v17, %v780_v29  ;;  %v1643_v17 = vshrl.u32 %v5399_v21, 16 }
 0x110   : > { %v781_v30 = vpop.f32.mrf.mxu1 }
 0x111   : > { %v1480_v35 = vadd.f32 %v1396_v51, %v1091_v57  ;;  %v782_v38 = vadd.f32 %v781_v30, %v5899_v20  ;;  %v1406_v56 = vpop.f32.mrf.mxu3  ;;  %v1646_v57 = vshll.u32 %v5399_v21, 16  ;;  %v1645_v15 = vrot.slane %v1643_v17, 1 }
 0x113   : > { %v1795_v5 = vpop.f32.mrf.mxu0  ;;  %v6007_v0 = vadd.f32 %v1793_v1, %v1480_v35  ;;  %v1289_v1 = vrot.slane %v5400_v39, 1  ;;  %v1648_v14 = vrot.slane %v1646_v57, 2 }
 0x115   : > { %v1290_v30 = vsel %vm872_vm2, %v1287_v31, %v1289_v1 }
 0x116   : > { %v1009_v27 = vpop.f32.mrf.mxu2 }
 0x117   : > { %v1092_v42 = vadd.f32 %v1009_v27, %v782_v38  ;;  %v1649_v38 = vor.u32 %v1648_v14, %v1645_v15 }
 0x118   : > { %v784_v9 = vpop.f32.mrf.mxu1 }
 0x119   : > { %v1481_v51 = vadd.f32 %v1398_v48, %v1092_v42  ;;  %v785_v20 = vadd.f32 %v784_v9, %v5911_v62  ;;  %v1408_v34 = vpop.f32.mrf.mxu3  ;;  %v5437_v62 = vld [vmem:[%s7143_s1 + $0xe0] sm:$0xff]  ;;  %v1650_v57 = vsel %vm1525_vm3, %v1640_v13, %v1649_v38  ;;  %v1652_v13 = vshrl.u32 %v5400_v39, 16 }
 0x11a   : > { %2831 = vmatpush.bf16.msra.mxu3 %v5437_v62 }
 0x11b   : > { %v1798_v29 = vpop.f32.mrf.mxu0  ;;  %4790 = vmatmul.msk.bf16.gmra.mxu1 %vm546_vm1, %v5575_v6  ;;  %4832 = vmatmul.msk.bf16.gmra.mxu2 %vm546_vm1, %v897_v53  ;;  %v6017_v4 = vadd.f32 %v1795_v5, %v1481_v51  ;;  %v5433_v5 = vld [vmem:[%s7143_s1 + $0xc0] sm:$0xff] }
 0x11c   : > { %2434 = vmatpush.bf16.msra.mxu2 %v5433_v5  ;;  %v5401_v53 = vld [vmem:[%s5563_s29 + $0x80] sm:$0xff]  ;;  %v1654_v5 = vrot.slane %v1652_v13, 1 }
 0x11d   : > { %v1661_v13 = vshrl.u32 %v5401_v53, 16 }
 0x11e   : > { %4984 = vmatmul.msk.bf16.gmra.mxu0 %vm546_vm1, %v1641_v59  ;;  %v1012_v54 = vpop.f32.mrf.mxu2  ;;  %4944 = vmatmul.msk.bf16.gmra.mxu3 %vm546_vm1, %v1290_v30 }
 0x11f   : > { %v1093_v48 = vadd.f32 %v1012_v54, %v785_v20 }
 0x120   : > { %v786_v49 = vpop.f32.mrf.mxu1 }
 0x121   : > { %v1482_v35 = vadd.f32 %v1401_v18, %v1093_v48  ;;  %v898_v18 = vrot.slane %v5680_v16, 1  ;;  %v787_v31 = vadd.f32 %v786_v49, %v5925_v7  ;;  %v1411_v27 = vpop.f32.mrf.mxu3  ;;  %v1291_v7 = vrot.slane %v5401_v53, 1 }
 0x122   : > { %v1655_v48 = vshll.u32 %v5400_v39, 16 }
 0x123   : > { %v1800_v6 = vpop.f32.mrf.mxu0  ;;  %v6029_v21 = vadd.f32 %v1798_v29, %v1482_v35  ;;  %v899_v59 = vsel %vm872_vm2, %v896_v47, %v898_v18  ;;  %v5412_v29 = vld [vmem:[%s7143_s1 + $0xa0] sm:$0xff]  ;;  %v1292_v35 = vsel %vm872_vm2, %v1289_v1, %v1291_v7 }
 0x124   : > { %2045 = vmatpush.bf16.msra.mxu1 %v5412_v29  ;;  %v1657_v62 = vrot.slane %v1655_v48, 2  ;;  %v1664_v48 = vshll.u32 %v5401_v53, 16 }
 0x126   : > { %v1014_v42 = vpop.f32.mrf.mxu2 }
 0x127   : > { %v1094_v9 = vadd.f32 %v1014_v42, %v787_v31  ;;  %v1658_v42 = vor.u32 %v1657_v62, %v1654_v5  ;;  %v5476_v5 = vld [vmem:[%s5563_s29 + $0x78] sm:$0xff] }
 0x128   : > { %v789_v51 = vpop.f32.mrf.mxu1  ;;  %v902_v62 = vrot.slane %v5476_v5, 1 }
 0x129   : > { %v1483_v20 = vadd.f32 %v1403_v44, %v1094_v9  ;;  %v5441_v44 = vld [vmem:[%s7143_s1 + $0x100] sm:$0xff]  ;;  %v790_v47 = vadd.f32 %v789_v51, %v5935_v41  ;;  %v1413_v30 = vpop.f32.mrf.mxu3  ;;  %v900_v41 = vrot.slane %v5731_v61, 1 }
 0x12a   : > { %3095 = vmatpush.bf16.msra.mxu0 %v5441_v44  ;;  %v1659_v44 = vsel %vm1525_vm3, %v1649_v38, %v1658_v42 }
 0x12b   : > { %v1803_v17 = vpop.f32.mrf.mxu0  ;;  %4791 = vmatmul.msk.bf16.gmra.mxu1 %vm546_vm1, %v5634_v43  ;;  %4833 = vmatmul.msk.bf16.gmra.mxu2 %vm546_vm1, %v899_v59  ;;  %v6042_v54 = vadd.f32 %v1800_v6, %v1483_v20  ;;  %v5402_v20 = vld [vmem:[%s5563_s29 + $0x88] sm:$0xff]  ;;  %v901_v1 = vsel %vm872_vm2, %v898_v18, %v900_v41 }
 0x12e   : > { %4985 = vmatmul.msk.bf16.gmra.mxu0 %vm546_vm1, %v1650_v57  ;;  %v1017_v49 = vpop.f32.mrf.mxu2  ;;  %4945 = vmatmul.msk.bf16.gmra.mxu3 %vm546_vm1, %v1292_v35 }
 0x12f   : > { %v1095_v43 = vadd.f32 %v1017_v49, %v790_v47 }
 0x130   : > { %v791_v6 = vpop.f32.mrf.mxu1 }
 0x131   : > { %v1484_v15 = vadd.f32 %v1406_v56, %v1095_v43  ;;  %v792_v39 = vadd.f32 %v791_v6, %v5953_v2  ;;  %v1416_v9 = vpop.f32.mrf.mxu3  ;;  %v1663_v6 = vrot.slane %v1661_v13, 1  ;;  %v1670_v13 = vshrl.u32 %v5402_v20, 16 }
 0x133   : > { %v1805_v14 = vpop.f32.mrf.mxu0  ;;  %v6051_v31 = vadd.f32 %v1803_v17, %v1484_v15  ;;  %v1293_v17 = vrot.slane %v5402_v20, 1  ;;  %v1666_v15 = vrot.slane %v1664_v48, 2 }
 0x135   : > { %v1294_v38 = vsel %vm872_vm2, %v1291_v7, %v1293_v17  ;;  %v1667_v53 = vor.u32 %v1666_v15, %v1663_v6  ;;  %v903_v7 = vsel %vm872_vm2, %v900_v41, %v902_v62  ;;  %v1673_v41 = vshll.u32 %v5402_v20, 16  ;;  %v5477_v20 = vld [vmem:[%s5563_s29 + $0x80] sm:$0xff] }
 0x136   : > { %v1019_v51 = vpop.f32.mrf.mxu2  ;;  %v904_v15 = vrot.slane %v5477_v20, 1 }
 0x137   : > { %v1096_v59 = vadd.f32 %v1019_v51, %v792_v39 }
 0x138   : > { %v794_v57 = vpop.f32.mrf.mxu1 }
 0x139   : > { %v1485_v56 = vadd.f32 %v1408_v34, %v1096_v59  ;;  %v795_v2 = vadd.f32 %v794_v57, %v5829_v52  ;;  %v1418_v18 = vpop.f32.mrf.mxu3  ;;  %v5403_v57 = vld [vmem:[%s5563_s29 + $0x90] sm:$0xff] }
 0x13b   : > { %v1808_v29 = vpop.f32.mrf.mxu0  ;;  %4792 = vmatmul.msk.bf16.gmra.mxu1 %vm546_vm1, %v5680_v16  ;;  %4834 = vmatmul.msk.bf16.gmra.mxu2 %vm546_vm1, %v901_v1  ;;  %v6061_v47 = vadd.f32 %v1805_v14, %v1485_v56 }
 0x13e   : > { %4986 = vmatmul.msk.bf16.gmra.mxu0 %vm546_vm1, %v1659_v44  ;;  %v1022_v34 = vpop.f32.mrf.mxu2  ;;  %4946 = vmatmul.msk.bf16.gmra.mxu3 %vm546_vm1, %v1294_v38  ;;  %v1668_v44 = vsel %vm1525_vm3, %v1658_v42, %v1667_v53 }
 0x13f   : > { %v1097_v49 = vadd.f32 %v1022_v34, %v795_v2 }
 0x140   : > { %v796_v43 = vpop.f32.mrf.mxu1 }
 0x141   : > { %v1486_v16 = vadd.f32 %v1411_v27, %v1097_v49  ;;  %v797_v52 = vadd.f32 %v796_v43, %v5845_v60  ;;  %v1421_v39 = vpop.f32.mrf.mxu3 }
 0x143   : > { %v1810_v35 = vpop.f32.mrf.mxu0  ;;  %v6067_v14 = vadd.f32 %v1808_v29, %v1486_v16  ;;  %v1295_v29 = vrot.slane %v5403_v57, 1  ;;  %v1672_v16 = vrot.slane %v1670_v13, 1 }
 0x145   : > { %v1296_v42 = vsel %vm872_vm2, %v1293_v17, %v1295_v29 }
 0x146   : > { %v1024_v51 = vpop.f32.mrf.mxu2 }
 0x147   : > { %v1098_v59 = vadd.f32 %v1024_v51, %v797_v52 }
 0x148   : > { %v799_v1 = vpop.f32.mrf.mxu1 }
 0x149   : > { %v1487_v27 = vadd.f32 %v1413_v30, %v1098_v59  ;;  %v800_v2 = vadd.f32 %v799_v1, %v5856_v11  ;;  %v6081_v30 = vpop.f32.mrf.mxu3 }
 0x14b   : > { %v1813_v56 = vpop.f32.mrf.mxu0  ;;  %4793 = vmatmul.msk.bf16.gmra.mxu1 %vm546_vm1, %v5731_v61  ;;  %4835 = vmatmul.msk.bf16.gmra.mxu2 %vm546_vm1, %v903_v7  ;;  %v6077_v60 = vadd.f32 %v1810_v35, %v1487_v27  ;;  %v1159_v61 = vld [vmem:[%s5563_s29 + $0x98] sm:$0x1]  ;;  %v1675_v35 = vrot.slane %v1673_v41, 2  ;;  %v905_v27 = vsel %vm872_vm2, %v902_v62, %v904_v15  ;;  %v2173_v41 = vld [vmem:[%s5563_s29 + $0x10] sm:$0xc]  ;;  %v1679_v62 = vshrl.u32 %v5403_v57, 16 }
 0x14c   : > { %v1242_v6 = vunpack.c.l.b16 %v1159_v61 }
 0x14d   : > { %v1676_v51 = vor.u32 %v1675_v35, %v1672_v16 }
 0x14e   : > { %4987 = vmatmul.msk.bf16.gmra.mxu0 %vm546_vm1, %v1668_v44  ;;  %v1027_v48 = vpop.f32.mrf.mxu2  ;;  %4947 = vmatmul.msk.bf16.gmra.mxu3 %vm546_vm1, %v1296_v42 }
 0x14f   : > { %v1099_v34 = vadd.f32 %v1027_v48, %v800_v2  ;;  %v1677_v13 = vsel %vm1525_vm3, %v1667_v53, %v1676_v51  ;;  %v2256_v48 = vunpack.c.l.b16 %v2173_v41  ;;  %v1682_v53 = vshll.u32 %v5403_v57, 16  ;;  %v1512_v57 = vld [vmem:[%s5563_s29 + $0x98] sm:$0x3] }
 0x150   : > { %v801_v49 = vpop.f32.mrf.mxu1 }
 0x151   : > { %v1488_v38 = vadd.f32 %v1416_v9, %v1099_v34  ;;  %v802_v52 = vadd.f32 %v801_v49, %v5871_v28  ;;  %v6090_v59 = vpop.f32.mrf.mxu3  ;;  %v1261_v9 = vpack.c.b16 %v1242_v6, %v1242_v6 }
 0x153   : > { %v1815_v43 = vpop.f32.mrf.mxu0  ;;  %v6086_v11 = vadd.f32 %v1813_v56, %v1488_v38  ;;  %v6096_v56 = vld [vmem:[%s5563_s29 + $0x14] sm:$0xf]  ;;  %v1297_v34 = vrot.slane %v1261_v9, 1 }
 0x154   : > { %v7149_v28 = vunpack.c.l.b16 %v6096_v56 }
 0x155   : > { %v1298_v16 = vsel %vm872_vm2, %v1295_v29, %v1297_v34  ;;  %v5478_v29 = vld [vmem:[%s5563_s29 + $0x88] sm:$0xff]  ;;  %v1523_v34 = vunpack.c.l.b16 %v1512_v57 }
 0x156   : > { %v1029_v17 = vpop.f32.mrf.mxu2  ;;  %v6109_v38 = vpack.c.b16 %v7149_v28, %v2256_v48 }
 0x157   : > { %v1100_v1 = vadd.f32 %v1029_v17, %v802_v52  ;;  %v1681_v17 = vrot.slane %v1679_v62, 1 }
 0x158   : > { %v804_v7 = vpop.f32.mrf.mxu1  ;;  %v2580_v9 = vshll.u32 %v6109_v38, 16 }
 0x159   : > { %v1489_v44 = vadd.f32 %v1418_v18, %v1100_v1  ;;  %v805_v18 = vadd.f32 %v804_v7, %v5882_v8  ;;  %v6105_v49 = vpop.f32.mrf.mxu3  ;;  %v1684_v8 = vrot.slane %v1682_v53, 2  ;;  %v2577_v1 = vshrl.u32 %v6109_v38, 16 }
 0x15b   : > { %v1818_v2 = vpop.f32.mrf.mxu0  ;;  %4794 = vmatmul.msk.bf16.gmra.mxu1 %vm546_vm1, %v5476_v5  ;;  %4836 = vmatmul.msk.bf16.gmra.mxu2 %vm546_vm1, %v905_v27  ;;  %v6101_v42 = vadd.f32 %v1815_v43, %v1489_v44  ;;  %v6113_v43 = vld [vmem:[%s5563_s29 + $0x18] sm:$0xff]  ;;  %v1685_v41 = vor.u32 %v1684_v8, %v1681_v17  ;;  %v2579_v62 = vrot.slane %v2577_v1, 2 }
 0x15c   : > { %v2585_v7 = vshrl.u32 %v6113_v43, 16  ;;  %v2588_v27 = vshll.u32 %v6113_v43, 16 }
 0x15d   : > { %7160 = vst [vmem:[#allocation9_spill] sm:$0xff] %v6101_v42 }
 0x15e   : > { %4988 = vmatmul.msk.bf16.gmra.mxu0 %vm546_vm1, %v1677_v13  ;;  %v1032_v61 = vpop.f32.mrf.mxu2  ;;  %4948 = vmatmul.msk.bf16.gmra.mxu3 %vm546_vm1, %v1298_v16  ;;  %v906_v13 = vrot.slane %v5478_v29, 1  ;;  %v2590_v16 = vrot.slane %v2588_v27, 3 }
 0x15f   : > { %v1101_v5 = vadd.f32 %v1032_v61, %v805_v18  ;;  %v2582_v61 = vrot.slane %v2580_v9, 3 }
 0x160   : > { %v806_v35 = vpop.f32.mrf.mxu1  ;;  %v907_v42 = vsel %vm872_vm2, %v904_v15, %v906_v13 }
 0x161   : > { %v1490_v6 = vadd.f32 %v1421_v39, %v1101_v5  ;;  %v807_v39 = vadd.f32 %v806_v35, %v5897_v50  ;;  %v6125_v48 = vpop.f32.mrf.mxu3  ;;  %v2587_v5 = vrot.slane %v2585_v7, 2  ;;  %v6130_v50 = vpack.c.b16 %v1523_v34, %v1523_v34 }
 0x162   : > { %v2583_v35 = vor.u32 %v2582_v61, %v2579_v62 }
 0x163   : > { %v1820_v52 = vpop.f32.mrf.mxu0  ;;  %v6121_v44 = vadd.f32 %v1818_v2, %v1490_v6  ;;  %v2591_v17 = vor.u32 %v2590_v16, %v2587_v5 }
 0x165   : > { %7161 = vst [vmem:[#allocation10_spill] sm:$0xff] %v6121_v44  ;;  %v1686_v44 = vsel %vm1525_vm3, %v1676_v51, %v1685_v41  ;;  %v1691_v51 = vshll.u32 %v6130_v50, 16 }
 0x166   : > { %v1034_v18 = vpop.f32.mrf.mxu2 }
 0x167   : > { %v1102_v53 = vadd.f32 %v1034_v18, %v807_v39  ;;  %v1693_v39 = vrot.slane %v1691_v51, 2  ;;  %v908_v18 = vrot.slane %v5715_v40, 1  ;;  %v2959_v40 = vld [vmem:[%s5563_s29 + $0x10] sm:$0x8] }
 0x168   : > { %v809_v28 = vpop.f32.mrf.mxu1 }
 0x169   : > { %v1491_v2 = vadd.f32 %v6081_v30, %v1102_v53  ;;  %v810_v15 = vadd.f32 %v809_v28, %v5908_v58  ;;  %v1688_v30 = vshrl.u32 %v6130_v50, 16  ;;  %v6140_v57 = vpop.f32.mrf.mxu3 }
 0x16b   : > { %v1823_v6 = vpop.f32.mrf.mxu0  ;;  %4795 = vmatmul.msk.bf16.gmra.mxu1 %vm546_vm1, %v5477_v20  ;;  %4837 = vmatmul.msk.bf16.gmra.mxu2 %vm546_vm1, %v907_v42  ;;  %v6134_v8 = vadd.f32 %v1820_v52, %v1491_v2  ;;  %v2592_v20 = vsel %vm2575_vm4, %v2583_v35, %v2591_v17  ;;  %v6144_v42 = vld [vmem:[%s5563_s29 + $0x20] sm:$0xff] }
 0x16c   : > { %v2594_v58 = vshrl.u32 %v6144_v42, 16  ;;  %v2597_v28 = vshll.u32 %v6144_v42, 16 }
 0x16e   : > { %4989 = vmatmul.msk.bf16.gmra.mxu0 %vm546_vm1, %v1686_v44  ;;  %v1037_v1 = vpop.f32.mrf.mxu2  ;;  %v1690_v44 = vrot.slane %v1688_v30, 1  ;;  %5167 = vmatmul.msk.bf16.vlgmr.msra.gmra.mxu3 %vm546_vm1, %v2592_v20  ;;  %v2596_v16 = vrot.slane %v2594_v58, 2  ;;  %v2599_v2 = vrot.slane %v2597_v28, 3  ;;  %v7162_v58 = vunpack.c.l.b16 %v5747_v12 }
 0x16f   : > { %v1103_v9 = vadd.f32 %v1037_v1, %v810_v15  ;;  %v909_v15 = vsel %vm872_vm2, %v906_v13, %v908_v18  ;;  %v1909_v1 = vld [vmem:[%s5563_s29 + $0x8] sm:$0xc]  ;;  %v2312_v12 = vrot.slane %v6109_v38, 2  ;;  %vm4463_vm2 = vcmask 1046534  }
 0x170   : > { %v811_v7 = vpop.f32.mrf.mxu1  ;;  %v1694_v53 = vor.u32 %v1693_v39, %v1690_v44  ;;  %v1920_v20 = vunpack.c.l.b16 %v1909_v1  ;;  %v6171_v39 = vld [vmem:[%s5563_s29 + $0x28] sm:$0xff] }
 0x171   : > { %v1492_v52 = vadd.f32 %v6090_v59, %v1103_v9  ;;  %v812_v62 = vadd.f32 %v811_v7, %v5923_v23  ;;  %v6154_v61 = vpop.f32.mrf.mxu3  ;;  %v2600_v23 = vor.u32 %v2599_v2, %v2596_v16  ;;  %v2970_v7 = vunpack.c.l.b16 %v2959_v40  ;;  %v5479_v16 = vld [vmem:[%s5563_s29 + $0x10] sm:$0xff] }
 0x172   : > { %v1924_v2 = vrot.slane %v5479_v16, 2 }
 0x173   : > { %v1825_v27 = vpop.f32.mrf.mxu0  ;;  %v6150_v34 = vadd.f32 %v1823_v6, %v1492_v52  ;;  %v1695_v6 = vsel %vm1525_vm3, %v1685_v41, %v1694_v53  ;;  %v2601_v44 = vsel %vm2575_vm4, %v2591_v17, %v2600_v23  ;;  %v2603_v53 = vshrl.u32 %v6171_v39, 16 }
 0x174   : > { %vm4466_vm3 = vcmask 1047559  }
 0x175   : > { %v2605_v40 = vrot.slane %v2603_v53, 2 }
 0x176   : > { %v1039_v59 = vpop.f32.mrf.mxu2 }
 0x177   : > { %v1104_v5 = vadd.f32 %v1039_v59, %v812_v62  ;;  %v7163_v62 = vunpack.c.l.b16 %v6096_v56  ;;  %v2606_v59 = vshll.u32 %v6171_v39, 16 }
 0x178   : > { %v814_v35 = vpop.f32.mrf.mxu1 }
 0x179   : > { %v1493_v30 = vadd.f32 %v6105_v49, %v1104_v5  ;;  %v815_v13 = vadd.f32 %v814_v35, %v5932_v37  ;;  %v6167_v49 = vpop.f32.mrf.mxu3  ;;  %v2971_v37 = vpack.c.b16 %v7163_v62, %v2970_v7  ;;  %v2313_v35 = vrot.slane %v6113_v43, 2 }
 0x17b   : > { %v1828_v51 = vpop.f32.mrf.mxu0  ;;  %4796 = vmatmul.msk.bf16.gmra.mxu1 %vm546_vm1, %v5478_v29  ;;  %4838 = vmatmul.msk.bf16.gmra.mxu2 %vm546_vm1, %v909_v15  ;;  %v6163_v9 = vadd.f32 %v1825_v27, %v1493_v30  ;;  %v1921_v27 = vpack.c.b16 %v7162_v58, %v1920_v20  ;;  %v2973_v56 = vrot.slane %v2971_v37, 3  ;;  %v2974_v15 = vrot.slane %v6113_v43, 3 }
 0x17c   : > { %v2314_v38 = vsel %vm1922_vm5, %v2312_v12, %v2313_v35  ;;  %v2315_v12 = vrot.slane %v6144_v42, 2 }
 0x17d   : > { %v1923_v17 = vrot.slane %v1921_v27, 2 }
 0x17e   : > { %4990 = vmatmul.msk.bf16.gmra.mxu0 %vm546_vm1, %v1695_v6  ;;  %v1042_v52 = vpop.f32.mrf.mxu2  ;;  %5168 = vmatmul.msk.bf16.gmra.mxu3 %vm546_vm1, %v2601_v44 }
 0x17f   : > { %v1105_v41 = vadd.f32 %v1042_v52, %v815_v13  ;;  %v1925_v13 = vsel %vm1922_vm5, %v1923_v17, %v1924_v2 }
 0x180   : > { %v816_v29 = vpop.f32.mrf.mxu1 }
 0x181   : > { %v1494_v28 = vadd.f32 %v6125_v48, %v1105_v41  ;;  %v817_v48 = vadd.f32 %v816_v29, %v5951_v63  ;;  %v1441_v30 = vpop.f32.mrf.mxu3  ;;  %v2975_v63 = vsel %vm2972_vm6, %v2973_v56, %v2974_v15 }
 0x183   : > { %v1830_v18 = vpop.f32.mrf.mxu0  ;;  %v6181_v5 = vadd.f32 %v1828_v51, %v1494_v28  ;;  %v2608_v51 = vrot.slane %v2606_v59, 3  ;;  %v6200_v28 = vld [vmem:[%s5563_s29 + $0x30] sm:$0xff] }
 0x184   : > { %v2615_v59 = vshll.u32 %v6200_v28, 16 }
 0x185   : > { %v2609_v43 = vor.u32 %v2608_v51, %v2605_v40 }
 0x186   : > { %v1044_v6 = vpop.f32.mrf.mxu2  ;;  %v2617_v40 = vrot.slane %v2615_v59, 3  ;;  %v2317_v59 = vrot.slane %v6171_v39, 2 }
 0x187   : > { %v1106_v1 = vadd.f32 %v1044_v6, %v817_v48  ;;  %v2976_v48 = vrot.slane %v6144_v42, 3 }
 0x188   : > { %v819_v20 = vpop.f32.mrf.mxu1 }
 0x189   : > { %v1495_v7 = vadd.f32 %v6140_v57, %v1106_v1  ;;  %v820_v44 = vadd.f32 %v819_v20, %v5842_v36  ;;  %v1443_v29 = vpop.f32.mrf.mxu3  ;;  %v2610_v57 = vsel %vm2575_vm4, %v2600_v23, %v2609_v43  ;;  %v5480_v36 = vld [vmem:[%s5563_s29 + $0x18] sm:$0xff] }
 0x18a   : > { %v1926_v16 = vrot.slane %v5480_v36, 2 }
 0x18b   : > { %v1833_v52 = vpop.f32.mrf.mxu0  ;;  %5015 = vmatmul.msk.bf16.vlgmr.msra.gmra.mxu1 %vm546_vm1, %v1925_v13  ;;  %5125 = vmatmul.msk.bf16.vlgmr.msra.gmra.mxu2 %vm546_vm1, %v2314_v38  ;;  %v6194_v41 = vadd.f32 %v1830_v18, %v1495_v7  ;;  %v2612_v18 = vshrl.u32 %v6200_v28, 16  ;;  %v2316_v13 = vsel %vm1922_vm5, %v2313_v35, %v2315_v12 }
 0x18c   : > { %v1927_v20 = vsel %vm1922_vm5, %v1924_v2, %v1926_v16 }
 0x18d   : > { %v2614_v1 = vrot.slane %v2612_v18, 2  ;;  %v5481_v18 = vld [vmem:[%s5563_s29 + $0x20] sm:$0xff] }
 0x18e   : > { %5209 = vmatmul.msk.bf16.vlgmr.msra.gmra.mxu0 %vm546_vm1, %v2975_v63  ;;  %v1047_v58 = vpop.f32.mrf.mxu2  ;;  %5169 = vmatmul.msk.bf16.gmra.mxu3 %vm546_vm1, %v2610_v57 }
 0x18f   : > { %v1107_v27 = vadd.f32 %v1047_v58, %v820_v44  ;;  %v6224_v58 = vld [vmem:[%s5563_s29 + $0x38] sm:$0xff] }
 0x190   : > { %v821_v62 = vpop.f32.mrf.mxu1 }
 0x191   : > { %v1496_v37 = vadd.f32 %v6154_v61, %v1107_v27  ;;  %v822_v23 = vadd.f32 %v821_v62, %v5853_v10  ;;  %v1446_v56 = vpop.f32.mrf.mxu3  ;;  %v2618_v10 = vor.u32 %v2617_v40, %v2614_v1  ;;  %v2621_v62 = vshrl.u32 %v6224_v58, 16 }
 0x193   : > { %v1835_v53 = vpop.f32.mrf.mxu0  ;;  %v6206_v17 = vadd.f32 %v1833_v52, %v1496_v37  ;;  %v2977_v52 = vsel %vm2972_vm6, %v2974_v15, %v2976_v48  ;;  %v2624_v37 = vshll.u32 %v6224_v58, 16 }
 0x195   : > { %7164 = vst [vmem:[#allocation11_spill] sm:$0xff] %v6206_v17  ;;  %v2626_v1 = vrot.slane %v2624_v37, 3  ;;  %v2319_v37 = vrot.slane %v6200_v28, 2 }
 0x196   : > { %v1049_v6 = vpop.f32.mrf.mxu2 }
 0x197   : > { %v1108_v61 = vadd.f32 %v1049_v6, %v822_v23 }
 0x198   : > { %v824_v51 = vpop.f32.mrf.mxu1 }
 0x199   : > { %v1497_v38 = vadd.f32 %v6167_v49, %v1108_v61  ;;  %v825_v63 = vadd.f32 %v824_v51, %v5868_v25  ;;  %v1448_v2 = vpop.f32.mrf.mxu3  ;;  %v2619_v49 = vsel %vm2575_vm4, %v2609_v43, %v2618_v10  ;;  %v1928_v25 = vrot.slane %v5481_v18, 2 }
 0x19a   : > { %v2978_v43 = vrot.slane %v6171_v39, 3  ;;  %v2623_v61 = vrot.slane %v2621_v62, 2  ;;  %v5482_v62 = vld [vmem:[%s5563_s29 + $0x28] sm:$0xff] }
 0x19b   : > { %v1838_v7 = vpop.f32.mrf.mxu0  ;;  %5016 = vmatmul.msk.bf16.gmra.mxu1 %vm546_vm1, %v1927_v20  ;;  %5126 = vmatmul.msk.bf16.gmra.mxu2 %vm546_vm1, %v2316_v13  ;;  %v6218_v42 = vadd.f32 %v1835_v53, %v1497_v38  ;;  %v1929_v51 = vsel %vm1922_vm5, %v1926_v16, %v1928_v25  ;;  %v2318_v20 = vsel %vm1922_vm5, %v2315_v12, %v2317_v59  ;;  %v6246_v12 = vld [vmem:[%s5563_s29 + $0x40] sm:$0xff] }
 0x19d   : > { %7165 = vst [vmem:[#allocation12_spill] sm:$0xff] %v6218_v42 }
 0x19e   : > { %5210 = vmatmul.msk.bf16.gmra.mxu0 %vm546_vm1, %v2977_v52  ;;  %v1052_v44 = vpop.f32.mrf.mxu2  ;;  %5170 = vmatmul.msk.bf16.gmra.mxu3 %vm546_vm1, %v2619_v49 }
 0x19f   : > { %v1109_v35 = vadd.f32 %v1052_v44, %v825_v63 }
 0x1a0   : > { %v826_v15 = vpop.f32.mrf.mxu1 }
 0x1a1   : > { %v1498_v27 = vadd.f32 %v1441_v30, %v1109_v35  ;;  %v827_v36 = vadd.f32 %v826_v15, %v5879_v22  ;;  %v1451_v23 = vpop.f32.mrf.mxu3  ;;  %v2627_v22 = vor.u32 %v2626_v1, %v2623_v61  ;;  %v2630_v15 = vshrl.u32 %v6246_v12, 16 }
 0x1a3   : > { %v1840_v57 = vpop.f32.mrf.mxu0  ;;  %v6229_v53 = vadd.f32 %v1838_v7, %v1498_v27  ;;  %v2979_v7 = vsel %vm2972_vm6, %v2976_v48, %v2978_v43  ;;  %v2633_v27 = vshll.u32 %v6246_v12, 16 }
 0x1a5   : > { %7166 = vst [vmem:[#allocation13_spill] sm:$0xff] %v6229_v53  ;;  %v2635_v61 = vrot.slane %v2633_v27, 3  ;;  %v2321_v27 = vrot.slane %v6224_v58, 2 }
 0x1a6   : > { %v1054_v6 = vpop.f32.mrf.mxu2 }
 0x1a7   : > { %v1110_v30 = vadd.f32 %v1054_v6, %v827_v36 }
 0x1a8   : > { %v829_v40 = vpop.f32.mrf.mxu1 }
 0x1a9   : > { %v1499_v13 = vadd.f32 %v1443_v29, %v1110_v30  ;;  %v830_v52 = vadd.f32 %v829_v40, %v5894_v45  ;;  %v1453_v63 = vpop.f32.mrf.mxu3  ;;  %v2628_v29 = vsel %vm2575_vm4, %v2618_v10, %v2627_v22  ;;  %v1930_v45 = vrot.slane %v5482_v62, 2 }
 0x1aa   : > { %v2980_v10 = vrot.slane %v6200_v28, 3  ;;  %v2632_v30 = vrot.slane %v2630_v15, 2  ;;  %v5483_v15 = vld [vmem:[%s5563_s29 + $0x30] sm:$0xff] }
 0x1ab   : > { %v1843_v38 = vpop.f32.mrf.mxu0  ;;  %5017 = vmatmul.msk.bf16.gmra.mxu1 %vm546_vm1, %v1929_v51  ;;  %5127 = vmatmul.msk.bf16.gmra.mxu2 %vm546_vm1, %v2318_v20  ;;  %v6240_v39 = vadd.f32 %v1840_v57, %v1499_v13  ;;  %v1931_v40 = vsel %vm1922_vm5, %v1928_v25, %v1930_v45  ;;  %v2320_v51 = vsel %vm1922_vm5, %v2317_v59, %v2319_v37  ;;  %v6268_v59 = vld [vmem:[%s5563_s29 + $0x48] sm:$0xff] }
 0x1ad   : > { %7167 = vst [vmem:[#allocation14_spill] sm:$0xff] %v6240_v39 }
 0x1ae   : > { %5211 = vmatmul.msk.bf16.gmra.mxu0 %vm546_vm1, %v2979_v7  ;;  %v1057_v16 = vpop.f32.mrf.mxu2  ;;  %5171 = vmatmul.msk.bf16.gmra.mxu3 %vm546_vm1, %v2628_v29 }
 0x1af   : > { %v1111_v44 = vadd.f32 %v1057_v16, %v830_v52 }
 0x1b0   : > { %v831_v48 = vpop.f32.mrf.mxu1 }
 0x1b1   : > { %v1500_v35 = vadd.f32 %v1446_v56, %v1111_v44  ;;  %v832_v18 = vadd.f32 %v831_v48, %v5905_v46  ;;  %v1456_v36 = vpop.f32.mrf.mxu3  ;;  %v2636_v46 = vor.u32 %v2635_v61, %v2632_v30  ;;  %v2639_v48 = vshrl.u32 %v6268_v59, 16 }
 0x1b3   : > { %v1845_v49 = vpop.f32.mrf.mxu0  ;;  %v6251_v57 = vadd.f32 %v1843_v38, %v1500_v35  ;;  %v2981_v38 = vsel %vm2972_vm6, %v2978_v43, %v2980_v10  ;;  %v2642_v35 = vshll.u32 %v6268_v59, 16 }
 0x1b5   : > { %7168 = vst [vmem:[#allocation15_spill] sm:$0xff] %v6251_v57  ;;  %v2644_v30 = vrot.slane %v2642_v35, 3  ;;  %v2323_v35 = vrot.slane %v6246_v12, 2 }
 0x1b6   : > { %v1059_v6 = vpop.f32.mrf.mxu2 }
 0x1b7   : > { %v1112_v56 = vadd.f32 %v1059_v6, %v832_v18 }
 0x1b8   : > { %v834_v1 = vpop.f32.mrf.mxu1 }
 0x1b9   : > { %v1501_v20 = vadd.f32 %v1448_v2, %v1112_v56  ;;  %v835_v7 = vadd.f32 %v834_v1, %v5920_v19  ;;  %v1458_v52 = vpop.f32.mrf.mxu3  ;;  %v2637_v2 = vsel %vm2575_vm4, %v2627_v22, %v2636_v46  ;;  %v1932_v19 = vrot.slane %v5483_v15, 2  ;;  %v7173_v15 = vld [vmem:[#allocation8_spill] sm:$0xff] }
 0x1ba   : > { %v2982_v22 = vrot.slane %v6224_v58, 3  ;;  %v2641_v56 = vrot.slane %v2639_v48, 2  ;;  %v5484_v48 = vld [vmem:[%s5563_s29 + $0x38] sm:$0xff] }
 0x1bb   : > { %v1848_v13 = vpop.f32.mrf.mxu0  ;;  %5018 = vmatmul.msk.bf16.gmra.mxu1 %vm546_vm1, %v1931_v40  ;;  %5128 = vmatmul.msk.bf16.gmra.mxu2 %vm546_vm1, %v2320_v51  ;;  %v6262_v28 = vadd.f32 %v1845_v49, %v1501_v20  ;;  %v1933_v1 = vsel %vm1922_vm5, %v1930_v45, %v1932_v19  ;;  %v2322_v40 = vsel %vm1922_vm5, %v2319_v37, %v2321_v27  ;;  %v6290_v37 = vld [vmem:[%s5563_s29 + $0x50] sm:$0xff] }
 0x1bd   : > { %7169 = vst [vmem:[#allocation16_spill] sm:$0xff] %v6262_v28 }
 0x1be   : > { %5212 = vmatmul.msk.bf16.gmra.mxu0 %vm546_vm1, %v2981_v38  ;;  %v1062_v25 = vpop.f32.mrf.mxu2  ;;  %5172 = vmatmul.msk.bf16.gmra.mxu3 %vm546_vm1, %v2637_v2 }
 0x1bf   : > { %v1113_v16 = vadd.f32 %v1062_v25, %v835_v7 }
 0x1c0   : > { %v836_v43 = vpop.f32.mrf.mxu1 }
 0x1c1   : > { %v1502_v44 = vadd.f32 %v1451_v23, %v1113_v16  ;;  %v837_v62 = vadd.f32 %v836_v43, %v5929_v32  ;;  %v1461_v18 = vpop.f32.mrf.mxu3  ;;  %v2645_v32 = vor.u32 %v2644_v30, %v2641_v56  ;;  %v2648_v43 = vshrl.u32 %v6290_v37, 16 }
 0x1c3   : > { %v1850_v29 = vpop.f32.mrf.mxu0  ;;  %v6273_v49 = vadd.f32 %v1848_v13, %v1502_v44  ;;  %v2983_v13 = vsel %vm2972_vm6, %v2980_v10, %v2982_v22  ;;  %v2651_v44 = vshll.u32 %v6290_v37, 16  ;;  %v2650_v56 = vrot.slane %v2648_v43, 2 }
 0x1c5   : > { %7170 = vst [vmem:[#allocation17_spill] sm:$0xff] %v6273_v49  ;;  %v2653_v30 = vrot.slane %v2651_v44, 3 }
 0x1c6   : > { %v1064_v6 = vpop.f32.mrf.mxu2 }
 0x1c7   : > { %v1114_v23 = vadd.f32 %v1064_v6, %v837_v62 }
 0x1c8   : > { %v839_v61 = vpop.f32.mrf.mxu1 }
 0x1c9   : > { %v1503_v51 = vadd.f32 %v1453_v63, %v1114_v23  ;;  %v840_v38 = vadd.f32 %v839_v61, %v5948_v55  ;;  %v1463_v7 = vpop.f32.mrf.mxu3  ;;  %v2646_v63 = vsel %vm2575_vm4, %v2636_v46, %v2645_v32  ;;  %v1934_v55 = vrot.slane %v5484_v48, 2 }
 0x1ca   : > { %v2984_v46 = vrot.slane %v6246_v12, 3  ;;  %v2654_v12 = vor.u32 %v2653_v30, %v2650_v56 }
 0x1cb   : > { %v1853_v20 = vpop.f32.mrf.mxu0  ;;  %5019 = vmatmul.msk.bf16.gmra.mxu1 %vm546_vm1, %v1933_v1  ;;  %5129 = vmatmul.msk.bf16.gmra.mxu2 %vm546_vm1, %v2322_v40  ;;  %v6284_v58 = vadd.f32 %v1850_v29, %v1503_v51  ;;  %v1935_v1 = vsel %vm1922_vm5, %v1932_v19, %v1934_v55  ;;  %v2324_v40 = vsel %vm1922_vm5, %v2321_v27, %v2323_v35  ;;  %v6312_v27 = vld [vmem:[%s5563_s29 + $0x58] sm:$0xff] }
 0x1cc   : > { %v2657_v44 = vshrl.u32 %v6312_v27, 16 }
 0x1cd   : > { %7171 = vst [vmem:[#allocation18_spill] sm:$0xff] %v6284_v58 }
 0x1ce   : > { %5213 = vmatmul.msk.bf16.gmra.mxu0 %vm546_vm1, %v2983_v13  ;;  %v1067_v45 = vpop.f32.mrf.mxu2  ;;  %5173 = vmatmul.msk.bf16.gmra.mxu3 %vm546_vm1, %v2646_v63  ;;  %v2985_v13 = vsel %vm2972_vm6, %v2982_v22, %v2984_v46 }
 0x1cf   : > { %v1115_v25 = vadd.f32 %v1067_v45, %v840_v38  ;;  %v7175_v45 = vld [vmem:[#allocation2_spill] sm:$0xff] }
 0x1d0   : > { %v841_v10 = vpop.f32.mrf.mxu1 }
 0x1d1   : > { %v1504_v16 = vadd.f32 %v1456_v36, %v1115_v25  ;;  %v842_v62 = vadd.f32 %v841_v10, %v7173_v15  ;;  %v1466_v6 = vpop.f32.mrf.mxu3  ;;  %v5485_v15 = vld [vmem:[%s5563_s29 + $0x40] sm:$0xff] }
 0x1d3   : > { %v1855_v2 = vpop.f32.mrf.mxu0  ;;  %v6295_v29 = vadd.f32 %v1853_v20, %v1504_v16 }
 0x1d5   : > { %7172 = vst [vmem:[#allocation19_spill] sm:$0xff] %v6295_v29  ;;  %v6451_v29 = vld [vmem:[%s5563_s29 + $0x78] sm:$0xff] }
 0x1d6   : > { %v1069_v23 = vpop.f32.mrf.mxu2 }
 0x1d7   : > { %v1116_v36 = vadd.f32 %v1069_v23, %v842_v62  ;;  %v1936_v62 = vrot.slane %v5485_v15, 2  ;;  %v2325_v23 = vrot.slane %v6268_v59, 2 }
 0x1d8   : > { %v844_v61 = vpop.f32.mrf.mxu1 }
 0x1d9   : > { %v1505_v51 = vadd.f32 %v1458_v52, %v1116_v36  ;;  %v845_v25 = vadd.f32 %v844_v61, %v7175_v45  ;;  %v1468_v63 = vpop.f32.mrf.mxu3  ;;  %v2655_v52 = vsel %vm2575_vm4, %v2645_v32, %v2654_v12  ;;  %v7177_v36 = vld [vmem:[#allocation3_spill] sm:$0xff]  ;;  %v2986_v32 = vrot.slane %v6268_v59, 3 }
 0x1db   : > { %v1858_v20 = vpop.f32.mrf.mxu0  ;;  %5020 = vmatmul.msk.bf16.gmra.mxu1 %vm546_vm1, %v1935_v1  ;;  %5130 = vmatmul.msk.bf16.gmra.mxu2 %vm546_vm1, %v2324_v40  ;;  %v6306_v38 = vadd.f32 %v1855_v2, %v1505_v51  ;;  %v2660_v2 = vshll.u32 %v6312_v27, 16  ;;  %v2659_v1 = vrot.slane %v2657_v44, 2 }
 0x1dd   : > { %7174 = vst [vmem:[#allocation8_spill] sm:$0xff] %v6306_v38  ;;  %v2662_v40 = vrot.slane %v2660_v2, 3 }
 0x1de   : > { %5214 = vmatmul.msk.bf16.gmra.mxu0 %vm546_vm1, %v2985_v13  ;;  %v1072_v19 = vpop.f32.mrf.mxu2  ;;  %5174 = vmatmul.msk.bf16.gmra.mxu3 %vm546_vm1, %v2655_v52  ;;  %v1937_v13 = vsel %vm1922_vm5, %v1934_v55, %v1936_v62  ;;  %v7179_v52 = vld [vmem:[#allocation4_spill] sm:$0xff] }
 0x1df   : > { %v1117_v10 = vadd.f32 %v1072_v19, %v845_v25  ;;  %v2987_v19 = vsel %vm2972_vm6, %v2984_v46, %v2986_v32  ;;  %v2663_v59 = vor.u32 %v2662_v40, %v2659_v1  ;;  %v2327_v1 = vrot.slane %v6290_v37, 2  ;;  %v7181_v40 = vld [vmem:[#allocation5_spill] sm:$0xff] }
 0x1e0   : > { %v846_v22 = vpop.f32.mrf.mxu1 }
 0x1e1   : > { %v1506_v16 = vadd.f32 %v1461_v18, %v1117_v10  ;;  %v847_v56 = vadd.f32 %v846_v22, %v7177_v36  ;;  %v1471_v30 = vpop.f32.mrf.mxu3 }
 0x1e3   : > { %v1860_v43 = vpop.f32.mrf.mxu0  ;;  %v6317_v48 = vadd.f32 %v1858_v20, %v1506_v16  ;;  %v2326_v20 = vsel %vm1922_vm5, %v2323_v35, %v2325_v23  ;;  %v6334_v35 = vld [vmem:[%s5563_s29 + $0x60] sm:$0xff] }
 0x1e4   : > { %v2666_v36 = vshrl.u32 %v6334_v35, 16 }
 0x1e5   : > { %7176 = vst [vmem:[#allocation2_spill] sm:$0xff] %v6317_v48 }
 0x1e6   : > { %v1074_v61 = vpop.f32.mrf.mxu2 }
 0x1e7   : > { %v1118_v18 = vadd.f32 %v1074_v61, %v847_v56  ;;  %v5486_v61 = vld [vmem:[%s5563_s29 + $0x48] sm:$0xff] }
 0x1e8   : > { %v849_v51 = vpop.f32.mrf.mxu1 }
 0x1e9   : > { %v1507_v45 = vadd.f32 %v1463_v7, %v1118_v18  ;;  %v850_v22 = vadd.f32 %v849_v51, %v7179_v52  ;;  %v1473_v16 = vpop.f32.mrf.mxu3  ;;  %v2664_v7 = vsel %vm2575_vm4, %v2654_v12, %v2663_v59  ;;  %v1938_v18 = vrot.slane %v5486_v61, 2  ;;  %v6358_v61 = vld [vmem:[%s5563_s29 + $0x68] sm:$0xff] }
 0x1ea   : > { %v2988_v12 = vrot.slane %v6290_v37, 3 }
 0x1eb   : > { %v1863_v25 = vpop.f32.mrf.mxu0  ;;  %5021 = vmatmul.msk.bf16.gmra.mxu1 %vm546_vm1, %v1937_v13  ;;  %5131 = vmatmul.msk.bf16.gmra.mxu2 %vm546_vm1, %v2326_v20  ;;  %v6328_v10 = vadd.f32 %v1860_v43, %v1507_v45  ;;  %v2669_v43 = vshll.u32 %v6334_v35, 16  ;;  %v2668_v45 = vrot.slane %v2666_v36, 2 }
 0x1ed   : > { %7178 = vst [vmem:[#allocation3_spill] sm:$0xff] %v6328_v10 }
 0x1ee   : > { %5215 = vmatmul.msk.bf16.gmra.mxu0 %vm546_vm1, %v2987_v19  ;;  %v1077_v55 = vpop.f32.mrf.mxu2  ;;  %5175 = vmatmul.msk.bf16.gmra.mxu3 %vm546_vm1, %v2664_v7  ;;  %v2671_v19 = vrot.slane %v2669_v43, 3  ;;  %v2989_v7 = vsel %vm2972_vm6, %v2986_v32, %v2988_v12 }
 0x1ef   : > { %v1119_v44 = vadd.f32 %v1077_v55, %v850_v22  ;;  %v1939_v22 = vsel %vm1922_vm5, %v1936_v62, %v1938_v18 }
 0x1f0   : > { %v851_v46 = vpop.f32.mrf.mxu1  ;;  %v2672_v37 = vor.u32 %v2671_v19, %v2668_v45  ;;  %v5487_v45 = vld [vmem:[%s5563_s29 + $0x50] sm:$0xff] }
 0x1f1   : > { %v1508_v2 = vadd.f32 %v1466_v6, %v1119_v44  ;;  %v852_v51 = vadd.f32 %v851_v46, %v7181_v40  ;;  %v2833_v13 = vpop.f32.mrf.mxu3  ;;  %v1940_v19 = vrot.slane %v5487_v45, 2 }
 0x1f3   : > { %v1865_v15 = vpop.f32.mrf.mxu0  ;;  %v6339_v56 = vadd.f32 %v1863_v25, %v1508_v2  ;;  %v2328_v25 = vsel %vm1922_vm5, %v2325_v23, %v2327_v1  ;;  %v7183_v2 = vld [vmem:[#allocation6_spill] sm:$0xff] }
 0x1f5   : > { %7180 = vst [vmem:[#allocation4_spill] sm:$0xff] %v6339_v56 }
 0x1f6   : > { %v1079_v20 = vpop.f32.mrf.mxu2 }
 0x1f7   : > { %v1120_v6 = vadd.f32 %v1079_v20, %v852_v51  ;;  %v2678_v20 = vshll.u32 %v6358_v61, 16 }
 0x1f8   : > { %v854_v52 = vpop.f32.mrf.mxu1 }
 0x1f9   : > { %v1509_v55 = vadd.f32 %v1468_v63, %v1120_v6  ;;  %v855_v36 = vadd.f32 %v854_v52, %v7183_v2  ;;  %v6354_v43 = vpop.f32.mrf.mxu3  ;;  %v2673_v63 = vsel %vm2575_vm4, %v2663_v59, %v2672_v37  ;;  %v2329_v52 = vrot.slane %v6312_v27, 2 }
 0x1fa   : > { %v2990_v59 = vrot.slane %v6312_v27, 3 }
 0x1fb   : > { %v1868_v44 = vpop.f32.mrf.mxu0  ;;  %5022 = vmatmul.msk.bf16.gmra.mxu1 %vm546_vm1, %v1939_v22  ;;  %5132 = vmatmul.msk.bf16.gmra.mxu2 %vm546_vm1, %v2328_v25  ;;  %v6350_v46 = vadd.f32 %v1865_v15, %v1509_v55  ;;  %v2675_v15 = vshrl.u32 %v6358_v61, 16  ;;  %v7185_v22 = vld [vmem:[#allocation7_spill] sm:$0xff] }
 0x1fc   : > { %v2991_v45 = vsel %vm2972_vm6, %v2988_v12, %v2990_v59 }
 0x1fd   : > { %7182 = vst [vmem:[#allocation5_spill] sm:$0xff] %v6350_v46  ;;  %v2677_v2 = vrot.slane %v2675_v15, 2 }
 0x1fe   : > { %5216 = vmatmul.msk.bf16.gmra.mxu0 %vm546_vm1, %v2989_v7  ;;  %v1082_v62 = vpop.f32.mrf.mxu2  ;;  %5176 = vmatmul.msk.bf16.gmra.mxu3 %vm546_vm1, %v2673_v63 }
 0x1ff   : > { %v1121_v23 = vadd.f32 %v1082_v62, %v855_v36  ;;  %v2680_v36 = vrot.slane %v2678_v20, 3 }
 0x200   : > { %v856_v32 = vpop.f32.mrf.mxu1 }
 0x201   : > { %v1510_v40 = vadd.f32 %v1471_v30, %v1121_v23  ;;  %v857_v25 = vadd.f32 %v856_v32, %v7185_v22  ;;  %v6369_v55 = vpop.f32.mrf.mxu3  ;;  %v1941_v23 = vsel %vm1922_vm5, %v1938_v18, %v1940_v19  ;;  %v2681_v27 = vor.u32 %v2680_v36, %v2677_v2  ;;  %v5488_v36 = vld [vmem:[%s5563_s29 + $0x58] sm:$0xff] }
 0x203   : > { %v1870_v51 = vpop.f32.mrf.mxu0  ;;  %v6363_v6 = vadd.f32 %v1868_v44, %v1510_v40  ;;  %v2330_v44 = vsel %vm1922_vm5, %v2327_v1, %v2329_v52  ;;  %v6383_v1 = vld [vmem:[%s5563_s29 + $0x70] sm:$0xff]  ;;  %v2682_v12 = vsel %vm2575_vm4, %v2672_v37, %v2681_v27 }
 0x204   : > { %v2687_v2 = vshll.u32 %v6383_v1, 16 }
 0x205   : > { %7184 = vst [vmem:[#allocation6_spill] sm:$0xff] %v6363_v6 }
 0x206   : > { %v1084_v30 = vpop.f32.mrf.mxu2 }
 0x207   : > { %v1122_v7 = vadd.f32 %v1084_v30, %v857_v25 }
 0x208   : > { %v2047_v62 = vpop.f32.mrf.mxu1 }
 0x209   : > { %v1511_v63 = vadd.f32 %v1473_v16, %v1122_v7  ;;  %v2137_v15 = vadd.f32 %v2047_v62, %v5975_v3  ;;  %v6380_v20 = vpop.f32.mrf.mxu3  ;;  %v2684_v3 = vshrl.u32 %v6383_v1, 16  ;;  %v1942_v62 = vrot.slane %v5488_v36, 2 }
 0x20b   : > { %v3097_v40 = vpop.f32.mrf.mxu0  ;;  %5023 = vmatmul.msk.bf16.gmra.mxu1 %vm546_vm1, %v1941_v23  ;;  %5133 = vmatmul.msk.bf16.gmra.mxu2 %vm546_vm1, %v2330_v44  ;;  %v6376_v32 = vadd.f32 %v1870_v51, %v1511_v63  ;;  %v6389_v51 = vld [vmem:[%s7144_s2] ss:$0 sm:$0xff]  ;;  %v2331_v23 = vrot.slane %v6334_v35, 2  ;;  %v2992_v44 = vrot.slane %v6334_v35, 3  ;;  %v1943_v35 = vsel %vm1922_vm5, %v1940_v19, %v1942_v62 }
 0x20d   : > { %7186 = vst [vmem:[#allocation7_spill] sm:$0xff] %v6376_v32 }
 0x20e   : > { %5217 = vmatmul.msk.bf16.gmra.mxu0 %vm546_vm1, %v2991_v45  ;;  %v2436_v18 = vpop.f32.mrf.mxu2  ;;  %5177 = vmatmul.msk.bf16.gmra.mxu3 %vm546_vm1, %v2682_v12  ;;  %v6404_v45 = vld [vmem:[%s7145_s3] ss:$0 sm:$0xff]  ;;  %v2689_v12 = vrot.slane %v2687_v2, 3 }
 0x20f   : > { %v2526_v16 = vadd.f32 %v2436_v18, %v2137_v15  ;;  %v2686_v15 = vrot.slane %v2684_v3, 2  ;;  %v2993_v3 = vsel %vm2972_vm6, %v2990_v59, %v2992_v44 }
 0x210   : > { %v2049_v22 = vpop.f32.mrf.mxu1 }
 0x211   : > { %v2923_v25 = vadd.f32 %v2833_v13, %v2526_v16  ;;  %v2138_v13 = vadd.f32 %v2049_v22, %v5985_v26  ;;  %v6399_v63 = vpop.f32.mrf.mxu3  ;;  %v2332_v22 = vsel %vm1922_vm5, %v2329_v52, %v2331_v23 }
 0x213   : > { %v3099_v30 = vpop.f32.mrf.mxu0  ;;  %v3187_v7 = vadd.f32 %v3097_v40, %v2923_v25  ;;  %v6409_v25 = vld [vmem:[%s7146_s4] ss:$0 sm:$0xff] }
 0x215   : > { %v3227_v37 = vadd.f32 %v6389_v51, %v3187_v7 }
 0x216   : > { %v2438_v40 = vpop.f32.mrf.mxu2 }
 0x217   : > { %vm3263_vm7 = vcmp.ge.f32.partialorder %v3227_v37, 0.0  ;;  %v3299_v18 = vmul.f32 0.1, %v3227_v37  ;;  %v2527_v16 = vadd.f32 %v2438_v40, %v2138_v13  ;;  %v6418_v40 = vor.u32 %v2689_v12, %v2686_v15 }
 0x218   : > { %v2052_v26 = vpop.f32.mrf.mxu1 }
 0x219   : > { %v3335_v7 = vsel %vm3263_vm7, %v3227_v37, %v3299_v18  ;;  %v2924_v36 = vadd.f32 %v6354_v43, %v2527_v16  ;;  %v2139_v43 = vadd.f32 %v2052_v26, %v5991_v33  ;;  %v6424_v37 = vpop.f32.mrf.mxu3  ;;  %v5489_v18 = vld [vmem:[%s5563_s29 + $0x60] sm:$0xff] }
 0x21a   : > { %v3375_v13 = vmul.f32 %v6404_v45, %v3335_v7  ;;  %v1944_v16 = vrot.slane %v5489_v18, 2 }
 0x21b   : > { %v3102_v32 = vpop.f32.mrf.mxu0  ;;  %v3188_v2 = vadd.f32 %v3099_v30, %v2924_v36  ;;  %5024 = vmatmul.msk.bf16.gmra.mxu1 %vm546_vm1, %v1943_v35  ;;  %5134 = vmatmul.msk.bf16.gmra.mxu2 %vm546_vm1, %v2332_v22  ;;  %v2333_v30 = vrot.slane %v6358_v61, 2  ;;  %v2994_v35 = vrot.slane %v6358_v61, 3  ;;  %v2691_v22 = vsel %vm2575_vm4, %v2681_v27, %v6418_v40 }
 0x21c   : > { %v3415_v19 = vadd.f32 %v6409_v25, %v3375_v13 }
 0x21d   : > { %v3228_v52 = vadd.f32 %v6389_v51, %v3188_v2  ;;  %v2995_v27 = vsel %vm2972_vm6, %v2992_v44, %v2994_v35 }
 0x21e   : > { %5218 = vmatmul.msk.bf16.gmra.mxu0 %vm546_vm1, %v2993_v3  ;;  %v2441_v59 = vpop.f32.mrf.mxu2  ;;  %v3489_v7 = vrot.slane %v3415_v19, 6  ;;  %v3487_v36 = vrot.slane %v3415_v19, 2  ;;  %v3488_v13 = vrot.slane %v3415_v19, 4  ;;  %v5227_v2 = vrot.slane %v3415_v19, 9  ;;  %5178 = vmatmul.msk.bf16.gmra.mxu3 %vm546_vm1, %v2691_v22 }
 0x21f   : > { %vm3264_vm8 = vcmp.ge.f32.partialorder %v3228_v52, 0.0  ;;  %v3300_v15 = vmul.f32 0.1, %v3228_v52  ;;  %v2528_v12 = vadd.f32 %v2441_v59, %v2139_v43  ;;  %v1945_v43 = vsel %vm1922_vm5, %v1942_v62, %v1944_v16 }
 0x220   : > { %v2054_v3 = vpop.f32.mrf.mxu1  ;;  %v2334_v59 = vsel %vm1922_vm5, %v2331_v23, %v2333_v30  ;;  %v5230_v46 = vrot.slane %v3489_v7, 9  ;;  %v6443_v22 = vmax.f32 %v3415_v19, %v5227_v2 }
 0x221   : > { %v3336_v33 = vsel %vm3264_vm8, %v3228_v52, %v3300_v15  ;;  %v2925_v26 = vadd.f32 %v6369_v55, %v2528_v12  ;;  %v5228_v52 = vrot.slane %v3487_v36, 9  ;;  %v6439_v15 = vld [vmem:[%s5563_s29 + $0x68] sm:$0xff]  ;;  %v6446_v62 = vpop.f32.mrf.mxu3  ;;  %v2996_v55 = vrot.slane %v6383_v1, 3 }
 0x222   : > { %v3376_v6 = vmul.f32 %v6404_v45, %v3336_v33  ;;  %v5229_v33 = vrot.slane %v3488_v13, 9 }
 0x223   : > { %v3104_v18 = vpop.f32.mrf.mxu0  ;;  %v3189_v61 = vadd.f32 %v3102_v32, %v2925_v26  ;;  %v2140_v32 = vadd.f32 %v2054_v3, %v6001_v24  ;;  %v4064_v24 = vmax.f32 %v3487_v36, %v5228_v52 }
 0x224   : > { %v3416_v56 = vadd.f32 %v6409_v25, %v3376_v6  ;;  %v4065_v28 = vmax.f32 %v3488_v13, %v5229_v33 }
 0x225   : > { %v3229_v12 = vadd.f32 %v6389_v51, %v3189_v61  ;;  %v6453_v61 = vmax.f32 %v3489_v7, %v5230_v46  ;;  %v7188_v46 = vrot.slane %v6383_v1, 2 }
 0x226   : > { %v3490_v23 = vrot.slane %v3416_v56, 2  ;;  %v3491_v44 = vrot.slane %v3416_v56, 4  ;;  %v3492_v26 = vrot.slane %v3416_v56, 6  ;;  %v2443_v10 = vpop.f32.mrf.mxu2  ;;  %v5231_v19 = vrot.slane %v3416_v56, 9 }
 0x227   : > { %vm3265_vm9 = vcmp.ge.f32.partialorder %v3229_v12, 0.0  ;;  %v3301_v48 = vmul.f32 0.1, %v3229_v12  ;;  %v2529_v38 = vadd.f32 %v2443_v10, %v2140_v32  ;;  %v7187_v10 = vrot.slane %v6439_v15, 2 }
 0x228   : > { %v5232_v2 = vrot.slane %v3490_v23, 9  ;;  %v2057_v3 = vpop.f32.mrf.mxu1  ;;  %v5233_v58 = vrot.slane %v3491_v44, 9  ;;  %v5234_v53 = vrot.slane %v3492_v26, 9  ;;  %v6465_v7 = vsel %vm1922_vm5, %v2333_v30, %v7188_v46 }
 0x229   : > { %v3337_v49 = vsel %vm3265_vm9, %v3229_v12, %v3301_v48  ;;  %v2926_v57 = vadd.f32 %v6380_v20, %v2529_v38  ;;  %v6460_v32 = vsel %vm1922_vm5, %v1944_v16, %v7187_v10  ;;  %v2693_v38 = vshrl.u32 %v6451_v29, 16 }
 0x22a   : > { %v3377_v6 = vmul.f32 %v6404_v45, %v3337_v49  ;;  %v6472_v49 = vsel %vm2972_vm6, %v2994_v35, %v2996_v55  ;;  %v2696_v48 = vshll.u32 %v6451_v29, 16  ;;  %v6476_v20 = vmax.f32 %v3416_v56, %v5231_v19  ;;  %v6486_v35 = vpop.f32.mrf.mxu3 }
 0x22b   : > { %v3107_v39 = vpop.f32.mrf.mxu0  ;;  %v3190_v36 = vadd.f32 %v3104_v18, %v2926_v57  ;;  %5025 = vmatmul.msk.bf16.gmra.mxu1 %vm546_vm1, %v1945_v43  ;;  %5135 = vmatmul.msk.bf16.gmra.mxu2 %vm546_vm1, %v2334_v59  ;;  %v6478_v16 = vmax.f32 %v3490_v23, %v5232_v2  ;;  %v2141_v57 = vadd.f32 %v2057_v3, %v6007_v0  ;;  %v2695_v43 = vrot.slane %v2693_v38, 2  ;;  %v6493_v3 = vld [vmem:[%s5563_s29 + $0x70] sm:$0xff] }
 0x22c   : > { %v3417_v30 = vadd.f32 %v6409_v25, %v3377_v6  ;;  %v6483_v13 = vmax.f32 %v3491_v44, %v5233_v58  ;;  %v2698_v59 = vrot.slane %v2696_v48, 3  ;;  %v6488_v23 = vmax.f32 %v3492_v26, %v5234_v53 }
 0x22d   : > { %v3230_v18 = vadd.f32 %v6389_v51, %v3190_v36  ;;  %v7152_v10 = vrot.slane %v6493_v3, 2 }
 0x22e   : > { %5219 = vmatmul.msk.bf16.gmra.mxu0 %vm546_vm1, %v2995_v27  ;;  %v3493_v52 = vrot.slane %v3417_v30, 2  ;;  %v3494_v56 = vrot.slane %v3417_v30, 4  ;;  %v3495_v12 = vrot.slane %v3417_v30, 6  ;;  %v2446_v33 = vpop.f32.mrf.mxu2  ;;  %v6490_v19 = vor.u32 %v2698_v59, %v2695_v43 }
 0x22f   : > { %vm3266_vm10 = vcmp.ge.f32.partialorder %v3230_v18, 0.0  ;;  %v3302_v6 = vmul.f32 0.1, %v3230_v18  ;;  %v2530_v0 = vadd.f32 %v2446_v33, %v2141_v57 }
 0x230   : > { %v5235_v58 = vrot.slane %v3493_v52, 9  ;;  %v5236_v27 = vrot.slane %v3494_v56, 9  ;;  %v5237_v44 = vrot.slane %v3495_v12, 9  ;;  %v2059_v2 = vpop.f32.mrf.mxu1  ;;  %v2700_v38 = vsel %vm2575_vm4, %v6418_v40, %v6490_v19 }
 0x231   : > { %v3338_v46 = vsel %vm3266_vm10, %v3230_v18, %v3302_v6  ;;  %v2927_v36 = vadd.f32 %v6399_v63, %v2530_v0  ;;  %v2142_v53 = vadd.f32 %v2059_v2, %v6017_v4  ;;  %5179 = vmatmul.msk.bf16.gmra.mxu3 %vm546_vm1, %v2700_v38  ;;  %v7189_v63 = vrot.slane %v6439_v15, 2 }
 0x232   : > { %v4071_v48 = vmax.f32 %v3493_v52, %v5235_v58  ;;  %v4072_v30 = vmax.f32 %v3494_v56, %v5236_v27  ;;  %v4073_v57 = vmax.f32 %v3495_v12, %v5237_v44  ;;  %v3378_v43 = vmul.f32 %v6404_v45, %v3338_v46  ;;  %v6515_v52 = vld [vmem:[%s5563_s29 + $0x80] sm:$0xff]  ;;  %v6520_v0 = vpop.f32.mrf.mxu3 }
 0x233   : > { %v6498_v26 = vpop.f32.mrf.mxu0  ;;  %v3191_v59 = vadd.f32 %v3107_v39, %v2927_v36  ;;  %v6510_v4 = vsel %vm1922_vm5, %v7189_v63, %v7152_v10  ;;  %v7151_v18 = vrot.slane %v6451_v29, 2  ;;  %v7150_v40 = vrot.slane %v6451_v29, 3 }
 0x234   : > { %v4191_v56 = vmax.f32 %v6443_v22, %v4071_v48  ;;  %v4192_v12 = vmax.f32 %v4064_v24, %v4072_v30  ;;  %v4193_v33 = vmax.f32 %v4065_v28, %v4073_v57  ;;  %v3418_v6 = vadd.f32 %v6409_v25, %v3378_v43 }
 0x235   : > { %v3231_v39 = vadd.f32 %v6389_v51, %v3191_v59  ;;  %v7190_v15 = vrot.slane %v6383_v1, 2  ;;  %v6534_v22 = vsel %vm2972_vm6, %v2996_v55, %v7150_v40  ;;  %v2702_v28 = vshrl.u32 %v6515_v52, 16 }
 0x236   : > { %v4255_v24 = vpack.c.bf16 %v4191_v56, %v4191_v56  ;;  %v4256_v27 = vpack.c.bf16 %v4192_v12, %v4192_v12  ;;  %v4257_v44 = vpack.c.bf16 %v4193_v33, %v4193_v33  ;;  %v3496_v2 = vrot.slane %v3418_v6, 2  ;;  %v2448_v46 = vpop.f32.mrf.mxu2 }
 0x237   : > { %v6527_v58 = vsel %vm1922_vm5, %v7190_v15, %v7151_v18  ;;  %v3497_v36 = vrot.slane %v3418_v6, 4  ;;  %v3498_v38 = vrot.slane %v3418_v6, 6  ;;  %v5238_v48 = vrot.slane %v3418_v6, 9 }
 0x238   : > { %vm3267_vm13 = vcmp.ge.f32.partialorder %v3231_v39, 0.0  ;;  %v4383_v30 = vunpack.c.l.b16 %v4255_v24  ;;  %v4384_v57 = vunpack.c.l.b16 %v4256_v27  ;;  %v4385_v43 = vunpack.c.l.b16 %v4257_v44  ;;  %v2062_v1 = vpop.f32.mrf.mxu1 }
 0x239   : > { %v5239_v59 = vrot.slane %v3496_v2, 9  ;;  %v5240_v63 = vrot.slane %v3497_v36, 9  ;;  %v5241_v55 = vrot.slane %v3498_v38, 9  ;;  %v4074_v15 = vmax.f32 %v3418_v6, %v5238_v48 }
 0x23a   : > { %v3303_v40 = vmul.f32 0.1, %v3231_v39  ;;  %v4447_v12 = vrot.slane %v4384_v57, 7  ;;  %v4450_v33 = vrot.slane %v4385_v43, 6  ;;  %v2531_v10 = vadd.f32 %v2448_v46, %v2142_v53 }
 0x23b   : > { %v6537_v56 = vpop.f32.mrf.mxu0  ;;  %v4075_v18 = vmax.f32 %v3496_v2, %v5239_v59  ;;  %v4076_v42 = vmax.f32 %v3497_v36, %v5240_v63  ;;  %v4077_v17 = vmax.f32 %v3498_v38, %v5241_v55  ;;  %v4194_v24 = vmax.f32 %v6453_v61, %v4074_v15  ;;  %5026 = vmatmul.msk.bf16.gmra.mxu1 %vm546_vm1, %v6460_v32  ;;  %v6554_v32 = vpop.f32.mrf.mxu3 }
 0x23c   : > { %v3339_v27 = vsel %vm3267_vm13, %v3231_v39, %v3303_v40  ;;  %v4449_v6 = vsel %vm4448_vm11, %v4447_v12, %v4383_v30  ;;  %v2928_v2 = vadd.f32 %v6424_v37, %v2531_v10  ;;  %5136 = vmatmul.msk.bf16.gmra.mxu2 %vm546_vm1, %v6465_v7  ;;  %v2143_v10 = vadd.f32 %v2062_v1, %v6029_v21 }
 0x23d   : > { %v4195_v44 = vmax.f32 %v6476_v20, %v4075_v18  ;;  %v3379_v48 = vmul.f32 %v6404_v45, %v3339_v27  ;;  %v4452_v53 = vsel %vm4451_vm12, %v4450_v33, %v4449_v6  ;;  %v4196_v61 = vmax.f32 %v6478_v16, %v4076_v42 }
 0x23e   : > { %v4197_v40 = vmax.f32 %v6483_v13, %v4077_v17  ;;  %v4258_v39 = vpack.c.bf16 %v4194_v24, %v4194_v24  ;;  %5220 = vmatmul.msk.bf16.gmra.mxu0 %vm546_vm1, %v6472_v49  ;;  %v3192_v37 = vadd.f32 %v6498_v26, %v2928_v2  ;;  %v2451_v7 = vpop.f32.mrf.mxu2  ;;  %v2704_v42 = vrot.slane %v2702_v28, 2 }
 0x23f   : > { %v4259_v20 = vpack.c.bf16 %v4195_v44, %v4195_v44  ;;  %v3419_v18 = vadd.f32 %v6409_v25, %v3379_v48  ;;  %v4260_v46 = vpack.c.bf16 %v4196_v61, %v4196_v61  ;;  %v2532_v61 = vadd.f32 %v2451_v7, %v2143_v10  ;;  %v6581_v7 = vld [vmem:[%s5563_s29 + $0x88] sm:$0xff] }
 0x240   : > { %v4261_v36 = vpack.c.bf16 %v4197_v40, %v4197_v40  ;;  %v4386_v38 = vunpack.c.l.b16 %v4258_v39  ;;  %v2064_v57 = vpop.f32.mrf.mxu1  ;;  %v3232_v63 = vadd.f32 %v6389_v51, %v3192_v37  ;;  %v2705_v37 = vshll.u32 %v6515_v52, 16 }
 0x241   : > { %v4387_v16 = vunpack.c.l.b16 %v4259_v20  ;;  %v3499_v17 = vrot.slane %v3419_v18, 4  ;;  %v3500_v13 = vrot.slane %v3419_v18, 6  ;;  %v5242_v30 = vrot.slane %v3419_v18, 9 }
 0x242   : > { %v4388_v49 = vunpack.c.l.b16 %v4260_v46  ;;  %v4389_v43 = vunpack.c.l.b16 %v4261_v36  ;;  %v4453_v59 = vrot.slane %v4386_v38, 5  ;;  %vm3268_vm7 = vcmp.ge.f32.partialorder %v3232_v63, 0.0  ;;  %v6574_v46 = vld [vmem:[%s5563_s29 + $0x78] sm:$0xff] }
 0x243   : > { %v3114_v55 = vpop.f32.mrf.mxu0  ;;  %v4456_v26 = vrot.slane %v4387_v16, 4  ;;  %v5243_v15 = vrot.slane %v3499_v17, 9  ;;  %v5244_v21 = vrot.slane %v3500_v13, 9  ;;  %v4078_v1 = vmax.f32 %v3419_v18, %v5242_v30 }
 0x244   : > { %v4455_v12 = vsel %vm4454_vm14, %v4453_v59, %v4452_v53  ;;  %v4459_v33 = vrot.slane %v4388_v49, 3  ;;  %v4462_v28 = vrot.slane %v4389_v43, 2  ;;  %v3304_v2 = vmul.f32 0.1, %v3232_v63  ;;  %v6569_v53 = vpop.f32.mrf.mxu3 }
 0x245   : > { %v6561_v24 = vmax.f32 %v3499_v17, %v5243_v15  ;;  %v6563_v27 = vmax.f32 %v3500_v13, %v5244_v21  ;;  %v4198_v6 = vmax.f32 %v6488_v23, %v4078_v1  ;;  %v4458_v44 = vsel %vm4457_vm15, %v4456_v26, %v4455_v12 }
 0x246   : > { %v4461_v48 = vsel %vm4460_vm0, %v4459_v33, %v4458_v44  ;;  %v2144_v40 = vadd.f32 %v2064_v57, %v6042_v54  ;;  %v2453_v18 = vpop.f32.mrf.mxu2  ;;  %v1950_v23 = vrot.slane %v6574_v46, 2  ;;  %v3340_v36 = vsel %vm3268_vm7, %v3232_v63, %v3304_v2 }
 0x247   : > { %v4262_v39 = vpack.c.bf16 %v4198_v6, %v4198_v6  ;;  %v4464_v20 = vsel %vm4463_vm2, %v4462_v28, %v4461_v48  ;;  %v2929_v38 = vadd.f32 %v6446_v62, %v2532_v61  ;;  %v2339_v54 = vrot.slane %v6515_v52, 2 }
 0x248   : > { %v2533_v10 = vadd.f32 %v2453_v18, %v2144_v40  ;;  %v3380_v17 = vmul.f32 %v6404_v45, %v3340_v36  ;;  %v2067_v13 = vpop.f32.mrf.mxu1  ;;  %v2707_v30 = vrot.slane %v2705_v37, 3  ;;  %v7191_v57 = vrot.slane %v6493_v3, 2 }
 0x249   : > { %v4390_v16 = vunpack.c.l.b16 %v4262_v39  ;;  %v3193_v62 = vadd.f32 %v6537_v56, %v2929_v38  ;;  %v2145_v59 = vadd.f32 %v2067_v13, %v6051_v31  ;;  %v7192_v26 = vrot.slane %v6451_v29, 2 }
 0x24a   : > { %v6589_v49 = vsel %vm1922_vm5, %v7191_v57, %v1950_v23  ;;  %v2930_v43 = vadd.f32 %v6486_v35, %v2533_v10  ;;  %v3420_v3 = vadd.f32 %v6409_v25, %v3380_v17  ;;  %v6603_v1 = vor.u32 %v2707_v30, %v2704_v42 }
 0x24b   : > { %v3117_v63 = vpop.f32.mrf.mxu0  ;;  %v6600_v15 = vsel %vm1922_vm5, %v7192_v26, %v2339_v54  ;;  %v4465_v21 = vrot.slane %v4390_v16, 1  ;;  %v3000_v12 = vrot.slane %v6515_v52, 3  ;;  %v3233_v56 = vadd.f32 %v6389_v51, %v3193_v62  ;;  %5027 = vmatmul.msk.bf16.gmra.mxu1 %vm546_vm1, %v6510_v4 }
 0x24c   : > { %v3194_v35 = vadd.f32 %v3114_v55, %v2930_v43  ;;  %v2711_v31 = vshrl.u32 %v6581_v7, 16  ;;  %v2714_v33 = vshll.u32 %v6581_v7, 16  ;;  %v3501_v28 = vrot.slane %v3420_v3, 2  ;;  %5137 = vmatmul.msk.bf16.gmra.mxu2 %vm546_vm1, %v6527_v58  ;;  %v6621_v2 = vpop.f32.mrf.mxu3 }
 0x24d   : > { %v4467_v42 = vsel %vm4466_vm3, %v4465_v21, %v4464_v20  ;;  %v3502_v6 = vrot.slane %v3420_v3, 4  ;;  %v3503_v44 = vrot.slane %v3420_v3, 6  ;;  %v5245_v4 = vrot.slane %v3420_v3, 9 }
 0x24e   : > { %v4566_v55 = vpack.c.b16 %v4467_v42, %v4467_v42  ;;  %vm3269_vm8 = vcmp.ge.f32.partialorder %v3233_v56, 0.0  ;;  %v3305_v48 = vmul.f32 0.1, %v3233_v56  ;;  %5221 = vmatmul.msk.bf16.gmra.mxu0 %vm546_vm1, %v6534_v22  ;;  %v5246_v61 = vrot.slane %v3501_v28, 9  ;;  %v2456_v20 = vpop.f32.mrf.mxu2  ;;  %v6647_v42 = vld [vmem:[%s5563_s29 + $0x80] sm:$0xff] }
 0x24f   : > { %v5247_v40 = vrot.slane %v3502_v6, 9  ;;  %v3234_v39 = vadd.f32 %v6389_v51, %v3194_v35  ;;  %v5248_v18 = vrot.slane %v3503_v44, 9  ;;  %v6625_v37 = vmax.f32 %v3420_v3, %v5245_v4 }
 0x250   : > { %4582 = vst [vmem:[%s6614_s13] sm:$0xf] %v4566_v55  ;;  %v3341_v36 = vsel %vm3269_vm8, %v3233_v56, %v3305_v48  ;;  %v2534_v58 = vadd.f32 %v2456_v20, %v2145_v59  ;;  %v2709_v38 = vsel %vm2575_vm4, %v6490_v19, %v6603_v1  ;;  %v6630_v10 = vmax.f32 %v3501_v28, %v5246_v61  ;;  %v2069_v17 = vpop.f32.mrf.mxu1 }
 0x251   : > { %v6632_v22 = vmax.f32 %v3502_v6, %v5247_v40  ;;  %v3381_v16 = vmul.f32 %v6404_v45, %v3341_v36  ;;  %vm3270_vm9 = vcmp.ge.f32.partialorder %v3234_v39, 0.0  ;;  %5180 = vmatmul.msk.bf16.gmra.mxu3 %vm546_vm1, %v2709_v38  ;;  %v3306_v13 = vmul.f32 0.1, %v3234_v39 }
 0x252   : > { %v2931_v30 = vadd.f32 %v6520_v0, %v2534_v58  ;;  %v6637_v57 = vmax.f32 %v3503_v44, %v5248_v18  ;;  %v2146_v62 = vadd.f32 %v2069_v17, %v6061_v47  ;;  %v7193_v59 = vrot.slane %v6451_v29, 3 }
 0x253   : > { %v3119_v43 = vpop.f32.mrf.mxu0  ;;  %v3421_v19 = vadd.f32 %v6409_v25, %v3381_v16  ;;  %v2713_v21 = vrot.slane %v2711_v31, 2  ;;  %v2716_v3 = vrot.slane %v2714_v33, 3  ;;  %v3342_v56 = vsel %vm3270_vm9, %v3234_v39, %v3306_v13 }
 0x254   : > { %v3001_v26 = vsel %vm2972_vm6, %v7193_v59, %v3000_v12  ;;  %v3195_v35 = vadd.f32 %v3117_v63, %v2931_v30  ;;  %v1952_v0 = vrot.slane %v6647_v42, 2  ;;  %v2341_v28 = vrot.slane %v6581_v7, 2  ;;  %v6655_v48 = vpop.f32.mrf.mxu3 }
 0x255   : > { %v3504_v47 = vrot.slane %v3421_v19, 2  ;;  %v3505_v6 = vrot.slane %v3421_v19, 6  ;;  %v5249_v44 = vrot.slane %v3421_v19, 9  ;;  %v3382_v55 = vmul.f32 %v6404_v45, %v3342_v56 }
 0x256   : > { %v3235_v4 = vadd.f32 %v6389_v51, %v3195_v35  ;;  %v6653_v29 = vor.u32 %v2716_v3, %v2713_v21  ;;  %v6662_v63 = vsel %vm1922_vm5, %v1950_v23, %v1952_v0  ;;  %v6669_v31 = vsel %vm1922_vm5, %v2339_v54, %v2341_v28  ;;  %v2458_v20 = vpop.f32.mrf.mxu2 }
 0x257   : > { %v5250_v33 = vrot.slane %v3504_v47, 9  ;;  %v5251_v61 = vrot.slane %v3505_v6, 9  ;;  %v6671_v40 = vmax.f32 %v3421_v19, %v5249_v44  ;;  %v3422_v39 = vadd.f32 %v6409_v25, %v3382_v55 }
 0x258   : > { %vm3271_vm10 = vcmp.ge.f32.partialorder %v3235_v4, 0.0  ;;  %v3307_v18 = vmul.f32 0.1, %v3235_v4  ;;  %v2535_v46 = vadd.f32 %v2458_v20, %v2146_v62  ;;  %v2718_v23 = vsel %vm2575_vm4, %v6603_v1, %v6653_v29  ;;  %v2072_v16 = vpop.f32.mrf.mxu1 }
 0x259   : > { %v6677_v36 = vmax.f32 %v3504_v47, %v5250_v33  ;;  %v4087_v58 = vmax.f32 %v3505_v6, %v5251_v61  ;;  %v3506_v38 = vrot.slane %v3422_v39, 2  ;;  %v3507_v54 = vrot.slane %v3422_v39, 4 }
 0x25a   : > { %v3508_v17 = vrot.slane %v3422_v39, 6  ;;  %v5252_v13 = vrot.slane %v3422_v39, 9  ;;  %v3343_v30 = vsel %vm3271_vm10, %v3235_v4, %v3307_v18  ;;  %v2932_v19 = vadd.f32 %v6554_v32, %v2535_v46 }
 0x25b   : > { %v6680_v59 = vpop.f32.mrf.mxu0  ;;  %v4199_v21 = vmax.f32 %v6561_v24, %v4087_v58  ;;  %v5253_v62 = vrot.slane %v3506_v38, 9  ;;  %v5254_v3 = vrot.slane %v3507_v54, 9  ;;  %v3383_v56 = vmul.f32 %v6404_v45, %v3343_v30  ;;  %5028 = vmatmul.msk.bf16.gmra.mxu1 %vm546_vm1, %v6589_v49 }
 0x25c   : > { %v5255_v1 = vrot.slane %v3508_v17, 9  ;;  %v4088_v35 = vmax.f32 %v3422_v39, %v5252_v13  ;;  %v3196_v47 = vadd.f32 %v3119_v43, %v2932_v19  ;;  %v2147_v6 = vadd.f32 %v2072_v16, %v6067_v14  ;;  %5138 = vmatmul.msk.bf16.gmra.mxu2 %vm546_vm1, %v6600_v15  ;;  %v6694_v43 = vpop.f32.mrf.mxu3 }
 0x25d   : > { %v4263_v44 = vpack.c.bf16 %v4199_v21, %v4199_v21  ;;  %v4089_v55 = vmax.f32 %v3506_v38, %v5253_v62  ;;  %v4090_v4 = vmax.f32 %v3507_v54, %v5254_v3  ;;  %v3423_v32 = vadd.f32 %v6409_v25, %v3383_v56 }
 0x25e   : > { %v4091_v24 = vmax.f32 %v3508_v17, %v5255_v1  ;;  %v4200_v33 = vmax.f32 %v6563_v27, %v4088_v35  ;;  %v3236_v61 = vadd.f32 %v6389_v51, %v3196_v47  ;;  %5222 = vmatmul.msk.bf16.gmra.mxu0 %vm546_vm1, %v3001_v26  ;;  %v3002_v14 = vrot.slane %v6581_v7, 3  ;;  %v2461_v46 = vpop.f32.mrf.mxu2 }
 0x25f   : > { %v4391_v49 = vunpack.c.l.b16 %v4263_v44  ;;  %v4201_v39 = vmax.f32 %v6625_v37, %v4089_v55  ;;  %v4202_v20 = vmax.f32 %v6630_v10, %v4090_v4  ;;  %v3509_v18 = vrot.slane %v3423_v32, 2 }
 0x260   : > { %v4203_v15 = vmax.f32 %v6632_v22, %v4091_v24  ;;  %v4264_v58 = vpack.c.bf16 %v4200_v33, %v4200_v33  ;;  %v3510_v38 = vrot.slane %v3423_v32, 4  ;;  %v5256_v27 = vrot.slane %v3423_v32, 9  ;;  %v2074_v26 = vpop.f32.mrf.mxu1 }
 0x261   : > { %v4265_v54 = vpack.c.bf16 %v4201_v39, %v4201_v39  ;;  %v4266_v16 = vpack.c.bf16 %v4202_v20, %v4202_v20  ;;  %v5257_v17 = vrot.slane %v3509_v18, 9  ;;  %vm3272_vm13 = vcmp.ge.f32.partialorder %v3236_v61, 0.0  ;;  %5181 = vmatmul.msk.bf16.gmra.mxu3 %vm546_vm1, %v2718_v23 }
 0x262   : > { %v4267_v13 = vpack.c.bf16 %v4203_v15, %v4203_v15  ;;  %v4392_v30 = vunpack.c.l.b16 %v4264_v58  ;;  %v5258_v19 = vrot.slane %v3510_v38, 9  ;;  %v4092_v37 = vmax.f32 %v3423_v32, %v5256_v27 }
 0x263   : > { %v3124_v21 = vpop.f32.mrf.mxu0  ;;  %v4393_v10 = vunpack.c.l.b16 %v4265_v54  ;;  %v4394_v62 = vunpack.c.l.b16 %v4266_v16  ;;  %v4093_v3 = vmax.f32 %v3509_v18, %v5257_v17  ;;  %v3308_v56 = vmul.f32 0.1, %v3236_v61 }
 0x264   : > { %v4395_v22 = vunpack.c.l.b16 %v4267_v13  ;;  %v4468_v1 = vrot.slane %v4392_v30, 7  ;;  %v4094_v35 = vmax.f32 %v3510_v38, %v5258_v19  ;;  %v4204_v47 = vmax.f32 %v6637_v57, %v4092_v37  ;;  %v6705_v20 = vpop.f32.mrf.mxu3 }
 0x265   : > { %v4470_v44 = vrot.slane %v4393_v10, 6  ;;  %v4472_v55 = vrot.slane %v4394_v62, 5  ;;  %v4205_v4 = vmax.f32 %v6671_v40, %v4093_v3  ;;  %v3344_v23 = vsel %vm3272_vm13, %v3236_v61, %v3308_v56 }
 0x266   : > { %v4469_v24 = vsel %vm4448_vm11, %v4468_v1, %v4391_v49  ;;  %v4474_v33 = vrot.slane %v4395_v22, 4  ;;  %v4206_v32 = vmax.f32 %v6677_v36, %v4094_v35  ;;  %v4268_v39 = vpack.c.bf16 %v4204_v47, %v4204_v47  ;;  %v2463_v38 = vpop.f32.mrf.mxu2 }
 0x267   : > { %v4269_v18 = vpack.c.bf16 %v4205_v4, %v4205_v4  ;;  %v4471_v15 = vsel %vm4451_vm12, %v4470_v44, %v4469_v24  ;;  %v3384_v58 = vmul.f32 %v6404_v45, %v3344_v23  ;;  %v2536_v57 = vadd.f32 %v2461_v46, %v2147_v6 }
 0x268   : > { %v4270_v27 = vpack.c.bf16 %v4206_v32, %v4206_v32  ;;  %v4396_v54 = vunpack.c.l.b16 %v4268_v39  ;;  %v4473_v40 = vsel %vm4454_vm14, %v4472_v55, %v4471_v15  ;;  %v2148_v61 = vadd.f32 %v2074_v26, %v6077_v60  ;;  %v2077_v13 = vpop.f32.mrf.mxu1 }
 0x269   : > { %v4397_v49 = vunpack.c.l.b16 %v4269_v18  ;;  %v4475_v16 = vsel %vm4457_vm15, %v4474_v33, %v4473_v40  ;;  %v3424_v36 = vadd.f32 %v6409_v25, %v3384_v58  ;;  %v2933_v17 = vadd.f32 %v6569_v53, %v2536_v57 }
 0x26a   : > { %v4398_v30 = vunpack.c.l.b16 %v4270_v27  ;;  %v4476_v19 = vrot.slane %v4396_v54, 3  ;;  %v2537_v37 = vadd.f32 %v2463_v38, %v2148_v61  ;;  %v2149_v6 = vadd.f32 %v2077_v13, %v6086_v11  ;;  %v7194_v61 = vld [vmem:[#allocation9_spill] sm:$0xff]  ;;  %v6752_v13 = vld [vmem:[%s5563_s29 + $0x88] sm:$0xff] }
 0x26b   : > { %v3127_v46 = vpop.f32.mrf.mxu0  ;;  %v4478_v10 = vrot.slane %v4397_v49, 2  ;;  %v3513_v62 = vrot.slane %v3424_v36, 6  ;;  %v3197_v3 = vadd.f32 %v6680_v59, %v2933_v17  ;;  %v3511_v60 = vrot.slane %v3424_v36, 2  ;;  %5029 = vmatmul.msk.bf16.gmra.mxu1 %vm546_vm1, %v6662_v63  ;;  %v6725_v59 = vld [vmem:[%s5563_s29 + $0x90] sm:$0xff] }
 0x26c   : > { %v4477_v26 = vsel %vm4460_vm0, %v4476_v19, %v4475_v16  ;;  %v4480_v56 = vrot.slane %v4398_v30, 1  ;;  %v2934_v22 = vadd.f32 %v6621_v2, %v2537_v37  ;;  %v3512_v1 = vrot.slane %v3424_v36, 4  ;;  %5139 = vmatmul.msk.bf16.gmra.mxu2 %vm546_vm1, %v6669_v31  ;;  %v6728_v23 = vpop.f32.mrf.mxu3 }
 0x26d   : > { %v4479_v53 = vsel %vm4463_vm2, %v4478_v10, %v4477_v26  ;;  %v5262_v35 = vrot.slane %v3513_v62, 9  ;;  %v3237_v11 = vadd.f32 %v6389_v51, %v3197_v3  ;;  %v5259_v47 = vrot.slane %v3424_v36, 9 }
 0x26e   : > { %v4481_v44 = vsel %vm4466_vm3, %v4480_v56, %v4479_v53  ;;  %v3198_v55 = vadd.f32 %v3124_v21, %v2934_v22  ;;  %v5260_v2 = vrot.slane %v3511_v60, 9  ;;  %v5261_v4 = vrot.slane %v3512_v1, 9  ;;  %v2466_v32 = vpop.f32.mrf.mxu2 }
 0x26f   : > { %v4567_v63 = vpack.c.b16 %v4481_v44, %v4481_v44  ;;  %v6730_v24 = vmax.f32 %v3513_v62, %v5262_v35  ;;  %vm3273_vm7 = vcmp.ge.f32.partialorder %v3237_v11, 0.0  ;;  %v3309_v33 = vmul.f32 0.1, %v3237_v11 }
 0x270   : > { %v3238_v39 = vadd.f32 %v6389_v51, %v3198_v55  ;;  %v6733_v18 = vmax.f32 %v3424_v36, %v5259_v47  ;;  %v6735_v31 = vmax.f32 %v3511_v60, %v5260_v2  ;;  %v6737_v15 = vmax.f32 %v3512_v1, %v5261_v4  ;;  %v2079_v38 = vpop.f32.mrf.mxu1 }
 0x271   : > { %4583 = vst [vmem:[%s6614_s13 + $0x4] sm:$0xf] %v4567_v63  ;;  %v3345_v21 = vsel %vm3273_vm7, %v3237_v11, %v3309_v33  ;;  %v3003_v58 = vsel %vm2972_vm6, %v3000_v12, %v3002_v14  ;;  %v2538_v57 = vadd.f32 %v2466_v32, %v2149_v6  ;;  %v2720_v27 = vshrl.u32 %v6725_v59, 16 }
 0x272   : > { %v3385_v54 = vmul.f32 %v6404_v45, %v3345_v21  ;;  %vm3274_vm8 = vcmp.ge.f32.partialorder %v3238_v39, 0.0  ;;  %v3310_v40 = vmul.f32 0.1, %v3238_v39  ;;  %5223 = vmatmul.msk.bf16.gmra.mxu0 %vm546_vm1, %v3003_v58  ;;  %v2150_v49 = vadd.f32 %v2079_v38, %v7194_v61 }
 0x273   : > { %v3129_v16 = vpop.f32.mrf.mxu0  ;;  %v2935_v36 = vadd.f32 %v6655_v48, %v2538_v57  ;;  %v2722_v17 = vrot.slane %v2720_v27, 2  ;;  %v2723_v52 = vshll.u32 %v6725_v59, 16  ;;  %v1954_v12 = vrot.slane %v6752_v13, 2  ;;  %v6785_v57 = vld [vmem:[%s5563_s29 + $0x98] sm:$0xff] }
 0x274   : > { %v3425_v30 = vadd.f32 %v6409_v25, %v3385_v54  ;;  %v3346_v19 = vsel %vm3274_vm8, %v3238_v39, %v3310_v40  ;;  %v2343_v37 = vrot.slane %v6725_v59, 2  ;;  %v3004_v6 = vrot.slane %v6725_v59, 3  ;;  %v6764_v1 = vpop.f32.mrf.mxu3 }
 0x275   : > { %v3386_v10 = vmul.f32 %v6404_v45, %v3346_v19  ;;  %v3199_v62 = vadd.f32 %v3127_v46, %v2935_v36  ;;  %v2725_v3 = vrot.slane %v2723_v52, 3  ;;  %v1955_v48 = vsel %vm1922_vm5, %v1952_v0, %v1954_v12  ;;  %v7195_v36 = vld [vmem:[#allocation10_spill] sm:$0xff] }
 0x276   : > { %v3514_v60 = vrot.slane %v3425_v30, 2  ;;  %v3515_v26 = vrot.slane %v3425_v30, 4  ;;  %v3516_v56 = vrot.slane %v3425_v30, 6  ;;  %v5263_v22 = vrot.slane %v3425_v30, 9  ;;  %v2468_v46 = vpop.f32.mrf.mxu2 }
 0x277   : > { %v3426_v53 = vadd.f32 %v6409_v25, %v3386_v10  ;;  %v3239_v35 = vadd.f32 %v6389_v51, %v3199_v62  ;;  %v6768_v11 = vor.u32 %v2725_v3, %v2722_v17  ;;  %v2344_v42 = vsel %vm1922_vm5, %v2341_v28, %v2343_v37 }
 0x278   : > { %v5264_v0 = vrot.slane %v3514_v60, 9  ;;  %v5265_v47 = vrot.slane %v3515_v26, 9  ;;  %v6775_v44 = vmax.f32 %v3425_v30, %v5263_v22  ;;  %v2539_v55 = vadd.f32 %v2468_v46, %v2150_v49  ;;  %v2082_v33 = vpop.f32.mrf.mxu1 }
 0x279   : > { %v3517_v2 = vrot.slane %v3426_v53, 2  ;;  %v3518_v4 = vrot.slane %v3426_v53, 4  ;;  %v3519_v63 = vrot.slane %v3426_v53, 6  ;;  %vm3275_vm9 = vcmp.ge.f32.partialorder %v3239_v35, 0.0 }
 0x27a   : > { %v6777_v32 = vmax.f32 %v3514_v60, %v5264_v0  ;;  %v6779_v39 = vmax.f32 %v3515_v26, %v5265_v47  ;;  %v3311_v21 = vmul.f32 0.1, %v3239_v35  ;;  %v2727_v58 = vsel %vm2575_vm4, %v6653_v29, %v6768_v11 }
 0x27b   : > { %v3132_v28 = vpop.f32.mrf.mxu0  ;;  %v5267_v38 = vrot.slane %v3517_v2, 9  ;;  %v5268_v27 = vrot.slane %v3518_v4, 9  ;;  %v5269_v54 = vrot.slane %v3519_v63, 9  ;;  %5182 = vmatmul.msk.bf16.gmra.mxu3 %vm546_vm1, %v2727_v58  ;;  %v2936_v40 = vadd.f32 %v6694_v43, %v2539_v55  ;;  %5030 = vmatmul.msk.bf16.gmra.mxu1 %vm546_vm1, %v1955_v48 }
 0x27c   : > { %v3347_v61 = vsel %vm3275_vm9, %v3239_v35, %v3311_v21  ;;  %v5266_v49 = vrot.slane %v3516_v56, 9  ;;  %v2151_v17 = vadd.f32 %v2082_v33, %v7195_v36  ;;  %v3005_v29 = vsel %vm2972_vm6, %v3002_v14, %v3004_v6  ;;  %5140 = vmatmul.msk.bf16.gmra.mxu2 %vm546_vm1, %v2344_v42  ;;  %v6802_v60 = vpop.f32.mrf.mxu3 }
 0x27d   : > { %v4103_v52 = vmax.f32 %v3517_v2, %v5267_v38  ;;  %v4104_v30 = vmax.f32 %v3518_v4, %v5268_v27  ;;  %v4105_v19 = vmax.f32 %v3519_v63, %v5269_v54  ;;  %v3387_v10 = vmul.f32 %v6404_v45, %v3347_v61 }
 0x27e   : > { %v3200_v43 = vadd.f32 %v3129_v16, %v2936_v40  ;;  %v6798_v62 = vmax.f32 %v3516_v56, %v5266_v49  ;;  %v2729_v3 = vshrl.u32 %v6785_v57, 16  ;;  %v2732_v48 = vshll.u32 %v6785_v57, 16  ;;  %v2471_v45 = vpop.f32.mrf.mxu2 }
 0x27f   : > { %v4207_v7 = vmax.f32 %v6733_v18, %v4103_v52  ;;  %v4208_v14 = vmax.f32 %v6735_v31, %v4104_v30  ;;  %v4209_v26 = vmax.f32 %v6737_v15, %v4105_v19  ;;  %v3427_v22 = vadd.f32 %v6409_v25, %v3387_v10  ;;  %v6820_v19 = vld [vmem:[%s7145_s3] ss:$0 sm:$0xff] }
 0x280   : > { %v3240_v53 = vadd.f32 %v6389_v51, %v3200_v43  ;;  %v2540_v16 = vadd.f32 %v2471_v45, %v2151_v17  ;;  %v2731_v56 = vrot.slane %v2729_v3, 2  ;;  %v2734_v35 = vrot.slane %v2732_v48, 3  ;;  %v2084_v55 = vpop.f32.mrf.mxu1 }
 0x281   : > { %v4271_v46 = vpack.c.bf16 %v4207_v7, %v4207_v7  ;;  %v4272_v42 = vpack.c.bf16 %v4208_v14, %v4208_v14  ;;  %v4273_v0 = vpack.c.bf16 %v4209_v26, %v4209_v26  ;;  %v3520_v47 = vrot.slane %v3427_v22, 2 }
 0x282   : > { %v3521_v2 = vrot.slane %v3427_v22, 4  ;;  %v3522_v4 = vrot.slane %v3427_v22, 6  ;;  %v5270_v18 = vrot.slane %v3427_v22, 9  ;;  %vm3276_vm10 = vcmp.ge.f32.partialorder %v3240_v53, 0.0  ;;  %5224 = vmatmul.msk.bf16.gmra.mxu0 %vm546_vm1, %v3005_v29 }
 0x283   : > { %v6810_v31 = vpop.f32.mrf.mxu0  ;;  %v4399_v25 = vunpack.c.l.b16 %v4271_v46  ;;  %v4400_v15 = vunpack.c.l.b16 %v4272_v42  ;;  %v4401_v63 = vunpack.c.l.b16 %v4273_v0  ;;  %v5271_v51 = vrot.slane %v3520_v47, 9 }
 0x284   : > { %v5272_v33 = vrot.slane %v3521_v2, 9  ;;  %v5273_v21 = vrot.slane %v3522_v4, 9  ;;  %v4106_v58 = vmax.f32 %v3427_v22, %v5270_v18  ;;  %v3312_v38 = vmul.f32 0.1, %v3240_v53  ;;  %v6826_v14 = vpop.f32.mrf.mxu3 }
 0x285   : > { %v4482_v27 = vrot.slane %v4400_v15, 7  ;;  %v4484_v54 = vrot.slane %v4401_v63, 6  ;;  %v4107_v40 = vmax.f32 %v3520_v47, %v5271_v51  ;;  %v2937_v61 = vadd.f32 %v6705_v20, %v2540_v16 }
 0x286   : > { %v4108_v49 = vmax.f32 %v3521_v2, %v5272_v33  ;;  %v4109_v36 = vmax.f32 %v3522_v4, %v5273_v21  ;;  %v4210_v17 = vmax.f32 %v6730_v24, %v4106_v58  ;;  %v3348_v29 = vsel %vm3276_vm10, %v3240_v53, %v3312_v38  ;;  %v2473_v3 = vpop.f32.mrf.mxu2 }
 0x287   : > { %v4483_v52 = vsel %vm4448_vm11, %v4482_v27, %v4399_v25  ;;  %v4211_v30 = vmax.f32 %v6775_v44, %v4107_v40  ;;  %v3388_v10 = vmul.f32 %v6820_v19, %v3348_v29  ;;  %v3201_v43 = vadd.f32 %v3132_v28, %v2937_v61  ;;  %v6831_v44 = vld [vmem:[%s7146_s4] ss:$0 sm:$0xff] }
 0x288   : > { %v4485_v20 = vsel %vm4451_vm12, %v4484_v54, %v4483_v52  ;;  %v4212_v48 = vmax.f32 %v6777_v32, %v4108_v49  ;;  %v4213_v24 = vmax.f32 %v6779_v39, %v4109_v36  ;;  %v4274_v7 = vpack.c.bf16 %v4210_v17, %v4210_v17  ;;  %v6837_v28 = vld [vmem:[%s7144_s2] ss:$0 sm:$0xff]  ;;  %v2087_v45 = vpop.f32.mrf.mxu1 }
 0x289   : > { %v4275_v26 = vpack.c.bf16 %v4211_v30, %v4211_v30  ;;  %v3428_v22 = vadd.f32 %v6831_v44, %v3388_v10  ;;  %v3241_v32 = vadd.f32 %v6837_v28, %v3201_v43  ;;  %v2152_v39 = vadd.f32 %v2084_v55, %v6134_v8 }
 0x28a   : > { %v4276_v53 = vpack.c.bf16 %v4212_v48, %v4212_v48  ;;  %v4277_v16 = vpack.c.bf16 %v4213_v24, %v4213_v24  ;;  %v4402_v46 = vunpack.c.l.b16 %v4274_v7  ;;  %v6841_v42 = vor.u32 %v2734_v35, %v2731_v56  ;;  %v6862_v48 = vld [vmem:[%s5563_s29 + $0x90] sm:$0xff] }
 0x28b   : > { %v6843_v0 = vpop.f32.mrf.mxu0  ;;  %v4403_v47 = vunpack.c.l.b16 %v4275_v26  ;;  %v3523_v2 = vrot.slane %v3428_v22, 4  ;;  %v3524_v4 = vrot.slane %v3428_v22, 6  ;;  %v5274_v18 = vrot.slane %v3428_v22, 9 }
 0x28c   : > { %v4404_v25 = vunpack.c.l.b16 %v4276_v53  ;;  %v4405_v15 = vunpack.c.l.b16 %v4277_v16  ;;  %v4486_v63 = vrot.slane %v4402_v46, 5  ;;  %vm3277_vm13 = vcmp.ge.f32.partialorder %v3241_v32, 0.0  ;;  %v6867_v26 = vpop.f32.mrf.mxu3 }
 0x28d   : > { %v4488_v51 = vrot.slane %v4403_v47, 4  ;;  %v5275_v33 = vrot.slane %v3523_v2, 9  ;;  %v5276_v21 = vrot.slane %v3524_v4, 9  ;;  %v4110_v8 = vmax.f32 %v3428_v22, %v5274_v18 }
 0x28e   : > { %v4487_v55 = vsel %vm4454_vm14, %v4486_v63, %v4485_v20  ;;  %v4490_v58 = vrot.slane %v4404_v25, 3  ;;  %v4492_v38 = vrot.slane %v4405_v15, 2  ;;  %v3313_v56 = vmul.f32 0.1, %v3241_v32  ;;  %v2476_v61 = vpop.f32.mrf.mxu2 }
 0x28f   : > { %v4489_v35 = vsel %vm4457_vm15, %v4488_v51, %v4487_v55  ;;  %v6847_v27 = vmax.f32 %v3523_v2, %v5275_v33  ;;  %v6849_v54 = vmax.f32 %v3524_v4, %v5276_v21  ;;  %v4214_v40 = vmax.f32 %v6798_v62, %v4110_v8 }
 0x290   : > { %v4491_v49 = vsel %vm4460_vm0, %v4490_v58, %v4489_v35  ;;  %v3349_v36 = vsel %vm3277_vm13, %v3241_v32, %v3313_v56  ;;  %v2736_v17 = vsel %vm2575_vm4, %v6768_v11, %v6841_v42  ;;  %v2541_v29 = vadd.f32 %v2473_v3, %v2152_v39  ;;  %v2089_v62 = vpop.f32.mrf.mxu1 }
 0x291   : > { %v4278_v52 = vpack.c.bf16 %v4214_v40, %v4214_v40  ;;  %v4493_v30 = vsel %vm4463_vm2, %v4492_v38, %v4491_v49  ;;  %v3389_v10 = vmul.f32 %v6820_v19, %v3349_v36  ;;  %5183 = vmatmul.msk.bf16.gmra.mxu3 %vm546_vm1, %v2736_v17  ;;  %v2153_v43 = vadd.f32 %v2087_v45, %v6150_v34  ;;  %v2562_v45 = vld [vmem:[%s5563_s29 + $0xa0] sm:$0x7] }
 0x292   : > { %v2938_v20 = vadd.f32 %v6728_v23, %v2541_v29  ;;  %v1956_v24 = vrot.slane %v6862_v48, 2  ;;  %v2345_v11 = vrot.slane %v6785_v57, 2  ;;  %v3006_v3 = vrot.slane %v6785_v57, 3  ;;  %v2209_v38 = vld [vmem:[%s5563_s29 + $0xa0] sm:$0x3] }
 0x293   : > { %v3139_v7 = vpop.f32.mrf.mxu0  ;;  %v4406_v22 = vunpack.c.l.b16 %v4278_v52  ;;  %v3429_v32 = vadd.f32 %v6831_v44, %v3389_v10  ;;  %v2542_v39 = vadd.f32 %v2476_v61, %v2153_v43  ;;  %v2154_v34 = vadd.f32 %v2089_v62, %v6163_v9 }
 0x294   : > { %v3202_v23 = vadd.f32 %v6810_v31, %v2938_v20  ;;  %v1957_v53 = vsel %vm1922_vm5, %v1954_v12, %v1956_v24  ;;  %v2346_v16 = vsel %vm1922_vm5, %v2343_v37, %v2345_v11  ;;  %v3007_v46 = vsel %vm2972_vm6, %v3004_v6, %v3006_v3  ;;  %v6908_v62 = vpop.f32.mrf.mxu3 }
 0x295   : > { %v4494_v9 = vrot.slane %v4406_v22, 1  ;;  %v3525_v47 = vrot.slane %v3429_v32, 2  ;;  %v3526_v2 = vrot.slane %v3429_v32, 4  ;;  %v3527_v31 = vrot.slane %v3429_v32, 6  ;;  %5031 = vmatmul.msk.bf16.gmra.mxu1 %vm546_vm1, %v1957_v53  ;;  %5141 = vmatmul.msk.bf16.gmra.mxu2 %vm546_vm1, %v2346_v16 }
 0x296   : > { %v5277_v13 = vrot.slane %v3429_v32, 9  ;;  %v3242_v12 = vadd.f32 %v6837_v28, %v3202_v23  ;;  %5225 = vmatmul.msk.bf16.gmra.mxu0 %vm546_vm1, %v3007_v46  ;;  %v2939_v37 = vadd.f32 %v6764_v1, %v2542_v39  ;;  %v2573_v4 = vunpack.c.l.b16 %v2562_v45  ;;  %v2478_v25 = vpop.f32.mrf.mxu2 }
 0x297   : > { %v4495_v59 = vsel %vm4466_vm3, %v4494_v9, %v4493_v30  ;;  %v5278_v6 = vrot.slane %v3525_v47, 9  ;;  %v5279_v18 = vrot.slane %v3526_v2, 9  ;;  %v5280_v15 = vrot.slane %v3527_v31, 9 }
 0x298   : > { %v4568_v63 = vpack.c.b16 %v4495_v59, %v4495_v59  ;;  %v6892_v51 = vmax.f32 %v3429_v32, %v5277_v13  ;;  %vm3278_vm7 = vcmp.ge.f32.partialorder %v3242_v12, 0.0  ;;  %v3314_v33 = vmul.f32 0.1, %v3242_v12  ;;  %v2092_v58 = vpop.f32.mrf.mxu1 }
 0x299   : > { %v6894_v21 = vmax.f32 %v3525_v47, %v5278_v6  ;;  %v6896_v8 = vmax.f32 %v3526_v2, %v5279_v18  ;;  %v3203_v1 = vadd.f32 %v6843_v0, %v2939_v37  ;;  %v2574_v55 = vpack.c.b16 %v2573_v4, %v2573_v4 }
 0x29a   : > { %4584 = vst [vmem:[%s6614_s13 + $0x8] sm:$0xf] %v4568_v63  ;;  %v3350_v56 = vsel %vm3278_vm7, %v3242_v12, %v3314_v33  ;;  %v2543_v35 = vadd.f32 %v2478_v25, %v2154_v34  ;;  %v6901_v40 = vmax.f32 %v3527_v31, %v5280_v15  ;;  %v2155_v61 = vadd.f32 %v2092_v58, %v6181_v5 }
 0x29b   : > { %v3142_v49 = vpop.f32.mrf.mxu0  ;;  %v3390_v36 = vmul.f32 %v6820_v19, %v3350_v56  ;;  %v3243_v17 = vadd.f32 %v6837_v28, %v3203_v1  ;;  %v2738_v29 = vshrl.u32 %v2574_v55, 16  ;;  %v2741_v52 = vshll.u32 %v2574_v55, 16 }
 0x29c   : > { %v2940_v30 = vadd.f32 %v6802_v60, %v2543_v35  ;;  %v1958_v0 = vrot.slane %v6130_v50, 2  ;;  %v2292_v10 = vunpack.c.l.b16 %v2209_v38  ;;  %v3008_v43 = vrot.slane %v2574_v55, 3 }
 0x29d   : > { %v3430_v20 = vadd.f32 %v6831_v44, %v3390_v36  ;;  %vm3279_vm8 = vcmp.ge.f32.partialorder %v3243_v17, 0.0  ;;  %v3315_v48 = vmul.f32 0.1, %v3243_v17  ;;  %v2740_v5 = vrot.slane %v2738_v29, 2 }
 0x29e   : > { %v2743_v22 = vrot.slane %v2741_v52, 3  ;;  %v3204_v32 = vadd.f32 %v3139_v7, %v2940_v30  ;;  %v1959_v39 = vsel %vm1922_vm5, %v1956_v24, %v1958_v0  ;;  %v2311_v34 = vpack.c.b16 %v2292_v10, %v2292_v10  ;;  %v2481_v16 = vpop.f32.mrf.mxu2 }
 0x29f   : > { %v3528_v45 = vrot.slane %v3430_v20, 2  ;;  %v3529_v23 = vrot.slane %v3430_v20, 6  ;;  %v5281_v53 = vrot.slane %v3430_v20, 9  ;;  %v3351_v60 = vsel %vm3279_vm8, %v3243_v17, %v3315_v48 }
 0x2a0   : > { %v3391_v50 = vmul.f32 %v6820_v19, %v3351_v60  ;;  %v2744_v46 = vor.u32 %v2743_v22, %v2740_v5  ;;  %v3244_v9 = vadd.f32 %v6837_v28, %v3204_v32  ;;  %v2347_v47 = vrot.slane %v2311_v34, 2  ;;  %v2094_v7 = vpop.f32.mrf.mxu1 }
 0x2a1   : > { %v5282_v2 = vrot.slane %v3528_v45, 9  ;;  %v5283_v31 = vrot.slane %v3529_v23, 9  ;;  %v6914_v13 = vmax.f32 %v3430_v20, %v5281_v53  ;;  %v3009_v24 = vsel %vm2972_vm6, %v3006_v3, %v3008_v43 }
 0x2a2   : > { %v3431_v12 = vadd.f32 %v6831_v44, %v3391_v50  ;;  %v2745_v37 = vsel %vm2575_vm4, %v6841_v42, %v2744_v46  ;;  %vm3280_vm9 = vcmp.ge.f32.partialorder %v3244_v9, 0.0  ;;  %v3316_v4 = vmul.f32 0.1, %v3244_v9 }
 0x2a3   : > { %v6922_v59 = vpop.f32.mrf.mxu0  ;;  %v6924_v6 = vmax.f32 %v3528_v45, %v5282_v2  ;;  %v4119_v18 = vmax.f32 %v3529_v23, %v5283_v31  ;;  %5184 = vmatmul.msk.bf16.gmra.mxu3 %vm546_vm1, %v2745_v37  ;;  %v2348_v25 = vsel %vm1922_vm5, %v2345_v11, %v2347_v47  ;;  %v2544_v3 = vadd.f32 %v2481_v16, %v2155_v61  ;;  %v6935_v11 = vpop.f32.mrf.mxu3 }
 0x2a4   : > { %v3530_v15 = vrot.slane %v3431_v12, 2  ;;  %v3531_v63 = vrot.slane %v3431_v12, 4  ;;  %v3532_v33 = vrot.slane %v3431_v12, 6  ;;  %v5284_v1 = vrot.slane %v3431_v12, 9 }
 0x2a5   : > { %v4215_v42 = vmax.f32 %v6847_v27, %v4119_v18  ;;  %v3352_v55 = vsel %vm3280_vm9, %v3244_v9, %v3316_v4  ;;  %5032 = vmatmul.msk.bf16.gmra.mxu1 %vm546_vm1, %v1959_v39  ;;  %5142 = vmatmul.msk.bf16.gmra.mxu2 %vm546_vm1, %v2348_v25  ;;  %v2941_v58 = vadd.f32 %v6826_v14, %v2544_v3 }
 0x2a6   : > { %v5285_v38 = vrot.slane %v3530_v15, 9  ;;  %v5286_v56 = vrot.slane %v3531_v63, 9  ;;  %v5287_v35 = vrot.slane %v3532_v33, 9  ;;  %v4120_v57 = vmax.f32 %v3431_v12, %v5284_v1  ;;  %5226 = vmatmul.msk.bf16.gmra.mxu0 %vm546_vm1, %v3009_v24  ;;  %v2483_v29 = vpop.f32.mrf.mxu2 }
 0x2a7   : > { %v4279_v61 = vpack.c.bf16 %v4215_v42, %v4215_v42  ;;  %v3392_v36 = vmul.f32 %v6820_v19, %v3352_v55  ;;  %v3205_v17 = vadd.f32 %v3142_v49, %v2941_v58  ;;  %v2156_v27 = vadd.f32 %v2094_v7, %v6194_v41 }
 0x2a8   : > { %v4121_v52 = vmax.f32 %v3530_v15, %v5285_v38  ;;  %v4122_v30 = vmax.f32 %v3531_v63, %v5286_v56  ;;  %v4123_v0 = vmax.f32 %v3532_v33, %v5287_v35  ;;  %v4216_v14 = vmax.f32 %v6849_v54, %v4120_v57  ;;  %v2097_v5 = vpop.f32.mrf.mxu1  ;;  %v7196_v38 = vld [vmem:[#allocation11_spill] sm:$0xff] }
 0x2a9   : > { %v4407_v10 = vunpack.c.l.b16 %v4279_v61  ;;  %v3432_v43 = vadd.f32 %v6831_v44, %v3392_v36  ;;  %v3245_v20 = vadd.f32 %v6837_v28, %v3205_v17  ;;  %v2545_v48 = vadd.f32 %v2483_v29, %v2156_v27 }
 0x2aa   : > { %v4217_v22 = vmax.f32 %v6892_v51, %v4121_v52  ;;  %v4218_v32 = vmax.f32 %v6894_v21, %v4122_v30  ;;  %v4219_v49 = vmax.f32 %v6896_v8, %v4123_v0  ;;  %v4280_v41 = vpack.c.bf16 %v4216_v14, %v4216_v14 }
 0x2ab   : > { %v3147_v39 = vpop.f32.mrf.mxu0  ;;  %v3533_v34 = vrot.slane %v3432_v43, 2  ;;  %v3534_v45 = vrot.slane %v3432_v43, 4  ;;  %v5288_v23 = vrot.slane %v3432_v43, 9  ;;  %vm3281_vm1 = vcmp.ge.f32.partialorder %v3245_v20, 0.0  ;;  %v6948_v3 = vpop.f32.mrf.mxu3 }
 0x2ac   : > { %v4281_v54 = vpack.c.bf16 %v4217_v22, %v4217_v22  ;;  %v4282_v53 = vpack.c.bf16 %v4218_v32, %v4218_v32  ;;  %v4283_v60 = vpack.c.bf16 %v4219_v49, %v4219_v49  ;;  %v4408_v16 = vunpack.c.l.b16 %v4280_v41 }
 0x2ad   : > { %v5289_v50 = vrot.slane %v3533_v34, 9  ;;  %v5290_v46 = vrot.slane %v3534_v45, 9  ;;  %v4124_v9 = vmax.f32 %v3432_v43, %v5288_v23  ;;  %v3317_v47 = vmul.f32 0.1, %v3245_v20  ;;  %v7197_v23 = vld [vmem:[#allocation12_spill] sm:$0xff] }
 0x2ae   : > { %v4409_v2 = vunpack.c.l.b16 %v4281_v54  ;;  %v4410_v51 = vunpack.c.l.b16 %v4282_v53  ;;  %v4411_v31 = vunpack.c.l.b16 %v4283_v60  ;;  %v4496_v21 = vrot.slane %v4408_v16, 7  ;;  %v2486_v37 = vpop.f32.mrf.mxu2 }
 0x2af   : > { %v4125_v24 = vmax.f32 %v3533_v34, %v5289_v50  ;;  %v4126_v8 = vmax.f32 %v3534_v45, %v5290_v46  ;;  %v4220_v7 = vmax.f32 %v6901_v40, %v4124_v9  ;;  %v3353_v12 = vsel %vm3281_vm1, %v3245_v20, %v3317_v47 }
 0x2b0   : > { %v4497_v4 = vsel %vm4448_vm11, %v4496_v21, %v4407_v10  ;;  %v4498_v18 = vrot.slane %v4409_v2, 6  ;;  %v4500_v25 = vrot.slane %v4410_v51, 5  ;;  %v3393_v1 = vmul.f32 %v6820_v19, %v3353_v12  ;;  %v2099_v42 = vpop.f32.mrf.mxu1 }
 0x2b1   : > { %v4221_v15 = vmax.f32 %v6914_v13, %v4125_v24  ;;  %v4222_v63 = vmax.f32 %v6924_v6, %v4126_v8  ;;  %v4284_v33 = vpack.c.bf16 %v4220_v7, %v4220_v7  ;;  %v4502_v40 = vrot.slane %v4411_v31, 4  ;;  %v7198_v7 = vld [vmem:[#allocation13_spill] sm:$0xff] }
 0x2b2   : > { %v4499_v55 = vsel %vm4451_vm12, %v4498_v18, %v4497_v4  ;;  %v2942_v58 = vadd.f32 %v6867_v26, %v2545_v48  ;;  %v2157_v56 = vadd.f32 %v2097_v5, %v7196_v38  ;;  %v3433_v0 = vadd.f32 %v6831_v44, %v3393_v1 }
 0x2b3   : > { %v3149_v35 = vpop.f32.mrf.mxu0  ;;  %v4285_v57 = vpack.c.bf16 %v4221_v15, %v4221_v15  ;;  %v4286_v61 = vpack.c.bf16 %v4222_v63, %v4222_v63  ;;  %v4412_v36 = vunpack.c.l.b16 %v4284_v33  ;;  %v4501_v17 = vsel %vm4454_vm14, %v4500_v25, %v4499_v55  ;;  %v6967_v54 = vpop.f32.mrf.mxu3 }
 0x2b4   : > { %v4503_v13 = vsel %vm4457_vm15, %v4502_v40, %v4501_v17  ;;  %v3206_v6 = vadd.f32 %v6922_v59, %v2942_v58  ;;  %v2546_v27 = vadd.f32 %v2486_v37, %v2157_v56  ;;  %v3537_v32 = vrot.slane %v3433_v0, 6 }
 0x2b5   : > { %v4413_v29 = vunpack.c.l.b16 %v4285_v57  ;;  %v4414_v52 = vunpack.c.l.b16 %v4286_v61  ;;  %v4504_v30 = vrot.slane %v4412_v36, 3  ;;  %v3535_v16 = vrot.slane %v3433_v0, 2 }
 0x2b6   : > { %v3246_v26 = vadd.f32 %v6837_v28, %v3206_v6  ;;  %v2943_v14 = vadd.f32 %v6908_v62, %v2546_v27  ;;  %v2488_v48 = vpop.f32.mrf.mxu2  ;;  %v2158_v62 = vadd.f32 %v2099_v42, %v7197_v23  ;;  %v3536_v50 = vrot.slane %v3433_v0, 4 }
 0x2b7   : > { %v4505_v10 = vsel %vm4460_vm0, %v4504_v30, %v4503_v13  ;;  %v4506_v43 = vrot.slane %v4413_v29, 2  ;;  %v4508_v20 = vrot.slane %v4414_v52, 1  ;;  %v5294_v47 = vrot.slane %v3537_v32, 9 }
 0x2b8   : > { %vm3282_vm4 = vcmp.ge.f32.partialorder %v3246_v26, 0.0  ;;  %v3318_v5 = vmul.f32 0.1, %v3246_v26  ;;  %v3207_v22 = vadd.f32 %v3147_v39, %v2943_v14  ;;  %v2102_v49 = vpop.f32.mrf.mxu1  ;;  %v2547_v9 = vadd.f32 %v2488_v48, %v2158_v62 }
 0x2b9   : > { %v4507_v59 = vsel %vm4463_vm2, %v4506_v43, %v4505_v10  ;;  %v5291_v31 = vrot.slane %v3433_v0, 9  ;;  %v5292_v24 = vrot.slane %v3535_v16, 9  ;;  %v5293_v8 = vrot.slane %v3536_v50, 9  ;;  %v7199_v10 = vld [vmem:[#allocation14_spill] sm:$0xff] }
 0x2ba   : > { %v4509_v41 = vsel %vm4466_vm3, %v4508_v20, %v4507_v59  ;;  %v3354_v34 = vsel %vm3282_vm4, %v3246_v26, %v3318_v5  ;;  %v3247_v45 = vadd.f32 %v6837_v28, %v3207_v22  ;;  %v2944_v21 = vadd.f32 %v6935_v11, %v2547_v9 }
 0x2bb   : > { %v4569_v53 = vpack.c.b16 %v4509_v41, %v4509_v41  ;;  %v3394_v60 = vmul.f32 %v6820_v19, %v3354_v34  ;;  %v3152_v39 = vpop.f32.mrf.mxu0  ;;  %v2159_v12 = vadd.f32 %v2102_v49, %v7198_v7  ;;  %v6977_v25 = vmax.f32 %v3537_v32, %v5294_v47  ;;  %v6984_v36 = vpop.f32.mrf.mxu3 }
 0x2bc   : > { %vm3283_vm5 = vcmp.ge.f32.partialorder %v3247_v45, 0.0  ;;  %v3319_v46 = vmul.f32 0.1, %v3247_v45  ;;  %v3208_v4 = vadd.f32 %v3149_v35, %v2944_v21  ;;  %v4127_v42 = vmax.f32 %v3433_v0, %v5291_v31 }
 0x2bd   : > { %4585 = vst [vmem:[%s6614_s13 + $0xc] sm:$0xf] %v4569_v53  ;;  %v6972_v2 = vadd.f32 %v6831_v44, %v3394_v60  ;;  %v4128_v40 = vmax.f32 %v3535_v16, %v5292_v24  ;;  %v4129_v58 = vmax.f32 %v3536_v50, %v5293_v8 }
 0x2be   : > { %v3355_v51 = vsel %vm3283_vm5, %v3247_v45, %v3319_v46  ;;  %v3248_v55 = vadd.f32 %v6837_v28, %v3208_v4 }
 0x2bf   : > { %v3395_v37 = vmul.f32 %v6820_v19, %v3355_v51  ;;  %v2491_v18 = vpop.f32.mrf.mxu2  ;;  %v3538_v33 = vrot.slane %v6972_v2, 2  ;;  %v3539_v11 = vrot.slane %v6972_v2, 4  ;;  %v3540_v17 = vrot.slane %v6972_v2, 6 }
 0x2c0   : > { %v2548_v15 = vadd.f32 %v2491_v18, %v2159_v12  ;;  %v2104_v63 = vpop.f32.mrf.mxu1  ;;  %vm3284_vm6 = vcmp.ge.f32.partialorder %v3248_v55, 0.0  ;;  %v5295_v13 = vrot.slane %v6972_v2, 9  ;;  %v3320_v6 = vmul.f32 0.1, %v3248_v55 }
 0x2c1   : > { %v3435_v1 = vadd.f32 %v6831_v44, %v3395_v37  ;;  %v5296_v29 = vrot.slane %v3538_v33, 9  ;;  %v5297_v26 = vrot.slane %v3539_v11, 9  ;;  %v2160_v43 = vadd.f32 %v2104_v63, %v7199_v10 }
 0x2c2   : > { %v2945_v38 = vadd.f32 %v6948_v3, %v2548_v15  ;;  %v3356_v14 = vsel %vm3284_vm6, %v3248_v55, %v3320_v6  ;;  %v4131_v32 = vmax.f32 %v6972_v2, %v5295_v13  ;;  %v5298_v50 = vrot.slane %v3540_v17, 9 }
 0x2c3   : > { %v3154_v56 = vpop.f32.mrf.mxu0  ;;  %v3541_v35 = vrot.slane %v3435_v1, 2  ;;  %v3542_v57 = vrot.slane %v3435_v1, 4  ;;  %v3543_v61 = vrot.slane %v3435_v1, 6  ;;  %v3396_v22 = vmul.f32 %v6820_v19, %v3356_v14  ;;  %v2895_v15 = vpop.f32.mrf.mxu3 }
 0x2c4   : > { %v3209_v27 = vadd.f32 %v3152_v39, %v2945_v38  ;;  %v4132_v60 = vmax.f32 %v3538_v33, %v5296_v29  ;;  %v4133_v12 = vmax.f32 %v3539_v11, %v5297_v26  ;;  %v4134_v10 = vmax.f32 %v3540_v17, %v5298_v50 }
 0x2c5   : > { %v5299_v52 = vrot.slane %v3541_v35, 9  ;;  %v5300_v30 = vrot.slane %v3542_v57, 9  ;;  %v5301_v0 = vrot.slane %v3543_v61, 9  ;;  %v3436_v53 = vadd.f32 %v6831_v44, %v3396_v22 }
 0x2c6   : > { %v3249_v3 = vadd.f32 %v6837_v28, %v3209_v27 }
 0x2c7   : > { %v4135_v20 = vmax.f32 %v3541_v35, %v5299_v52  ;;  %v4136_v48 = vmax.f32 %v3542_v57, %v5300_v30  ;;  %v4137_v5 = vmax.f32 %v3543_v61, %v5301_v0  ;;  %v2493_v59 = vpop.f32.mrf.mxu2  ;;  %v3544_v31 = vrot.slane %v3436_v53, 2 }
 0x2c8   : > { %vm3285_vm10 = vcmp.ge.f32.partialorder %v3249_v3, 0.0  ;;  %v3321_v49 = vmul.f32 0.1, %v3249_v3  ;;  %v2549_v41 = vadd.f32 %v2493_v59, %v2160_v43  ;;  %v2107_v34 = vpop.f32.mrf.mxu1  ;;  %v3545_v21 = vrot.slane %v3436_v53, 4  ;;  %v7200_v59 = vld [vmem:[#allocation15_spill] sm:$0xff] }
 0x2c9   : > { %v4223_v45 = vmax.f32 %v4127_v42, %v4135_v20  ;;  %v4224_v23 = vmax.f32 %v4128_v40, %v4136_v48  ;;  %v4225_v62 = vmax.f32 %v4129_v58, %v4137_v5  ;;  %v3546_v24 = vrot.slane %v3436_v53, 6 }
 0x2ca   : > { %v3357_v16 = vsel %vm3285_vm10, %v3249_v3, %v3321_v49  ;;  %v2946_v39 = vadd.f32 %v6967_v54, %v2549_v41  ;;  %v5302_v8 = vrot.slane %v3436_v53, 9  ;;  %v5303_v18 = vrot.slane %v3544_v31, 9 }
 0x2cb   : > { %v6996_v46 = vpop.f32.mrf.mxu0  ;;  %v4287_v9 = vpack.c.bf16 %v4223_v45, %v4223_v45  ;;  %v4288_v47 = vpack.c.bf16 %v4224_v23, %v4224_v23  ;;  %v4289_v51 = vpack.c.bf16 %v4225_v62, %v4225_v62  ;;  %v3397_v7 = vmul.f32 %v6820_v19, %v3357_v16 }
 0x2cc   : > { %v5304_v63 = vrot.slane %v3545_v21, 9  ;;  %v5305_v33 = vrot.slane %v3546_v24, 9  ;;  %v4138_v1 = vmax.f32 %v3436_v53, %v5302_v8  ;;  %v4139_v58 = vmax.f32 %v3544_v31, %v5303_v18 }
 0x2cd   : > { %v4416_v37 = vunpack.c.l.b16 %v4288_v47  ;;  %v4417_v4 = vunpack.c.l.b16 %v4289_v51  ;;  %v7000_v54 = vadd.f32 %v6831_v44, %v3397_v7  ;;  %v4415_v42 = vunpack.c.l.b16 %v4287_v9  ;;  %v7201_v9 = vld [vmem:[#allocation16_spill] sm:$0xff] }
 0x2ce   : > { %v4140_v35 = vmax.f32 %v3545_v21, %v5304_v63  ;;  %v4141_v57 = vmax.f32 %v3546_v24, %v5305_v33  ;;  %v4226_v61 = vmax.f32 %v6977_v25, %v4138_v1  ;;  %v3210_v11 = vadd.f32 %v3154_v56, %v2946_v39 }
 0x2cf   : > { %v4510_v55 = vrot.slane %v4416_v37, 7  ;;  %v4512_v40 = vrot.slane %v4417_v4, 6  ;;  %v2496_v38 = vpop.f32.mrf.mxu2  ;;  %v4227_v27 = vmax.f32 %v4131_v32, %v4139_v58  ;;  %v5306_v29 = vrot.slane %v7000_v54, 9 }
 0x2d0   : > { %v2109_v13 = vpop.f32.mrf.mxu1  ;;  %v4228_v30 = vmax.f32 %v4132_v60, %v4140_v35  ;;  %v4229_v0 = vmax.f32 %v4133_v12, %v4141_v57  ;;  %v4290_v26 = vpack.c.bf16 %v4226_v61, %v4226_v61  ;;  %v3250_v48 = vadd.f32 %v6837_v28, %v3210_v11 }
 0x2d1   : > { %v4511_v6 = vsel %vm4448_vm11, %v4510_v55, %v4415_v42  ;;  %v4291_v3 = vpack.c.bf16 %v4227_v27, %v4227_v27  ;;  %v4142_v43 = vmax.f32 %v7000_v54, %v5306_v29  ;;  %v2161_v32 = vadd.f32 %v2107_v34, %v7200_v59 }
 0x2d2   : > { %v4513_v52 = vsel %vm4451_vm12, %v4512_v40, %v4511_v6  ;;  %v4292_v25 = vpack.c.bf16 %v4228_v30, %v4228_v30  ;;  %v4293_v56 = vpack.c.bf16 %v4229_v0, %v4229_v0  ;;  %v4418_v20 = vunpack.c.l.b16 %v4290_v26 }
 0x2d3   : > { %v3159_v14 = vpop.f32.mrf.mxu0  ;;  %v4419_v5 = vunpack.c.l.b16 %v4291_v3  ;;  %v4230_v22 = vmax.f32 %v4134_v10, %v4142_v43  ;;  %vm3286_vm13 = vcmp.ge.f32.partialorder %v3250_v48, 0.0  ;;  %v3322_v53 = vmul.f32 0.1, %v3250_v48 }
 0x2d4   : > { %v4420_v49 = vunpack.c.l.b16 %v4292_v25  ;;  %v4421_v41 = vunpack.c.l.b16 %v4293_v56  ;;  %v4514_v45 = vrot.slane %v4418_v20, 5  ;;  %v2550_v2 = vadd.f32 %v2496_v38, %v2161_v32  ;;  %v2898_v60 = vpop.f32.mrf.mxu3  ;;  %v7202_v38 = vld [vmem:[#allocation17_spill] sm:$0xff] }
 0x2d5   : > { %v4516_v23 = vrot.slane %v4419_v5, 4  ;;  %v4294_v62 = vpack.c.bf16 %v4230_v22, %v4230_v22  ;;  %v2162_v47 = vadd.f32 %v2109_v13, %v7201_v9  ;;  %v3358_v21 = vsel %vm3286_vm13, %v3250_v48, %v3322_v53 }
 0x2d6   : > { %v4515_v16 = vsel %vm4454_vm14, %v4514_v45, %v4513_v52  ;;  %v4518_v50 = vrot.slane %v4420_v49, 3  ;;  %v4520_v39 = vrot.slane %v4421_v41, 2  ;;  %v2947_v24 = vadd.f32 %v6984_v36, %v2550_v2  ;;  %v7203_v2 = vld [vmem:[#allocation18_spill] sm:$0xff] }
 0x2d7   : > { %v2498_v17 = vpop.f32.mrf.mxu2  ;;  %v4517_v31 = vsel %vm4457_vm15, %v4516_v23, %v4515_v16  ;;  %v4422_v34 = vunpack.c.l.b16 %v4294_v62  ;;  %v3398_v7 = vmul.f32 %v6820_v19, %v3358_v21  ;;  %v3547_v42 = vrot.slane %v7000_v54, 4 }
 0x2d8   : > { %v2112_v51 = vpop.f32.mrf.mxu1  ;;  %v4519_v8 = vsel %vm4460_vm0, %v4518_v50, %v4517_v31  ;;  %v2551_v12 = vadd.f32 %v2498_v17, %v2162_v47  ;;  %v3211_v63 = vadd.f32 %v6996_v46, %v2947_v24  ;;  %v3548_v40 = vrot.slane %v7000_v54, 6 }
 0x2d9   : > { %v4521_v4 = vsel %vm4463_vm2, %v4520_v39, %v4519_v8  ;;  %v4522_v18 = vrot.slane %v4422_v34, 1  ;;  %v3438_v33 = vadd.f32 %v6831_v44, %v3398_v7  ;;  %v2163_v35 = vadd.f32 %v2112_v51, %v7202_v38 }
 0x2da   : > { %v2948_v1 = vadd.f32 %v2895_v15, %v2551_v12  ;;  %v3251_v36 = vadd.f32 %v6837_v28, %v3211_v63  ;;  %v5307_v29 = vrot.slane %v3547_v42, 9  ;;  %v5308_v26 = vrot.slane %v3548_v40, 9 }
 0x2db   : > { %v3162_v37 = vpop.f32.mrf.mxu0  ;;  %v4523_v55 = vsel %vm4466_vm3, %v4522_v18, %v4521_v4  ;;  %v3549_v57 = vrot.slane %v3438_v33, 2  ;;  %v3550_v46 = vrot.slane %v3438_v33, 4  ;;  %v3551_v6 = vrot.slane %v3438_v33, 6 }
 0x2dc   : > { %v4570_v58 = vpack.c.b16 %v4523_v55, %v4523_v55  ;;  %vm3287_vm7 = vcmp.ge.f32.partialorder %v3251_v36, 0.0  ;;  %v3323_v61 = vmul.f32 0.1, %v3251_v36  ;;  %v3212_v11 = vadd.f32 %v3159_v14, %v2948_v1  ;;  %v2900_v0 = vpop.f32.mrf.mxu3 }
 0x2dd   : > { %v5309_v10 = vrot.slane %v3438_v33, 9  ;;  %v5310_v43 = vrot.slane %v3549_v57, 9  ;;  %v5311_v14 = vrot.slane %v3550_v46, 9  ;;  %v5312_v48 = vrot.slane %v3551_v6, 9 }
 0x2de   : > { %4586 = vst [vmem:[%s6614_s13 + $0x10] sm:$0xf] %v4570_v58  ;;  %v3359_v52 = vsel %vm3287_vm7, %v3251_v36, %v3323_v61  ;;  %v3252_v30 = vadd.f32 %v6837_v28, %v3212_v11  ;;  %v4143_v22 = vmax.f32 %v3547_v42, %v5307_v29  ;;  %v4144_v32 = vmax.f32 %v3548_v40, %v5308_v26 }
 0x2df   : > { %v2501_v13 = vpop.f32.mrf.mxu2  ;;  %v3399_v54 = vmul.f32 %v6820_v19, %v3359_v52  ;;  %v4145_v23 = vmax.f32 %v3438_v33, %v5309_v10  ;;  %v4146_v62 = vmax.f32 %v3549_v57, %v5310_v43  ;;  %v4147_v16 = vmax.f32 %v3550_v46, %v5311_v14 }
 0x2e0   : > { %v2552_v15 = vadd.f32 %v2501_v13, %v2163_v35  ;;  %v2114_v27 = vpop.f32.mrf.mxu1  ;;  %vm3288_vm8 = vcmp.ge.f32.partialorder %v3252_v30, 0.0  ;;  %v3324_v25 = vmul.f32 0.1, %v3252_v30  ;;  %v4148_v9 = vmax.f32 %v3551_v6, %v5312_v48 }
 0x2e1   : > { %v3439_v56 = vadd.f32 %v6831_v44, %v3399_v54  ;;  %v2164_v17 = vadd.f32 %v2114_v27, %v7203_v2 }
 0x2e2   : > { %v2949_v3 = vadd.f32 %v2898_v60, %v2552_v15  ;;  %v3360_v59 = vsel %vm3288_vm8, %v3252_v30, %v3324_v25 }
 0x2e3   : > { %v3164_v5 = vpop.f32.mrf.mxu0  ;;  %v3552_v49 = vrot.slane %v3439_v56, 2  ;;  %v3553_v41 = vrot.slane %v3439_v56, 6  ;;  %v3400_v45 = vmul.f32 %v6820_v19, %v3360_v59  ;;  %v5313_v51 = vrot.slane %v3439_v56, 9 }
 0x2e4   : > { %v3213_v20 = vadd.f32 %v3162_v37, %v2949_v3  ;;  %v7033_v63 = vpop.f32.mrf.mxu3 }
 0x2e5   : > { %v5315_v50 = vrot.slane %v3553_v41, 9  ;;  %v3440_v39 = vadd.f32 %v6831_v44, %v3400_v45  ;;  %v5314_v21 = vrot.slane %v3552_v49, 9  ;;  %v4149_v36 = vmax.f32 %v3439_v56, %v5313_v51 }
 0x2e6   : > { %v3253_v53 = vadd.f32 %v6837_v28, %v3213_v20 }
 0x2e7   : > { %v2503_v60 = vpop.f32.mrf.mxu2  ;;  %v4151_v24 = vmax.f32 %v3553_v41, %v5315_v50  ;;  %v3554_v8 = vrot.slane %v3440_v39, 2  ;;  %v3555_v7 = vrot.slane %v3440_v39, 4  ;;  %v3556_v12 = vrot.slane %v3440_v39, 6 }
 0x2e8   : > { %v2117_v47 = vpop.f32.mrf.mxu1  ;;  %vm3289_vm9 = vcmp.ge.f32.partialorder %v3253_v53, 0.0  ;;  %v3325_v31 = vmul.f32 0.1, %v3253_v53  ;;  %v2553_v34 = vadd.f32 %v2503_v60, %v2164_v17  ;;  %v5316_v37 = vrot.slane %v3440_v39, 9 }
 0x2e9   : > { %v4231_v33 = vmax.f32 %v4143_v22, %v4151_v24  ;;  %v5317_v1 = vrot.slane %v3554_v8, 9  ;;  %v5318_v42 = vrot.slane %v3555_v7, 9  ;;  %v5319_v40 = vrot.slane %v3556_v12, 9 }
 0x2ea   : > { %v3361_v4 = vsel %vm3289_vm9, %v3253_v53, %v3325_v31  ;;  %v2950_v18 = vadd.f32 %v2900_v0, %v2553_v34  ;;  %v4152_v58 = vmax.f32 %v3440_v39, %v5316_v37  ;;  %v4150_v46 = vmax.f32 %v3552_v49, %v5314_v21  ;;  %v7204_v39 = vld [vmem:[#allocation19_spill] sm:$0xff] }
 0x2eb   : > { %v3401_v55 = vmul.f32 %v6820_v19, %v3361_v4  ;;  %v4295_v35 = vpack.c.bf16 %v4231_v33, %v4231_v33  ;;  %v4153_v57 = vmax.f32 %v3554_v8, %v5317_v1  ;;  %v4154_v61 = vmax.f32 %v3555_v7, %v5318_v42  ;;  %v7205_v42 = vld [vmem:[#allocation8_spill] sm:$0xff] }
 0x2ec   : > { %v3214_v38 = vadd.f32 %v3164_v5, %v2950_v18  ;;  %v4155_v6 = vmax.f32 %v3556_v12, %v5319_v40  ;;  %v4232_v15 = vmax.f32 %v4144_v32, %v4152_v58  ;;  %v2905_v17 = vpop.f32.mrf.mxu3  ;;  %v2165_v51 = vadd.f32 %v2117_v47, %v7204_v39 }
 0x2ed   : > { %v3441_v11 = vadd.f32 %v6831_v44, %v3401_v55  ;;  %v4423_v52 = vunpack.c.l.b16 %v4295_v35  ;;  %v4233_v30 = vmax.f32 %v4145_v23, %v4153_v57  ;;  %v4234_v0 = vmax.f32 %v4146_v62, %v4154_v61 }
 0x2ee   : > { %v3254_v27 = vadd.f32 %v6837_v28, %v3214_v38  ;;  %v4235_v3 = vmax.f32 %v4147_v16, %v4155_v6  ;;  %v4296_v10 = vpack.c.bf16 %v4232_v15, %v4232_v15 }
 0x2ef   : > { %v3167_v13 = vpop.f32.mrf.mxu0  ;;  %v2506_v29 = vpop.f32.mrf.mxu2  ;;  %v3557_v26 = vrot.slane %v3441_v11, 2  ;;  %v3558_v43 = vrot.slane %v3441_v11, 4  ;;  %v5320_v25 = vrot.slane %v3441_v11, 9  ;;  %v4297_v14 = vpack.c.bf16 %v4233_v30, %v4233_v30 }
 0x2f0   : > { %v2119_v54 = vpop.f32.mrf.mxu1  ;;  %v4298_v56 = vpack.c.bf16 %v4234_v0, %v4234_v0  ;;  %vm3290_vm1 = vcmp.ge.f32.partialorder %v3254_v27, 0.0  ;;  %v4299_v48 = vpack.c.bf16 %v4235_v3, %v4235_v3  ;;  %v4424_v5 = vunpack.c.l.b16 %v4296_v10  ;;  %v7206_v3 = vld [vmem:[#allocation2_spill] sm:$0xff] }
 0x2f1   : > { %v5321_v20 = vrot.slane %v3557_v26, 9  ;;  %v5322_v22 = vrot.slane %v3558_v43, 9  ;;  %v4156_v59 = vmax.f32 %v3441_v11, %v5320_v25  ;;  %v4425_v32 = vunpack.c.l.b16 %v4297_v14 }
 0x2f2   : > { %v4426_v49 = vunpack.c.l.b16 %v4298_v56  ;;  %v3326_v45 = vmul.f32 0.1, %v3254_v27  ;;  %v4427_v23 = vunpack.c.l.b16 %v4299_v48  ;;  %v4524_v62 = vrot.slane %v4424_v5, 7  ;;  %v7065_v56 = vld [vmem:[%s7145_s3] ss:$0 sm:$0xff] }
 0x2f3   : > { %v4157_v41 = vmax.f32 %v3557_v26, %v5321_v20  ;;  %v4158_v53 = vmax.f32 %v3558_v43, %v5322_v22  ;;  %v4236_v2 = vmax.f32 %v4148_v9, %v4156_v59  ;;  %v4526_v60 = vrot.slane %v4425_v32, 6  ;;  %v7058_v43 = vld [vmem:[%s7144_s2] ss:$0 sm:$0xff] }
 0x2f4   : > { %v4528_v16 = vrot.slane %v4426_v49, 5  ;;  %v4525_v31 = vsel %vm4448_vm11, %v4524_v62, %v4423_v52  ;;  %v3362_v24 = vsel %vm3290_vm1, %v3254_v27, %v3326_v45  ;;  %v4530_v12 = vrot.slane %v4427_v23, 4 }
 0x2f5   : > { %v4237_v50 = vmax.f32 %v4149_v36, %v4157_v41  ;;  %v4238_v34 = vmax.f32 %v4150_v46, %v4158_v53  ;;  %v4300_v21 = vpack.c.bf16 %v4236_v2, %v4236_v2  ;;  %v4527_v7 = vsel %vm4451_vm12, %v4526_v60, %v4525_v31  ;;  %v7074_v41 = vld [vmem:[%s7146_s4] ss:$0 sm:$0xff] }
 0x2f6   : > { %v2554_v4 = vadd.f32 %v2506_v29, %v2165_v51  ;;  %v4529_v1 = vsel %vm4454_vm14, %v4528_v16, %v4527_v7  ;;  %v2166_v55 = vadd.f32 %v2119_v54, %v7205_v42  ;;  %v3402_v57 = vmul.f32 %v6820_v19, %v3362_v24 }
 0x2f7   : > { %v2508_v8 = vpop.f32.mrf.mxu2  ;;  %v4301_v37 = vpack.c.bf16 %v4237_v50, %v4237_v50  ;;  %v3169_v18 = vpop.f32.mrf.mxu0  ;;  %v4302_v9 = vpack.c.bf16 %v4238_v34, %v4238_v34  ;;  %v4428_v33 = vunpack.c.l.b16 %v4300_v21  ;;  %v4531_v40 = vsel %vm4457_vm15, %v4530_v12, %v4529_v1 }
 0x2f8   : > { %v2122_v47 = vpop.f32.mrf.mxu1  ;;  %v2951_v58 = vadd.f32 %v7033_v63, %v2554_v4  ;;  %v2555_v61 = vadd.f32 %v2508_v8, %v2166_v55  ;;  %v7052_v63 = vadd.f32 %v6831_v44, %v3402_v57 }
 0x2f9   : > { %v4429_v36 = vunpack.c.l.b16 %v4301_v37  ;;  %v4430_v38 = vunpack.c.l.b16 %v4302_v9  ;;  %v4532_v35 = vrot.slane %v4428_v33, 3  ;;  %v2167_v10 = vadd.f32 %v2122_v47, %v7206_v3 }
 0x2fa   : > { %v3215_v46 = vadd.f32 %v3167_v13, %v2951_v58  ;;  %v2952_v27 = vadd.f32 %v2905_v17, %v2555_v61  ;;  %v3559_v5 = vrot.slane %v7052_v63, 2  ;;  %v3560_v59 = vrot.slane %v7052_v63, 4  ;;  %v7207_v17 = vld [vmem:[#allocation3_spill] sm:$0xff] }
 0x2fb   : > { %v4534_v11 = vrot.slane %v4429_v36, 2  ;;  %v4533_v6 = vsel %vm4460_vm0, %v4532_v35, %v4531_v40  ;;  %v4536_v15 = vrot.slane %v4430_v38, 1  ;;  %v3561_v49 = vrot.slane %v7052_v63, 6 }
 0x2fc   : > { %v3255_v52 = vadd.f32 %v6837_v28, %v3215_v46  ;;  %v3216_v0 = vadd.f32 %v3169_v18, %v2952_v27  ;;  %v5323_v62 = vrot.slane %v7052_v63, 9  ;;  %v5324_v16 = vrot.slane %v3559_v5, 9 }
 0x2fd   : > { %v4535_v29 = vsel %vm4463_vm2, %v4534_v11, %v4533_v6  ;;  %v5325_v51 = vrot.slane %v3560_v59, 9  ;;  %v5326_v21 = vrot.slane %v3561_v49, 9 }
 0x2fe   : > { %v4537_v30 = vsel %vm4466_vm3, %v4536_v15, %v4535_v29  ;;  %v2908_v26 = vpop.f32.mrf.mxu3  ;;  %vm3291_vm4 = vcmp.ge.f32.partialorder %v3255_v52, 0.0  ;;  %v3327_v13 = vmul.f32 0.1, %v3255_v52  ;;  %v3256_v28 = vadd.f32 %v7058_v43, %v3216_v0 }
 0x2ff   : > { %v2511_v19 = vpop.f32.mrf.mxu2  ;;  %v4571_v54 = vpack.c.b16 %v4537_v30, %v4537_v30  ;;  %v3172_v14 = vpop.f32.mrf.mxu0  ;;  %v4159_v7 = vmax.f32 %v7052_v63, %v5323_v62  ;;  %v4160_v33 = vmax.f32 %v3559_v5, %v5324_v16  ;;  %v4161_v40 = vmax.f32 %v3560_v59, %v5325_v51 }
 0x300   : > { %v3363_v25 = vsel %vm3291_vm4, %v3255_v52, %v3327_v13  ;;  %v2556_v44 = vadd.f32 %v2511_v19, %v2167_v10  ;;  %vm3292_vm5 = vcmp.ge.f32.partialorder %v3256_v28, 0.0  ;;  %v3328_v48 = vmul.f32 0.1, %v3256_v28  ;;  %v2124_v22 = vpop.f32.mrf.mxu1 }
 0x301   : > { %4587 = vst [vmem:[%s6614_s13 + $0x14] sm:$0xf] %v4571_v54  ;;  %v3403_v20 = vmul.f32 %v7065_v56, %v3363_v25  ;;  %v2168_v60 = vadd.f32 %v2124_v22, %v7207_v17  ;;  %v4162_v27 = vmax.f32 %v3561_v49, %v5326_v21 }
 0x302   : > { %v2953_v32 = vadd.f32 %v2908_v26, %v2556_v44  ;;  %v3364_v23 = vsel %vm3292_vm5, %v3256_v28, %v3328_v48 }
 0x303   : > { %v7077_v45 = vadd.f32 %v7074_v41, %v3403_v20  ;;  %v3404_v53 = vmul.f32 %v7065_v56, %v3364_v23 }
 0x304   : > { %v3217_v2 = vadd.f32 %v3172_v14, %v2953_v32 }
 0x305   : > { %v3444_v39 = vadd.f32 %v7074_v41, %v3404_v53  ;;  %v3562_v24 = vrot.slane %v7077_v45, 2  ;;  %v3563_v8 = vrot.slane %v7077_v45, 4  ;;  %v5327_v9 = vrot.slane %v7077_v45, 9 }
 0x306   : > { %v3257_v31 = vadd.f32 %v7058_v43, %v3217_v2  ;;  %v2910_v12 = vpop.f32.mrf.mxu3  ;;  %v3564_v29 = vrot.slane %v7077_v45, 6 }
 0x307   : > { %v2513_v50 = vpop.f32.mrf.mxu2  ;;  %v3565_v37 = vrot.slane %v3444_v39, 2  ;;  %v3566_v4 = vrot.slane %v3444_v39, 4  ;;  %v3567_v18 = vrot.slane %v3444_v39, 6  ;;  %v3174_v58 = vpop.f32.mrf.mxu0  ;;  %v5328_v38 = vrot.slane %v3562_v24, 9  ;;  %v7208_v39 = vld [vmem:[#allocation4_spill] sm:$0xff] }
 0x308   : > { %v2557_v34 = vadd.f32 %v2513_v50, %v2168_v60  ;;  %vm3293_vm6 = vcmp.ge.f32.partialorder %v3257_v31, 0.0  ;;  %v3329_v1 = vmul.f32 0.1, %v3257_v31  ;;  %v5329_v35 = vrot.slane %v3563_v8, 9 }
 0x309   : > { %v5331_v55 = vrot.slane %v3565_v37, 9  ;;  %v5332_v47 = vrot.slane %v3566_v4, 9  ;;  %v5333_v36 = vrot.slane %v3567_v18, 9  ;;  %v4163_v52 = vmax.f32 %v7077_v45, %v5327_v9 }
 0x30a   : > { %v2954_v42 = vadd.f32 %v2910_v12, %v2557_v34  ;;  %v3365_v57 = vsel %vm3293_vm6, %v3257_v31, %v3329_v1  ;;  %v4164_v54 = vmax.f32 %v3562_v24, %v5328_v38  ;;  %v4165_v13 = vmax.f32 %v3563_v8, %v5329_v35 }
 0x30b   : > { %v4167_v11 = vmax.f32 %v3565_v37, %v5331_v55  ;;  %v4168_v46 = vmax.f32 %v3566_v4, %v5332_v47  ;;  %v4169_v6 = vmax.f32 %v3567_v18, %v5333_v36  ;;  %v3405_v15 = vmul.f32 %v7065_v56, %v3365_v57 }
 0x30c   : > { %v3218_v61 = vadd.f32 %v3174_v58, %v2954_v42  ;;  %v5330_v4 = vrot.slane %v3564_v29, 9 }
 0x30d   : > { %v4239_v63 = vmax.f32 %v4159_v7, %v4167_v11  ;;  %v4240_v0 = vmax.f32 %v4160_v33, %v4168_v46  ;;  %v4241_v26 = vmax.f32 %v4161_v40, %v4169_v6  ;;  %v3445_v19 = vadd.f32 %v7074_v41, %v3405_v15 }
 0x30e   : > { %v3258_v30 = vadd.f32 %v7058_v43, %v3218_v61  ;;  %v4166_v61 = vmax.f32 %v3564_v29, %v5330_v4  ;;  %v7209_v29 = vld [vmem:[#allocation5_spill] sm:$0xff]  ;;  %v7211_v4 = vld [vmem:[#allocation7_spill] sm:$0xff] }
 0x30f   : > { %v4303_v28 = vpack.c.bf16 %v4239_v63, %v4239_v63  ;;  %v4304_v25 = vpack.c.bf16 %v4240_v0, %v4240_v0  ;;  %v4305_v14 = vpack.c.bf16 %v4241_v26, %v4241_v26  ;;  %v3568_v44 = vrot.slane %v3445_v19, 2 }
 0x310   : > { %vm3294_vm10 = vcmp.ge.f32.partialorder %v3258_v30, 0.0  ;;  %v3330_v3 = vmul.f32 0.1, %v3258_v30  ;;  %v3569_v20 = vrot.slane %v3445_v19, 4  ;;  %v3570_v48 = vrot.slane %v3445_v19, 6 }
 0x311   : > { %v5334_v5 = vrot.slane %v3445_v19, 9  ;;  %v4431_v32 = vunpack.c.l.b16 %v4303_v28  ;;  %v4432_v49 = vunpack.c.l.b16 %v4304_v25  ;;  %v4433_v45 = vunpack.c.l.b16 %v4305_v14 }
 0x312   : > { %v2127_v10 = vpop.f32.mrf.mxu1  ;;  %v3366_v22 = vsel %vm3294_vm10, %v3258_v30, %v3330_v3  ;;  %v5335_v23 = vrot.slane %v3568_v44, 9  ;;  %v5336_v62 = vrot.slane %v3569_v20, 9  ;;  %v5337_v53 = vrot.slane %v3570_v48, 9 }
 0x313   : > { %v4170_v2 = vmax.f32 %v3445_v19, %v5334_v5  ;;  %v3406_v17 = vmul.f32 %v7065_v56, %v3366_v22  ;;  %v4538_v60 = vrot.slane %v4432_v49, 7  ;;  %v4540_v16 = vrot.slane %v4433_v45, 6  ;;  %v3177_v31 = vpop.f32.mrf.mxu0 }
 0x314   : > { %v2913_v59 = vpop.f32.mrf.mxu3  ;;  %v4171_v50 = vmax.f32 %v3568_v44, %v5335_v23  ;;  %v2169_v51 = vadd.f32 %v2127_v10, %v7208_v39  ;;  %v4172_v34 = vmax.f32 %v3569_v20, %v5336_v62  ;;  %v4173_v21 = vmax.f32 %v3570_v48, %v5337_v53  ;;  %v7210_v62 = vld [vmem:[#allocation6_spill] sm:$0xff] }
 0x315   : > { %v4242_v24 = vmax.f32 %v4162_v27, %v4170_v2  ;;  %v7096_v8 = vadd.f32 %v7074_v41, %v3406_v17  ;;  %v4539_v12 = vsel %vm4448_vm11, %v4538_v60, %v4431_v32 }
 0x316   : > { %v4243_v37 = vmax.f32 %v4163_v52, %v4171_v50  ;;  %v4541_v9 = vsel %vm4451_vm12, %v4540_v16, %v4539_v12  ;;  %v4244_v33 = vmax.f32 %v4164_v54, %v4172_v34  ;;  %v4245_v1 = vmax.f32 %v4165_v13, %v4173_v21 }
 0x317   : > { %v4306_v42 = vpack.c.bf16 %v4242_v24, %v4242_v24  ;;  %v5338_v36 = vrot.slane %v7096_v8, 9  ;;  %v3571_v12 = vrot.slane %v7096_v8, 4 }
 0x318   : > { %v2516_v7 = vpop.f32.mrf.mxu2  ;;  %v4307_v47 = vpack.c.bf16 %v4243_v37, %v4243_v37  ;;  %v4308_v40 = vpack.c.bf16 %v4244_v33, %v4244_v33  ;;  %v4309_v58 = vpack.c.bf16 %v4245_v1, %v4245_v1 }
 0x319   : > { %v2558_v18 = vadd.f32 %v2516_v7, %v2169_v51  ;;  %v4434_v38 = vunpack.c.l.b16 %v4306_v42  ;;  %v4174_v11 = vmax.f32 %v7096_v8, %v5338_v36 }
 0x31a   : > { %v2129_v55 = vpop.f32.mrf.mxu1  ;;  %v4435_v57 = vunpack.c.l.b16 %v4307_v47  ;;  %v4436_v46 = vunpack.c.l.b16 %v4308_v40  ;;  %v4437_v6 = vunpack.c.l.b16 %v4309_v58  ;;  %v5339_v58 = vrot.slane %v3571_v12, 9 }
 0x31b   : > { %v2955_v35 = vadd.f32 %v2913_v59, %v2558_v18  ;;  %v4542_v15 = vrot.slane %v4434_v38, 5  ;;  %v4246_v63 = vmax.f32 %v4166_v61, %v4174_v11  ;;  %v2170_v28 = vadd.f32 %v2129_v55, %v7209_v29  ;;  %v3179_v25 = vpop.f32.mrf.mxu0 }
 0x31c   : > { %v2915_v52 = vpop.f32.mrf.mxu3  ;;  %v4544_v30 = vrot.slane %v4435_v57, 4  ;;  %v4546_v26 = vrot.slane %v4436_v46, 3  ;;  %v4548_v19 = vrot.slane %v4437_v6, 2 }
 0x31d   : > { %v3219_v27 = vadd.f32 %v3177_v31, %v2955_v35  ;;  %v4543_v0 = vsel %vm4454_vm14, %v4542_v15, %v4541_v9  ;;  %v4310_v3 = vpack.c.bf16 %v4246_v63, %v4246_v63  ;;  %v3572_v9 = vrot.slane %v7096_v8, 6 }
 0x31e   : > { %v4545_v13 = vsel %vm4457_vm15, %v4544_v30, %v4543_v0  ;;  %v4175_v30 = vmax.f32 %v3571_v12, %v5339_v58 }
 0x31f   : > { %v3259_v10 = vadd.f32 %v7058_v43, %v3219_v27  ;;  %v4547_v14 = vsel %vm4460_vm0, %v4546_v26, %v4545_v13  ;;  %v4438_v20 = vunpack.c.l.b16 %v4310_v3  ;;  %v5340_v57 = vrot.slane %v3572_v9, 9 }
 0x320   : > { %v2518_v54 = vpop.f32.mrf.mxu2  ;;  %v4549_v48 = vsel %vm4463_vm2, %v4548_v19, %v4547_v14 }
 0x321   : > { %v2559_v5 = vadd.f32 %v2518_v54, %v2170_v28  ;;  %v4550_v22 = vrot.slane %v4438_v20, 1  ;;  %v3331_v59 = vmul.f32 0.1, %v3259_v10  ;;  %vm3295_vm13 = vcmp.ge.f32.partialorder %v3259_v10, 0.0 }
 0x322   : > { %v2132_v44 = vpop.f32.mrf.mxu1  ;;  %v4176_v19 = vmax.f32 %v3572_v9, %v5340_v57 }
 0x323   : > { %v2956_v32 = vadd.f32 %v2915_v52, %v2559_v5  ;;  %v4551_v49 = vsel %vm4466_vm3, %v4550_v22, %v4549_v48  ;;  %v2171_v53 = vadd.f32 %v2132_v44, %v7210_v62  ;;  %v3367_v60 = vsel %vm3295_vm13, %v3259_v10, %v3331_v59  ;;  %v3182_v39 = vpop.f32.mrf.mxu0 }
 0x324   : > { %v4572_v23 = vpack.c.b16 %v4551_v49, %v4551_v49  ;;  %v3407_v51 = vmul.f32 %v7065_v56, %v3367_v60 }
 0x325   : > { %v3220_v45 = vadd.f32 %v3179_v25, %v2956_v32 }
 0x326   : > { %v2918_v2 = vpop.f32.mrf.mxu3  ;;  %4588 = vst [vmem:[%s6614_s13 + $0x18] sm:$0xf] %v4572_v23  ;;  %v3447_v33 = vadd.f32 %v7074_v41, %v3407_v51 }
 0x327   : > { %v3260_v16 = vadd.f32 %v7058_v43, %v3220_v45 }
 0x328   : > { %v2521_v17 = vpop.f32.mrf.mxu2  ;;  %v3573_v61 = vrot.slane %v3447_v33, 2  ;;  %v3574_v11 = vrot.slane %v3447_v33, 4  ;;  %v5341_v27 = vrot.slane %v3447_v33, 9  ;;  %v3575_v63 = vrot.slane %v3447_v33, 6 }
 0x329   : > { %v2560_v50 = vadd.f32 %v2521_v17, %v2171_v53  ;;  %vm3296_vm7 = vcmp.ge.f32.partialorder %v3260_v16, 0.0  ;;  %v3332_v31 = vmul.f32 0.1, %v3260_v16 }
 0x32a   : > { %v2134_v21 = vpop.f32.mrf.mxu1  ;;  %v5342_v54 = vrot.slane %v3573_v61, 9  ;;  %v5343_v13 = vrot.slane %v3574_v11, 9  ;;  %v4177_v14 = vmax.f32 %v3447_v33, %v5341_v27  ;;  %v5344_v59 = vrot.slane %v3575_v63, 9 }
 0x32b   : > { %v2957_v34 = vadd.f32 %v2918_v2, %v2560_v50  ;;  %v3368_v24 = vsel %vm3296_vm7, %v3260_v16, %v3332_v31  ;;  %v2172_v18 = vadd.f32 %v2134_v21, %v7211_v4  ;;  %v3184_v15 = vpop.f32.mrf.mxu0 }
 0x32c   : > { %v3408_v37 = vmul.f32 %v7065_v56, %v3368_v24  ;;  %v4178_v32 = vmax.f32 %v3573_v61, %v5342_v54  ;;  %v4179_v49 = vmax.f32 %v3574_v11, %v5343_v13  ;;  %v4180_v24 = vmax.f32 %v3575_v63, %v5344_v59 }
 0x32d   : > { %v3221_v7 = vadd.f32 %v3182_v39, %v2957_v34 }
 0x32e   : > { %v7120_v55 = vadd.f32 %v7074_v41, %v3408_v37  ;;  %v2920_v40 = vpop.f32.mrf.mxu3 }
 0x32f   : > { %v3261_v1 = vadd.f32 %v7058_v43, %v3221_v7 }
 0x330   : > { %v2523_v42 = vpop.f32.mrf.mxu2  ;;  %v3577_v38 = vrot.slane %v7120_v55, 6  ;;  %v3576_v62 = vrot.slane %v7120_v55, 2  ;;  %v5345_v31 = vrot.slane %v7120_v55, 9 }
 0x331   : > { %v2561_v47 = vadd.f32 %v2523_v42, %v2172_v18  ;;  %vm3297_vm8 = vcmp.ge.f32.partialorder %v3261_v1, 0.0  ;;  %v3333_v36 = vmul.f32 0.1, %v3261_v1 }
 0x332   : > { %v5347_v46 = vrot.slane %v3577_v38, 9  ;;  %v5346_v7 = vrot.slane %v3576_v62, 9  ;;  %v4181_v57 = vmax.f32 %v7120_v55, %v5345_v31 }
 0x333   : > { %v2958_v35 = vadd.f32 %v2920_v40, %v2561_v47  ;;  %v3369_v8 = vsel %vm3297_vm8, %v3261_v1, %v3333_v36 }
 0x334   : > { %v3409_v6 = vmul.f32 %v7065_v56, %v3369_v8  ;;  %v4183_v0 = vmax.f32 %v3577_v38, %v5347_v46 }
 0x335   : > { %v3222_v52 = vadd.f32 %v3184_v15, %v2958_v35 }
 0x336   : > { %v3449_v26 = vadd.f32 %v7074_v41, %v3409_v6  ;;  %v4247_v10 = vmax.f32 %v4175_v30, %v4183_v0 }
 0x337   : > { %v3262_v3 = vadd.f32 %v7058_v43, %v3222_v52 }
 0x338   : > { %v3578_v29 = vrot.slane %v3449_v26, 2  ;;  %v3579_v28 = vrot.slane %v3449_v26, 4  ;;  %v3580_v25 = vrot.slane %v3449_v26, 6  ;;  %v5348_v44 = vrot.slane %v3449_v26, 9 }
 0x339   : > { %vm3298_vm9 = vcmp.ge.f32.partialorder %v3262_v3, 0.0  ;;  %v3334_v20 = vmul.f32 0.1, %v3262_v3  ;;  %v4311_v16 = vpack.c.bf16 %v4247_v10, %v4247_v10 }
 0x33a   : > { %v5349_v48 = vrot.slane %v3578_v29, 9  ;;  %v5350_v5 = vrot.slane %v3579_v28, 9  ;;  %v5351_v22 = vrot.slane %v3580_v25, 9  ;;  %v4184_v45 = vmax.f32 %v3449_v26, %v5348_v44 }
 0x33b   : > { %v3370_v23 = vsel %vm3298_vm9, %v3262_v3, %v3334_v20  ;;  %v4439_v42 = vunpack.c.l.b16 %v4311_v16 }
 0x33c   : > { %v4185_v53 = vmax.f32 %v3578_v29, %v5349_v48  ;;  %v4186_v43 = vmax.f32 %v3579_v28, %v5350_v5  ;;  %v4187_v2 = vmax.f32 %v3580_v25, %v5351_v22  ;;  %v4248_v17 = vmax.f32 %v4176_v19, %v4184_v45 }
 0x33d   : > { %v3410_v60 = vmul.f32 %v7065_v56, %v3370_v23 }
 0x33e   : > { %v4249_v50 = vmax.f32 %v4177_v14, %v4185_v53  ;;  %v4250_v39 = vmax.f32 %v4178_v32, %v4186_v43  ;;  %v4251_v51 = vmax.f32 %v4179_v49, %v4187_v2  ;;  %v4312_v34 = vpack.c.bf16 %v4248_v17, %v4248_v17 }
 0x33f   : > { %v3450_v21 = vadd.f32 %v7074_v41, %v3410_v60  ;;  %v4182_v41 = vmax.f32 %v3576_v62, %v5346_v7 }
 0x340   : > { %v4313_v12 = vpack.c.bf16 %v4249_v50, %v4249_v50  ;;  %v4314_v37 = vpack.c.bf16 %v4250_v39, %v4250_v39  ;;  %v4315_v4 = vpack.c.bf16 %v4251_v51, %v4251_v51  ;;  %v4440_v18 = vunpack.c.l.b16 %v4312_v34 }
 0x341   : > { %v3581_v9 = vrot.slane %v3450_v21, 2  ;;  %v3582_v33 = vrot.slane %v3450_v21, 4  ;;  %v5352_v1 = vrot.slane %v3450_v21, 9 }
 0x342   : > { %v4441_v56 = vunpack.c.l.b16 %v4313_v12  ;;  %v4442_v47 = vunpack.c.l.b16 %v4314_v37  ;;  %v4443_v36 = vunpack.c.l.b16 %v4315_v4  ;;  %v4552_v40 = vrot.slane %v4440_v18, 7 }
 0x343   : > { %v5353_v58 = vrot.slane %v3581_v9, 9  ;;  %v5354_v38 = vrot.slane %v3582_v33, 9  ;;  %v4188_v35 = vmax.f32 %v3450_v21, %v5352_v1 }
 0x344   : > { %v4554_v61 = vrot.slane %v4441_v56, 6  ;;  %v4556_v11 = vrot.slane %v4442_v47, 5  ;;  %v4553_v8 = vsel %vm4448_vm11, %v4552_v40, %v4439_v42  ;;  %v4558_v52 = vrot.slane %v4443_v36, 4 }
 0x345   : > { %v4189_v46 = vmax.f32 %v3581_v9, %v5353_v58  ;;  %v4190_v6 = vmax.f32 %v3582_v33, %v5354_v38  ;;  %v4252_v15 = vmax.f32 %v4180_v24, %v4188_v35 }
 0x346   : > { %v4555_v27 = vsel %vm4451_vm12, %v4554_v61, %v4553_v8 }
 0x347   : > { %v4253_v30 = vmax.f32 %v4181_v57, %v4189_v46  ;;  %v4254_v63 = vmax.f32 %v4182_v41, %v4190_v6  ;;  %v4316_v0 = vpack.c.bf16 %v4252_v15, %v4252_v15  ;;  %v4557_v26 = vsel %vm4454_vm14, %v4556_v11, %v4555_v27 }
 0x348   : > { %v4559_v19 = vsel %vm4457_vm15, %v4558_v52, %v4557_v26 }
 0x349   : > { %v4317_v55 = vpack.c.bf16 %v4253_v30, %v4253_v30  ;;  %v4318_v54 = vpack.c.bf16 %v4254_v63, %v4254_v63  ;;  %v4444_v13 = vunpack.c.l.b16 %v4316_v0 }
 0x34b   : > { %v4445_v3 = vunpack.c.l.b16 %v4317_v55  ;;  %v4446_v10 = vunpack.c.l.b16 %v4318_v54  ;;  %v4560_v29 = vrot.slane %v4444_v13, 3 }
 0x34d   : > { %v4561_v28 = vsel %vm4460_vm0, %v4560_v29, %v4559_v19  ;;  %v4562_v25 = vrot.slane %v4445_v3, 2  ;;  %v4564_v14 = vrot.slane %v4446_v10, 1 }
 0x34f   : > { %v4563_v44 = vsel %vm4463_vm2, %v4562_v25, %v4561_v28 }
 0x350   : > { %v4565_v20 = vsel %vm4466_vm3, %v4564_v14, %v4563_v44 }
 0x351   : > { %v4573_v48 = vpack.c.b16 %v4565_v20, %v4565_v20 }
 0x353   : > { %4589 = vst [vmem:[%s6614_s13 + $0x1c] sm:$0xf] %v4573_v48 }
 0x354 PF: > { %s15_s18 = sadd.s32 1, %s5508_s18  }
 0x355   : > { %p12_p4 = scmp.ge.s32.totalorder %s15_s18, 4  }
 0x357   :  { %14 = sbr.rel (!%p12_p4) target bundleno = 1 (0x1), region = 78 }

</bundles_post_ra>
